<compile_context>
chip_gen: v7x
topology: tpu7x:2x2x1
jax: 0.10.0
libtpu: 0.0.40
codegen_flags: <defaults>
</compile_context>

<pallas_src>
import functools

import numpy as np

import jax
import jax.numpy as jnp
from jax.experimental import pallas as pl
from jax.experimental.pallas import tpu as pltpu


# ----------------------------------------------------------------------------
# Fused kernel: everything runs on VMEM-resident tiles, MXU matmuls only.
# ----------------------------------------------------------------------------
def _dqn_tiny_kernel(*refs, use_additional):
    if use_additional:
        (p1_ref, w1_ref, b1_ref, g2_ref, w2_ref, b2_ref, g3_ref, w3_ref,
         b3_ref, rsel_ref, wct_ref, yt_ref, pwt_ref, pb_ref, wpt_ref,
         ab_ref, o_ref) = refs
    else:
        (p1_ref, w1_ref, b1_ref, g2_ref, w2_ref, b2_ref, g3_ref, w3_ref,
         b3_ref, rsel_ref, wct_ref, ab_ref, o_ref) = refs

    f32 = jnp.float32

    # ---- conv1: single matmul on the pre-built (channels-major) patch matrix.
    a = jnp.dot(w1_ref[...], p1_ref[...], preferred_element_type=f32)  # (16, B*196)
    a = jnp.maximum(a + b1_ref[...], 0.0)

    # ---- conv2 / conv3: in-kernel im2col via 0/1 selection matmuls + per-tap
    # ---- weight matmuls, accumulated.  Only plain 2-D dots / adds / relu.
    def conv_taps(act, g_ref, w_ref, b_ref):
        acc = None
        for kk in range(g_ref.shape[0]):                       # K*K taps (unrolled)
            patches = jnp.dot(act, g_ref[kk], preferred_element_type=f32)  # (Cin, B*OH*OW)
            term = jnp.dot(w_ref[kk], patches, preferred_element_type=f32)  # (Cout, B*OH*OW)
            acc = term if acc is None else acc + term
        return jnp.maximum(acc + b_ref[...], 0.0)

    a = conv_taps(a, g2_ref, w2_ref, b2_ref)                   # (16, B*36)
    a = conv_taps(a, g3_ref, w3_ref, b3_ref)                   # (16, B*4)

    # ---- flatten (PyTorch NCHW order) + affine2, computed transposed (A, B).
    # out[a, b] = sum_{c,p} h3[b, c, p] * aff2_w[c*4+p, a]  (+ preprocess part)
    out = jnp.zeros(o_ref.shape, f32)                          # (n_action, B)
    for p in range(rsel_ref.shape[0]):                         # 4 spatial positions
        col = jnp.dot(a, rsel_ref[p], preferred_element_type=f32)        # (16, B)
        out = out + jnp.dot(wct_ref[p], col, preferred_element_type=f32)  # (n_act, B)

    if use_additional:
        z = jnp.dot(pwt_ref[...], yt_ref[...], preferred_element_type=f32)  # (144, B)
        z = jnp.maximum(z + pb_ref[...], 0.0)
        out = out + jnp.dot(wpt_ref[...], z, preferred_element_type=f32)    # (n_act, B)

    o_ref[...] = (out + ab_ref[...]).astype(o_ref.dtype)


# ----------------------------------------------------------------------------
# Static helper matrices (built with numpy at trace time -> XLA constants).
# ----------------------------------------------------------------------------
def _im2col_selectors(batch, h, w, k, stride):
    """0/1 G with (A @ G[kk])[c, (b,oh,ow)] = A[c, (b, s*oh+ki, s*ow+kj)]."""
    oh = (h - k) // stride + 1
    ow = (w - k) // stride + 1
    g = np.zeros((k * k, batch * h * w, batch * oh * ow), np.float32)
    for ki in range(k):
        for kj in range(k):
            kk = ki * k + kj
            for b in range(batch):
                for i in range(oh):
                    for j in range(ow):
                        col = (b * oh + i) * ow + j
                        row = (b * h + (stride * i + ki)) * w + (stride * j + kj)
                        g[kk, row, col] = 1.0
    return g


def _batch_pick(batch, n_pos):
    """R with (A @ R[p])[c, b] = A[c, b*n_pos + p]."""
    r = np.zeros((n_pos, batch * n_pos, batch), np.float32)
    for p in range(n_pos):
        for b in range(batch):
            r[p, b * n_pos + p, b] = 1.0
    return r


# ----------------------------------------------------------------------------
# Wrapper-side (cheap, fused XLA) data prep
# ----------------------------------------------------------------------------
def _conv1_patches(x):
    """x (B,4,60,60) -> channels-major im2col (4*8*8, B*14*14) for k=8, s=4.

    kernel==2*stride: split each spatial dim into 4-wide blocks; the 8x8 window
    at stride 4 is four shifted, non-overlapping 4x4 sub-blocks.  Row order is
    (di, dj, ci, i, j) and matches _conv1_weight(); columns are (b, oh, ow).
    """
    bsz, cin, h, w = x.shape
    k, s = 8, 4
    oh = (h - k) // s + 1                       # 14
    nb = h // s                                 # 15
    xr = x.reshape(bsz, cin, nb, s, nb, s)
    xq = xr.transpose(1, 3, 5, 0, 2, 4)         # (ci, i, j, b, r, c)
    blocks = []
    for di in range(k // s):
        for dj in range(k // s):
            blk = xq[:, :, :, :, di:di + oh, dj:dj + oh]         # (ci,i,j,b,oh,ow)
            blocks.append(blk.reshape(cin * s * s, bsz * oh * oh))
    return jnp.concatenate(blocks, axis=0)      # (cin*k*k, B*oh*ow)


def _conv1_weight(w):
    """(16,4,8,8) OIHW -> (16, 256) with columns (di,dj,ci,i,j)."""
    co, ci, k, _ = w.shape
    s = 4
    wr = w.reshape(co, ci, k // s, s, k // s, s)                 # (co,ci,di,i,dj,j)
    return wr.transpose(0, 2, 4, 1, 3, 5).reshape(co, ci * k * k)


def _conv_tap_weights(w):
    """(Cout, Cin, K, K) -> (K*K, Cout, Cin), tap index kk = ki*K + kj."""
    co, ci, k, _ = w.shape
    return w.reshape(co, ci, k * k).transpose(2, 0, 1)


def dqn_tiny_forward(params, x, y, activate_additional=True):
    assert x.shape[1:] == (4, 60, 60), x.shape
    bsz = x.shape[0]
    n_action = params["aff2_b"].shape[0]

    # Weights / patches (reshapes + one small transpose; all fused under jit).
    p1 = _conv1_patches(x.astype(jnp.float32))                   # (256, B*196)
    w1 = _conv1_weight(params["conv1_w"])                        # (16, 256)
    b1 = params["conv1_b"].reshape(-1, 1)
    w2 = _conv_tap_weights(params["conv2_w"])                    # (16, 16, 16)
    b2 = params["conv2_b"].reshape(-1, 1)
    w3 = _conv_tap_weights(params["conv3_w"])                    # (16, 16, 16)
    b3 = params["conv3_b"].reshape(-1, 1)

    g2 = jnp.asarray(_im2col_selectors(bsz, 14, 14, 4, 2))       # (16, B*196, B*36)
    g3 = jnp.asarray(_im2col_selectors(bsz, 6, 6, 4, 2))         # (16, B*36,  B*4)
    rsel = jnp.asarray(_batch_pick(bsz, 4))                      # (4, B*4, B)

    aff2_w = params["aff2_w"]                                    # ((64|208), 4), (in, out)
    wct = aff2_w[:64].reshape(16, 4, n_action).transpose(1, 2, 0)  # (p, a, c)
    ab = params["aff2_b"].reshape(-1, 1)                         # (n_action, 1)

    args = [p1, w1, b1, g2, w2, b2, g3, w3, b3, rsel, wct]
    if activate_additional:
        yt = y.reshape(bsz, -1).T.astype(jnp.float32)            # (48, B)
        pwt = params["pre_w"].T                                  # (144, 48)
        pb = params["pre_b"].reshape(-1, 1)                      # (144, 1)
        wpt = aff2_w[64:].T                                      # (n_action, 144)
        args += [yt, pwt, pb, wpt]
    args.append(ab)

    # Advisory cost hint so XLA schedules the tiny custom call tightly.
    flops = 2 * (16 * 256 * (bsz * 196)
                 + 16 * (16 * (bsz * 196) * (bsz * 36) + 16 * 16 * (bsz * 36))
                 + 16 * (16 * (bsz * 36) * (bsz * 4) + 16 * 16 * (bsz * 4))
                 + 4 * (16 * (bsz * 4) * bsz + n_action * 16 * bsz))
    if activate_additional:
        flops += 2 * (144 * 48 * bsz + n_action * 144 * bsz)
    bytes_accessed = sum(int(np.prod(a.shape)) * 4 for a in args) + n_action * bsz * 4

    kernel = functools.partial(_dqn_tiny_kernel,
                               use_additional=activate_additional)
    out_t = pl.pallas_call(
        kernel,
        out_shape=jax.ShapeDtypeStruct((n_action, bsz), jnp.float32),
        # No grid: whole arrays live in VMEM, single kernel invocation.
        in_specs=[pl.BlockSpec(memory_space=pltpu.MemorySpace.VMEM)] * len(args),
        out_specs=pl.BlockSpec(memory_space=pltpu.MemorySpace.VMEM),
        cost_estimate=pl.CostEstimate(flops=int(flops), transcendentals=0,
                                      bytes_accessed=int(bytes_accessed)),
    )(*args)
    return out_t.T                                               # (B, n_action)


# ----------------------------------------------------------------------------
# Parameter init (conv: OIHW, linear: (in, out) -- transposed vs nn.Linear)
# ----------------------------------------------------------------------------
def init_params(key, activate_additional=True):
    ks = jax.random.split(key, 10)
    scale = 0.05
    p = {
        "conv1_w": scale * jax.random.normal(ks[0], (16, 4, 8, 8), jnp.float32),
        "conv1_b": scale * jax.random.normal(ks[1], (16,), jnp.float32),
        "conv2_w": scale * jax.random.normal(ks[2], (16, 16, 4, 4), jnp.float32),
        "conv2_b": scale * jax.random.normal(ks[3], (16,), jnp.float32),
        "conv3_w": scale * jax.random.normal(ks[4], (16, 16, 4, 4), jnp.float32),
        "conv3_b": scale * jax.random.normal(ks[5], (16,), jnp.float32),
    }
    if activate_additional:
        p["pre_w"] = scale * jax.random.normal(ks[6], (48, 144), jnp.float32)
        p["pre_b"] = scale * jax.random.normal(ks[7], (144,), jnp.float32)
        in_aff = 208
    else:
        in_aff = 64
    p["aff2_w"] = scale * jax.random.normal(ks[8], (in_aff, 4), jnp.float32)
    p["aff2_b"] = scale * jax.random.normal(ks[9], (4,), jnp.float32)
    return p


if __name__ == "__main__":
    activate_additional = True
    key = jax.random.PRNGKey(0)
    kx, ky, kp = jax.random.split(key, 3)

    # 60x60 input is dictated by the conv stack feeding affine2(64/208 inputs).
    x = jax.random.normal(kx, (2, 4, 60, 60), jnp.float32)
    y = jax.random.normal(ky, (2, 12, 4), jnp.float32)
    params = init_params(kp, activate_additional)

    fwd = jax.jit(functools.partial(dqn_tiny_forward,
                                    activate_additional=activate_additional))
    out = fwd(params, x, y)
    jax.block_until_ready(out)
    assert out.shape == (2, 4), out.shape
    print("KERNEL_OK")
</pallas_src>

<mosaic_0001>
module attributes {stable_mosaic.version = 11 : i64} {
  func.func @_dqn_tiny_kernel(%arg0: memref<256x392xf32, #tpu.memory_space<vmem>>, %arg1: memref<16x256xf32, #tpu.memory_space<vmem>>, %arg2: memref<16x1xf32, #tpu.memory_space<vmem>>, %arg3: memref<16x392x72xf32, #tpu.memory_space<vmem>>, %arg4: memref<16x16x16xf32, #tpu.memory_space<vmem>>, %arg5: memref<16x1xf32, #tpu.memory_space<vmem>>, %arg6: memref<16x72x8xf32, #tpu.memory_space<vmem>>, %arg7: memref<16x16x16xf32, #tpu.memory_space<vmem>>, %arg8: memref<16x1xf32, #tpu.memory_space<vmem>>, %arg9: memref<4x8x2xf32, #tpu.memory_space<vmem>>, %arg10: memref<4x4x16xf32, #tpu.memory_space<vmem>>, %arg11: memref<48x2xf32, #tpu.memory_space<vmem>>, %arg12: memref<144x48xf32, #tpu.memory_space<vmem>>, %arg13: memref<144x1xf32, #tpu.memory_space<vmem>>, %arg14: memref<4x144xf32, #tpu.memory_space<vmem>>, %arg15: memref<4x1xf32, #tpu.memory_space<vmem>>, %arg16: memref<4x2xf32, #tpu.memory_space<vmem>>) attributes {dimension_semantics = [], scalar_prefetch = 0 : i64, scratch_operands = 0 : i64, tpu.core_type = #tpu.core_type<tc>} {
    %c0 = arith.constant 0 : index
    %c0_0 = arith.constant 0 : index
    %0 = vector.load %arg1[%c0, %c0_0] : memref<16x256xf32, #tpu.memory_space<vmem>>, vector<16x256xf32>
    %c0_1 = arith.constant 0 : index
    %c0_2 = arith.constant 0 : index
    %1 = vector.load %arg0[%c0_1, %c0_2] : memref<256x392xf32, #tpu.memory_space<vmem>>, vector<256x392xf32>
    %cst = arith.constant dense<0.000000e+00> : vector<16x392xf32>
    %2 = tpu.matmul %0, %1, %cst {dimension_numbers = #tpu.dot_dimension_numbers<[1], [0], [0], [1], [0, 0, 1, 1], [], []>} : vector<16x256xf32>, vector<256x392xf32>, vector<16x392xf32> -> vector<16x392xf32>
    %c0_3 = arith.constant 0 : index
    %c0_4 = arith.constant 0 : index
    %3 = vector.load %arg2[%c0_3, %c0_4] : memref<16x1xf32, #tpu.memory_space<vmem>>, vector<16x1xf32>
    %4 = vector.broadcast %3 : vector<16x1xf32> to vector<16x392xf32>
    %5 = arith.addf %2, %4 : vector<16x392xf32>
    %cst_5 = arith.constant 0.000000e+00 : f32
    %6 = vector.broadcast %cst_5 : f32 to vector<16x392xf32>
    %7 = arith.maximumf %5, %6 : vector<16x392xf32>
    %c0_6 = arith.constant 0 : index
    %c0_7 = arith.constant 0 : index
    %c0_8 = arith.constant 0 : index
    %8 = vector.load %arg3[%c0_6, %c0_7, %c0_8] : memref<16x392x72xf32, #tpu.memory_space<vmem>>, vector<1x392x72xf32>
    %9 = vector.shape_cast %8 : vector<1x392x72xf32> to vector<392x72xf32>
    %cst_9 = arith.constant dense<0.000000e+00> : vector<16x72xf32>
    %10 = tpu.matmul %7, %9, %cst_9 {dimension_numbers = #tpu.dot_dimension_numbers<[1], [0], [0], [1], [0, 0, 1, 1], [], []>} : vector<16x392xf32>, vector<392x72xf32>, vector<16x72xf32> -> vector<16x72xf32>
    %c0_10 = arith.constant 0 : index
    %c0_11 = arith.constant 0 : index
    %c0_12 = arith.constant 0 : index
    %11 = vector.load %arg4[%c0_10, %c0_11, %c0_12] : memref<16x16x16xf32, #tpu.memory_space<vmem>>, vector<1x16x16xf32>
    %12 = vector.shape_cast %11 : vector<1x16x16xf32> to vector<16x16xf32>
    %cst_13 = arith.constant dense<0.000000e+00> : vector<16x72xf32>
    %13 = tpu.matmul %12, %10, %cst_13 {dimension_numbers = #tpu.dot_dimension_numbers<[1], [0], [0], [1], [0, 0, 1, 1], [], []>} : vector<16x16xf32>, vector<16x72xf32>, vector<16x72xf32> -> vector<16x72xf32>
    %c1 = arith.constant 1 : index
    %c0_14 = arith.constant 0 : index
    %c0_15 = arith.constant 0 : index
    %14 = vector.load %arg3[%c1, %c0_14, %c0_15] : memref<16x392x72xf32, #tpu.memory_space<vmem>>, vector<1x392x72xf32>
    %15 = vector.shape_cast %14 : vector<1x392x72xf32> to vector<392x72xf32>
    %cst_16 = arith.constant dense<0.000000e+00> : vector<16x72xf32>
    %16 = tpu.matmul %7, %15, %cst_16 {dimension_numbers = #tpu.dot_dimension_numbers<[1], [0], [0], [1], [0, 0, 1, 1], [], []>} : vector<16x392xf32>, vector<392x72xf32>, vector<16x72xf32> -> vector<16x72xf32>
    %c1_17 = arith.constant 1 : index
    %c0_18 = arith.constant 0 : index
    %c0_19 = arith.constant 0 : index
    %17 = vector.load %arg4[%c1_17, %c0_18, %c0_19] : memref<16x16x16xf32, #tpu.memory_space<vmem>>, vector<1x16x16xf32>
    %18 = vector.shape_cast %17 : vector<1x16x16xf32> to vector<16x16xf32>
    %cst_20 = arith.constant dense<0.000000e+00> : vector<16x72xf32>
    %19 = tpu.matmul %18, %16, %cst_20 {dimension_numbers = #tpu.dot_dimension_numbers<[1], [0], [0], [1], [0, 0, 1, 1], [], []>} : vector<16x16xf32>, vector<16x72xf32>, vector<16x72xf32> -> vector<16x72xf32>
    %20 = arith.addf %13, %19 : vector<16x72xf32>
    %c2 = arith.constant 2 : index
    %c0_21 = arith.constant 0 : index
    %c0_22 = arith.constant 0 : index
    %21 = vector.load %arg3[%c2, %c0_21, %c0_22] : memref<16x392x72xf32, #tpu.memory_space<vmem>>, vector<1x392x72xf32>
    %22 = vector.shape_cast %21 : vector<1x392x72xf32> to vector<392x72xf32>
    %cst_23 = arith.constant dense<0.000000e+00> : vector<16x72xf32>
    %23 = tpu.matmul %7, %22, %cst_23 {dimension_numbers = #tpu.dot_dimension_numbers<[1], [0], [0], [1], [0, 0, 1, 1], [], []>} : vector<16x392xf32>, vector<392x72xf32>, vector<16x72xf32> -> vector<16x72xf32>
    %c2_24 = arith.constant 2 : index
    %c0_25 = arith.constant 0 : index
    %c0_26 = arith.constant 0 : index
    %24 = vector.load %arg4[%c2_24, %c0_25, %c0_26] : memref<16x16x16xf32, #tpu.memory_space<vmem>>, vector<1x16x16xf32>
    %25 = vector.shape_cast %24 : vector<1x16x16xf32> to vector<16x16xf32>
    %cst_27 = arith.constant dense<0.000000e+00> : vector<16x72xf32>
    %26 = tpu.matmul %25, %23, %cst_27 {dimension_numbers = #tpu.dot_dimension_numbers<[1], [0], [0], [1], [0, 0, 1, 1], [], []>} : vector<16x16xf32>, vector<16x72xf32>, vector<16x72xf32> -> vector<16x72xf32>
    %27 = arith.addf %20, %26 : vector<16x72xf32>
    %c3 = arith.constant 3 : index
    %c0_28 = arith.constant 0 : index
    %c0_29 = arith.constant 0 : index
    %28 = vector.load %arg3[%c3, %c0_28, %c0_29] : memref<16x392x72xf32, #tpu.memory_space<vmem>>, vector<1x392x72xf32>
    %29 = vector.shape_cast %28 : vector<1x392x72xf32> to vector<392x72xf32>
    %cst_30 = arith.constant dense<0.000000e+00> : vector<16x72xf32>
    %30 = tpu.matmul %7, %29, %cst_30 {dimension_numbers = #tpu.dot_dimension_numbers<[1], [0], [0], [1], [0, 0, 1, 1], [], []>} : vector<16x392xf32>, vector<392x72xf32>, vector<16x72xf32> -> vector<16x72xf32>
    %c3_31 = arith.constant 3 : index
    %c0_32 = arith.constant 0 : index
    %c0_33 = arith.constant 0 : index
    %31 = vector.load %arg4[%c3_31, %c0_32, %c0_33] : memref<16x16x16xf32, #tpu.memory_space<vmem>>, vector<1x16x16xf32>
    %32 = vector.shape_cast %31 : vector<1x16x16xf32> to vector<16x16xf32>
    %cst_34 = arith.constant dense<0.000000e+00> : vector<16x72xf32>
    %33 = tpu.matmul %32, %30, %cst_34 {dimension_numbers = #tpu.dot_dimension_numbers<[1], [0], [0], [1], [0, 0, 1, 1], [], []>} : vector<16x16xf32>, vector<16x72xf32>, vector<16x72xf32> -> vector<16x72xf32>
    %34 = arith.addf %27, %33 : vector<16x72xf32>
    %c4 = arith.constant 4 : index
    %c0_35 = arith.constant 0 : index
    %c0_36 = arith.constant 0 : index
    %35 = vector.load %arg3[%c4, %c0_35, %c0_36] : memref<16x392x72xf32, #tpu.memory_space<vmem>>, vector<1x392x72xf32>
    %36 = vector.shape_cast %35 : vector<1x392x72xf32> to vector<392x72xf32>
    %cst_37 = arith.constant dense<0.000000e+00> : vector<16x72xf32>
    %37 = tpu.matmul %7, %36, %cst_37 {dimension_numbers = #tpu.dot_dimension_numbers<[1], [0], [0], [1], [0, 0, 1, 1], [], []>} : vector<16x392xf32>, vector<392x72xf32>, vector<16x72xf32> -> vector<16x72xf32>
    %c4_38 = arith.constant 4 : index
    %c0_39 = arith.constant 0 : index
    %c0_40 = arith.constant 0 : index
    %38 = vector.load %arg4[%c4_38, %c0_39, %c0_40] : memref<16x16x16xf32, #tpu.memory_space<vmem>>, vector<1x16x16xf32>
    %39 = vector.shape_cast %38 : vector<1x16x16xf32> to vector<16x16xf32>
    %cst_41 = arith.constant dense<0.000000e+00> : vector<16x72xf32>
    %40 = tpu.matmul %39, %37, %cst_41 {dimension_numbers = #tpu.dot_dimension_numbers<[1], [0], [0], [1], [0, 0, 1, 1], [], []>} : vector<16x16xf32>, vector<16x72xf32>, vector<16x72xf32> -> vector<16x72xf32>
    %41 = arith.addf %34, %40 : vector<16x72xf32>
    %c5 = arith.constant 5 : index
    %c0_42 = arith.constant 0 : index
    %c0_43 = arith.constant 0 : index
    %42 = vector.load %arg3[%c5, %c0_42, %c0_43] : memref<16x392x72xf32, #tpu.memory_space<vmem>>, vector<1x392x72xf32>
    %43 = vector.shape_cast %42 : vector<1x392x72xf32> to vector<392x72xf32>
    %cst_44 = arith.constant dense<0.000000e+00> : vector<16x72xf32>
    %44 = tpu.matmul %7, %43, %cst_44 {dimension_numbers = #tpu.dot_dimension_numbers<[1], [0], [0], [1], [0, 0, 1, 1], [], []>} : vector<16x392xf32>, vector<392x72xf32>, vector<16x72xf32> -> vector<16x72xf32>
    %c5_45 = arith.constant 5 : index
    %c0_46 = arith.constant 0 : index
    %c0_47 = arith.constant 0 : index
    %45 = vector.load %arg4[%c5_45, %c0_46, %c0_47] : memref<16x16x16xf32, #tpu.memory_space<vmem>>, vector<1x16x16xf32>
    %46 = vector.shape_cast %45 : vector<1x16x16xf32> to vector<16x16xf32>
    %cst_48 = arith.constant dense<0.000000e+00> : vector<16x72xf32>
    %47 = tpu.matmul %46, %44, %cst_48 {dimension_numbers = #tpu.dot_dimension_numbers<[1], [0], [0], [1], [0, 0, 1, 1], [], []>} : vector<16x16xf32>, vector<16x72xf32>, vector<16x72xf32> -> vector<16x72xf32>
    %48 = arith.addf %41, %47 : vector<16x72xf32>
    %c6 = arith.constant 6 : index
    %c0_49 = arith.constant 0 : index
    %c0_50 = arith.constant 0 : index
    %49 = vector.load %arg3[%c6, %c0_49, %c0_50] : memref<16x392x72xf32, #tpu.memory_space<vmem>>, vector<1x392x72xf32>
    %50 = vector.shape_cast %49 : vector<1x392x72xf32> to vector<392x72xf32>
    %cst_51 = arith.constant dense<0.000000e+00> : vector<16x72xf32>
    %51 = tpu.matmul %7, %50, %cst_51 {dimension_numbers = #tpu.dot_dimension_numbers<[1], [0], [0], [1], [0, 0, 1, 1], [], []>} : vector<16x392xf32>, vector<392x72xf32>, vector<16x72xf32> -> vector<16x72xf32>
    %c6_52 = arith.constant 6 : index
    %c0_53 = arith.constant 0 : index
    %c0_54 = arith.constant 0 : index
    %52 = vector.load %arg4[%c6_52, %c0_53, %c0_54] : memref<16x16x16xf32, #tpu.memory_space<vmem>>, vector<1x16x16xf32>
    %53 = vector.shape_cast %52 : vector<1x16x16xf32> to vector<16x16xf32>
    %cst_55 = arith.constant dense<0.000000e+00> : vector<16x72xf32>
    %54 = tpu.matmul %53, %51, %cst_55 {dimension_numbers = #tpu.dot_dimension_numbers<[1], [0], [0], [1], [0, 0, 1, 1], [], []>} : vector<16x16xf32>, vector<16x72xf32>, vector<16x72xf32> -> vector<16x72xf32>
    %55 = arith.addf %48, %54 : vector<16x72xf32>
    %c7 = arith.constant 7 : index
    %c0_56 = arith.constant 0 : index
    %c0_57 = arith.constant 0 : index
    %56 = vector.load %arg3[%c7, %c0_56, %c0_57] : memref<16x392x72xf32, #tpu.memory_space<vmem>>, vector<1x392x72xf32>
    %57 = vector.shape_cast %56 : vector<1x392x72xf32> to vector<392x72xf32>
    %cst_58 = arith.constant dense<0.000000e+00> : vector<16x72xf32>
    %58 = tpu.matmul %7, %57, %cst_58 {dimension_numbers = #tpu.dot_dimension_numbers<[1], [0], [0], [1], [0, 0, 1, 1], [], []>} : vector<16x392xf32>, vector<392x72xf32>, vector<16x72xf32> -> vector<16x72xf32>
    %c7_59 = arith.constant 7 : index
    %c0_60 = arith.constant 0 : index
    %c0_61 = arith.constant 0 : index
    %59 = vector.load %arg4[%c7_59, %c0_60, %c0_61] : memref<16x16x16xf32, #tpu.memory_space<vmem>>, vector<1x16x16xf32>
    %60 = vector.shape_cast %59 : vector<1x16x16xf32> to vector<16x16xf32>
    %cst_62 = arith.constant dense<0.000000e+00> : vector<16x72xf32>
    %61 = tpu.matmul %60, %58, %cst_62 {dimension_numbers = #tpu.dot_dimension_numbers<[1], [0], [0], [1], [0, 0, 1, 1], [], []>} : vector<16x16xf32>, vector<16x72xf32>, vector<16x72xf32> -> vector<16x72xf32>
    %62 = arith.addf %55, %61 : vector<16x72xf32>
    %c8 = arith.constant 8 : index
    %c0_63 = arith.constant 0 : index
    %c0_64 = arith.constant 0 : index
    %63 = vector.load %arg3[%c8, %c0_63, %c0_64] : memref<16x392x72xf32, #tpu.memory_space<vmem>>, vector<1x392x72xf32>
    %64 = vector.shape_cast %63 : vector<1x392x72xf32> to vector<392x72xf32>
    %cst_65 = arith.constant dense<0.000000e+00> : vector<16x72xf32>
    %65 = tpu.matmul %7, %64, %cst_65 {dimension_numbers = #tpu.dot_dimension_numbers<[1], [0], [0], [1], [0, 0, 1, 1], [], []>} : vector<16x392xf32>, vector<392x72xf32>, vector<16x72xf32> -> vector<16x72xf32>
    %c8_66 = arith.constant 8 : index
    %c0_67 = arith.constant 0 : index
    %c0_68 = arith.constant 0 : index
    %66 = vector.load %arg4[%c8_66, %c0_67, %c0_68] : memref<16x16x16xf32, #tpu.memory_space<vmem>>, vector<1x16x16xf32>
    %67 = vector.shape_cast %66 : vector<1x16x16xf32> to vector<16x16xf32>
    %cst_69 = arith.constant dense<0.000000e+00> : vector<16x72xf32>
    %68 = tpu.matmul %67, %65, %cst_69 {dimension_numbers = #tpu.dot_dimension_numbers<[1], [0], [0], [1], [0, 0, 1, 1], [], []>} : vector<16x16xf32>, vector<16x72xf32>, vector<16x72xf32> -> vector<16x72xf32>
    %69 = arith.addf %62, %68 : vector<16x72xf32>
    %c9 = arith.constant 9 : index
    %c0_70 = arith.constant 0 : index
    %c0_71 = arith.constant 0 : index
    %70 = vector.load %arg3[%c9, %c0_70, %c0_71] : memref<16x392x72xf32, #tpu.memory_space<vmem>>, vector<1x392x72xf32>
    %71 = vector.shape_cast %70 : vector<1x392x72xf32> to vector<392x72xf32>
    %cst_72 = arith.constant dense<0.000000e+00> : vector<16x72xf32>
    %72 = tpu.matmul %7, %71, %cst_72 {dimension_numbers = #tpu.dot_dimension_numbers<[1], [0], [0], [1], [0, 0, 1, 1], [], []>} : vector<16x392xf32>, vector<392x72xf32>, vector<16x72xf32> -> vector<16x72xf32>
    %c9_73 = arith.constant 9 : index
    %c0_74 = arith.constant 0 : index
    %c0_75 = arith.constant 0 : index
    %73 = vector.load %arg4[%c9_73, %c0_74, %c0_75] : memref<16x16x16xf32, #tpu.memory_space<vmem>>, vector<1x16x16xf32>
    %74 = vector.shape_cast %73 : vector<1x16x16xf32> to vector<16x16xf32>
    %cst_76 = arith.constant dense<0.000000e+00> : vector<16x72xf32>
    %75 = tpu.matmul %74, %72, %cst_76 {dimension_numbers = #tpu.dot_dimension_numbers<[1], [0], [0], [1], [0, 0, 1, 1], [], []>} : vector<16x16xf32>, vector<16x72xf32>, vector<16x72xf32> -> vector<16x72xf32>
    %76 = arith.addf %69, %75 : vector<16x72xf32>
    %c10 = arith.constant 10 : index
    %c0_77 = arith.constant 0 : index
    %c0_78 = arith.constant 0 : index
    %77 = vector.load %arg3[%c10, %c0_77, %c0_78] : memref<16x392x72xf32, #tpu.memory_space<vmem>>, vector<1x392x72xf32>
    %78 = vector.shape_cast %77 : vector<1x392x72xf32> to vector<392x72xf32>
    %cst_79 = arith.constant dense<0.000000e+00> : vector<16x72xf32>
    %79 = tpu.matmul %7, %78, %cst_79 {dimension_numbers = #tpu.dot_dimension_numbers<[1], [0], [0], [1], [0, 0, 1, 1], [], []>} : vector<16x392xf32>, vector<392x72xf32>, vector<16x72xf32> -> vector<16x72xf32>
    %c10_80 = arith.constant 10 : index
    %c0_81 = arith.constant 0 : index
    %c0_82 = arith.constant 0 : index
    %80 = vector.load %arg4[%c10_80, %c0_81, %c0_82] : memref<16x16x16xf32, #tpu.memory_space<vmem>>, vector<1x16x16xf32>
    %81 = vector.shape_cast %80 : vector<1x16x16xf32> to vector<16x16xf32>
    %cst_83 = arith.constant dense<0.000000e+00> : vector<16x72xf32>
    %82 = tpu.matmul %81, %79, %cst_83 {dimension_numbers = #tpu.dot_dimension_numbers<[1], [0], [0], [1], [0, 0, 1, 1], [], []>} : vector<16x16xf32>, vector<16x72xf32>, vector<16x72xf32> -> vector<16x72xf32>
    %83 = arith.addf %76, %82 : vector<16x72xf32>
    %c11 = arith.constant 11 : index
    %c0_84 = arith.constant 0 : index
    %c0_85 = arith.constant 0 : index
    %84 = vector.load %arg3[%c11, %c0_84, %c0_85] : memref<16x392x72xf32, #tpu.memory_space<vmem>>, vector<1x392x72xf32>
    %85 = vector.shape_cast %84 : vector<1x392x72xf32> to vector<392x72xf32>
    %cst_86 = arith.constant dense<0.000000e+00> : vector<16x72xf32>
    %86 = tpu.matmul %7, %85, %cst_86 {dimension_numbers = #tpu.dot_dimension_numbers<[1], [0], [0], [1], [0, 0, 1, 1], [], []>} : vector<16x392xf32>, vector<392x72xf32>, vector<16x72xf32> -> vector<16x72xf32>
    %c11_87 = arith.constant 11 : index
    %c0_88 = arith.constant 0 : index
    %c0_89 = arith.constant 0 : index
    %87 = vector.load %arg4[%c11_87, %c0_88, %c0_89] : memref<16x16x16xf32, #tpu.memory_space<vmem>>, vector<1x16x16xf32>
    %88 = vector.shape_cast %87 : vector<1x16x16xf32> to vector<16x16xf32>
    %cst_90 = arith.constant dense<0.000000e+00> : vector<16x72xf32>
    %89 = tpu.matmul %88, %86, %cst_90 {dimension_numbers = #tpu.dot_dimension_numbers<[1], [0], [0], [1], [0, 0, 1, 1], [], []>} : vector<16x16xf32>, vector<16x72xf32>, vector<16x72xf32> -> vector<16x72xf32>
    %90 = arith.addf %83, %89 : vector<16x72xf32>
    %c12 = arith.constant 12 : index
    %c0_91 = arith.constant 0 : index
    %c0_92 = arith.constant 0 : index
    %91 = vector.load %arg3[%c12, %c0_91, %c0_92] : memref<16x392x72xf32, #tpu.memory_space<vmem>>, vector<1x392x72xf32>
    %92 = vector.shape_cast %91 : vector<1x392x72xf32> to vector<392x72xf32>
    %cst_93 = arith.constant dense<0.000000e+00> : vector<16x72xf32>
    %93 = tpu.matmul %7, %92, %cst_93 {dimension_numbers = #tpu.dot_dimension_numbers<[1], [0], [0], [1], [0, 0, 1, 1], [], []>} : vector<16x392xf32>, vector<392x72xf32>, vector<16x72xf32> -> vector<16x72xf32>
    %c12_94 = arith.constant 12 : index
    %c0_95 = arith.constant 0 : index
    %c0_96 = arith.constant 0 : index
    %94 = vector.load %arg4[%c12_94, %c0_95, %c0_96] : memref<16x16x16xf32, #tpu.memory_space<vmem>>, vector<1x16x16xf32>
    %95 = vector.shape_cast %94 : vector<1x16x16xf32> to vector<16x16xf32>
    %cst_97 = arith.constant dense<0.000000e+00> : vector<16x72xf32>
    %96 = tpu.matmul %95, %93, %cst_97 {dimension_numbers = #tpu.dot_dimension_numbers<[1], [0], [0], [1], [0, 0, 1, 1], [], []>} : vector<16x16xf32>, vector<16x72xf32>, vector<16x72xf32> -> vector<16x72xf32>
    %97 = arith.addf %90, %96 : vector<16x72xf32>
    %c13 = arith.constant 13 : index
    %c0_98 = arith.constant 0 : index
    %c0_99 = arith.constant 0 : index
    %98 = vector.load %arg3[%c13, %c0_98, %c0_99] : memref<16x392x72xf32, #tpu.memory_space<vmem>>, vector<1x392x72xf32>
    %99 = vector.shape_cast %98 : vector<1x392x72xf32> to vector<392x72xf32>
    %cst_100 = arith.constant dense<0.000000e+00> : vector<16x72xf32>
    %100 = tpu.matmul %7, %99, %cst_100 {dimension_numbers = #tpu.dot_dimension_numbers<[1], [0], [0], [1], [0, 0, 1, 1], [], []>} : vector<16x392xf32>, vector<392x72xf32>, vector<16x72xf32> -> vector<16x72xf32>
    %c13_101 = arith.constant 13 : index
    %c0_102 = arith.constant 0 : index
    %c0_103 = arith.constant 0 : index
    %101 = vector.load %arg4[%c13_101, %c0_102, %c0_103] : memref<16x16x16xf32, #tpu.memory_space<vmem>>, vector<1x16x16xf32>
    %102 = vector.shape_cast %101 : vector<1x16x16xf32> to vector<16x16xf32>
    %cst_104 = arith.constant dense<0.000000e+00> : vector<16x72xf32>
    %103 = tpu.matmul %102, %100, %cst_104 {dimension_numbers = #tpu.dot_dimension_numbers<[1], [0], [0], [1], [0, 0, 1, 1], [], []>} : vector<16x16xf32>, vector<16x72xf32>, vector<16x72xf32> -> vector<16x72xf32>
    %104 = arith.addf %97, %103 : vector<16x72xf32>
    %c14 = arith.constant 14 : index
    %c0_105 = arith.constant 0 : index
    %c0_106 = arith.constant 0 : index
    %105 = vector.load %arg3[%c14, %c0_105, %c0_106] : memref<16x392x72xf32, #tpu.memory_space<vmem>>, vector<1x392x72xf32>
    %106 = vector.shape_cast %105 : vector<1x392x72xf32> to vector<392x72xf32>
    %cst_107 = arith.constant dense<0.000000e+00> : vector<16x72xf32>
    %107 = tpu.matmul %7, %106, %cst_107 {dimension_numbers = #tpu.dot_dimension_numbers<[1], [0], [0], [1], [0, 0, 1, 1], [], []>} : vector<16x392xf32>, vector<392x72xf32>, vector<16x72xf32> -> vector<16x72xf32>
    %c14_108 = arith.constant 14 : index
    %c0_109 = arith.constant 0 : index
    %c0_110 = arith.constant 0 : index
    %108 = vector.load %arg4[%c14_108, %c0_109, %c0_110] : memref<16x16x16xf32, #tpu.memory_space<vmem>>, vector<1x16x16xf32>
    %109 = vector.shape_cast %108 : vector<1x16x16xf32> to vector<16x16xf32>
    %cst_111 = arith.constant dense<0.000000e+00> : vector<16x72xf32>
    %110 = tpu.matmul %109, %107, %cst_111 {dimension_numbers = #tpu.dot_dimension_numbers<[1], [0], [0], [1], [0, 0, 1, 1], [], []>} : vector<16x16xf32>, vector<16x72xf32>, vector<16x72xf32> -> vector<16x72xf32>
    %111 = arith.addf %104, %110 : vector<16x72xf32>
    %c15 = arith.constant 15 : index
    %c0_112 = arith.constant 0 : index
    %c0_113 = arith.constant 0 : index
    %112 = vector.load %arg3[%c15, %c0_112, %c0_113] : memref<16x392x72xf32, #tpu.memory_space<vmem>>, vector<1x392x72xf32>
    %113 = vector.shape_cast %112 : vector<1x392x72xf32> to vector<392x72xf32>
    %cst_114 = arith.constant dense<0.000000e+00> : vector<16x72xf32>
    %114 = tpu.matmul %7, %113, %cst_114 {dimension_numbers = #tpu.dot_dimension_numbers<[1], [0], [0], [1], [0, 0, 1, 1], [], []>} : vector<16x392xf32>, vector<392x72xf32>, vector<16x72xf32> -> vector<16x72xf32>
    %c15_115 = arith.constant 15 : index
    %c0_116 = arith.constant 0 : index
    %c0_117 = arith.constant 0 : index
    %115 = vector.load %arg4[%c15_115, %c0_116, %c0_117] : memref<16x16x16xf32, #tpu.memory_space<vmem>>, vector<1x16x16xf32>
    %116 = vector.shape_cast %115 : vector<1x16x16xf32> to vector<16x16xf32>
    %cst_118 = arith.constant dense<0.000000e+00> : vector<16x72xf32>
    %117 = tpu.matmul %116, %114, %cst_118 {dimension_numbers = #tpu.dot_dimension_numbers<[1], [0], [0], [1], [0, 0, 1, 1], [], []>} : vector<16x16xf32>, vector<16x72xf32>, vector<16x72xf32> -> vector<16x72xf32>
    %118 = arith.addf %111, %117 : vector<16x72xf32>
    %c0_119 = arith.constant 0 : index
    %c0_120 = arith.constant 0 : index
    %119 = vector.load %arg5[%c0_119, %c0_120] : memref<16x1xf32, #tpu.memory_space<vmem>>, vector<16x1xf32>
    %120 = vector.broadcast %119 : vector<16x1xf32> to vector<16x72xf32>
    %121 = arith.addf %118, %120 : vector<16x72xf32>
    %cst_121 = arith.constant 0.000000e+00 : f32
    %122 = vector.broadcast %cst_121 : f32 to vector<16x72xf32>
    %123 = arith.maximumf %121, %122 : vector<16x72xf32>
    %c0_122 = arith.constant 0 : index
    %c0_123 = arith.constant 0 : index
    %c0_124 = arith.constant 0 : index
    %124 = vector.load %arg6[%c0_122, %c0_123, %c0_124] : memref<16x72x8xf32, #tpu.memory_space<vmem>>, vector<1x72x8xf32>
    %125 = vector.shape_cast %124 : vector<1x72x8xf32> to vector<72x8xf32>
    %cst_125 = arith.constant dense<0.000000e+00> : vector<16x8xf32>
    %126 = tpu.matmul %123, %125, %cst_125 {dimension_numbers = #tpu.dot_dimension_numbers<[1], [0], [0], [1], [0, 0, 1, 1], [], []>} : vector<16x72xf32>, vector<72x8xf32>, vector<16x8xf32> -> vector<16x8xf32>
    %c0_126 = arith.constant 0 : index
    %c0_127 = arith.constant 0 : index
    %c0_128 = arith.constant 0 : index
    %127 = vector.load %arg7[%c0_126, %c0_127, %c0_128] : memref<16x16x16xf32, #tpu.memory_space<vmem>>, vector<1x16x16xf32>
    %128 = vector.shape_cast %127 : vector<1x16x16xf32> to vector<16x16xf32>
    %cst_129 = arith.constant dense<0.000000e+00> : vector<16x8xf32>
    %129 = tpu.matmul %128, %126, %cst_129 {dimension_numbers = #tpu.dot_dimension_numbers<[1], [0], [0], [1], [0, 0, 1, 1], [], []>} : vector<16x16xf32>, vector<16x8xf32>, vector<16x8xf32> -> vector<16x8xf32>
    %c1_130 = arith.constant 1 : index
    %c0_131 = arith.constant 0 : index
    %c0_132 = arith.constant 0 : index
    %130 = vector.load %arg6[%c1_130, %c0_131, %c0_132] : memref<16x72x8xf32, #tpu.memory_space<vmem>>, vector<1x72x8xf32>
    %131 = vector.shape_cast %130 : vector<1x72x8xf32> to vector<72x8xf32>
    %cst_133 = arith.constant dense<0.000000e+00> : vector<16x8xf32>
    %132 = tpu.matmul %123, %131, %cst_133 {dimension_numbers = #tpu.dot_dimension_numbers<[1], [0], [0], [1], [0, 0, 1, 1], [], []>} : vector<16x72xf32>, vector<72x8xf32>, vector<16x8xf32> -> vector<16x8xf32>
    %c1_134 = arith.constant 1 : index
    %c0_135 = arith.constant 0 : index
    %c0_136 = arith.constant 0 : index
    %133 = vector.load %arg7[%c1_134, %c0_135, %c0_136] : memref<16x16x16xf32, #tpu.memory_space<vmem>>, vector<1x16x16xf32>
    %134 = vector.shape_cast %133 : vector<1x16x16xf32> to vector<16x16xf32>
    %cst_137 = arith.constant dense<0.000000e+00> : vector<16x8xf32>
    %135 = tpu.matmul %134, %132, %cst_137 {dimension_numbers = #tpu.dot_dimension_numbers<[1], [0], [0], [1], [0, 0, 1, 1], [], []>} : vector<16x16xf32>, vector<16x8xf32>, vector<16x8xf32> -> vector<16x8xf32>
    %136 = arith.addf %129, %135 : vector<16x8xf32>
    %c2_138 = arith.constant 2 : index
    %c0_139 = arith.constant 0 : index
    %c0_140 = arith.constant 0 : index
    %137 = vector.load %arg6[%c2_138, %c0_139, %c0_140] : memref<16x72x8xf32, #tpu.memory_space<vmem>>, vector<1x72x8xf32>
    %138 = vector.shape_cast %137 : vector<1x72x8xf32> to vector<72x8xf32>
    %cst_141 = arith.constant dense<0.000000e+00> : vector<16x8xf32>
    %139 = tpu.matmul %123, %138, %cst_141 {dimension_numbers = #tpu.dot_dimension_numbers<[1], [0], [0], [1], [0, 0, 1, 1], [], []>} : vector<16x72xf32>, vector<72x8xf32>, vector<16x8xf32> -> vector<16x8xf32>
    %c2_142 = arith.constant 2 : index
    %c0_143 = arith.constant 0 : index
    %c0_144 = arith.constant 0 : index
    %140 = vector.load %arg7[%c2_142, %c0_143, %c0_144] : memref<16x16x16xf32, #tpu.memory_space<vmem>>, vector<1x16x16xf32>
    %141 = vector.shape_cast %140 : vector<1x16x16xf32> to vector<16x16xf32>
    %cst_145 = arith.constant dense<0.000000e+00> : vector<16x8xf32>
    %142 = tpu.matmul %141, %139, %cst_145 {dimension_numbers = #tpu.dot_dimension_numbers<[1], [0], [0], [1], [0, 0, 1, 1], [], []>} : vector<16x16xf32>, vector<16x8xf32>, vector<16x8xf32> -> vector<16x8xf32>
    %143 = arith.addf %136, %142 : vector<16x8xf32>
    %c3_146 = arith.constant 3 : index
    %c0_147 = arith.constant 0 : index
    %c0_148 = arith.constant 0 : index
    %144 = vector.load %arg6[%c3_146, %c0_147, %c0_148] : memref<16x72x8xf32, #tpu.memory_space<vmem>>, vector<1x72x8xf32>
    %145 = vector.shape_cast %144 : vector<1x72x8xf32> to vector<72x8xf32>
    %cst_149 = arith.constant dense<0.000000e+00> : vector<16x8xf32>
    %146 = tpu.matmul %123, %145, %cst_149 {dimension_numbers = #tpu.dot_dimension_numbers<[1], [0], [0], [1], [0, 0, 1, 1], [], []>} : vector<16x72xf32>, vector<72x8xf32>, vector<16x8xf32> -> vector<16x8xf32>
    %c3_150 = arith.constant 3 : index
    %c0_151 = arith.constant 0 : index
    %c0_152 = arith.constant 0 : index
    %147 = vector.load %arg7[%c3_150, %c0_151, %c0_152] : memref<16x16x16xf32, #tpu.memory_space<vmem>>, vector<1x16x16xf32>
    %148 = vector.shape_cast %147 : vector<1x16x16xf32> to vector<16x16xf32>
    %cst_153 = arith.constant dense<0.000000e+00> : vector<16x8xf32>
    %149 = tpu.matmul %148, %146, %cst_153 {dimension_numbers = #tpu.dot_dimension_numbers<[1], [0], [0], [1], [0, 0, 1, 1], [], []>} : vector<16x16xf32>, vector<16x8xf32>, vector<16x8xf32> -> vector<16x8xf32>
    %150 = arith.addf %143, %149 : vector<16x8xf32>
    %c4_154 = arith.constant 4 : index
    %c0_155 = arith.constant 0 : index
    %c0_156 = arith.constant 0 : index
    %151 = vector.load %arg6[%c4_154, %c0_155, %c0_156] : memref<16x72x8xf32, #tpu.memory_space<vmem>>, vector<1x72x8xf32>
    %152 = vector.shape_cast %151 : vector<1x72x8xf32> to vector<72x8xf32>
    %cst_157 = arith.constant dense<0.000000e+00> : vector<16x8xf32>
    %153 = tpu.matmul %123, %152, %cst_157 {dimension_numbers = #tpu.dot_dimension_numbers<[1], [0], [0], [1], [0, 0, 1, 1], [], []>} : vector<16x72xf32>, vector<72x8xf32>, vector<16x8xf32> -> vector<16x8xf32>
    %c4_158 = arith.constant 4 : index
    %c0_159 = arith.constant 0 : index
    %c0_160 = arith.constant 0 : index
    %154 = vector.load %arg7[%c4_158, %c0_159, %c0_160] : memref<16x16x16xf32, #tpu.memory_space<vmem>>, vector<1x16x16xf32>
    %155 = vector.shape_cast %154 : vector<1x16x16xf32> to vector<16x16xf32>
    %cst_161 = arith.constant dense<0.000000e+00> : vector<16x8xf32>
    %156 = tpu.matmul %155, %153, %cst_161 {dimension_numbers = #tpu.dot_dimension_numbers<[1], [0], [0], [1], [0, 0, 1, 1], [], []>} : vector<16x16xf32>, vector<16x8xf32>, vector<16x8xf32> -> vector<16x8xf32>
    %157 = arith.addf %150, %156 : vector<16x8xf32>
    %c5_162 = arith.constant 5 : index
    %c0_163 = arith.constant 0 : index
    %c0_164 = arith.constant 0 : index
    %158 = vector.load %arg6[%c5_162, %c0_163, %c0_164] : memref<16x72x8xf32, #tpu.memory_space<vmem>>, vector<1x72x8xf32>
    %159 = vector.shape_cast %158 : vector<1x72x8xf32> to vector<72x8xf32>
    %cst_165 = arith.constant dense<0.000000e+00> : vector<16x8xf32>
    %160 = tpu.matmul %123, %159, %cst_165 {dimension_numbers = #tpu.dot_dimension_numbers<[1], [0], [0], [1], [0, 0, 1, 1], [], []>} : vector<16x72xf32>, vector<72x8xf32>, vector<16x8xf32> -> vector<16x8xf32>
    %c5_166 = arith.constant 5 : index
    %c0_167 = arith.constant 0 : index
    %c0_168 = arith.constant 0 : index
    %161 = vector.load %arg7[%c5_166, %c0_167, %c0_168] : memref<16x16x16xf32, #tpu.memory_space<vmem>>, vector<1x16x16xf32>
    %162 = vector.shape_cast %161 : vector<1x16x16xf32> to vector<16x16xf32>
    %cst_169 = arith.constant dense<0.000000e+00> : vector<16x8xf32>
    %163 = tpu.matmul %162, %160, %cst_169 {dimension_numbers = #tpu.dot_dimension_numbers<[1], [0], [0], [1], [0, 0, 1, 1], [], []>} : vector<16x16xf32>, vector<16x8xf32>, vector<16x8xf32> -> vector<16x8xf32>
    %164 = arith.addf %157, %163 : vector<16x8xf32>
    %c6_170 = arith.constant 6 : index
    %c0_171 = arith.constant 0 : index
    %c0_172 = arith.constant 0 : index
    %165 = vector.load %arg6[%c6_170, %c0_171, %c0_172] : memref<16x72x8xf32, #tpu.memory_space<vmem>>, vector<1x72x8xf32>
    %166 = vector.shape_cast %165 : vector<1x72x8xf32> to vector<72x8xf32>
    %cst_173 = arith.constant dense<0.000000e+00> : vector<16x8xf32>
    %167 = tpu.matmul %123, %166, %cst_173 {dimension_numbers = #tpu.dot_dimension_numbers<[1], [0], [0], [1], [0, 0, 1, 1], [], []>} : vector<16x72xf32>, vector<72x8xf32>, vector<16x8xf32> -> vector<16x8xf32>
    %c6_174 = arith.constant 6 : index
    %c0_175 = arith.constant 0 : index
    %c0_176 = arith.constant 0 : index
    %168 = vector.load %arg7[%c6_174, %c0_175, %c0_176] : memref<16x16x16xf32, #tpu.memory_space<vmem>>, vector<1x16x16xf32>
    %169 = vector.shape_cast %168 : vector<1x16x16xf32> to vector<16x16xf32>
    %cst_177 = arith.constant dense<0.000000e+00> : vector<16x8xf32>
    %170 = tpu.matmul %169, %167, %cst_177 {dimension_numbers = #tpu.dot_dimension_numbers<[1], [0], [0], [1], [0, 0, 1, 1], [], []>} : vector<16x16xf32>, vector<16x8xf32>, vector<16x8xf32> -> vector<16x8xf32>
    %171 = arith.addf %164, %170 : vector<16x8xf32>
    %c7_178 = arith.constant 7 : index
    %c0_179 = arith.constant 0 : index
    %c0_180 = arith.constant 0 : index
    %172 = vector.load %arg6[%c7_178, %c0_179, %c0_180] : memref<16x72x8xf32, #tpu.memory_space<vmem>>, vector<1x72x8xf32>
    %173 = vector.shape_cast %172 : vector<1x72x8xf32> to vector<72x8xf32>
    %cst_181 = arith.constant dense<0.000000e+00> : vector<16x8xf32>
    %174 = tpu.matmul %123, %173, %cst_181 {dimension_numbers = #tpu.dot_dimension_numbers<[1], [0], [0], [1], [0, 0, 1, 1], [], []>} : vector<16x72xf32>, vector<72x8xf32>, vector<16x8xf32> -> vector<16x8xf32>
    %c7_182 = arith.constant 7 : index
    %c0_183 = arith.constant 0 : index
    %c0_184 = arith.constant 0 : index
    %175 = vector.load %arg7[%c7_182, %c0_183, %c0_184] : memref<16x16x16xf32, #tpu.memory_space<vmem>>, vector<1x16x16xf32>
    %176 = vector.shape_cast %175 : vector<1x16x16xf32> to vector<16x16xf32>
    %cst_185 = arith.constant dense<0.000000e+00> : vector<16x8xf32>
    %177 = tpu.matmul %176, %174, %cst_185 {dimension_numbers = #tpu.dot_dimension_numbers<[1], [0], [0], [1], [0, 0, 1, 1], [], []>} : vector<16x16xf32>, vector<16x8xf32>, vector<16x8xf32> -> vector<16x8xf32>
    %178 = arith.addf %171, %177 : vector<16x8xf32>
    %c8_186 = arith.constant 8 : index
    %c0_187 = arith.constant 0 : index
    %c0_188 = arith.constant 0 : index
    %179 = vector.load %arg6[%c8_186, %c0_187, %c0_188] : memref<16x72x8xf32, #tpu.memory_space<vmem>>, vector<1x72x8xf32>
    %180 = vector.shape_cast %179 : vector<1x72x8xf32> to vector<72x8xf32>
    %cst_189 = arith.constant dense<0.000000e+00> : vector<16x8xf32>
    %181 = tpu.matmul %123, %180, %cst_189 {dimension_numbers = #tpu.dot_dimension_numbers<[1], [0], [0], [1], [0, 0, 1, 1], [], []>} : vector<16x72xf32>, vector<72x8xf32>, vector<16x8xf32> -> vector<16x8xf32>
    %c8_190 = arith.constant 8 : index
    %c0_191 = arith.constant 0 : index
    %c0_192 = arith.constant 0 : index
    %182 = vector.load %arg7[%c8_190, %c0_191, %c0_192] : memref<16x16x16xf32, #tpu.memory_space<vmem>>, vector<1x16x16xf32>
    %183 = vector.shape_cast %182 : vector<1x16x16xf32> to vector<16x16xf32>
    %cst_193 = arith.constant dense<0.000000e+00> : vector<16x8xf32>
    %184 = tpu.matmul %183, %181, %cst_193 {dimension_numbers = #tpu.dot_dimension_numbers<[1], [0], [0], [1], [0, 0, 1, 1], [], []>} : vector<16x16xf32>, vector<16x8xf32>, vector<16x8xf32> -> vector<16x8xf32>
    %185 = arith.addf %178, %184 : vector<16x8xf32>
    %c9_194 = arith.constant 9 : index
    %c0_195 = arith.constant 0 : index
    %c0_196 = arith.constant 0 : index
    %186 = vector.load %arg6[%c9_194, %c0_195, %c0_196] : memref<16x72x8xf32, #tpu.memory_space<vmem>>, vector<1x72x8xf32>
    %187 = vector.shape_cast %186 : vector<1x72x8xf32> to vector<72x8xf32>
    %cst_197 = arith.constant dense<0.000000e+00> : vector<16x8xf32>
    %188 = tpu.matmul %123, %187, %cst_197 {dimension_numbers = #tpu.dot_dimension_numbers<[1], [0], [0], [1], [0, 0, 1, 1], [], []>} : vector<16x72xf32>, vector<72x8xf32>, vector<16x8xf32> -> vector<16x8xf32>
    %c9_198 = arith.constant 9 : index
    %c0_199 = arith.constant 0 : index
    %c0_200 = arith.constant 0 : index
    %189 = vector.load %arg7[%c9_198, %c0_199, %c0_200] : memref<16x16x16xf32, #tpu.memory_space<vmem>>, vector<1x16x16xf32>
    %190 = vector.shape_cast %189 : vector<1x16x16xf32> to vector<16x16xf32>
    %cst_201 = arith.constant dense<0.000000e+00> : vector<16x8xf32>
    %191 = tpu.matmul %190, %188, %cst_201 {dimension_numbers = #tpu.dot_dimension_numbers<[1], [0], [0], [1], [0, 0, 1, 1], [], []>} : vector<16x16xf32>, vector<16x8xf32>, vector<16x8xf32> -> vector<16x8xf32>
    %192 = arith.addf %185, %191 : vector<16x8xf32>
    %c10_202 = arith.constant 10 : index
    %c0_203 = arith.constant 0 : index
    %c0_204 = arith.constant 0 : index
    %193 = vector.load %arg6[%c10_202, %c0_203, %c0_204] : memref<16x72x8xf32, #tpu.memory_space<vmem>>, vector<1x72x8xf32>
    %194 = vector.shape_cast %193 : vector<1x72x8xf32> to vector<72x8xf32>
    %cst_205 = arith.constant dense<0.000000e+00> : vector<16x8xf32>
    %195 = tpu.matmul %123, %194, %cst_205 {dimension_numbers = #tpu.dot_dimension_numbers<[1], [0], [0], [1], [0, 0, 1, 1], [], []>} : vector<16x72xf32>, vector<72x8xf32>, vector<16x8xf32> -> vector<16x8xf32>
    %c10_206 = arith.constant 10 : index
    %c0_207 = arith.constant 0 : index
    %c0_208 = arith.constant 0 : index
    %196 = vector.load %arg7[%c10_206, %c0_207, %c0_208] : memref<16x16x16xf32, #tpu.memory_space<vmem>>, vector<1x16x16xf32>
    %197 = vector.shape_cast %196 : vector<1x16x16xf32> to vector<16x16xf32>
    %cst_209 = arith.constant dense<0.000000e+00> : vector<16x8xf32>
    %198 = tpu.matmul %197, %195, %cst_209 {dimension_numbers = #tpu.dot_dimension_numbers<[1], [0], [0], [1], [0, 0, 1, 1], [], []>} : vector<16x16xf32>, vector<16x8xf32>, vector<16x8xf32> -> vector<16x8xf32>
    %199 = arith.addf %192, %198 : vector<16x8xf32>
    %c11_210 = arith.constant 11 : index
    %c0_211 = arith.constant 0 : index
    %c0_212 = arith.constant 0 : index
    %200 = vector.load %arg6[%c11_210, %c0_211, %c0_212] : memref<16x72x8xf32, #tpu.memory_space<vmem>>, vector<1x72x8xf32>
    %201 = vector.shape_cast %200 : vector<1x72x8xf32> to vector<72x8xf32>
    %cst_213 = arith.constant dense<0.000000e+00> : vector<16x8xf32>
    %202 = tpu.matmul %123, %201, %cst_213 {dimension_numbers = #tpu.dot_dimension_numbers<[1], [0], [0], [1], [0, 0, 1, 1], [], []>} : vector<16x72xf32>, vector<72x8xf32>, vector<16x8xf32> -> vector<16x8xf32>
    %c11_214 = arith.constant 11 : index
    %c0_215 = arith.constant 0 : index
    %c0_216 = arith.constant 0 : index
    %203 = vector.load %arg7[%c11_214, %c0_215, %c0_216] : memref<16x16x16xf32, #tpu.memory_space<vmem>>, vector<1x16x16xf32>
    %204 = vector.shape_cast %203 : vector<1x16x16xf32> to vector<16x16xf32>
    %cst_217 = arith.constant dense<0.000000e+00> : vector<16x8xf32>
    %205 = tpu.matmul %204, %202, %cst_217 {dimension_numbers = #tpu.dot_dimension_numbers<[1], [0], [0], [1], [0, 0, 1, 1], [], []>} : vector<16x16xf32>, vector<16x8xf32>, vector<16x8xf32> -> vector<16x8xf32>
    %206 = arith.addf %199, %205 : vector<16x8xf32>
    %c12_218 = arith.constant 12 : index
    %c0_219 = arith.constant 0 : index
    %c0_220 = arith.constant 0 : index
    %207 = vector.load %arg6[%c12_218, %c0_219, %c0_220] : memref<16x72x8xf32, #tpu.memory_space<vmem>>, vector<1x72x8xf32>
    %208 = vector.shape_cast %207 : vector<1x72x8xf32> to vector<72x8xf32>
    %cst_221 = arith.constant dense<0.000000e+00> : vector<16x8xf32>
    %209 = tpu.matmul %123, %208, %cst_221 {dimension_numbers = #tpu.dot_dimension_numbers<[1], [0], [0], [1], [0, 0, 1, 1], [], []>} : vector<16x72xf32>, vector<72x8xf32>, vector<16x8xf32> -> vector<16x8xf32>
    %c12_222 = arith.constant 12 : index
    %c0_223 = arith.constant 0 : index
    %c0_224 = arith.constant 0 : index
    %210 = vector.load %arg7[%c12_222, %c0_223, %c0_224] : memref<16x16x16xf32, #tpu.memory_space<vmem>>, vector<1x16x16xf32>
    %211 = vector.shape_cast %210 : vector<1x16x16xf32> to vector<16x16xf32>
    %cst_225 = arith.constant dense<0.000000e+00> : vector<16x8xf32>
    %212 = tpu.matmul %211, %209, %cst_225 {dimension_numbers = #tpu.dot_dimension_numbers<[1], [0], [0], [1], [0, 0, 1, 1], [], []>} : vector<16x16xf32>, vector<16x8xf32>, vector<16x8xf32> -> vector<16x8xf32>
    %213 = arith.addf %206, %212 : vector<16x8xf32>
    %c13_226 = arith.constant 13 : index
    %c0_227 = arith.constant 0 : index
    %c0_228 = arith.constant 0 : index
    %214 = vector.load %arg6[%c13_226, %c0_227, %c0_228] : memref<16x72x8xf32, #tpu.memory_space<vmem>>, vector<1x72x8xf32>
    %215 = vector.shape_cast %214 : vector<1x72x8xf32> to vector<72x8xf32>
    %cst_229 = arith.constant dense<0.000000e+00> : vector<16x8xf32>
    %216 = tpu.matmul %123, %215, %cst_229 {dimension_numbers = #tpu.dot_dimension_numbers<[1], [0], [0], [1], [0, 0, 1, 1], [], []>} : vector<16x72xf32>, vector<72x8xf32>, vector<16x8xf32> -> vector<16x8xf32>
    %c13_230 = arith.constant 13 : index
    %c0_231 = arith.constant 0 : index
    %c0_232 = arith.constant 0 : index
    %217 = vector.load %arg7[%c13_230, %c0_231, %c0_232] : memref<16x16x16xf32, #tpu.memory_space<vmem>>, vector<1x16x16xf32>
    %218 = vector.shape_cast %217 : vector<1x16x16xf32> to vector<16x16xf32>
    %cst_233 = arith.constant dense<0.000000e+00> : vector<16x8xf32>
    %219 = tpu.matmul %218, %216, %cst_233 {dimension_numbers = #tpu.dot_dimension_numbers<[1], [0], [0], [1], [0, 0, 1, 1], [], []>} : vector<16x16xf32>, vector<16x8xf32>, vector<16x8xf32> -> vector<16x8xf32>
    %220 = arith.addf %213, %219 : vector<16x8xf32>
    %c14_234 = arith.constant 14 : index
    %c0_235 = arith.constant 0 : index
    %c0_236 = arith.constant 0 : index
    %221 = vector.load %arg6[%c14_234, %c0_235, %c0_236] : memref<16x72x8xf32, #tpu.memory_space<vmem>>, vector<1x72x8xf32>
    %222 = vector.shape_cast %221 : vector<1x72x8xf32> to vector<72x8xf32>
    %cst_237 = arith.constant dense<0.000000e+00> : vector<16x8xf32>
    %223 = tpu.matmul %123, %222, %cst_237 {dimension_numbers = #tpu.dot_dimension_numbers<[1], [0], [0], [1], [0, 0, 1, 1], [], []>} : vector<16x72xf32>, vector<72x8xf32>, vector<16x8xf32> -> vector<16x8xf32>
    %c14_238 = arith.constant 14 : index
    %c0_239 = arith.constant 0 : index
    %c0_240 = arith.constant 0 : index
    %224 = vector.load %arg7[%c14_238, %c0_239, %c0_240] : memref<16x16x16xf32, #tpu.memory_space<vmem>>, vector<1x16x16xf32>
    %225 = vector.shape_cast %224 : vector<1x16x16xf32> to vector<16x16xf32>
    %cst_241 = arith.constant dense<0.000000e+00> : vector<16x8xf32>
    %226 = tpu.matmul %225, %223, %cst_241 {dimension_numbers = #tpu.dot_dimension_numbers<[1], [0], [0], [1], [0, 0, 1, 1], [], []>} : vector<16x16xf32>, vector<16x8xf32>, vector<16x8xf32> -> vector<16x8xf32>
    %227 = arith.addf %220, %226 : vector<16x8xf32>
    %c15_242 = arith.constant 15 : index
    %c0_243 = arith.constant 0 : index
    %c0_244 = arith.constant 0 : index
    %228 = vector.load %arg6[%c15_242, %c0_243, %c0_244] : memref<16x72x8xf32, #tpu.memory_space<vmem>>, vector<1x72x8xf32>
    %229 = vector.shape_cast %228 : vector<1x72x8xf32> to vector<72x8xf32>
    %cst_245 = arith.constant dense<0.000000e+00> : vector<16x8xf32>
    %230 = tpu.matmul %123, %229, %cst_245 {dimension_numbers = #tpu.dot_dimension_numbers<[1], [0], [0], [1], [0, 0, 1, 1], [], []>} : vector<16x72xf32>, vector<72x8xf32>, vector<16x8xf32> -> vector<16x8xf32>
    %c15_246 = arith.constant 15 : index
    %c0_247 = arith.constant 0 : index
    %c0_248 = arith.constant 0 : index
    %231 = vector.load %arg7[%c15_246, %c0_247, %c0_248] : memref<16x16x16xf32, #tpu.memory_space<vmem>>, vector<1x16x16xf32>
    %232 = vector.shape_cast %231 : vector<1x16x16xf32> to vector<16x16xf32>
    %cst_249 = arith.constant dense<0.000000e+00> : vector<16x8xf32>
    %233 = tpu.matmul %232, %230, %cst_249 {dimension_numbers = #tpu.dot_dimension_numbers<[1], [0], [0], [1], [0, 0, 1, 1], [], []>} : vector<16x16xf32>, vector<16x8xf32>, vector<16x8xf32> -> vector<16x8xf32>
    %234 = arith.addf %227, %233 : vector<16x8xf32>
    %c0_250 = arith.constant 0 : index
    %c0_251 = arith.constant 0 : index
    %235 = vector.load %arg8[%c0_250, %c0_251] : memref<16x1xf32, #tpu.memory_space<vmem>>, vector<16x1xf32>
    %236 = vector.broadcast %235 : vector<16x1xf32> to vector<16x8xf32>
    %237 = arith.addf %234, %236 : vector<16x8xf32>
    %cst_252 = arith.constant 0.000000e+00 : f32
    %238 = vector.broadcast %cst_252 : f32 to vector<16x8xf32>
    %239 = arith.maximumf %237, %238 : vector<16x8xf32>
    %cst_253 = arith.constant 0.000000e+00 : f32
    %240 = vector.broadcast %cst_253 : f32 to vector<4x2xf32>
    %c0_254 = arith.constant 0 : index
    %c0_255 = arith.constant 0 : index
    %c0_256 = arith.constant 0 : index
    %241 = vector.load %arg9[%c0_254, %c0_255, %c0_256] : memref<4x8x2xf32, #tpu.memory_space<vmem>>, vector<1x8x2xf32>
    %242 = vector.shape_cast %241 : vector<1x8x2xf32> to vector<8x2xf32>
    %cst_257 = arith.constant dense<0.000000e+00> : vector<16x2xf32>
    %243 = tpu.matmul %239, %242, %cst_257 {dimension_numbers = #tpu.dot_dimension_numbers<[1], [0], [0], [1], [0, 0, 1, 1], [], []>} : vector<16x8xf32>, vector<8x2xf32>, vector<16x2xf32> -> vector<16x2xf32>
    %c0_258 = arith.constant 0 : index
    %c0_259 = arith.constant 0 : index
    %c0_260 = arith.constant 0 : index
    %244 = vector.load %arg10[%c0_258, %c0_259, %c0_260] : memref<4x4x16xf32, #tpu.memory_space<vmem>>, vector<1x4x16xf32>
    %245 = vector.shape_cast %244 : vector<1x4x16xf32> to vector<4x16xf32>
    %cst_261 = arith.constant dense<0.000000e+00> : vector<4x2xf32>
    %246 = tpu.matmul %245, %243, %cst_261 {dimension_numbers = #tpu.dot_dimension_numbers<[1], [0], [0], [1], [0, 0, 1, 1], [], []>} : vector<4x16xf32>, vector<16x2xf32>, vector<4x2xf32> -> vector<4x2xf32>
    %247 = arith.addf %240, %246 : vector<4x2xf32>
    %c1_262 = arith.constant 1 : index
    %c0_263 = arith.constant 0 : index
    %c0_264 = arith.constant 0 : index
    %248 = vector.load %arg9[%c1_262, %c0_263, %c0_264] : memref<4x8x2xf32, #tpu.memory_space<vmem>>, vector<1x8x2xf32>
    %249 = vector.shape_cast %248 : vector<1x8x2xf32> to vector<8x2xf32>
    %cst_265 = arith.constant dense<0.000000e+00> : vector<16x2xf32>
    %250 = tpu.matmul %239, %249, %cst_265 {dimension_numbers = #tpu.dot_dimension_numbers<[1], [0], [0], [1], [0, 0, 1, 1], [], []>} : vector<16x8xf32>, vector<8x2xf32>, vector<16x2xf32> -> vector<16x2xf32>
    %c1_266 = arith.constant 1 : index
    %c0_267 = arith.constant 0 : index
    %c0_268 = arith.constant 0 : index
    %251 = vector.load %arg10[%c1_266, %c0_267, %c0_268] : memref<4x4x16xf32, #tpu.memory_space<vmem>>, vector<1x4x16xf32>
    %252 = vector.shape_cast %251 : vector<1x4x16xf32> to vector<4x16xf32>
    %cst_269 = arith.constant dense<0.000000e+00> : vector<4x2xf32>
    %253 = tpu.matmul %252, %250, %cst_269 {dimension_numbers = #tpu.dot_dimension_numbers<[1], [0], [0], [1], [0, 0, 1, 1], [], []>} : vector<4x16xf32>, vector<16x2xf32>, vector<4x2xf32> -> vector<4x2xf32>
    %254 = arith.addf %247, %253 : vector<4x2xf32>
    %c2_270 = arith.constant 2 : index
    %c0_271 = arith.constant 0 : index
    %c0_272 = arith.constant 0 : index
    %255 = vector.load %arg9[%c2_270, %c0_271, %c0_272] : memref<4x8x2xf32, #tpu.memory_space<vmem>>, vector<1x8x2xf32>
    %256 = vector.shape_cast %255 : vector<1x8x2xf32> to vector<8x2xf32>
    %cst_273 = arith.constant dense<0.000000e+00> : vector<16x2xf32>
    %257 = tpu.matmul %239, %256, %cst_273 {dimension_numbers = #tpu.dot_dimension_numbers<[1], [0], [0], [1], [0, 0, 1, 1], [], []>} : vector<16x8xf32>, vector<8x2xf32>, vector<16x2xf32> -> vector<16x2xf32>
    %c2_274 = arith.constant 2 : index
    %c0_275 = arith.constant 0 : index
    %c0_276 = arith.constant 0 : index
    %258 = vector.load %arg10[%c2_274, %c0_275, %c0_276] : memref<4x4x16xf32, #tpu.memory_space<vmem>>, vector<1x4x16xf32>
    %259 = vector.shape_cast %258 : vector<1x4x16xf32> to vector<4x16xf32>
    %cst_277 = arith.constant dense<0.000000e+00> : vector<4x2xf32>
    %260 = tpu.matmul %259, %257, %cst_277 {dimension_numbers = #tpu.dot_dimension_numbers<[1], [0], [0], [1], [0, 0, 1, 1], [], []>} : vector<4x16xf32>, vector<16x2xf32>, vector<4x2xf32> -> vector<4x2xf32>
    %261 = arith.addf %254, %260 : vector<4x2xf32>
    %c3_278 = arith.constant 3 : index
    %c0_279 = arith.constant 0 : index
    %c0_280 = arith.constant 0 : index
    %262 = vector.load %arg9[%c3_278, %c0_279, %c0_280] : memref<4x8x2xf32, #tpu.memory_space<vmem>>, vector<1x8x2xf32>
    %263 = vector.shape_cast %262 : vector<1x8x2xf32> to vector<8x2xf32>
    %cst_281 = arith.constant dense<0.000000e+00> : vector<16x2xf32>
    %264 = tpu.matmul %239, %263, %cst_281 {dimension_numbers = #tpu.dot_dimension_numbers<[1], [0], [0], [1], [0, 0, 1, 1], [], []>} : vector<16x8xf32>, vector<8x2xf32>, vector<16x2xf32> -> vector<16x2xf32>
    %c3_282 = arith.constant 3 : index
    %c0_283 = arith.constant 0 : index
    %c0_284 = arith.constant 0 : index
    %265 = vector.load %arg10[%c3_282, %c0_283, %c0_284] : memref<4x4x16xf32, #tpu.memory_space<vmem>>, vector<1x4x16xf32>
    %266 = vector.shape_cast %265 : vector<1x4x16xf32> to vector<4x16xf32>
    %cst_285 = arith.constant dense<0.000000e+00> : vector<4x2xf32>
    %267 = tpu.matmul %266, %264, %cst_285 {dimension_numbers = #tpu.dot_dimension_numbers<[1], [0], [0], [1], [0, 0, 1, 1], [], []>} : vector<4x16xf32>, vector<16x2xf32>, vector<4x2xf32> -> vector<4x2xf32>
    %268 = arith.addf %261, %267 : vector<4x2xf32>
    %c0_286 = arith.constant 0 : index
    %c0_287 = arith.constant 0 : index
    %269 = vector.load %arg12[%c0_286, %c0_287] : memref<144x48xf32, #tpu.memory_space<vmem>>, vector<144x48xf32>
    %c0_288 = arith.constant 0 : index
    %c0_289 = arith.constant 0 : index
    %270 = vector.load %arg11[%c0_288, %c0_289] : memref<48x2xf32, #tpu.memory_space<vmem>>, vector<48x2xf32>
    %cst_290 = arith.constant dense<0.000000e+00> : vector<144x2xf32>
    %271 = tpu.matmul %269, %270, %cst_290 {dimension_numbers = #tpu.dot_dimension_numbers<[1], [0], [0], [1], [0, 0, 1, 1], [], []>} : vector<144x48xf32>, vector<48x2xf32>, vector<144x2xf32> -> vector<144x2xf32>
    %c0_291 = arith.constant 0 : index
    %c0_292 = arith.constant 0 : index
    %272 = vector.load %arg13[%c0_291, %c0_292] : memref<144x1xf32, #tpu.memory_space<vmem>>, vector<144x1xf32>
    %273 = vector.broadcast %272 : vector<144x1xf32> to vector<144x2xf32>
    %274 = arith.addf %271, %273 : vector<144x2xf32>
    %cst_293 = arith.constant 0.000000e+00 : f32
    %275 = vector.broadcast %cst_293 : f32 to vector<144x2xf32>
    %276 = arith.maximumf %274, %275 : vector<144x2xf32>
    %c0_294 = arith.constant 0 : index
    %c0_295 = arith.constant 0 : index
    %277 = vector.load %arg14[%c0_294, %c0_295] : memref<4x144xf32, #tpu.memory_space<vmem>>, vector<4x144xf32>
    %cst_296 = arith.constant dense<0.000000e+00> : vector<4x2xf32>
    %278 = tpu.matmul %277, %276, %cst_296 {dimension_numbers = #tpu.dot_dimension_numbers<[1], [0], [0], [1], [0, 0, 1, 1], [], []>} : vector<4x144xf32>, vector<144x2xf32>, vector<4x2xf32> -> vector<4x2xf32>
    %279 = arith.addf %268, %278 : vector<4x2xf32>
    %c0_297 = arith.constant 0 : index
    %c0_298 = arith.constant 0 : index
    %280 = vector.load %arg15[%c0_297, %c0_298] : memref<4x1xf32, #tpu.memory_space<vmem>>, vector<4x1xf32>
    %281 = vector.broadcast %280 : vector<4x1xf32> to vector<4x2xf32>
    %282 = arith.addf %279, %281 : vector<4x2xf32>
    %c0_299 = arith.constant 0 : index
    %c0_300 = arith.constant 0 : index
    %283 = vector.load %arg16[%c0_299, %c0_300] : memref<4x2xf32, #tpu.memory_space<vmem>>, vector<4x2xf32>
    tpu.vector_store %arg16[%c0_299, %c0_300], %282 {strides = array<i32>} : memref<4x2xf32, #tpu.memory_space<vmem>>, vector<4x2xf32>,
    return
  }
}

</mosaic_0001>

<bundles_post_ra>
// kernel: dqn_tiny_forward.1
= control target key start
LH: loop header
LB: loop body
LE: loop exit
PB: predicated region body
PF: predicated region fallthrough
CT: control target
= control target key end

     0   :  { %v12997_v3 = vmov 0   ;;  %vm408_vm0 = vcmask 64512   ;;  %vm770_vm1 = vcmask 130048   ;;  %vm4962_vm2 = vcmask 588800   ;;  %s17261_s0 = inlined_call_operand.vmem [shape: f32[256,392], index: 0, kind: input, shape index: {}]   ;;  %s17262_s1 = inlined_call_operand.vmem [shape: f32[16,256], index: 1, kind: input, shape index: {}]   ;;  %s17263_s2 = inlined_call_operand.vmem [shape: f32[16,1], index: 2, kind: input, shape index: {}]   ;;  %s17264_s8 = inlined_call_operand.vmem [shape: f32[16,1], index: 8, kind: input, shape index: {}]   ;;  %s17265_s13 = inlined_call_operand.vmem [shape: f32[144,1], index: 13, kind: input, shape index: {}]   ;;  %s17266_s3 = inlined_call_operand.vmem [shape: f32[16,392,72], index: 3, kind: input, shape index: {}]   ;;  %s17267_s15 = inlined_call_operand.vmem [shape: f32[4,1], index: 15, kind: input, shape index: {}]   ;;  %s17268_s4 = inlined_call_operand.vmem [shape: f32[16,16,16], index: 4, kind: input, shape index: {}]   ;;  %s17269_s5 = inlined_call_operand.vmem [shape: f32[16,1], index: 5, kind: input, shape index: {}]   ;;  %s17270_s6 = inlined_call_operand.vmem [shape: f32[16,72,8], index: 6, kind: input, shape index: {}]   ;;  %s17271_s7 = inlined_call_operand.vmem [shape: f32[16,16,16], index: 7, kind: input, shape index: {}]   ;;  %s17272_s9 = inlined_call_operand.vmem [shape: f32[4,8,2], index: 9, kind: input, shape index: {}]   ;;  %s17273_s10 = inlined_call_operand.vmem [shape: f32[4,4,16], index: 10, kind: input, shape index: {}]   ;;  %s17274_s11 = inlined_call_operand.vmem [shape: f32[48,2], index: 11, kind: input, shape index: {}]   ;;  %s17275_s12 = inlined_call_operand.vmem [shape: f32[144,48], index: 12, kind: input, shape index: {}]   ;;  %s17276_s14 = inlined_call_operand.vmem [shape: f32[4,144], index: 14, kind: input, shape index: {}]   ;;  %s17277_s16 = inlined_call_operand.vmem [shape: f32[4,2], index: 16, kind: output, shape index: {}]  }
   0x1   :  { %17279 = sst [smem:[#allocation2_spill]] %s17261_s0  ;;  %12994 = vset.pattern.permute.xlu0 %v12997_v3  ;;  %12995 = vset.pattern.permute.xlu1 %v12997_v3  ;;  %vm13000_vm3 = vmmov 0   ;;  %vm8452_vm4 = vcmask 392192   ;;  %vm8763_vm5 = vcmask 11264  }
   0x2   :  { %s17280_s23 = sld [smem:[#allocation2_spill]] }
   0x8   :  { %v58_v0 = vld [vmem:[%s17280_s23 + $0x8] sm:$0xff]  ;;  %v60_v2 = vld [vmem:[%s17280_s23 + $0x18] sm:$0xff]  ;;  %v57_v6 = vld [vmem:[%s17280_s23] sm:$0xff] }
   0x9   :  { %v62_v1 = vld [vmem:[%s17280_s23 + $0x28] sm:$0xff]  ;;  %v64_v5 = vld [vmem:[%s17280_s23 + $0x38] sm:$0xff]  ;;  %v61_v7 = vld [vmem:[%s17280_s23 + $0x20] sm:$0xff] }
   0xa   :  { %v11471_v4 = vpack.c.bf16 %v62_v1, %v58_v0  ;;  %v11535_v8 = vpack.c.bf16 %v64_v5, %v60_v2  ;;  %v11473_v9 = vpack.c.bf16 %v61_v7, %v57_v6  ;;  %v59_v10 = vld [vmem:[%s17280_s23 + $0x10] sm:$0xff]  ;;  %v66_v12 = vld [vmem:[%s17280_s23 + $0x48] sm:$0xff]  ;;  %v68_v15 = vld [vmem:[%s17280_s23 + $0x58] sm:$0xff] }
   0xb   :  { %v63_v11 = vld [vmem:[%s17280_s23 + $0x30] sm:$0xff]  ;;  %v70_v14 = vld [vmem:[%s17280_s23 + $0x68] sm:$0xff]  ;;  %v72_v16 = vld [vmem:[%s17280_s23 + $0x78] sm:$0xff] }
   0xc   :  { %11472 = vmatprep.subr.bf16.mxu0 %v11471_v4  ;;  %v11537_v13 = vpack.c.bf16 %v63_v11, %v59_v10  ;;  %11536 = vmatprep.subr.bf16.mxu1 %v11535_v8  ;;  %v11475_v17 = vpack.c.bf16 %v70_v14, %v66_v12  ;;  %v11539_v18 = vpack.c.bf16 %v72_v16, %v68_v15  ;;  %v65_v19 = vld [vmem:[%s17280_s23 + $0x40] sm:$0xff]  ;;  %v67_v21 = vld [vmem:[%s17280_s23 + $0x50] sm:$0xff]  ;;  %v74_v24 = vld [vmem:[%s17280_s23 + $0x88] sm:$0xff] }
   0xd   :  { %11474 = vmatpush1.bf16.msra.mxu0 %v11473_v9  ;;  %v69_v20 = vld [vmem:[%s17280_s23 + $0x60] sm:$0xff]  ;;  %v71_v23 = vld [vmem:[%s17280_s23 + $0x70] sm:$0xff]  ;;  %v78_v25 = vld [vmem:[%s17280_s23 + $0xa8] sm:$0xff] }
   0xe   :  { %11538 = vmatpush1.bf16.msra.mxu1 %v11537_v13  ;;  %v11477_v22 = vpack.c.bf16 %v69_v20, %v65_v19  ;;  %11476 = vmatprep.subr.bf16.mxu0 %v11475_v17  ;;  %v11541_v26 = vpack.c.bf16 %v71_v23, %v67_v21  ;;  %v11479_v27 = vpack.c.bf16 %v78_v25, %v74_v24  ;;  %v76_v28 = vld [vmem:[%s17280_s23 + $0x98] sm:$0xff]  ;;  %v73_v30 = vld [vmem:[%s17280_s23 + $0x80] sm:$0xff]  ;;  %v75_v33 = vld [vmem:[%s17280_s23 + $0x90] sm:$0xff] }
   0xf   :  { %11540 = vmatprep.subr.bf16.mxu1 %v11539_v18  ;;  %v80_v29 = vld [vmem:[%s17280_s23 + $0xb8] sm:$0xff]  ;;  %v77_v32 = vld [vmem:[%s17280_s23 + $0xa0] sm:$0xff]  ;;  %v79_v34 = vld [vmem:[%s17280_s23 + $0xb0] sm:$0xff] }
  0x10   :  { %v11543_v31 = vpack.c.bf16 %v80_v29, %v76_v28  ;;  %v11481_v35 = vpack.c.bf16 %v77_v32, %v73_v30  ;;  %v82_v36 = vld [vmem:[%s17280_s23 + $0xc8] sm:$0xff]  ;;  %v84_v38 = vld [vmem:[%s17280_s23 + $0xd8] sm:$0xff]  ;;  %v11545_v39 = vpack.c.bf16 %v79_v34, %v75_v33  ;;  %v81_v42 = vld [vmem:[%s17280_s23 + $0xc0] sm:$0xff] }
  0x11   :  { %11478 = vmatpush1.bf16.msra.mxu0 %v11477_v22  ;;  %v86_v37 = vld [vmem:[%s17280_s23 + $0xe8] sm:$0xff]  ;;  %v88_v41 = vld [vmem:[%s17280_s23 + $0xf8] sm:$0xff]  ;;  %v85_v43 = vld [vmem:[%s17280_s23 + $0xe0] sm:$0xff] }
  0x12   :  { %11542 = vmatpush1.bf16.msra.mxu1 %v11541_v26  ;;  %11480 = vmatprep.subr.bf16.mxu0 %v11479_v27  ;;  %v11483_v40 = vpack.c.bf16 %v86_v37, %v82_v36  ;;  %v11547_v44 = vpack.c.bf16 %v88_v41, %v84_v38  ;;  %v83_v45 = vld [vmem:[%s17280_s23 + $0xd0] sm:$0xff]  ;;  %v90_v47 = vld [vmem:[%s17280_s23 + $0x108] sm:$0xff]  ;;  %v92_v49 = vld [vmem:[%s17280_s23 + $0x118] sm:$0xff]  ;;  %v11485_v51 = vpack.c.bf16 %v85_v43, %v81_v42 }
  0x13   :  { %11544 = vmatprep.subr.bf16.mxu1 %v11543_v31  ;;  %v87_v46 = vld [vmem:[%s17280_s23 + $0xf0] sm:$0xff]  ;;  %v94_v48 = vld [vmem:[%s17280_s23 + $0x128] sm:$0xff]  ;;  %v96_v50 = vld [vmem:[%s17280_s23 + $0x138] sm:$0xff] }
  0x14   :  { %v11549_v52 = vpack.c.bf16 %v87_v46, %v83_v45  ;;  %v11487_v53 = vpack.c.bf16 %v94_v48, %v90_v47  ;;  %v89_v54 = vld [vmem:[%s17280_s23 + $0x100] sm:$0xff]  ;;  %v91_v56 = vld [vmem:[%s17280_s23 + $0x110] sm:$0xff]  ;;  %v11551_v57 = vpack.c.bf16 %v96_v50, %v92_v49  ;;  %v98_v59 = vld [vmem:[%s17280_s23 + $0x148] sm:$0xff] }
  0x15   :  { %11482 = vmatpush1.bf16.msra.mxu0 %v11481_v35  ;;  %v93_v55 = vld [vmem:[%s17280_s23 + $0x120] sm:$0xff]  ;;  %v95_v58 = vld [vmem:[%s17280_s23 + $0x130] sm:$0xff]  ;;  %v102_v60 = vld [vmem:[%s17280_s23 + $0x168] sm:$0xff] }
  0x16   :  { %11546 = vmatpush1.bf16.msra.mxu1 %v11545_v39  ;;  %11484 = vmatprep.subr.bf16.mxu0 %v11483_v40  ;;  %v100_v61 = vld [vmem:[%s17280_s23 + $0x158] sm:$0xff]  ;;  %v11489_v63 = vpack.c.bf16 %v93_v55, %v89_v54  ;;  %v11553_v0 = vpack.c.bf16 %v95_v58, %v91_v56  ;;  %v11491_v1 = vpack.c.bf16 %v102_v60, %v98_v59  ;;  %v97_v2 = vld [vmem:[%s17280_s23 + $0x140] sm:$0xff]  ;;  %v99_v4 = vld [vmem:[%s17280_s23 + $0x150] sm:$0xff] }
  0x17   :  { %11548 = vmatprep.subr.bf16.mxu1 %v11547_v44  ;;  %v104_v62 = vld [vmem:[%s17280_s23 + $0x178] sm:$0xff]  ;;  %v101_v3 = vld [vmem:[%s17280_s23 + $0x160] sm:$0xff]  ;;  %v103_v6 = vld [vmem:[%s17280_s23 + $0x170] sm:$0xff] }
  0x18   :  { %v11555_v5 = vpack.c.bf16 %v104_v62, %v100_v61  ;;  %v106_v7 = vld [vmem:[%s17280_s23 + $0x188] sm:$0xff]  ;;  %v108_v9 = vld [vmem:[%s17280_s23 + $0x198] sm:$0xff]  ;;  %v11493_v11 = vpack.c.bf16 %v101_v3, %v97_v2  ;;  %v11557_v12 = vpack.c.bf16 %v103_v6, %v99_v4  ;;  %v105_v14 = vld [vmem:[%s17280_s23 + $0x180] sm:$0xff] }
  0x19   :  { %11486 = vmatpush1.bf16.msra.mxu0 %v11485_v51  ;;  %v110_v8 = vld [vmem:[%s17280_s23 + $0x1a8] sm:$0xff]  ;;  %v112_v10 = vld [vmem:[%s17280_s23 + $0x1b8] sm:$0xff]  ;;  %v109_v15 = vld [vmem:[%s17280_s23 + $0x1a0] sm:$0xff] }
  0x1a   :  { %11550 = vmatpush1.bf16.msra.mxu1 %v11549_v52  ;;  %11488 = vmatprep.subr.bf16.mxu0 %v11487_v53  ;;  %v11495_v13 = vpack.c.bf16 %v110_v8, %v106_v7  ;;  %v107_v16 = vld [vmem:[%s17280_s23 + $0x190] sm:$0xff]  ;;  %v11559_v17 = vpack.c.bf16 %v112_v10, %v108_v9  ;;  %v114_v19 = vld [vmem:[%s17280_s23 + $0x1c8] sm:$0xff]  ;;  %v116_v21 = vld [vmem:[%s17280_s23 + $0x1d8] sm:$0xff]  ;;  %v11497_v23 = vpack.c.bf16 %v109_v15, %v105_v14 }
  0x1b   :  { %11552 = vmatprep.subr.bf16.mxu1 %v11551_v57  ;;  %v111_v18 = vld [vmem:[%s17280_s23 + $0x1b0] sm:$0xff]  ;;  %v118_v20 = vld [vmem:[%s17280_s23 + $0x1e8] sm:$0xff]  ;;  %v120_v22 = vld [vmem:[%s17280_s23 + $0x1f8] sm:$0xff] }
  0x1c   :  { %v11561_v24 = vpack.c.bf16 %v111_v18, %v107_v16  ;;  %v11499_v25 = vpack.c.bf16 %v118_v20, %v114_v19  ;;  %v113_v26 = vld [vmem:[%s17280_s23 + $0x1c0] sm:$0xff]  ;;  %v115_v28 = vld [vmem:[%s17280_s23 + $0x1d0] sm:$0xff]  ;;  %v11563_v29 = vpack.c.bf16 %v120_v22, %v116_v21  ;;  %v122_v31 = vld [vmem:[%s17280_s23 + $0x208] sm:$0xff] }
  0x1d   :  { %11490 = vmatpush1.bf16.msra.mxu0 %v11489_v63  ;;  %v117_v27 = vld [vmem:[%s17280_s23 + $0x1e0] sm:$0xff]  ;;  %v119_v30 = vld [vmem:[%s17280_s23 + $0x1f0] sm:$0xff]  ;;  %v126_v32 = vld [vmem:[%s17280_s23 + $0x228] sm:$0xff] }
  0x1e   :  { %11554 = vmatpush1.bf16.msra.mxu1 %v11553_v0  ;;  %11492 = vmatprep.subr.bf16.mxu0 %v11491_v1  ;;  %v124_v33 = vld [vmem:[%s17280_s23 + $0x218] sm:$0xff]  ;;  %v11501_v35 = vpack.c.bf16 %v117_v27, %v113_v26  ;;  %v11565_v36 = vpack.c.bf16 %v119_v30, %v115_v28  ;;  %v11503_v37 = vpack.c.bf16 %v126_v32, %v122_v31  ;;  %v121_v38 = vld [vmem:[%s17280_s23 + $0x200] sm:$0xff]  ;;  %v123_v40 = vld [vmem:[%s17280_s23 + $0x210] sm:$0xff] }
  0x1f   :  { %11556 = vmatprep.subr.bf16.mxu1 %v11555_v5  ;;  %v128_v34 = vld [vmem:[%s17280_s23 + $0x238] sm:$0xff]  ;;  %v125_v39 = vld [vmem:[%s17280_s23 + $0x220] sm:$0xff]  ;;  %v127_v42 = vld [vmem:[%s17280_s23 + $0x230] sm:$0xff] }
  0x20   :  { %v11567_v41 = vpack.c.bf16 %v128_v34, %v124_v33  ;;  %v130_v43 = vld [vmem:[%s17280_s23 + $0x248] sm:$0xff]  ;;  %v132_v45 = vld [vmem:[%s17280_s23 + $0x258] sm:$0xff]  ;;  %v11505_v47 = vpack.c.bf16 %v125_v39, %v121_v38  ;;  %v11569_v48 = vpack.c.bf16 %v127_v42, %v123_v40  ;;  %v129_v50 = vld [vmem:[%s17280_s23 + $0x240] sm:$0xff] }
  0x21   :  { %11494 = vmatpush1.bf16.msra.mxu0 %v11493_v11  ;;  %v134_v44 = vld [vmem:[%s17280_s23 + $0x268] sm:$0xff]  ;;  %v136_v46 = vld [vmem:[%s17280_s23 + $0x278] sm:$0xff]  ;;  %v133_v51 = vld [vmem:[%s17280_s23 + $0x260] sm:$0xff] }
  0x22   :  { %11558 = vmatpush1.bf16.msra.mxu1 %v11557_v12  ;;  %11496 = vmatprep.subr.bf16.mxu0 %v11495_v13  ;;  %v11507_v49 = vpack.c.bf16 %v134_v44, %v130_v43  ;;  %v131_v52 = vld [vmem:[%s17280_s23 + $0x250] sm:$0xff]  ;;  %v11571_v53 = vpack.c.bf16 %v136_v46, %v132_v45  ;;  %v138_v55 = vld [vmem:[%s17280_s23 + $0x288] sm:$0xff]  ;;  %v140_v57 = vld [vmem:[%s17280_s23 + $0x298] sm:$0xff]  ;;  %v11509_v59 = vpack.c.bf16 %v133_v51, %v129_v50 }
  0x23   :  { %11560 = vmatprep.subr.bf16.mxu1 %v11559_v17  ;;  %v135_v54 = vld [vmem:[%s17280_s23 + $0x270] sm:$0xff]  ;;  %v142_v56 = vld [vmem:[%s17280_s23 + $0x2a8] sm:$0xff]  ;;  %v144_v58 = vld [vmem:[%s17280_s23 + $0x2b8] sm:$0xff] }
  0x24   :  { %v11573_v60 = vpack.c.bf16 %v135_v54, %v131_v52  ;;  %v11511_v61 = vpack.c.bf16 %v142_v56, %v138_v55  ;;  %v137_v62 = vld [vmem:[%s17280_s23 + $0x280] sm:$0xff]  ;;  %v139_v0 = vld [vmem:[%s17280_s23 + $0x290] sm:$0xff]  ;;  %v11575_v1 = vpack.c.bf16 %v144_v58, %v140_v57  ;;  %v146_v3 = vld [vmem:[%s17280_s23 + $0x2c8] sm:$0xff] }
  0x25   :  { %11498 = vmatpush1.bf16.msra.mxu0 %v11497_v23  ;;  %v141_v63 = vld [vmem:[%s17280_s23 + $0x2a0] sm:$0xff]  ;;  %v143_v2 = vld [vmem:[%s17280_s23 + $0x2b0] sm:$0xff]  ;;  %v150_v4 = vld [vmem:[%s17280_s23 + $0x2e8] sm:$0xff] }
  0x26   :  { %11562 = vmatpush1.bf16.msra.mxu1 %v11561_v24  ;;  %11500 = vmatprep.subr.bf16.mxu0 %v11499_v25  ;;  %v148_v5 = vld [vmem:[%s17280_s23 + $0x2d8] sm:$0xff]  ;;  %v11513_v7 = vpack.c.bf16 %v141_v63, %v137_v62  ;;  %v145_v8 = vld [vmem:[%s17280_s23 + $0x2c0] sm:$0xff]  ;;  %v11577_v9 = vpack.c.bf16 %v143_v2, %v139_v0  ;;  %v11515_v10 = vpack.c.bf16 %v150_v4, %v146_v3  ;;  %v147_v12 = vld [vmem:[%s17280_s23 + $0x2d0] sm:$0xff] }
  0x27   :  { %11564 = vmatprep.subr.bf16.mxu1 %v11563_v29  ;;  %v152_v6 = vld [vmem:[%s17280_s23 + $0x2f8] sm:$0xff]  ;;  %v149_v11 = vld [vmem:[%s17280_s23 + $0x2e0] sm:$0xff]  ;;  %v151_v13 = vld [vmem:[%s17280_s23 + $0x2f0] sm:$0xff] }
  0x28   :  { %v11579_v14 = vpack.c.bf16 %v152_v6, %v148_v5  ;;  %v154_v15 = vld [vmem:[%s17280_s23 + $0x308] sm:$0xff]  ;;  %v156_v18 = vld [vmem:[%s17280_s23 + $0x318] sm:$0xff]  ;;  %v11517_v20 = vpack.c.bf16 %v149_v11, %v145_v8  ;;  %v185_v21 = vld [vmem:[%s17263_s2] sm:$0xff]  ;;  %v11581_v22 = vpack.c.bf16 %v151_v13, %v147_v12  ;;  %v12998_v11 = vmov 0.0|0.0  }
  0x29   :  { %11502 = vmatpush1.bf16.msra.mxu0 %v11501_v35  ;;  %v158_v16 = vld [vmem:[%s17280_s23 + $0x328] sm:$0xff]  ;;  %v160_v19 = vld [vmem:[%s17280_s23 + $0x338] sm:$0xff]  ;;  %v153_v24 = vld [vmem:[%s17280_s23 + $0x300] sm:$0xff]  ;;  %189 = vperm.xlu0 %12994, %v185_v21  }
  0x2a   :  { %11566 = vmatpush1.bf16.msra.mxu1 %v11565_v36  ;;  %11504 = vmatprep.subr.bf16.mxu0 %v11503_v37  ;;  %v54_v17 = vld [vmem:[%s17262_s1 + $0x8] sm:$0xff]  ;;  %v11519_v23 = vpack.c.bf16 %v158_v16, %v154_v15  ;;  %v157_v25 = vld [vmem:[%s17280_s23 + $0x320] sm:$0xff]  ;;  %v155_v26 = vld [vmem:[%s17280_s23 + $0x310] sm:$0xff]  ;;  %v11583_v27 = vpack.c.bf16 %v160_v19, %v156_v18 }
  0x2b   :  { %11568 = vmatprep.subr.bf16.mxu1 %v11567_v41  ;;  %261 = vmatprep.mubr.f32.mxu0 %v54_v17  ;;  %v159_v28 = vld [vmem:[%s17280_s23 + $0x330] sm:$0xff]  ;;  %v162_v29 = vld [vmem:[%s17280_s23 + $0x348] sm:$0xff]  ;;  %v164_v31 = vld [vmem:[%s17280_s23 + $0x358] sm:$0xff]  ;;  %v11521_v34 = vpack.c.bf16 %v157_v25, %v153_v24 }
  0x2c   :  { %338 = vmatprep.mubr.f32.mxu1 %v54_v17  ;;  %v166_v30 = vld [vmem:[%s17280_s23 + $0x368] sm:$0xff]  ;;  %v168_v32 = vld [vmem:[%s17280_s23 + $0x378] sm:$0xff]  ;;  %v11585_v35 = vpack.c.bf16 %v159_v28, %v155_v26  ;;  %v161_v37 = vld [vmem:[%s17280_s23 + $0x340] sm:$0xff] }
  0x2d   :  { %11506 = vmatpush1.bf16.msra.mxu0 %v11505_v47  ;;  %v186_v33 = vld [vmem:[%s17263_s2 + $0x8] sm:$0xff]  ;;  %v11523_v36 = vpack.c.bf16 %v166_v30, %v162_v29  ;;  %v165_v38 = vld [vmem:[%s17280_s23 + $0x360] sm:$0xff]  ;;  %v163_v39 = vld [vmem:[%s17280_s23 + $0x350] sm:$0xff]  ;;  %v11587_v40 = vpack.c.bf16 %v168_v32, %v164_v31 }
  0x2e   :  { %11570 = vmatpush1.bf16.msra.mxu1 %v11569_v48  ;;  %11508 = vmatprep.subr.bf16.mxu0 %v11507_v49  ;;  %v167_v41 = vld [vmem:[%s17280_s23 + $0x370] sm:$0xff]  ;;  %v170_v42 = vld [vmem:[%s17280_s23 + $0x388] sm:$0xff]  ;;  %v172_v44 = vld [vmem:[%s17280_s23 + $0x398] sm:$0xff]  ;;  %v11525_v47 = vpack.c.bf16 %v165_v38, %v161_v37 }
  0x2f   :  { %11572 = vmatprep.subr.bf16.mxu1 %v11571_v53  ;;  %v174_v43 = vld [vmem:[%s17280_s23 + $0x3a8] sm:$0xff]  ;;  %194 = vperm.xlu0 %12994, %v186_v33   ;;  %v176_v45 = vld [vmem:[%s17280_s23 + $0x3b8] sm:$0xff]  ;;  %v7690_v46 = vld [vmem:[%s17264_s8] sm:$0xff]  ;;  %v11589_v48 = vpack.c.bf16 %v167_v41, %v163_v39 }
  0x30   :  { %v11527_v49 = vpack.c.bf16 %v174_v43, %v170_v42  ;;  %v169_v50 = vld [vmem:[%s17280_s23 + $0x380] sm:$0xff]  ;;  %v171_v52 = vld [vmem:[%s17280_s23 + $0x390] sm:$0xff]  ;;  %v11591_v53 = vpack.c.bf16 %v176_v45, %v172_v44  ;;  %v178_v55 = vld [vmem:[%s17280_s23 + $0x3c8] sm:$0xff] }
  0x31   :  { %11510 = vmatpush1.bf16.msra.mxu0 %v11509_v59  ;;  %v173_v51 = vld [vmem:[%s17280_s23 + $0x3a0] sm:$0xff]  ;;  %v175_v54 = vld [vmem:[%s17280_s23 + $0x3b0] sm:$0xff]  ;;  %v182_v56 = vld [vmem:[%s17280_s23 + $0x3e8] sm:$0xff] }
  0x32   :  { %11574 = vmatpush1.bf16.msra.mxu1 %v11573_v60  ;;  %11512 = vmatprep.subr.bf16.mxu0 %v11511_v61  ;;  %v180_v57 = vld [vmem:[%s17280_s23 + $0x3d8] sm:$0xff]  ;;  %v8344_v59 = vld [vmem:[%s17265_s13] sm:$0xff]  ;;  %v11529_v60 = vpack.c.bf16 %v173_v51, %v169_v50  ;;  %v11593_v61 = vpack.c.bf16 %v175_v54, %v171_v52  ;;  %v11531_v62 = vpack.c.bf16 %v182_v56, %v178_v55  ;;  %v179_v2 = vld [vmem:[%s17280_s23 + $0x3d0] sm:$0xff] }
  0x33   :  { %11576 = vmatprep.subr.bf16.mxu1 %v11575_v1  ;;  %7694 = vperm.xlu0 %12994, %v7690_v46   ;;  %v184_v58 = vld [vmem:[%s17280_s23 + $0x3f8] sm:$0xff]  ;;  %v177_v63 = vld [vmem:[%s17280_s23 + $0x3c0] sm:$0xff]  ;;  %v183_v3 = vld [vmem:[%s17280_s23 + $0x3f0] sm:$0xff] }
  0x34   :  { %v181_v0 = vld [vmem:[%s17280_s23 + $0x3e0] sm:$0xff]  ;;  %v11595_v1 = vpack.c.bf16 %v184_v58, %v180_v57  ;;  %v8346_v4 = vld [vmem:[%s17265_s13 + $0x10] sm:$0xff]  ;;  %v11597_v6 = vpack.c.bf16 %v183_v3, %v179_v2  ;;  %v392_v13 = vld [vmem:[%s17266_s3 + $0x108] sm:$0xff] }
  0x35   :  { %11514 = vmatpush1.bf16.msra.mxu0 %v11513_v7  ;;  %v11533_v5 = vpack.c.bf16 %v181_v0, %v177_v63  ;;  %v8348_v7 = vld [vmem:[%s17265_s13 + $0x20] sm:$0xff]  ;;  %v376_v16 = vld [vmem:[%s17266_s3 + $0x88] sm:$0xff]  ;;  %v55_v19 = vld [vmem:[%s17262_s1 + $0x10] sm:$0xff] }
  0x36   :  { %11578 = vmatpush1.bf16.msra.mxu1 %v11577_v9  ;;  %11516 = vmatprep.subr.bf16.mxu0 %v11515_v10  ;;  %v53_v8 = vld [vmem:[%s17262_s1] sm:$0xff]  ;;  %v56_v9 = vld [vmem:[%s17262_s1 + $0x18] sm:$0xff]  ;;  %v8350_v10 = vld [vmem:[%s17265_s13 + $0x30] sm:$0xff] }
  0x37   :  { %11580 = vmatprep.subr.bf16.mxu1 %v11579_v14  ;;  %8364 = vperm.xlu0 %12994, %v8344_v59   ;;  %v391_v12 = vld [vmem:[%s17266_s3 + $0x100] sm:$0xff]  ;;  %v360_v18 = vld [vmem:[%s17266_s3 + $0x8] sm:$0xff]  ;;  %v377_v24 = vld [vmem:[%s17266_s3 + $0x90] sm:$0xff] }
  0x38   :  { %v375_v14 = vld [vmem:[%s17266_s3 + $0x80] sm:$0xff]  ;;  %v11632_v15 = vpack.c.bf16 %v392_v13, %v391_v12  ;;  %v378_v26 = vld [vmem:[%s17266_s3 + $0x98] sm:$0xff]  ;;  %v396_v33 = vld [vmem:[%s17266_s3 + $0x128] sm:$0xff] }
  0x39   :  { %11518 = vmatpush1.bf16.msra.mxu0 %v11517_v20  ;;  %v359_v17 = vld [vmem:[%s17266_s3] sm:$0xff]  ;;  %v11599_v20 = vpack.c.bf16 %v376_v16, %v375_v14  ;;  %v362_v28 = vld [vmem:[%s17266_s3 + $0x18] sm:$0xff]  ;;  %v11603_v30 = vpack.c.bf16 %v378_v26, %v377_v24  ;;  %v364_v38 = vld [vmem:[%s17266_s3 + $0x28] sm:$0xff] }
  0x3a   :  { %11582 = vmatpush1.bf16.msra.mxu1 %v11581_v22  ;;  %11520 = vmatprep.subr.bf16.mxu0 %v11519_v23  ;;  %v11601_v21 = vpack.c.bf16 %v360_v18, %v359_v17  ;;  %v393_v22 = vld [vmem:[%s17266_s3 + $0x110] sm:$0xff]  ;;  %v394_v23 = vld [vmem:[%s17266_s3 + $0x118] sm:$0xff]  ;;  %v8352_v29 = vld [vmem:[%s17265_s13 + $0x40] sm:$0xff] }
  0x3b   :  { %11584 = vmatprep.subr.bf16.mxu1 %v11583_v27  ;;  %8374 = vperm.xlu0 %12994, %v8346_v4   ;;  %v11635_v25 = vpack.c.bf16 %v394_v23, %v393_v22  ;;  %v361_v27 = vld [vmem:[%s17266_s3 + $0x10] sm:$0xff]  ;;  %v395_v32 = vld [vmem:[%s17266_s3 + $0x120] sm:$0xff]  ;;  %v398_v43 = vld [vmem:[%s17266_s3 + $0x138] sm:$0xff] }
  0x3c   :  { %v11605_v31 = vpack.c.bf16 %v362_v28, %v361_v27  ;;  %v363_v37 = vld [vmem:[%s17266_s3 + $0x20] sm:$0xff]  ;;  %v8354_v39 = vld [vmem:[%s17265_s13 + $0x50] sm:$0xff]  ;;  %v382_v46 = vld [vmem:[%s17266_s3 + $0xb8] sm:$0xff] }
  0x3d   :  { %11522 = vmatpush1.bf16.msra.mxu0 %v11521_v34  ;;  %v379_v34 = vld [vmem:[%s17266_s3 + $0xa0] sm:$0xff]  ;;  %v11609_v41 = vpack.c.bf16 %v364_v38, %v363_v37  ;;  %v397_v42 = vld [vmem:[%s17266_s3 + $0x130] sm:$0xff]  ;;  %v384_v56 = vld [vmem:[%s17266_s3 + $0xc8] sm:$0xff] }
  0x3e   :  { %11586 = vmatpush1.bf16.msra.mxu1 %v11585_v35  ;;  %11524 = vmatprep.subr.bf16.mxu0 %v11523_v36  ;;  %v11638_v35 = vpack.c.bf16 %v396_v33, %v395_v32  ;;  %v380_v36 = vld [vmem:[%s17266_s3 + $0xa8] sm:$0xff]  ;;  %v381_v44 = vld [vmem:[%s17266_s3 + $0xb0] sm:$0xff]  ;;  %v11641_v45 = vpack.c.bf16 %v398_v43, %v397_v42  ;;  %v399_v52 = vld [vmem:[%s17266_s3 + $0x140] sm:$0xff] }
  0x3f   :  { %11588 = vmatprep.subr.bf16.mxu1 %v11587_v40  ;;  %8384 = vperm.xlu0 %12994, %v8348_v7   ;;  %v11607_v40 = vpack.c.bf16 %v380_v36, %v379_v34  ;;  %v11611_v50 = vpack.c.bf16 %v382_v46, %v381_v44  ;;  %v383_v54 = vld [vmem:[%s17266_s3 + $0xc0] sm:$0xff]  ;;  %v368_v58 = vld [vmem:[%s17266_s3 + $0x48] sm:$0xff]  ;;  %v8358_v59 = vld [vmem:[%s17265_s13 + $0x70] sm:$0xff] }
  0x40   :  { %v367_v57 = vld [vmem:[%s17266_s3 + $0x40] sm:$0xff]  ;;  %v402_v63 = vld [vmem:[%s17266_s3 + $0x158] sm:$0xff]  ;;  %v385_v0 = vld [vmem:[%s17266_s3 + $0xd0] sm:$0xff] }
  0x41   :  { %11526 = vmatpush1.bf16.msra.mxu0 %v11525_v47  ;;  %v365_v47 = vld [vmem:[%s17266_s3 + $0x30] sm:$0xff]  ;;  %v386_v2 = vld [vmem:[%s17266_s3 + $0xd8] sm:$0xff]  ;;  %v388_v13 = vld [vmem:[%s17266_s3 + $0xe8] sm:$0xff] }
  0x42   :  { %11590 = vmatpush1.bf16.msra.mxu1 %v11589_v48  ;;  %11528 = vmatprep.subr.bf16.mxu0 %v11527_v49  ;;  %v366_v48 = vld [vmem:[%s17266_s3 + $0x38] sm:$0xff]  ;;  %v8356_v49 = vld [vmem:[%s17265_s13 + $0x60] sm:$0xff]  ;;  %v369_v3 = vld [vmem:[%s17266_s3 + $0x50] sm:$0xff] }
  0x43   :  { %11592 = vmatprep.subr.bf16.mxu1 %v11591_v53  ;;  %8394 = vperm.xlu0 %12994, %v8350_v10   ;;  %v11613_v51 = vpack.c.bf16 %v366_v48, %v365_v47  ;;  %v400_v53 = vld [vmem:[%s17266_s3 + $0x148] sm:$0xff]  ;;  %v370_v4 = vld [vmem:[%s17266_s3 + $0x58] sm:$0xff]  ;;  %v387_v10 = vld [vmem:[%s17266_s3 + $0xe0] sm:$0xff] }
  0x44   :  { %v11644_v55 = vpack.c.bf16 %v400_v53, %v399_v52  ;;  %v11621_v7 = vpack.c.bf16 %v370_v4, %v369_v3  ;;  %v371_v14 = vld [vmem:[%s17266_s3 + $0x60] sm:$0xff]  ;;  %v11623_v17 = vpack.c.bf16 %v388_v13, %v387_v10  ;;  %v389_v22 = vld [vmem:[%s17266_s3 + $0xf0] sm:$0xff]  ;;  %v390_v23 = vld [vmem:[%s17266_s3 + $0xf8] sm:$0xff] }
  0x45   :  { %11530 = vmatpush1.bf16.msra.mxu0 %v11529_v60  ;;  %v11615_v60 = vpack.c.bf16 %v384_v56, %v383_v54  ;;  %v8756_v16 = vld [vmem:[%s17267_s15] sm:$0xf]  ;;  %v11627_v24 = vpack.c.bf16 %v390_v23, %v389_v22  ;;  %v374_v26 = vld [vmem:[%s17266_s3 + $0x78] sm:$0xff]  ;;  %v8787_v28 = vld [vmem:[%s17266_s3 + $0x208] sm:$0xff] }
  0x46   :  { %11594 = vmatpush1.bf16.msra.mxu1 %v11593_v61  ;;  %11532 = vmatprep.subr.bf16.mxu0 %v11531_v62  ;;  %v11617_v61 = vpack.c.bf16 %v368_v58, %v367_v57  ;;  %v401_v62 = vld [vmem:[%s17266_s3 + $0x150] sm:$0xff]  ;;  %v8790_v46 = vld [vmem:[%s17266_s3 + $0x220] sm:$0xff]  ;;  %v8791_v4 = vld [vmem:[%s17266_s3 + $0x228] sm:$0xff] }
  0x47   :  { %11596 = vmatprep.subr.bf16.mxu1 %v11595_v1  ;;  %8404 = vperm.xlu0 %12994, %v8352_v29   ;;  %v11647_v1 = vpack.c.bf16 %v402_v63, %v401_v62  ;;  %v8788_v29 = vld [vmem:[%s17266_s3 + $0x210] sm:$0xff]  ;;  %v8777_v23 = vld [vmem:[%s17266_s3 + $0x1b8] sm:$0xff] }
  0x48   :  { %v11655_v32 = vpack.c.bf16 %v8788_v29, %v8787_v28  ;;  %v8776_v13 = vld [vmem:[%s17266_s3 + $0x1b0] sm:$0xff] }
  0x49   :  { %11534 = vmatpush1.bf16.msra.mxu0 %v11533_v5  ;;  %v8360_v5 = vld [vmem:[%s17265_s13 + $0x80] sm:$0xff]  ;;  %v8796_v28 = vld [vmem:[%s17266_s3 + $0x250] sm:$0xff] }
  0x4a   :  { %11598 = vmatpush1.bf16.msra.mxu1 %v11597_v6  ;;  %11600 = vmatprep.subr.bf16.mxu0 %v11599_v20  ;;  %v11619_v6 = vpack.c.bf16 %v386_v2, %v385_v0  ;;  %v406_v20 = vld [vmem:[%s17266_s3 + $0x178] sm:$0xff]  ;;  %v8806_v2 = vld [vmem:[%s17266_s3 + $0x2a0] sm:$0xff] }
  0x4b   :  { %11631 = vmatprep.subr.bf16.mxu1 %v12998_v11  ;;  %8414 = vperm.xlu0 %12994, %v8354_v39   ;;  %v8772_v39 = vld [vmem:[%s17266_s3 + $0x190] sm:$0xff] }
  0x4c   :  { %262 = vmatmul.mubr.f32.vlgmr.msra.gmra.mrb[0].mxu0 %v53_v8 }
  0x4d   :  { %339 = vmatmul.mubr.f32.vlgmr.msra.gmra.mrb[0].mxu1 %v53_v8  ;;  %267 = vmatprep.mubr.f32.mxu0 %v56_v9  ;;  %v403_v8 = vld [vmem:[%s17266_s3 + $0x160] sm:$0xff] }
  0x4e   :  { %344 = vmatprep.mubr.f32.mxu1 %v56_v9  ;;  %11633 = vmatpush1.bf16.msra.mxu1 %v11632_v15  ;;  %v404_v9 = vld [vmem:[%s17266_s3 + $0x168] sm:$0xff] }
  0x4f   :  { %11634 = vmatprep.subr.bf16.mxu1 %v12998_v11  ;;  %11602 = vmatpush3.bf16.msra.mxu0 %v11601_v21  ;;  %v11650_v12 = vpack.c.bf16 %v404_v9, %v403_v8  ;;  %v372_v15 = vld [vmem:[%s17266_s3 + $0x68] sm:$0xff] }
  0x50   :  { %268 = vmatmul.mubr.f32.gmra.mrb[2].mxu0 %v55_v19  ;;  %11604 = vmatprep.subr.bf16.mxu0 %v11603_v30  ;;  %v11625_v18 = vpack.c.bf16 %v372_v15, %v371_v14  ;;  %v12999_v30 = vmov 0.0   ;;  %v8807_v14 = vld [vmem:[%s17266_s3 + $0x2a8] sm:$0xff] }
  0x51   :  { %345 = vmatmul.mubr.f32.gmra.mrb[2].mxu1 %v55_v19  ;;  %8424 = vperm.xlu0 %12994, %v8356_v49   ;;  %v405_v19 = vld [vmem:[%s17266_s3 + $0x170] sm:$0xff] }
  0x52   :  { %11636 = vmatpush1.bf16.msra.mxu1 %v11635_v25  ;;  %v11653_v21 = vpack.c.bf16 %v406_v20, %v405_v19  ;;  %v373_v25 = vld [vmem:[%s17266_s3 + $0x70] sm:$0xff]  ;;  %v8794_v19 = vld [vmem:[%s17266_s3 + $0x240] sm:$0xff] }
  0x53   :  { %11637 = vmatprep.subr.bf16.mxu1 %v12998_v11  ;;  %11606 = vmatpush3.bf16.msra.mxu0 %v11605_v31  ;;  %v11629_v27 = vpack.c.bf16 %v374_v26, %v373_v25  ;;  %v407_v31 = vld [vmem:[%s17266_s3 + $0x180] sm:$0xff]  ;;  %v8809_v25 = vld [vmem:[%s17266_s3 + $0x2b8] sm:$0xff] }
  0x54   :  { %11608 = vmatprep.subr.bf16.mxu0 %v11607_v40  ;;  %v8803_v40 = vld [vmem:[%s17266_s3 + $0x288] sm:$0xff]  ;;  %v8810_v26 = vld [vmem:[%s17266_s3 + $0x2c0] sm:$0xff] }
  0x55   :  { %8434 = vperm.xlu0 %12994, %v8358_v59  }
  0x56   :  { %11639 = vmatpush1.bf16.msra.mxu1 %v11638_v35  ;;  %v8771_v35 = vld [vmem:[%s17266_s3 + $0x188] sm:$0xff] }
  0x57   :  { %11640 = vmatprep.subr.bf16.mxu1 %v12998_v11  ;;  %11610 = vmatpush3.bf16.msra.mxu0 %v11609_v41  ;;  %v8804_v41 = vld [vmem:[%s17266_s3 + $0x290] sm:$0xff]  ;;  %v11657_v52 = vpack.c.bf16 %v8772_v39, %v8771_v35  ;;  %v8811_v35 = vld [vmem:[%s17266_s3 + $0x2c8] sm:$0xff] }
  0x58   :  { %11612 = vmatprep.subr.bf16.mxu0 %v11611_v50  ;;  %v11688_v53 = vpack.c.bf16 %v8804_v41, %v8803_v40 }
  0x59   :  { %8444 = vperm.xlu0 %12994, %v8360_v5   ;;  %v8792_v5 = vld [vmem:[%s17266_s3 + $0x230] sm:$0xff] }
  0x5a   :  { %11642 = vmatpush1.bf16.msra.mxu1 %v11641_v45  ;;  %v8789_v45 = vld [vmem:[%s17266_s3 + $0x218] sm:$0xff] }
  0x5b   :  { %11643 = vmatprep.subr.bf16.mxu1 %v12998_v11  ;;  %11614 = vmatpush3.bf16.msra.mxu0 %v11613_v51  ;;  %v11659_v59 = vpack.c.bf16 %v8790_v46, %v8789_v45  ;;  %v8814_v45 = vld [vmem:[%s17266_s3 + $0x2e0] sm:$0xff]  ;;  %v8799_v46 = vld [vmem:[%s17266_s3 + $0x268] sm:$0xff] }
  0x5c   :  { %11616 = vmatprep.subr.bf16.mxu0 %v11615_v60  ;;  %v8773_v60 = vld [vmem:[%s17266_s3 + $0x198] sm:$0xff] }
  0x5d   :  { %8759 = vperm.xlu0 %12994, %v8756_v16   ;;  %v11663_v16 = vpack.c.bf16 %v8792_v5, %v8791_v4 }
  0x5e   :  { %11645 = vmatpush1.bf16.msra.mxu1 %v11644_v55 }
  0x5f   :  { %11646 = vmatprep.subr.bf16.mxu1 %v12998_v11  ;;  %11618 = vmatpush3.bf16.msra.mxu0 %v11617_v61  ;;  %v8774_v61 = vld [vmem:[%s17266_s3 + $0x1a0] sm:$0xff] }
  0x60   :  { %11620 = vmatprep.subr.bf16.mxu0 %v11619_v6 }
  0x62   :  { %11648 = vmatpush1.bf16.msra.mxu1 %v11647_v1  ;;  %v8805_v1 = vld [vmem:[%s17266_s3 + $0x298] sm:$0xff] }
  0x63   :  { %11649 = vmatprep.subr.bf16.mxu1 %v12998_v11  ;;  %11622 = vmatpush3.bf16.msra.mxu0 %v11621_v7  ;;  %v11661_v7 = vpack.c.bf16 %v8774_v61, %v8773_v60  ;;  %v11691_v10 = vpack.c.bf16 %v8806_v2, %v8805_v1  ;;  %v8802_v60 = vld [vmem:[%s17266_s3 + $0x280] sm:$0xff]  ;;  %v8817_v2 = vld [vmem:[%s17266_s3 + $0x2f8] sm:$0xff] }
  0x64   :  { %11624 = vmatprep.subr.bf16.mxu0 %v11623_v17  ;;  %v8808_v17 = vld [vmem:[%s17266_s3 + $0x2b0] sm:$0xff]  ;;  %v8786_v1 = vld [vmem:[%s17266_s3 + $0x200] sm:$0xff] }
  0x66   :  { %11651 = vmatpush1.bf16.msra.mxu1 %v11650_v12  ;;  %v8775_v12 = vld [vmem:[%s17266_s3 + $0x1a8] sm:$0xff] }
  0x67   :  { %11652 = vmatprep.subr.bf16.mxu1 %v12998_v11  ;;  %11626 = vmatpush3.bf16.msra.mxu0 %v11625_v18  ;;  %v8793_v18 = vld [vmem:[%s17266_s3 + $0x238] sm:$0xff]  ;;  %v11665_v20 = vpack.c.bf16 %v8776_v13, %v8775_v12  ;;  %v8828_v12 = vld [vmem:[%s17266_s3 + $0x310] sm:$0xff] }
  0x68   :  { %11628 = vmatprep.subr.bf16.mxu0 %v11627_v24  ;;  %v11667_v22 = vpack.c.bf16 %v8794_v19, %v8793_v18  ;;  %v8778_v24 = vld [vmem:[%s17266_s3 + $0x1c0] sm:$0xff]  ;;  %v8829_v13 = vld [vmem:[%s17266_s3 + $0x318] sm:$0xff] }
  0x69   :  { %v11669_v29 = vpack.c.bf16 %v8778_v24, %v8777_v23  ;;  %v11721_v19 = vpack.c.bf16 %v8829_v13, %v8828_v12  ;;  %v8848_v23 = vld [vmem:[%s17266_s3 + $0x3b0] sm:$0xff]  ;;  %v8849_v24 = vld [vmem:[%s17266_s3 + $0x3b8] sm:$0xff] }
  0x6a   :  { %11654 = vmatpush1.bf16.msra.mxu1 %v11653_v21  ;;  %v11694_v21 = vpack.c.bf16 %v8808_v17, %v8807_v14  ;;  %v8846_v14 = vld [vmem:[%s17266_s3 + $0x3a0] sm:$0xff]  ;;  %v8819_v17 = vld [vmem:[%s17266_s3 + $0x308] sm:$0xff] }
  0x6b   :  { %11630 = vmatpush3.bf16.msra.mxu0 %v11629_v27  ;;  %522 = vmatprep.subr.mxu1 %v12999_v30  ;;  %v8795_v27 = vld [vmem:[%s17266_s3 + $0x248] sm:$0xff] }
  0x6c   :  { %11656 = vmatprep.subr.bf16.mxu0 %v11655_v32  ;;  %v11671_v32 = vpack.c.bf16 %v8796_v28, %v8795_v27  ;;  %v8832_v27 = vld [vmem:[%s17266_s3 + $0x330] sm:$0xff]  ;;  %v8833_v28 = vld [vmem:[%s17266_s3 + $0x338] sm:$0xff] }
  0x6e   :  { %523 = vmatpush1.msra.mxu1 %v407_v31  ;;  %v11697_v31 = vpack.c.bf16 %v8810_v26, %v8809_v25  ;;  %v11727_v26 = vpack.c.bf16 %v8849_v24, %v8848_v23  ;;  %v8905_v23 = vld [vmem:[%s17266_s3 + $0x548] sm:$0xff]  ;;  %v8906_v24 = vld [vmem:[%s17266_s3 + $0x550] sm:$0xff] }
  0x6f   :  { %11687 = vmatprep.subr.bf16.mxu1 %v12998_v11 }
  0xa8   :  { %v190_v33 = vpop.permute.xlu0 %189 }
  0xae   :  { %v195_v48 = vpop.permute.xlu0 %194 }
 0x11f   :  { %v263_v34 = vpop.f32.mrb[0].mxu0 }
 0x120   :  { %v264_v36 = vadd.f32 %v263_v34, %v190_v33  ;;  %v340_v37 = vpop.f32.mrb[0].mxu1  ;;  %v265_v38 = vpop.f32.mrb[1].mxu0  ;;  %v8780_v34 = vld [vmem:[%s17266_s3 + $0x1d0] sm:$0xff] }
 0x121   :  { %v341_v42 = vadd.f32 %v340_v37, %v190_v33  ;;  %v266_v43 = vadd.f32 %v265_v38, %v190_v33  ;;  %v342_v44 = vpop.f32.mrb[1].mxu1  ;;  %v8797_v37 = vld [vmem:[%s17266_s3 + $0x258] sm:$0xff]  ;;  %v8798_v38 = vld [vmem:[%s17266_s3 + $0x260] sm:$0xff] }
 0x122   :  { %v343_v47 = vadd.f32 %v342_v44, %v190_v33  ;;  %v13706_v54 = vmax.f32 %v264_v36, 0.0  ;;  %v8779_v33 = vld [vmem:[%s17266_s3 + $0x1c8] sm:$0xff]  ;;  %v8812_v36 = vld [vmem:[%s17266_s3 + $0x2d0] sm:$0xff]  ;;  %v11675_v41 = vpack.c.bf16 %v8798_v38, %v8797_v37  ;;  %v8813_v44 = vld [vmem:[%s17266_s3 + $0x2d8] sm:$0xff] }
 0x123   :  { %v13702_v49 = vmax.f32 %v341_v42, 0.0  ;;  %v13704_v50 = vmax.f32 %v266_v43, 0.0  ;;  %v269_v51 = vpop.f32.mrb[2].mxu0  ;;  %v11673_v39 = vpack.c.bf16 %v8780_v34, %v8779_v33  ;;  %v11700_v40 = vpack.c.bf16 %v8812_v36, %v8811_v35  ;;  %v8781_v42 = vld [vmem:[%s17266_s3 + $0x1d8] sm:$0xff]  ;;  %v8782_v43 = vld [vmem:[%s17266_s3 + $0x1e0] sm:$0xff]  ;;  %v8835_v35 = vld [vmem:[%s17266_s3 + $0x348] sm:$0xff] }
 0x124   :  { %v13708_v55 = vmax.f32 %v343_v47, 0.0  ;;  %v270_v56 = vadd.f32 %v269_v51, %v195_v48  ;;  %v346_v57 = vpop.f32.mrb[2].mxu1  ;;  %v271_v58 = vpop.f32.mrb[3].mxu0  ;;  %v8800_v47 = vld [vmem:[%s17266_s3 + $0x270] sm:$0xff]  ;;  %v11703_v51 = vpack.c.bf16 %v8814_v45, %v8813_v44  ;;  %v8834_v34 = vld [vmem:[%s17266_s3 + $0x340] sm:$0xff]  ;;  %v8853_v37 = vld [vmem:[%s17266_s3 + $0x3d8] sm:$0xff] }
 0x125   :  { %v347_v62 = vadd.f32 %v346_v57, %v195_v48  ;;  %v272_v63 = vadd.f32 %v271_v58, %v195_v48  ;;  %v348_v0 = vpop.f32.mrb[3].mxu1  ;;  %479 = vmatprep.mubr.f32.mxu0 %v13704_v50  ;;  %v8815_v57 = vld [vmem:[%s17266_s3 + $0x2e8] sm:$0xff]  ;;  %v8816_v58 = vld [vmem:[%s17266_s3 + $0x2f0] sm:$0xff]  ;;  %v11733_v38 = vpack.c.bf16 %v8835_v35, %v8834_v34  ;;  %v8891_v34 = vld [vmem:[%s17266_s3 + $0x4d8] sm:$0xff] }
 0x126   :  { %v349_v3 = vadd.f32 %v348_v0, %v195_v48  ;;  %8769 = vmatprep.mubr.msk.f32.mxu1 %vm408_vm0, %v13708_v55  ;;  %480 = vmatmul.mubr.f32.vlgmr.msra.gmra.mrb[4].mxu0 %v13706_v54  ;;  %v13735_v8 = vmax.f32 %v270_v56, 0.0  ;;  %v11677_v48 = vpack.c.bf16 %v8782_v43, %v8781_v42  ;;  %v8784_v56 = vld [vmem:[%s17266_s3 + $0x1f0] sm:$0xff]  ;;  %v8785_v0 = vld [vmem:[%s17266_s3 + $0x1f8] sm:$0xff]  ;;  %v8854_v42 = vld [vmem:[%s17266_s3 + $0x3e0] sm:$0xff] }
 0x127   :  { %v13732_v6 = vmax.f32 %v272_v63, 0.0  ;;  %555 = vmatmul.mubr.f32.vlgmr.msra.gmra.mrb[4].mxu1 %v13702_v49  ;;  %11658 = vmatpush3.bf16.msra.mxu0 %v11657_v52  ;;  %v13748_v15 = vmax.f32 %v347_v62, 0.0  ;;  %v11679_v52 = vpack.c.bf16 %v8800_v47, %v8799_v46  ;;  %v11706_v62 = vpack.c.bf16 %v8816_v58, %v8815_v57  ;;  %v8852_v36 = vld [vmem:[%s17266_s3 + $0x3d0] sm:$0xff]  ;;  %v8855_v43 = vld [vmem:[%s17266_s3 + $0x3e8] sm:$0xff]  ;;  %v8838_v46 = vld [vmem:[%s17266_s3 + $0x360] sm:$0xff] }
 0x128   :  { %v13737_v9 = vmax.f32 %v349_v3, 0.0  ;;  %11689 = vmatpush1.bf16.msra.mxu1 %v11688_v53  ;;  %11660 = vmatprep.subr.bf16.mxu0 %v11659_v59  ;;  %v8783_v53 = vld [vmem:[%s17266_s3 + $0x1e8] sm:$0xff]  ;;  %v8801_v59 = vld [vmem:[%s17266_s3 + $0x278] sm:$0xff]  ;;  %v8818_v3 = vld [vmem:[%s17266_s3 + $0x300] sm:$0xff]  ;;  %v11685_v4 = vpack.c.bf16 %v8786_v1, %v8785_v0  ;;  %v11739_v45 = vpack.c.bf16 %v8855_v43, %v8854_v42 }
 0x129   :  { %484 = vmatprep.mubr.f32.mxu0 %v13732_v6  ;;  %11690 = vmatprep.subr.bf16.mxu1 %v12998_v11  ;;  %v11681_v61 = vpack.c.bf16 %v8784_v56, %v8783_v53  ;;  %v11683_v63 = vpack.c.bf16 %v8802_v60, %v8801_v59  ;;  %v11709_v5 = vpack.c.bf16 %v8818_v3, %v8817_v2  ;;  %v8839_v47 = vld [vmem:[%s17266_s3 + $0x368] sm:$0xff]  ;;  %v8840_v56 = vld [vmem:[%s17266_s3 + $0x370] sm:$0xff]  ;;  %v8841_v57 = vld [vmem:[%s17266_s3 + $0x378] sm:$0xff] }
 0x12a   :  { %8770 = vmatprep.mubr.msk.f32.mxu1 %vm408_vm0, %v13737_v9  ;;  %485 = vmatmul.mubr.f32.gmra.mrb[6].mxu0 %v13735_v8  ;;  %v8858_v58 = vld [vmem:[%s17266_s3 + $0x400] sm:$0xff]  ;;  %v8859_v59 = vld [vmem:[%s17266_s3 + $0x408] sm:$0xff]  ;;  %v11745_v60 = vpack.c.bf16 %v8841_v57, %v8840_v56  ;;  %v8899_v0 = vld [vmem:[%s17266_s3 + $0x518] sm:$0xff] }
 0x12b   :  { %560 = vmatmul.mubr.f32.gmra.mrb[6].mxu1 %v13748_v15  ;;  %11662 = vmatpush3.bf16.msra.mxu0 %v11661_v7  ;;  %v8844_v7 = vld [vmem:[%s17266_s3 + $0x390] sm:$0xff]  ;;  %v8900_v1 = vld [vmem:[%s17266_s3 + $0x520] sm:$0xff]  ;;  %v8911_v42 = vld [vmem:[%s17266_s3 + $0x578] sm:$0xff] }
 0x12c   :  { %11692 = vmatpush1.bf16.msra.mxu1 %v11691_v10  ;;  %681 = vmatprep.mubr.f32.mxu0 %v13704_v50  ;;  %v8845_v10 = vld [vmem:[%s17266_s3 + $0x398] sm:$0xff]  ;;  %v11779_v3 = vpack.c.bf16 %v8900_v1, %v8899_v0  ;;  %v8892_v35 = vld [vmem:[%s17266_s3 + $0x4e0] sm:$0xff]  ;;  %v8897_v56 = vld [vmem:[%s17266_s3 + $0x508] sm:$0xff] }
 0x12d   :  { %8820 = vmatprep.mubr.msk.f32.mxu1 %vm408_vm0, %v13708_v55  ;;  %11664 = vmatprep.subr.bf16.mxu0 %v11663_v16  ;;  %v8847_v16 = vld [vmem:[%s17266_s3 + $0x3a8] sm:$0xff]  ;;  %v11719_v18 = vpack.c.bf16 %v8845_v10, %v8844_v7  ;;  %v8902_v10 = vld [vmem:[%s17266_s3 + $0x530] sm:$0xff]  ;;  %v8912_v43 = vld [vmem:[%s17266_s3 + $0x580] sm:$0xff] }
 0x12e   :  { %11693 = vmatprep.subr.bf16.mxu1 %v12998_v11  ;;  %v8901_v7 = vld [vmem:[%s17266_s3 + $0x528] sm:$0xff]  ;;  %v8898_v57 = vld [vmem:[%s17266_s3 + $0x510] sm:$0xff]  ;;  %v8957_v1 = vld [vmem:[%s17266_s3 + $0x6b8] sm:$0xff] }
 0x12f   :  { %11666 = vmatpush3.bf16.msra.mxu0 %v11665_v20  ;;  %v11723_v20 = vpack.c.bf16 %v8847_v16, %v8846_v14  ;;  %v11783_v13 = vpack.c.bf16 %v8902_v10, %v8901_v7  ;;  %v8885_v14 = vld [vmem:[%s17266_s3 + $0x4a8] sm:$0xff]  ;;  %v8886_v16 = vld [vmem:[%s17266_s3 + $0x4b0] sm:$0xff]  ;;  %v8958_v7 = vld [vmem:[%s17266_s3 + $0x6c0] sm:$0xff] }
 0x130   :  { %11695 = vmatpush1.bf16.msra.mxu1 %v11694_v21  ;;  %11668 = vmatprep.subr.bf16.mxu0 %v11667_v22  ;;  %v8830_v21 = vld [vmem:[%s17266_s3 + $0x320] sm:$0xff]  ;;  %v8831_v22 = vld [vmem:[%s17266_s3 + $0x328] sm:$0xff]  ;;  %v8956_v0 = vld [vmem:[%s17266_s3 + $0x6b0] sm:$0xff] }
 0x131   :  { %11696 = vmatprep.subr.bf16.mxu1 %v12998_v11  ;;  %v11725_v25 = vpack.c.bf16 %v8831_v22, %v8830_v21  ;;  %v8887_v21 = vld [vmem:[%s17266_s3 + $0x4b8] sm:$0xff]  ;;  %v8888_v22 = vld [vmem:[%s17266_s3 + $0x4c0] sm:$0xff]  ;;  %v8959_v10 = vld [vmem:[%s17266_s3 + $0x6c8] sm:$0xff] }
 0x133   :  { %11670 = vmatpush3.bf16.msra.mxu0 %v11669_v29  ;;  %v8850_v29 = vld [vmem:[%s17266_s3 + $0x3c0] sm:$0xff] }
 0x134   :  { %11698 = vmatpush1.bf16.msra.mxu1 %v11697_v31  ;;  %11672 = vmatprep.subr.bf16.mxu0 %v11671_v32  ;;  %v8851_v31 = vld [vmem:[%s17266_s3 + $0x3c8] sm:$0xff]  ;;  %v11729_v32 = vpack.c.bf16 %v8833_v28, %v8832_v27  ;;  %v8890_v28 = vld [vmem:[%s17266_s3 + $0x4d0] sm:$0xff] }
 0x135   :  { %11699 = vmatprep.subr.bf16.mxu1 %v12998_v11  ;;  %v11731_v33 = vpack.c.bf16 %v8851_v31, %v8850_v29  ;;  %v8889_v27 = vld [vmem:[%s17266_s3 + $0x4c8] sm:$0xff]  ;;  %v8907_v29 = vld [vmem:[%s17266_s3 + $0x558] sm:$0xff]  ;;  %v8908_v31 = vld [vmem:[%s17266_s3 + $0x560] sm:$0xff] }
 0x137   :  { %11674 = vmatpush3.bf16.msra.mxu0 %v11673_v39  ;;  %v11735_v39 = vpack.c.bf16 %v8853_v37, %v8852_v36  ;;  %v8909_v36 = vld [vmem:[%s17266_s3 + $0x568] sm:$0xff]  ;;  %v8910_v37 = vld [vmem:[%s17266_s3 + $0x570] sm:$0xff] }
 0x138   :  { %11701 = vmatpush1.bf16.msra.mxu1 %v11700_v40  ;;  %11676 = vmatprep.subr.bf16.mxu0 %v11675_v41  ;;  %v8836_v40 = vld [vmem:[%s17266_s3 + $0x350] sm:$0xff]  ;;  %v8837_v41 = vld [vmem:[%s17266_s3 + $0x358] sm:$0xff] }
 0x139   :  { %11702 = vmatprep.subr.bf16.mxu1 %v12998_v11  ;;  %v11737_v44 = vpack.c.bf16 %v8837_v41, %v8836_v40  ;;  %v8893_v40 = vld [vmem:[%s17266_s3 + $0x4e8] sm:$0xff]  ;;  %v8894_v41 = vld [vmem:[%s17266_s3 + $0x4f0] sm:$0xff] }
 0x13b   :  { %11678 = vmatpush3.bf16.msra.mxu0 %v11677_v48  ;;  %v8856_v48 = vld [vmem:[%s17266_s3 + $0x3f0] sm:$0xff] }
 0x13c   :  { %11704 = vmatpush1.bf16.msra.mxu1 %v11703_v51  ;;  %11680 = vmatprep.subr.bf16.mxu0 %v11679_v52  ;;  %v8857_v51 = vld [vmem:[%s17266_s3 + $0x3f8] sm:$0xff]  ;;  %v11741_v52 = vpack.c.bf16 %v8839_v47, %v8838_v46  ;;  %v8896_v47 = vld [vmem:[%s17266_s3 + $0x500] sm:$0xff] }
 0x13d   :  { %11705 = vmatprep.subr.bf16.mxu1 %v12998_v11  ;;  %v11743_v53 = vpack.c.bf16 %v8857_v51, %v8856_v48  ;;  %v8895_v46 = vld [vmem:[%s17266_s3 + $0x4f8] sm:$0xff]  ;;  %v8913_v48 = vld [vmem:[%s17266_s3 + $0x588] sm:$0xff]  ;;  %v8914_v51 = vld [vmem:[%s17266_s3 + $0x590] sm:$0xff] }
 0x13f   :  { %11682 = vmatpush3.bf16.msra.mxu0 %v11681_v61  ;;  %v11747_v61 = vpack.c.bf16 %v8859_v59, %v8858_v58  ;;  %v8954_v58 = vld [vmem:[%s17266_s3 + $0x6a0] sm:$0xff]  ;;  %v8955_v59 = vld [vmem:[%s17266_s3 + $0x6a8] sm:$0xff] }
 0x140   :  { %11707 = vmatpush1.bf16.msra.mxu1 %v11706_v62  ;;  %11684 = vmatprep.subr.bf16.mxu0 %v11683_v63  ;;  %v8842_v62 = vld [vmem:[%s17266_s3 + $0x380] sm:$0xff]  ;;  %v8843_v63 = vld [vmem:[%s17266_s3 + $0x388] sm:$0xff] }
 0x141   :  { %11708 = vmatprep.subr.bf16.mxu1 %v12998_v11  ;;  %v11749_v2 = vpack.c.bf16 %v8843_v63, %v8842_v62  ;;  %v8938_v62 = vld [vmem:[%s17266_s3 + $0x620] sm:$0xff]  ;;  %v8939_v63 = vld [vmem:[%s17266_s3 + $0x628] sm:$0xff] }
 0x143   :  { %11686 = vmatpush3.bf16.msra.mxu0 %v11685_v4  ;;  %v8883_v4 = vld [vmem:[%s17266_s3 + $0x498] sm:$0xff] }
 0x144   :  { %11710 = vmatpush1.bf16.msra.mxu1 %v11709_v5  ;;  %v8884_v5 = vld [vmem:[%s17266_s3 + $0x4a0] sm:$0xff] }
 0x145   :  { %724 = vmatprep.subr.mxu1 %v12999_v30  ;;  %v11781_v12 = vpack.c.bf16 %v8884_v5, %v8883_v4  ;;  %v8940_v4 = vld [vmem:[%s17266_s3 + $0x630] sm:$0xff]  ;;  %v8941_v5 = vld [vmem:[%s17266_s3 + $0x638] sm:$0xff] }
 0x146   :  { %682 = vmatmul.mubr.f32.vlgmr.msra.gmra.mrb[8].mxu0 %v13706_v54 }
 0x147   :  { %686 = vmatprep.mubr.f32.mxu0 %v13732_v6 }
 0x148   :  { %725 = vmatpush1.msra.mxu1 %v8819_v17  ;;  %v8903_v17 = vld [vmem:[%s17266_s3 + $0x538] sm:$0xff] }
 0x149   :  { %757 = vmatmul.mubr.f32.vlgmr.msra.gmra.mrb[8].mxu1 %v13702_v49  ;;  %11720 = vmatprep.subr.bf16.mxu1 %v11719_v18  ;;  %v8904_v18 = vld [vmem:[%s17266_s3 + $0x540] sm:$0xff] }
 0x14a   :  { %8821 = vmatprep.mubr.msk.f32.mxu1 %vm408_vm0, %v13737_v9  ;;  %11722 = vmatpush3.bf16.msra.mxu1 %v11721_v19  ;;  %v11785_v19 = vpack.c.bf16 %v8886_v16, %v8885_v14  ;;  %v8942_v14 = vld [vmem:[%s17266_s3 + $0x640] sm:$0xff]  ;;  %v8943_v16 = vld [vmem:[%s17266_s3 + $0x648] sm:$0xff] }
 0x14b   :  { %687 = vmatmul.mubr.f32.gmra.mrb[10].mxu0 %v13735_v8  ;;  %11724 = vmatprep.subr.bf16.mxu1 %v11723_v20  ;;  %v11787_v20 = vpack.c.bf16 %v8904_v18, %v8903_v17  ;;  %v8960_v17 = vld [vmem:[%s17266_s3 + $0x6d0] sm:$0xff]  ;;  %v8961_v18 = vld [vmem:[%s17266_s3 + $0x6d8] sm:$0xff] }
 0x14d   :  { %762 = vmatmul.mubr.f32.gmra.mrb[10].mxu1 %v13748_v15 }
 0x14e   :  { %11726 = vmatpush3.bf16.msra.mxu1 %v11725_v25  ;;  %1047 = vmatprep.mubr.f32.mxu1 %v13704_v50  ;;  %v11789_v25 = vpack.c.bf16 %v8888_v22, %v8887_v21  ;;  %v8944_v21 = vld [vmem:[%s17266_s3 + $0x650] sm:$0xff]  ;;  %v8945_v22 = vld [vmem:[%s17266_s3 + $0x658] sm:$0xff] }
 0x14f   :  { %11728 = vmatprep.subr.bf16.mxu1 %v11727_v26  ;;  %v11791_v26 = vpack.c.bf16 %v8906_v24, %v8905_v23  ;;  %v8962_v23 = vld [vmem:[%s17266_s3 + $0x6e0] sm:$0xff]  ;;  %v8963_v24 = vld [vmem:[%s17266_s3 + $0x6e8] sm:$0xff] }
 0x152   :  { %11730 = vmatpush3.bf16.msra.mxu1 %v11729_v32  ;;  %v11793_v32 = vpack.c.bf16 %v8890_v28, %v8889_v27  ;;  %v8946_v27 = vld [vmem:[%s17266_s3 + $0x660] sm:$0xff]  ;;  %v8947_v28 = vld [vmem:[%s17266_s3 + $0x668] sm:$0xff] }
 0x153   :  { %11732 = vmatprep.subr.bf16.mxu1 %v11731_v33  ;;  %v11795_v33 = vpack.c.bf16 %v8908_v31, %v8907_v29  ;;  %v8964_v29 = vld [vmem:[%s17266_s3 + $0x6f0] sm:$0xff]  ;;  %v8965_v31 = vld [vmem:[%s17266_s3 + $0x6f8] sm:$0xff] }
 0x156   :  { %11734 = vmatpush3.bf16.msra.mxu1 %v11733_v38  ;;  %v11797_v38 = vpack.c.bf16 %v8892_v35, %v8891_v34  ;;  %v8948_v34 = vld [vmem:[%s17266_s3 + $0x670] sm:$0xff]  ;;  %v8949_v35 = vld [vmem:[%s17266_s3 + $0x678] sm:$0xff] }
 0x157   :  { %11736 = vmatprep.subr.bf16.mxu1 %v11735_v39  ;;  %v11799_v39 = vpack.c.bf16 %v8910_v37, %v8909_v36  ;;  %v8966_v36 = vld [vmem:[%s17266_s3 + $0x700] sm:$0xff]  ;;  %v8967_v37 = vld [vmem:[%s17266_s3 + $0x708] sm:$0xff] }
 0x15a   :  { %11738 = vmatpush3.bf16.msra.mxu1 %v11737_v44  ;;  %v11801_v44 = vpack.c.bf16 %v8894_v41, %v8893_v40  ;;  %v8950_v40 = vld [vmem:[%s17266_s3 + $0x680] sm:$0xff]  ;;  %v8951_v41 = vld [vmem:[%s17266_s3 + $0x688] sm:$0xff] }
 0x15b   :  { %11740 = vmatprep.subr.bf16.mxu1 %v11739_v45  ;;  %v11803_v45 = vpack.c.bf16 %v8912_v43, %v8911_v42  ;;  %v8968_v42 = vld [vmem:[%s17266_s3 + $0x710] sm:$0xff]  ;;  %v8969_v43 = vld [vmem:[%s17266_s3 + $0x718] sm:$0xff] }
 0x15e   :  { %11742 = vmatpush3.bf16.msra.mxu1 %v11741_v52  ;;  %v11805_v52 = vpack.c.bf16 %v8896_v47, %v8895_v46  ;;  %v8952_v46 = vld [vmem:[%s17266_s3 + $0x690] sm:$0xff]  ;;  %v8953_v47 = vld [vmem:[%s17266_s3 + $0x698] sm:$0xff] }
 0x15f   :  { %11744 = vmatprep.subr.bf16.mxu1 %v11743_v53  ;;  %v11807_v53 = vpack.c.bf16 %v8914_v51, %v8913_v48  ;;  %v9009_v48 = vld [vmem:[%s17266_s3 + $0x828] sm:$0xff]  ;;  %v9010_v51 = vld [vmem:[%s17266_s3 + $0x830] sm:$0xff] }
 0x162   :  { %11746 = vmatpush3.bf16.msra.mxu1 %v11745_v60  ;;  %v11809_v60 = vpack.c.bf16 %v8898_v57, %v8897_v56  ;;  %v8993_v56 = vld [vmem:[%s17266_s3 + $0x7a8] sm:$0xff]  ;;  %v8994_v57 = vld [vmem:[%s17266_s3 + $0x7b0] sm:$0xff] }
 0x163   :  { %11748 = vmatprep.subr.bf16.mxu1 %v11747_v61  ;;  %v11839_v61 = vpack.c.bf16 %v8955_v59, %v8954_v58  ;;  %v9011_v58 = vld [vmem:[%s17266_s3 + $0x838] sm:$0xff]  ;;  %v9012_v59 = vld [vmem:[%s17266_s3 + $0x840] sm:$0xff] }
 0x166   :  { %11750 = vmatpush3.bf16.msra.mxu1 %v11749_v2  ;;  %v11841_v2 = vpack.c.bf16 %v8939_v63, %v8938_v62  ;;  %v8995_v62 = vld [vmem:[%s17266_s3 + $0x7b8] sm:$0xff]  ;;  %v8996_v63 = vld [vmem:[%s17266_s3 + $0x7c0] sm:$0xff] }
 0x167   :  { %11780 = vmatprep.subr.bf16.mxu1 %v11779_v3  ;;  %v11843_v3 = vpack.c.bf16 %v8957_v1, %v8956_v0  ;;  %v9013_v0 = vld [vmem:[%s17266_s3 + $0x848] sm:$0xff]  ;;  %v9014_v1 = vld [vmem:[%s17266_s3 + $0x850] sm:$0xff] }
 0x169   :  { %1048 = vmatmul.mubr.f32.vlgmr.msra.gmra.mrb[12].mxu1 %v13706_v54 }
 0x16a   :  { %1052 = vmatprep.mubr.f32.mxu1 %v13732_v6  ;;  %11782 = vmatpush3.bf16.msra.mxu1 %v11781_v12  ;;  %v11845_v12 = vpack.c.bf16 %v8941_v5, %v8940_v4  ;;  %v11907_v4 = vpack.c.bf16 %v9014_v1, %v9013_v0  ;;  %v8997_v5 = vld [vmem:[%s17266_s3 + $0x7c8] sm:$0xff]  ;;  %v9036_v0 = vld [vmem:[%s17266_s3 + $0x900] sm:$0xff] }
 0x16b   :  { %11784 = vmatprep.subr.bf16.mxu1 %v11783_v13  ;;  %v11847_v13 = vpack.c.bf16 %v8959_v10, %v8958_v7  ;;  %v8998_v7 = vld [vmem:[%s17266_s3 + $0x7d0] sm:$0xff]  ;;  %v9015_v10 = vld [vmem:[%s17266_s3 + $0x858] sm:$0xff] }
 0x16d   :  { %1053 = vmatmul.mubr.f32.gmra.mrb[14].mxu1 %v13735_v8 }
 0x16e   :  { %11786 = vmatpush3.bf16.msra.mxu1 %v11785_v19  ;;  %1333 = vmatprep.mubr.f32.mxu1 %v13704_v50  ;;  %v11849_v19 = vpack.c.bf16 %v8943_v16, %v8942_v14  ;;  %v8999_v16 = vld [vmem:[%s17266_s3 + $0x7d8] sm:$0xff] }
 0x16f   :  { %11788 = vmatprep.subr.bf16.mxu1 %v11787_v20  ;;  %v11851_v20 = vpack.c.bf16 %v8961_v18, %v8960_v17  ;;  %v9000_v17 = vld [vmem:[%s17266_s3 + $0x7e0] sm:$0xff]  ;;  %v9017_v18 = vld [vmem:[%s17266_s3 + $0x868] sm:$0xff] }
 0x172   :  { %11790 = vmatpush3.bf16.msra.mxu1 %v11789_v25  ;;  %v11853_v25 = vpack.c.bf16 %v8945_v22, %v8944_v21  ;;  %v9001_v22 = vld [vmem:[%s17266_s3 + $0x7e8] sm:$0xff] }
 0x173   :  { %11792 = vmatprep.subr.bf16.mxu1 %v11791_v26  ;;  %v11855_v26 = vpack.c.bf16 %v8963_v24, %v8962_v23  ;;  %v9002_v23 = vld [vmem:[%s17266_s3 + $0x7f0] sm:$0xff]  ;;  %v9019_v24 = vld [vmem:[%s17266_s3 + $0x878] sm:$0xff] }
 0x176   :  { %11794 = vmatpush3.bf16.msra.mxu1 %v11793_v32  ;;  %v11857_v32 = vpack.c.bf16 %v8947_v28, %v8946_v27  ;;  %v9003_v28 = vld [vmem:[%s17266_s3 + $0x7f8] sm:$0xff] }
 0x177   :  { %11796 = vmatprep.subr.bf16.mxu1 %v11795_v33  ;;  %v11859_v33 = vpack.c.bf16 %v8965_v31, %v8964_v29  ;;  %v9004_v29 = vld [vmem:[%s17266_s3 + $0x800] sm:$0xff]  ;;  %v9021_v31 = vld [vmem:[%s17266_s3 + $0x888] sm:$0xff] }
 0x17a   :  { %11798 = vmatpush3.bf16.msra.mxu1 %v11797_v38  ;;  %v11861_v38 = vpack.c.bf16 %v8949_v35, %v8948_v34  ;;  %v9005_v35 = vld [vmem:[%s17266_s3 + $0x808] sm:$0xff] }
 0x17b   :  { %11800 = vmatprep.subr.bf16.mxu1 %v11799_v39  ;;  %v11863_v39 = vpack.c.bf16 %v8967_v37, %v8966_v36  ;;  %v9006_v36 = vld [vmem:[%s17266_s3 + $0x810] sm:$0xff]  ;;  %v9023_v37 = vld [vmem:[%s17266_s3 + $0x898] sm:$0xff] }
 0x17e   :  { %11802 = vmatpush3.bf16.msra.mxu1 %v11801_v44  ;;  %v11865_v44 = vpack.c.bf16 %v8951_v41, %v8950_v40  ;;  %v9007_v41 = vld [vmem:[%s17266_s3 + $0x818] sm:$0xff] }
 0x17f   :  { %11804 = vmatprep.subr.bf16.mxu1 %v11803_v45  ;;  %v11867_v45 = vpack.c.bf16 %v8969_v43, %v8968_v42  ;;  %v9008_v42 = vld [vmem:[%s17266_s3 + $0x820] sm:$0xff] }
 0x180   :  { %v11929_v43 = vpack.c.bf16 %v9008_v42, %v9007_v41  ;;  %v9093_v41 = vld [vmem:[%s17266_s3 + $0xa98] sm:$0xff] }
 0x182   :  { %11806 = vmatpush3.bf16.msra.mxu1 %v11805_v52  ;;  %v11869_v52 = vpack.c.bf16 %v8953_v47, %v8952_v46  ;;  %v9027_v47 = vld [vmem:[%s17266_s3 + $0x8b8] sm:$0xff] }
 0x183   :  { %11808 = vmatprep.subr.bf16.mxu1 %v11807_v53  ;;  %v11899_v53 = vpack.c.bf16 %v9010_v51, %v9009_v48  ;;  %v9028_v48 = vld [vmem:[%s17266_s3 + $0x8c0] sm:$0xff] }
 0x184   :  { %v11935_v51 = vpack.c.bf16 %v9028_v48, %v9027_v47  ;;  %v9094_v48 = vld [vmem:[%s17266_s3 + $0xaa0] sm:$0xff] }
 0x186   :  { %11810 = vmatpush3.bf16.msra.mxu1 %v11809_v60  ;;  %v11901_v60 = vpack.c.bf16 %v8994_v57, %v8993_v56  ;;  %v9031_v57 = vld [vmem:[%s17266_s3 + $0x8d8] sm:$0xff] }
 0x187   :  { %11840 = vmatprep.subr.bf16.mxu1 %v11839_v61  ;;  %v11903_v61 = vpack.c.bf16 %v9012_v59, %v9011_v58  ;;  %v9032_v58 = vld [vmem:[%s17266_s3 + $0x8e0] sm:$0xff] }
 0x188   :  { %v11941_v59 = vpack.c.bf16 %v9032_v58, %v9031_v57  ;;  %v9136_v57 = vld [vmem:[%s17266_s3 + $0xbc0] sm:$0xff]  ;;  %v9096_v58 = vld [vmem:[%s17266_s3 + $0xab0] sm:$0xff] }
 0x189   :  { %1334 = vmatmul.mubr.f32.vlgmr.msra.gmra.mrb[16].mxu1 %v13706_v54 }
 0x18a   :  { %1338 = vmatprep.mubr.f32.mxu1 %v13732_v6  ;;  %11842 = vmatpush3.bf16.msra.mxu1 %v11841_v2  ;;  %v8822_v2 = vld [vmem:[%s17268_s4 + $0x10] sm:$0xff] }
 0x18b   :  { %11844 = vmatprep.subr.bf16.mxu1 %v11843_v3  ;;  %10828 = vmatprep.mubr.msk.f32.mxu0 %vm770_vm1, %v8822_v2  ;;  %v11905_v3 = vpack.c.bf16 %v8996_v63, %v8995_v62  ;;  %v9035_v63 = vld [vmem:[%s17266_s3 + $0x8f8] sm:$0xff]  ;;  %v9037_v2 = vld [vmem:[%s17266_s3 + $0x908] sm:$0xff] }
 0x18c   :  { %v11947_v1 = vpack.c.bf16 %v9036_v0, %v9035_v63  ;;  %v9139_v63 = vld [vmem:[%s17266_s3 + $0xbd8] sm:$0xff]  ;;  %v9140_v0 = vld [vmem:[%s17266_s3 + $0xbe0] sm:$0xff] }
 0x18d   :  { %1339 = vmatmul.mubr.f32.gmra.mrb[18].mxu1 %v13735_v8 }
 0x18e   :  { %11846 = vmatpush3.bf16.msra.mxu1 %v11845_v12  ;;  %1619 = vmatprep.mubr.f32.mxu1 %v13704_v50  ;;  %v9016_v12 = vld [vmem:[%s17266_s3 + $0x860] sm:$0xff] }
 0x18f   :  { %11848 = vmatprep.subr.bf16.mxu1 %v11847_v13  ;;  %v11909_v13 = vpack.c.bf16 %v8998_v7, %v8997_v5  ;;  %v11911_v14 = vpack.c.bf16 %v9016_v12, %v9015_v10  ;;  %v9039_v5 = vld [vmem:[%s17266_s3 + $0x918] sm:$0xff]  ;;  %v9040_v7 = vld [vmem:[%s17266_s3 + $0x920] sm:$0xff]  ;;  %v9080_v12 = vld [vmem:[%s17266_s3 + $0xa30] sm:$0xff] }
 0x190   :  { %v11953_v10 = vpack.c.bf16 %v9040_v7, %v9039_v5  ;;  %v9143_v5 = vld [vmem:[%s17266_s3 + $0xbf8] sm:$0xff]  ;;  %v9144_v7 = vld [vmem:[%s17266_s3 + $0xc00] sm:$0xff] }
 0x192   :  { %11850 = vmatpush3.bf16.msra.mxu1 %v11849_v19  ;;  %v9018_v19 = vld [vmem:[%s17266_s3 + $0x870] sm:$0xff] }
 0x193   :  { %11852 = vmatprep.subr.bf16.mxu1 %v11851_v20  ;;  %v11913_v20 = vpack.c.bf16 %v9000_v17, %v8999_v16  ;;  %v11915_v21 = vpack.c.bf16 %v9018_v19, %v9017_v18  ;;  %v9082_v17 = vld [vmem:[%s17266_s3 + $0xa40] sm:$0xff]  ;;  %v9083_v18 = vld [vmem:[%s17266_s3 + $0xa48] sm:$0xff] }
 0x194   :  { %v11995_v19 = vpack.c.bf16 %v9083_v18, %v9082_v17  ;;  %v9146_v17 = vld [vmem:[%s17266_s3 + $0xc10] sm:$0xff] }
 0x196   :  { %11854 = vmatpush3.bf16.msra.mxu1 %v11853_v25  ;;  %v9020_v25 = vld [vmem:[%s17266_s3 + $0x880] sm:$0xff] }
 0x197   :  { %11856 = vmatprep.subr.bf16.mxu1 %v11855_v26  ;;  %v11917_v26 = vpack.c.bf16 %v9002_v23, %v9001_v22  ;;  %v11919_v27 = vpack.c.bf16 %v9020_v25, %v9019_v24  ;;  %v9086_v23 = vld [vmem:[%s17266_s3 + $0xa60] sm:$0xff]  ;;  %v9087_v24 = vld [vmem:[%s17266_s3 + $0xa68] sm:$0xff] }
 0x198   :  { %v12001_v25 = vpack.c.bf16 %v9087_v24, %v9086_v23  ;;  %v9147_v24 = vld [vmem:[%s17266_s3 + $0xc18] sm:$0xff] }
 0x19a   :  { %11858 = vmatpush3.bf16.msra.mxu1 %v11857_v32  ;;  %v9022_v32 = vld [vmem:[%s17266_s3 + $0x890] sm:$0xff] }
 0x19b   :  { %11860 = vmatprep.subr.bf16.mxu1 %v11859_v33  ;;  %v11921_v33 = vpack.c.bf16 %v9004_v29, %v9003_v28  ;;  %v11923_v34 = vpack.c.bf16 %v9022_v32, %v9021_v31  ;;  %v9090_v31 = vld [vmem:[%s17266_s3 + $0xa80] sm:$0xff]  ;;  %v9091_v32 = vld [vmem:[%s17266_s3 + $0xa88] sm:$0xff] }
 0x19e   :  { %11862 = vmatpush3.bf16.msra.mxu1 %v11861_v38  ;;  %v9024_v38 = vld [vmem:[%s17266_s3 + $0x8a0] sm:$0xff] }
 0x19f   :  { %11864 = vmatprep.subr.bf16.mxu1 %v11863_v39  ;;  %v11925_v39 = vpack.c.bf16 %v9006_v36, %v9005_v35  ;;  %v11927_v40 = vpack.c.bf16 %v9024_v38, %v9023_v37  ;;  %v12007_v37 = vpack.c.bf16 %v9091_v32, %v9090_v31  ;;  %v9149_v32 = vld [vmem:[%s17266_s3 + $0xc28] sm:$0xff] }
 0x1a2   :  { %11866 = vmatpush3.bf16.msra.mxu1 %v11865_v44  ;;  %v9025_v44 = vld [vmem:[%s17266_s3 + $0x8a8] sm:$0xff] }
 0x1a3   :  { %11868 = vmatprep.subr.bf16.mxu1 %v11867_v45  ;;  %v9026_v45 = vld [vmem:[%s17266_s3 + $0x8b0] sm:$0xff] }
 0x1a4   :  { %v11932_v46 = vpack.c.bf16 %v9026_v45, %v9025_v44 }
 0x1a6   :  { %11870 = vmatpush3.bf16.msra.mxu1 %v11869_v52  ;;  %v9029_v52 = vld [vmem:[%s17266_s3 + $0x8c8] sm:$0xff] }
 0x1a7   :  { %11900 = vmatprep.subr.bf16.mxu1 %v11899_v53  ;;  %v9030_v53 = vld [vmem:[%s17266_s3 + $0x8d0] sm:$0xff] }
 0x1a8   :  { %v11938_v56 = vpack.c.bf16 %v9030_v53, %v9029_v52 }
 0x1a9   :  { %1620 = vmatmul.mubr.f32.vlgmr.msra.gmra.mrb[20].mxu1 %v13706_v54 }
 0x1aa   :  { %1624 = vmatprep.mubr.f32.mxu1 %v13732_v6  ;;  %11902 = vmatpush3.bf16.msra.mxu1 %v11901_v60  ;;  %v9033_v60 = vld [vmem:[%s17266_s3 + $0x8e8] sm:$0xff] }
 0x1ab   :  { %11904 = vmatprep.subr.bf16.mxu1 %v11903_v61  ;;  %v9034_v61 = vld [vmem:[%s17266_s3 + $0x8f0] sm:$0xff] }
 0x1ac   :  { %v11944_v62 = vpack.c.bf16 %v9034_v61, %v9033_v60  ;;  %v9137_v60 = vld [vmem:[%s17266_s3 + $0xbc8] sm:$0xff]  ;;  %v9138_v61 = vld [vmem:[%s17266_s3 + $0xbd0] sm:$0xff] }
 0x1ad   :  { %1625 = vmatmul.mubr.f32.gmra.mrb[22].mxu1 %v13735_v8 }
 0x1ae   :  { %11906 = vmatpush3.bf16.msra.mxu1 %v11905_v3  ;;  %1905 = vmatprep.mubr.f32.mxu1 %v13704_v50  ;;  %v9038_v3 = vld [vmem:[%s17266_s3 + $0x910] sm:$0xff] }
 0x1af   :  { %11908 = vmatprep.subr.bf16.mxu1 %v11907_v4  ;;  %v11950_v4 = vpack.c.bf16 %v9038_v3, %v9037_v2  ;;  %v9141_v2 = vld [vmem:[%s17266_s3 + $0xbe8] sm:$0xff]  ;;  %v9142_v3 = vld [vmem:[%s17266_s3 + $0xbf0] sm:$0xff] }
 0x1b2   :  { %11910 = vmatpush3.bf16.msra.mxu1 %v11909_v13  ;;  %v9081_v13 = vld [vmem:[%s17266_s3 + $0xa38] sm:$0xff] }
 0x1b3   :  { %11912 = vmatprep.subr.bf16.mxu1 %v11911_v14  ;;  %v9041_v14 = vld [vmem:[%s17266_s3 + $0x928] sm:$0xff]  ;;  %v11992_v16 = vpack.c.bf16 %v9081_v13, %v9080_v12  ;;  %v12064_v13 = vpack.c.bf16 %v9144_v7, %v9143_v5 }
 0x1b6   :  { %11914 = vmatpush3.bf16.msra.mxu1 %v11913_v20  ;;  %v9084_v20 = vld [vmem:[%s17266_s3 + $0xa50] sm:$0xff] }
 0x1b7   :  { %11916 = vmatprep.subr.bf16.mxu1 %v11915_v21  ;;  %v9085_v21 = vld [vmem:[%s17266_s3 + $0xa58] sm:$0xff] }
 0x1b8   :  { %v11998_v22 = vpack.c.bf16 %v9085_v21, %v9084_v20 }
 0x1ba   :  { %11918 = vmatpush3.bf16.msra.mxu1 %v11917_v26  ;;  %v9088_v26 = vld [vmem:[%s17266_s3 + $0xa70] sm:$0xff] }
 0x1bb   :  { %11920 = vmatprep.subr.bf16.mxu1 %v11919_v27  ;;  %v9089_v27 = vld [vmem:[%s17266_s3 + $0xa78] sm:$0xff] }
 0x1bc   :  { %v12004_v28 = vpack.c.bf16 %v9089_v27, %v9088_v26 }
 0x1be   :  { %11922 = vmatpush3.bf16.msra.mxu1 %v11921_v33 }
 0x1bf   :  { %11924 = vmatprep.subr.bf16.mxu1 %v11923_v34 }
 0x1c2   :  { %11926 = vmatpush3.bf16.msra.mxu1 %v11925_v39 }
 0x1c3   :  { %11928 = vmatprep.subr.bf16.mxu1 %v11927_v40  ;;  %v9092_v40 = vld [vmem:[%s17266_s3 + $0xa90] sm:$0xff] }
 0x1c6   :  { %11930 = vmatpush3.bf16.msra.mxu1 %v11929_v43 }
 0x1c7   :  { %11931 = vmatprep.subr.bf16.mxu1 %v12998_v11 }
 0x1c9   :  { %1906 = vmatmul.mubr.f32.vlgmr.msra.gmra.mrb[24].mxu1 %v13706_v54 }
 0x1ca   :  { %1910 = vmatprep.mubr.f32.mxu1 %v13732_v6  ;;  %11933 = vmatpush1.bf16.msra.mxu1 %v11932_v46  ;;  %v12010_v46 = vpack.c.bf16 %v9093_v41, %v9092_v40  ;;  %v9151_v40 = vld [vmem:[%s17266_s3 + $0xc38] sm:$0xff] }
 0x1cb   :  { %11934 = vmatprep.subr.bf16.mxu1 %v12998_v11 }
 0x1cd   :  { %1911 = vmatmul.mubr.f32.gmra.mrb[26].mxu1 %v13735_v8 }
 0x1ce   :  { %11936 = vmatpush1.bf16.msra.mxu1 %v11935_v51  ;;  %9042 = vmatprep.mubr.msk.f32.mxu1 %vm408_vm0, %v13708_v55  ;;  %v9095_v51 = vld [vmem:[%s17266_s3 + $0xaa8] sm:$0xff] }
 0x1cf   :  { %11937 = vmatprep.subr.bf16.mxu1 %v12998_v11  ;;  %v12013_v53 = vpack.c.bf16 %v9095_v51, %v9094_v48  ;;  %v8862_v48 = vld [vmem:[%s17266_s3 + $0x420] sm:$0xff]  ;;  %v8863_v51 = vld [vmem:[%s17266_s3 + $0x428] sm:$0xff] }
 0x1d2   :  { %11939 = vmatpush1.bf16.msra.mxu1 %v11938_v56  ;;  %v9135_v56 = vld [vmem:[%s17266_s3 + $0xbb8] sm:$0xff] }
 0x1d3   :  { %11940 = vmatprep.subr.bf16.mxu1 %v12998_v11 }
 0x1d6   :  { %11942 = vmatpush1.bf16.msra.mxu1 %v11941_v59  ;;  %v12052_v59 = vpack.c.bf16 %v9136_v57, %v9135_v56  ;;  %v9195_v56 = vld [vmem:[%s17266_s3 + $0xd68] sm:$0xff]  ;;  %v11755_v57 = vpack.c.bf16 %v8863_v51, %v8862_v48  ;;  %v9250_v51 = vld [vmem:[%s17266_s3 + $0xef0] sm:$0xff] }
 0x1d7   :  { %11943 = vmatprep.subr.bf16.mxu1 %v12998_v11  ;;  %v9249_v48 = vld [vmem:[%s17266_s3 + $0xee8] sm:$0xff] }
 0x1da   :  { %11945 = vmatpush1.bf16.msra.mxu1 %v11944_v62  ;;  %v12055_v62 = vpack.c.bf16 %v9138_v61, %v9137_v60  ;;  %v9196_v61 = vld [vmem:[%s17266_s3 + $0xd70] sm:$0xff] }
 0x1db   :  { %11946 = vmatprep.subr.bf16.mxu1 %v12998_v11 }
 0x1de   :  { %11948 = vmatpush1.bf16.msra.mxu1 %v11947_v1  ;;  %v12058_v1 = vpack.c.bf16 %v9140_v0, %v9139_v63  ;;  %v8866_v0 = vld [vmem:[%s17266_s3 + $0x440] sm:$0xff] }
 0x1df   :  { %11949 = vmatprep.subr.bf16.mxu1 %v12998_v11 }
 0x1e2   :  { %11951 = vmatpush1.bf16.msra.mxu1 %v11950_v4  ;;  %v12061_v4 = vpack.c.bf16 %v9142_v3, %v9141_v2  ;;  %v9198_v3 = vld [vmem:[%s17266_s3 + $0xd80] sm:$0xff] }
 0x1e3   :  { %11952 = vmatprep.subr.bf16.mxu1 %v12998_v11 }
 0x1e6   :  { %11954 = vmatpush1.bf16.msra.mxu1 %v11953_v10 }
 0x1e7   :  { %1948 = vmatprep.subr.mxu1 %v12999_v30 }
 0x1ea   :  { %1949 = vmatpush1.msra.mxu1 %v9041_v14 }
 0x1eb   :  { %1981 = vmatmul.mubr.f32.vlgmr.msra.gmra.mrb[28].mxu1 %v13702_v49  ;;  %11991 = vmatprep.subr.bf16.mxu1 %v12998_v11 }
 0x1ec   :  { %9043 = vmatprep.mubr.msk.f32.mxu1 %vm408_vm0, %v13737_v9  ;;  %11993 = vmatpush1.bf16.msra.mxu1 %v11992_v16  ;;  %v9145_v16 = vld [vmem:[%s17266_s3 + $0xc08] sm:$0xff] }
 0x1ed   :  { %11994 = vmatprep.subr.bf16.mxu1 %v12998_v11 }
 0x1ef   :  { %1986 = vmatmul.mubr.f32.gmra.mrb[30].mxu1 %v13748_v15 }
 0x1f0   :  { %11996 = vmatpush1.bf16.msra.mxu1 %v11995_v19  ;;  %9097 = vmatprep.mubr.msk.f32.mxu1 %vm408_vm0, %v13708_v55 }
 0x1f1   :  { %11997 = vmatprep.subr.bf16.mxu1 %v12998_v11 }
 0x1f4   :  { %11999 = vmatpush1.bf16.msra.mxu1 %v11998_v22  ;;  %v12067_v22 = vpack.c.bf16 %v9146_v17, %v9145_v16  ;;  %v9200_v17 = vld [vmem:[%s17266_s3 + $0xd90] sm:$0xff] }
 0x1f5   :  { %12000 = vmatprep.subr.bf16.mxu1 %v12998_v11 }
 0x1f8   :  { %12002 = vmatpush1.bf16.msra.mxu1 %v12001_v25  ;;  %v9148_v25 = vld [vmem:[%s17266_s3 + $0xc20] sm:$0xff] }
 0x1f9   :  { %v9896_v29 = vpop.f32.mrb[4].mxu0  ;;  %12003 = vmatprep.subr.bf16.mxu1 %v12998_v11  ;;  %v12070_v31 = vpack.c.bf16 %v9148_v25, %v9147_v24 }
 0x1fa   :  { %v556_v33 = vpop.f32.mrb[4].mxu1  ;;  %v9897_v34 = vpop.f32.mrb[5].mxu0 }
 0x1fb   :  { %v9898_v35 = vadd.f32 %v9897_v34, %v9896_v29  ;;  %v558_v36 = vpop.f32.mrb[5].mxu1 }
 0x1fc   :  { %12005 = vmatpush1.bf16.msra.mxu1 %v12004_v28  ;;  %v8823_v36 = vld [vmem:[%s17268_s4 + $0x18] sm:$0xff] }
 0x1fd   :  { %v557_v38 = vadd.f32 %v9898_v35, %v556_v33  ;;  %v9899_v39 = vpop.f32.mrb[6].mxu0  ;;  %12006 = vmatprep.subr.bf16.mxu1 %v12998_v11  ;;  %v9150_v33 = vld [vmem:[%s17266_s3 + $0xc30] sm:$0xff] }
 0x1fe   :  { %v561_v42 = vpop.f32.mrb[6].mxu1  ;;  %v9900_v43 = vpop.f32.mrb[7].mxu0  ;;  %v12073_v35 = vpack.c.bf16 %v9150_v33, %v9149_v32  ;;  %v9204_v33 = vld [vmem:[%s17266_s3 + $0xdb0] sm:$0xff] }
 0x1ff   :  { %v9901_v44 = vadd.f32 %v9900_v43, %v9899_v39  ;;  %v563_v45 = vpop.f32.mrb[7].mxu1  ;;  %v565_v39 = vld [vmem:[%s17268_s4] sm:$0xff]  ;;  %v8861_v43 = vld [vmem:[%s17266_s3 + $0x418] sm:$0xff] }
 0x200   :  { %12008 = vmatpush1.bf16.msra.mxu1 %v12007_v37  ;;  %v9190_v37 = vld [vmem:[%s17266_s3 + $0xd40] sm:$0xff]  ;;  %v9193_v45 = vld [vmem:[%s17266_s3 + $0xd58] sm:$0xff] }
 0x201   :  { %v562_v47 = vadd.f32 %v9901_v44, %v561_v42  ;;  %12009 = vmatprep.subr.bf16.mxu1 %v12998_v11  ;;  %v8860_v42 = vld [vmem:[%s17266_s3 + $0x410] sm:$0xff] }
 0x202   :  { %v9192_v44 = vld [vmem:[%s17266_s3 + $0xd50] sm:$0xff] }
 0x203   :  { %v14396_v52 = vpack.c.bf16 %v562_v47, %v557_v38  ;;  %v9191_v38 = vld [vmem:[%s17266_s3 + $0xd48] sm:$0xff]  ;;  %v11752_v47 = vpack.c.bf16 %v8861_v43, %v8860_v42  ;;  %v9206_v42 = vld [vmem:[%s17266_s3 + $0xdc0] sm:$0xff]  ;;  %v8876_v43 = vld [vmem:[%s17266_s3 + $0x490] sm:$0xff] }
 0x204   :  { %12011 = vmatpush1.bf16.msra.mxu1 %v12010_v46  ;;  %v12112_v41 = vpack.c.bf16 %v9191_v38, %v9190_v37  ;;  %v566_v46 = vld [vmem:[%s17268_s4 + $0x8] sm:$0xff] }
 0x205   :  { %12012 = vmatprep.subr.bf16.mxu1 %v12998_v11  ;;  %v8875_v37 = vld [vmem:[%s17266_s3 + $0x488] sm:$0xff] }
 0x208   :  { %12014 = vmatpush1.bf16.msra.mxu1 %v12013_v53  ;;  %v9194_v53 = vld [vmem:[%s17266_s3 + $0xd60] sm:$0xff] }
 0x209   :  { %2234 = vmatprep.subr.mxu1 %v12999_v30  ;;  %v12118_v60 = vpack.c.bf16 %v9195_v56, %v9194_v53  ;;  %v9251_v53 = vld [vmem:[%s17266_s3 + $0xef8] sm:$0xff]  ;;  %v9252_v56 = vld [vmem:[%s17266_s3 + $0xf00] sm:$0xff] }
 0x20c   :  { %2235 = vmatpush1.msra.mxu1 %v9096_v58  ;;  %v8864_v58 = vld [vmem:[%s17266_s3 + $0x430] sm:$0xff] }
 0x20d   :  { %2267 = vmatmul.mubr.f32.vlgmr.msra.gmra.mrb[32].mxu1 %v13702_v49  ;;  %12051 = vmatprep.subr.bf16.mxu1 %v12998_v11 }
 0x20e   :  { %9098 = vmatprep.mubr.msk.f32.mxu1 %vm408_vm0, %v13737_v9  ;;  %12053 = vmatpush1.bf16.msra.mxu1 %v12052_v59  ;;  %v8865_v59 = vld [vmem:[%s17266_s3 + $0x438] sm:$0xff] }
 0x20f   :  { %12054 = vmatprep.subr.bf16.mxu1 %v12998_v11  ;;  %v11758_v63 = vpack.c.bf16 %v8865_v59, %v8864_v58  ;;  %v12181_v58 = vpack.c.bf16 %v9252_v56, %v9251_v53  ;;  %v9339_v53 = vld [vmem:[%s17266_s3 + $0x1158] sm:$0xff]  ;;  %v9340_v56 = vld [vmem:[%s17266_s3 + $0x1160] sm:$0xff] }
 0x211   :  { %2272 = vmatmul.mubr.f32.gmra.mrb[34].mxu1 %v13748_v15 }
 0x212   :  { %12056 = vmatpush1.bf16.msra.mxu1 %v12055_v62  ;;  %9152 = vmatprep.mubr.msk.f32.mxu1 %vm408_vm0, %v13708_v55  ;;  %v9197_v62 = vld [vmem:[%s17266_s3 + $0xd78] sm:$0xff] }
 0x213   :  { %12057 = vmatprep.subr.bf16.mxu1 %v12998_v11  ;;  %v12121_v2 = vpack.c.bf16 %v9197_v62, %v9196_v61  ;;  %v9254_v61 = vld [vmem:[%s17266_s3 + $0xf10] sm:$0xff] }
 0x216   :  { %12059 = vmatpush1.bf16.msra.mxu1 %v12058_v1  ;;  %v8867_v1 = vld [vmem:[%s17266_s3 + $0x448] sm:$0xff] }
 0x217   :  { %12060 = vmatprep.subr.bf16.mxu1 %v12998_v11  ;;  %v11761_v5 = vpack.c.bf16 %v8867_v1, %v8866_v0 }
 0x219   :  { %v9934_v10 = vpop.f32.mrb[8].mxu0 }
 0x21a   :  { %12062 = vmatpush1.bf16.msra.mxu1 %v12061_v4  ;;  %v9935_v12 = vpop.f32.mrb[9].mxu0  ;;  %v9199_v4 = vld [vmem:[%s17266_s3 + $0xd88] sm:$0xff] }
 0x21b   :  { %v9936_v14 = vadd.f32 %v9935_v12, %v9934_v10  ;;  %12063 = vmatprep.subr.bf16.mxu1 %v12998_v11  ;;  %v8868_v10 = vld [vmem:[%s17266_s3 + $0x450] sm:$0xff]  ;;  %v8869_v12 = vld [vmem:[%s17266_s3 + $0x458] sm:$0xff] }
 0x21c   :  { %v758_v18 = vpop.f32.mrb[8].mxu1 }
 0x21d   :  { %v759_v19 = vadd.f32 %v9936_v14, %v758_v18  ;;  %v760_v20 = vpop.f32.mrb[9].mxu1  ;;  %v12124_v14 = vpack.c.bf16 %v9199_v4, %v9198_v3  ;;  %v9201_v18 = vld [vmem:[%s17266_s3 + $0xd98] sm:$0xff]  ;;  %v9256_v3 = vld [vmem:[%s17266_s3 + $0xf20] sm:$0xff] }
 0x21e   :  { %v9937_v21 = vpop.f32.mrb[10].mxu0  ;;  %12065 = vmatpush1.bf16.msra.mxu1 %v12064_v13  ;;  %v12127_v24 = vpack.c.bf16 %v9201_v18, %v9200_v17  ;;  %v9300_v18 = vld [vmem:[%s17266_s3 + $0x1050] sm:$0xff] }
 0x21f   :  { %v9938_v23 = vpop.f32.mrb[11].mxu0  ;;  %12066 = vmatprep.subr.bf16.mxu1 %v12998_v11 }
 0x220   :  { %v9939_v26 = vadd.f32 %v9938_v23, %v9937_v21  ;;  %v763_v27 = vpop.f32.mrb[10].mxu1  ;;  %v8870_v21 = vld [vmem:[%s17266_s3 + $0x460] sm:$0xff] }
 0x221   :  { %v765_v28 = vpop.f32.mrb[11].mxu1 }
 0x222   :  { %v764_v29 = vadd.f32 %v9939_v26, %v763_v27  ;;  %12068 = vmatpush1.bf16.msra.mxu1 %v12067_v22  ;;  %v8871_v22 = vld [vmem:[%s17266_s3 + $0x468] sm:$0xff]  ;;  %v9202_v26 = vld [vmem:[%s17266_s3 + $0xda0] sm:$0xff] }
 0x223   :  { %12069 = vmatprep.subr.bf16.mxu1 %v12998_v11  ;;  %v9203_v27 = vld [vmem:[%s17266_s3 + $0xda8] sm:$0xff]  ;;  %v11767_v28 = vpack.c.bf16 %v8871_v22, %v8870_v21  ;;  %v9302_v22 = vld [vmem:[%s17266_s3 + $0x1060] sm:$0xff] }
 0x224   :  { %v11711_v34 = vpack.c.bf16 %v764_v29, %v759_v19  ;;  %v11764_v19 = vpack.c.bf16 %v8869_v12, %v8868_v10  ;;  %v8872_v29 = vld [vmem:[%s17266_s3 + $0x470] sm:$0xff]  ;;  %v12130_v32 = vpack.c.bf16 %v9203_v27, %v9202_v26  ;;  %v9305_v27 = vld [vmem:[%s17266_s3 + $0x1078] sm:$0xff] }
 0x225   :  { %v9258_v10 = vld [vmem:[%s17266_s3 + $0xf30] sm:$0xff] }
 0x226   :  { %11712 = vmatprep.subr.bf16.mxu0 %v11711_v34  ;;  %12071 = vmatpush1.bf16.msra.mxu1 %v12070_v31  ;;  %v8873_v31 = vld [vmem:[%s17266_s3 + $0x478] sm:$0xff]  ;;  %v9304_v26 = vld [vmem:[%s17266_s3 + $0x1070] sm:$0xff] }
 0x227   :  { %11714 = vmatpush3.bf16.msra.mxu0 %v11711_v34  ;;  %12072 = vmatprep.subr.bf16.mxu1 %v12998_v11  ;;  %v9205_v34 = vld [vmem:[%s17266_s3 + $0xdb8] sm:$0xff] }
 0x228   :  { %11716 = vmatprep.subr.bf16.mxu0 %v14396_v52  ;;  %v12133_v38 = vpack.c.bf16 %v9205_v34, %v9204_v33 }
 0x22a   :  { %10829 = vmatmul.mubr.msk.f32.vlgmr.msra.gmra.mrb[12].mxu0 %vm770_vm1, %v8823_v36  ;;  %12074 = vmatpush1.bf16.msra.mxu1 %v12073_v35  ;;  %v11770_v35 = vpack.c.bf16 %v8873_v31, %v8872_v29  ;;  %v8874_v36 = vld [vmem:[%s17266_s3 + $0x480] sm:$0xff]  ;;  %v9307_v31 = vld [vmem:[%s17266_s3 + $0x1088] sm:$0xff] }
 0x22b   :  { %11718 = vmatpush3.bf16.msra.mxu0 %v14396_v52  ;;  %2520 = vmatprep.subr.mxu1 %v12999_v30  ;;  %v12115_v52 = vpack.c.bf16 %v9193_v45, %v9192_v44  ;;  %v9247_v45 = vld [vmem:[%s17266_s3 + $0xed8] sm:$0xff]  ;;  %v9306_v29 = vld [vmem:[%s17266_s3 + $0x1080] sm:$0xff] }
 0x22c   :  { %10835 = vmatprep.mubr.msk.f32.mxu0 %vm770_vm1, %v565_v39  ;;  %11751 = vmatprep.subr.bf16.mxu0 %v12998_v11  ;;  %v11773_v39 = vpack.c.bf16 %v8875_v37, %v8874_v36  ;;  %v9308_v36 = vld [vmem:[%s17266_s3 + $0x1090] sm:$0xff]  ;;  %v9309_v37 = vld [vmem:[%s17266_s3 + $0x1098] sm:$0xff] }
 0x22e   :  { %2521 = vmatpush1.msra.mxu1 %v9151_v40  ;;  %v9245_v40 = vld [vmem:[%s17266_s3 + $0xec8] sm:$0xff] }
 0x22f   :  { %2553 = vmatmul.mubr.f32.vlgmr.msra.gmra.mrb[36].mxu1 %v13702_v49  ;;  %12111 = vmatprep.subr.bf16.mxu1 %v12998_v11 }
 0x230   :  { %9153 = vmatprep.mubr.msk.f32.mxu1 %vm408_vm0, %v13737_v9  ;;  %12113 = vmatpush1.bf16.msra.mxu1 %v12112_v41  ;;  %v9246_v41 = vld [vmem:[%s17266_s3 + $0xed0] sm:$0xff] }
 0x231   :  { %12114 = vmatprep.subr.bf16.mxu1 %v12998_v11  ;;  %v12172_v44 = vpack.c.bf16 %v9246_v41, %v9245_v40  ;;  %v12244_v41 = vpack.c.bf16 %v9309_v37, %v9308_v36  ;;  %v9332_v36 = vld [vmem:[%s17266_s3 + $0x1120] sm:$0xff] }
 0x232   :  { %10836 = vmatmul.mubr.msk.f32.vlgmr.msra.gmra.mrb[12].mxu0 %vm770_vm1, %v566_v46  ;;  %v9248_v46 = vld [vmem:[%s17266_s3 + $0xee0] sm:$0xff] }
 0x233   :  { %11753 = vmatpush1.bf16.msra.mxu0 %v11752_v47  ;;  %8877 = vmatprep.mubr.msk.f32.mxu0 %vm408_vm0, %v13708_v55  ;;  %v12175_v47 = vpack.c.bf16 %v9248_v46, %v9247_v45  ;;  %v9312_v45 = vld [vmem:[%s17266_s3 + $0x10b0] sm:$0xff]  ;;  %v9313_v46 = vld [vmem:[%s17266_s3 + $0x10b8] sm:$0xff] }
 0x234   :  { %2558 = vmatmul.mubr.f32.gmra.mrb[38].mxu1 %v13748_v15  ;;  %11754 = vmatprep.subr.bf16.mxu0 %v12998_v11 }
 0x235   :  { %12116 = vmatpush1.bf16.msra.mxu1 %v12115_v52  ;;  %9207 = vmatprep.mubr.msk.f32.mxu1 %vm408_vm0, %v13708_v55  ;;  %v12178_v52 = vpack.c.bf16 %v9250_v51, %v9249_v48  ;;  %v9314_v48 = vld [vmem:[%s17266_s3 + $0x10c0] sm:$0xff]  ;;  %v9315_v51 = vld [vmem:[%s17266_s3 + $0x10c8] sm:$0xff] }
 0x236   :  { %12117 = vmatprep.subr.bf16.mxu1 %v12998_v11 }
 0x237   :  { %11756 = vmatpush1.bf16.msra.mxu0 %v11755_v57 }
 0x238   :  { %11757 = vmatprep.subr.bf16.mxu0 %v12998_v11 }
 0x239   :  { %12119 = vmatpush1.bf16.msra.mxu1 %v12118_v60  ;;  %v9253_v60 = vld [vmem:[%s17266_s3 + $0xf08] sm:$0xff] }
 0x23a   :  { %12120 = vmatprep.subr.bf16.mxu1 %v12998_v11  ;;  %v12184_v0 = vpack.c.bf16 %v9254_v61, %v9253_v60  ;;  %v9342_v60 = vld [vmem:[%s17266_s3 + $0x1170] sm:$0xff] }
 0x23b   :  { %11759 = vmatpush1.bf16.msra.mxu0 %v11758_v63  ;;  %v9316_v61 = vld [vmem:[%s17266_s3 + $0x10d0] sm:$0xff] }
 0x23c   :  { %v9980_v7 = vpop.f32.mrb[12].mxu1  ;;  %11760 = vmatprep.subr.bf16.mxu0 %v12998_v11 }
 0x23d   :  { %12122 = vmatpush1.bf16.msra.mxu1 %v12121_v2  ;;  %v9981_v13 = vpop.f32.mrb[13].mxu1  ;;  %v9255_v2 = vld [vmem:[%s17266_s3 + $0xf18] sm:$0xff] }
 0x23e   :  { %v14559_v16 = vadd.f32 %v9981_v13, %v9980_v7  ;;  %12123 = vmatprep.subr.bf16.mxu1 %v12998_v11  ;;  %v9257_v7 = vld [vmem:[%s17266_s3 + $0xf28] sm:$0xff]  ;;  %v9259_v13 = vld [vmem:[%s17266_s3 + $0xf38] sm:$0xff] }
 0x23f   :  { %11762 = vmatpush1.bf16.msra.mxu0 %v11761_v5  ;;  %v12187_v5 = vpack.c.bf16 %v9256_v3, %v9255_v2  ;;  %v12190_v12 = vpack.c.bf16 %v9258_v10, %v9257_v7  ;;  %v9325_v2 = vld [vmem:[%s17266_s3 + $0x10e8] sm:$0xff]  ;;  %v9326_v3 = vld [vmem:[%s17266_s3 + $0x10f0] sm:$0xff]  ;;  %v9344_v7 = vld [vmem:[%s17266_s3 + $0x1180] sm:$0xff] }
 0x240   :  { %v9983_v20 = vpop.f32.mrb[14].mxu1  ;;  %11763 = vmatprep.subr.bf16.mxu0 %v12998_v11  ;;  %v12265_v10 = vpack.c.bf16 %v9326_v3, %v9325_v2  ;;  %v9378_v2 = vld [vmem:[%s17266_s3 + $0x1260] sm:$0xff]  ;;  %v9379_v3 = vld [vmem:[%s17266_s3 + $0x1268] sm:$0xff] }
 0x241   :  { %12125 = vmatpush1.bf16.msra.mxu1 %v12124_v14  ;;  %v9984_v23 = vpop.f32.mrb[15].mxu1  ;;  %v9260_v14 = vld [vmem:[%s17266_s3 + $0xf40] sm:$0xff] }
 0x242   :  { %v14575_v25 = vadd.f32 %v9984_v23, %v9983_v20  ;;  %12126 = vmatprep.subr.bf16.mxu1 %v12998_v11  ;;  %v12193_v17 = vpack.c.bf16 %v9260_v14, %v9259_v13  ;;  %v9261_v20 = vld [vmem:[%s17266_s3 + $0xf48] sm:$0xff]  ;;  %v9327_v13 = vld [vmem:[%s17266_s3 + $0x10f8] sm:$0xff]  ;;  %v9328_v14 = vld [vmem:[%s17266_s3 + $0x1100] sm:$0xff] }
 0x243   :  { %11765 = vmatpush1.bf16.msra.mxu0 %v11764_v19  ;;  %v9301_v19 = vld [vmem:[%s17266_s3 + $0x1058] sm:$0xff]  ;;  %v9303_v23 = vld [vmem:[%s17266_s3 + $0x1068] sm:$0xff] }
 0x244   :  { %11766 = vmatprep.subr.bf16.mxu0 %v12998_v11  ;;  %v12232_v21 = vpack.c.bf16 %v9301_v19, %v9300_v18  ;;  %v9346_v18 = vld [vmem:[%s17266_s3 + $0x1190] sm:$0xff] }
 0x245   :  { %12128 = vmatpush1.bf16.msra.mxu1 %v12127_v24  ;;  %v12235_v24 = vpack.c.bf16 %v9303_v23, %v9302_v22  ;;  %v9329_v23 = vld [vmem:[%s17266_s3 + $0x1108] sm:$0xff] }
 0x246   :  { %12129 = vmatprep.subr.bf16.mxu1 %v12998_v11 }
 0x247   :  { %11768 = vmatpush1.bf16.msra.mxu0 %v11767_v28  ;;  %v12238_v28 = vpack.c.bf16 %v9305_v27, %v9304_v26  ;;  %v9347_v27 = vld [vmem:[%s17266_s3 + $0x1198] sm:$0xff] }
 0x248   :  { %11769 = vmatprep.subr.bf16.mxu0 %v12998_v11 }
 0x249   :  { %12131 = vmatpush1.bf16.msra.mxu1 %v12130_v32 }
 0x24a   :  { %12132 = vmatprep.subr.bf16.mxu1 %v12998_v11 }
 0x24b   :  { %11771 = vmatpush1.bf16.msra.mxu0 %v11770_v35  ;;  %v12241_v35 = vpack.c.bf16 %v9307_v31, %v9306_v29 }
 0x24c   :  { %11772 = vmatprep.subr.bf16.mxu0 %v12998_v11 }
 0x24d   :  { %12134 = vmatpush1.bf16.msra.mxu1 %v12133_v38 }
 0x24e   :  { %2806 = vmatprep.subr.mxu1 %v12999_v30 }
 0x24f   :  { %11774 = vmatpush1.bf16.msra.mxu0 %v11773_v39 }
 0x250   :  { %1090 = vmatprep.subr.mxu0 %v12999_v30 }
 0x251   :  { %2807 = vmatpush1.msra.mxu1 %v9206_v42  ;;  %v9310_v42 = vld [vmem:[%s17266_s3 + $0x10a0] sm:$0xff] }
 0x252   :  { %2839 = vmatmul.mubr.f32.vlgmr.msra.gmra.mrb[40].mxu1 %v13702_v49  ;;  %12171 = vmatprep.subr.bf16.mxu1 %v12998_v11 }
 0x253   :  { %1091 = vmatpush1.msra.mxu0 %v8876_v43  ;;  %9208 = vmatprep.mubr.msk.f32.mxu1 %vm408_vm0, %v13737_v9  ;;  %v9311_v43 = vld [vmem:[%s17266_s3 + $0x10a8] sm:$0xff] }
 0x254   :  { %12173 = vmatpush1.bf16.msra.mxu1 %v12172_v44  ;;  %1123 = vmatmul.mubr.f32.vlgmr.msra.gmra.mrb[14].mxu0 %v13702_v49  ;;  %v12247_v44 = vpack.c.bf16 %v9311_v43, %v9310_v42  ;;  %v9333_v43 = vld [vmem:[%s17266_s3 + $0x1128] sm:$0xff] }
 0x255   :  { %8878 = vmatprep.mubr.msk.f32.mxu0 %vm408_vm0, %v13737_v9  ;;  %12174 = vmatprep.subr.bf16.mxu1 %v12998_v11 }
 0x256   :  { %2844 = vmatmul.mubr.f32.gmra.mrb[42].mxu1 %v13748_v15 }
 0x257   :  { %9262 = vmatprep.mubr.msk.f32.mxu1 %vm408_vm0, %v13708_v55 }
 0x258   :  { %12176 = vmatpush1.bf16.msra.mxu1 %v12175_v47  ;;  %1128 = vmatmul.mubr.f32.gmra.mrb[16].mxu0 %v13748_v15  ;;  %v12250_v47 = vpack.c.bf16 %v9313_v46, %v9312_v45  ;;  %v9351_v45 = vld [vmem:[%s17266_s3 + $0x11b8] sm:$0xff]  ;;  %v9352_v46 = vld [vmem:[%s17266_s3 + $0x11c0] sm:$0xff] }
 0x259   :  { %12177 = vmatprep.subr.bf16.mxu1 %v12998_v11 }
 0x25c   :  { %12179 = vmatpush1.bf16.msra.mxu1 %v12178_v52  ;;  %v10022_v57 = vpop.f32.mrb[16].mxu1  ;;  %v12253_v52 = vpack.c.bf16 %v9315_v51, %v9314_v48  ;;  %v12283_v48 = vpack.c.bf16 %v9352_v46, %v9351_v45  ;;  %v9335_v51 = vld [vmem:[%s17266_s3 + $0x1138] sm:$0xff]  ;;  %v9404_v46 = vld [vmem:[%s17266_s3 + $0x1330] sm:$0xff] }
 0x25d   :  { %v10023_v59 = vpop.f32.mrb[17].mxu1  ;;  %12180 = vmatprep.subr.bf16.mxu1 %v12998_v11 }
 0x25e   :  { %v14659_v62 = vadd.f32 %v10023_v59, %v10022_v57  ;;  %v9323_v57 = vld [vmem:[%s17266_s3 + $0x10d8] sm:$0xff]  ;;  %v9341_v59 = vld [vmem:[%s17266_s3 + $0x1168] sm:$0xff] }
 0x260   :  { %12182 = vmatpush1.bf16.msra.mxu1 %v12181_v58  ;;  %v10025_v63 = vpop.f32.mrb[18].mxu1  ;;  %v9324_v58 = vld [vmem:[%s17266_s3 + $0x10e0] sm:$0xff] }
 0x261   :  { %v10026_v1 = vpop.f32.mrb[19].mxu1  ;;  %12183 = vmatprep.subr.bf16.mxu1 %v12998_v11 }
 0x262   :  { %v14668_v4 = vadd.f32 %v10026_v1, %v10025_v63  ;;  %v12259_v63 = vpack.c.bf16 %v9340_v56, %v9339_v53  ;;  %v12263_v1 = vpack.c.bf16 %v9342_v60, %v9341_v59  ;;  %v9353_v53 = vld [vmem:[%s17266_s3 + $0x11c8] sm:$0xff]  ;;  %v9354_v56 = vld [vmem:[%s17266_s3 + $0x11d0] sm:$0xff] }
 0x263   :  { %v9337_v59 = vld [vmem:[%s17266_s3 + $0x1148] sm:$0xff]  ;;  %v9338_v60 = vld [vmem:[%s17266_s3 + $0x1150] sm:$0xff] }
 0x264   :  { %12185 = vmatpush1.bf16.msra.mxu1 %v12184_v0  ;;  %v12261_v0 = vpack.c.bf16 %v9324_v58, %v9323_v57  ;;  %v12287_v58 = vpack.c.bf16 %v9354_v56, %v9353_v53  ;;  %v9388_v56 = vld [vmem:[%s17266_s3 + $0x12b0] sm:$0xff] }
 0x265   :  { %12186 = vmatprep.subr.bf16.mxu1 %v12998_v11 }
 0x268   :  { %12188 = vmatpush1.bf16.msra.mxu1 %v12187_v5  ;;  %v9343_v5 = vld [vmem:[%s17266_s3 + $0x1178] sm:$0xff] }
 0x269   :  { %12189 = vmatprep.subr.bf16.mxu1 %v12998_v11 }
 0x26c   :  { %12191 = vmatpush1.bf16.msra.mxu1 %v12190_v12  ;;  %v12267_v12 = vpack.c.bf16 %v9344_v7, %v9343_v5  ;;  %v8879_v5 = vld [vmem:[%s17268_s4 + $0x20] sm:$0xff]  ;;  %v9396_v7 = vld [vmem:[%s17266_s3 + $0x12f0] sm:$0xff] }
 0x26d   :  { %12192 = vmatprep.subr.bf16.mxu1 %v12998_v11  ;;  %10842 = vmatprep.mubr.msk.f32.mxu0 %vm770_vm1, %v8879_v5  ;;  %v9392_v5 = vld [vmem:[%s17266_s3 + $0x12d0] sm:$0xff] }
 0x270   :  { %12194 = vmatpush1.bf16.msra.mxu1 %v12193_v17  ;;  %v9345_v17 = vld [vmem:[%s17266_s3 + $0x1188] sm:$0xff] }
 0x271   :  { %3092 = vmatprep.subr.mxu1 %v12999_v30  ;;  %v12271_v22 = vpack.c.bf16 %v9346_v18, %v9345_v17  ;;  %v9381_v17 = vld [vmem:[%s17266_s3 + $0x1278] sm:$0xff]  ;;  %v9398_v18 = vld [vmem:[%s17266_s3 + $0x1300] sm:$0xff] }
 0x274   :  { %3093 = vmatpush1.msra.mxu1 %v9261_v20  ;;  %v12269_v20 = vpack.c.bf16 %v9328_v14, %v9327_v13  ;;  %v9380_v14 = vld [vmem:[%s17266_s3 + $0x1270] sm:$0xff] }
 0x275   :  { %3125 = vmatmul.mubr.f32.vlgmr.msra.gmra.mrb[44].mxu1 %v13702_v49  ;;  %12231 = vmatprep.subr.bf16.mxu1 %v12998_v11 }
 0x276   :  { %9263 = vmatprep.mubr.msk.f32.mxu1 %vm408_vm0, %v13737_v9  ;;  %12233 = vmatpush1.bf16.msra.mxu1 %v12232_v21 }
 0x277   :  { %12234 = vmatprep.subr.bf16.mxu1 %v12998_v11 }
 0x279   :  { %3130 = vmatmul.mubr.f32.gmra.mrb[46].mxu1 %v13748_v15 }
 0x27a   :  { %12236 = vmatpush1.bf16.msra.mxu1 %v12235_v24  ;;  %9317 = vmatprep.mubr.msk.f32.mxu1 %vm408_vm0, %v13708_v55  ;;  %v9330_v24 = vld [vmem:[%s17266_s3 + $0x1110] sm:$0xff] }
 0x27b   :  { %12237 = vmatprep.subr.bf16.mxu1 %v12998_v11  ;;  %v12273_v31 = vpack.c.bf16 %v9330_v24, %v9329_v23  ;;  %v9383_v23 = vld [vmem:[%s17266_s3 + $0x1288] sm:$0xff]  ;;  %v9400_v24 = vld [vmem:[%s17266_s3 + $0x1310] sm:$0xff] }
 0x27c   :  { %v10064_v32 = vpop.f32.mrb[20].mxu1 }
 0x27d   :  { %v10065_v33 = vpop.f32.mrb[21].mxu1 }
 0x27e   :  { %12239 = vmatpush1.bf16.msra.mxu1 %v12238_v28  ;;  %v14722_v34 = vadd.f32 %v10065_v33, %v10064_v32  ;;  %v9348_v28 = vld [vmem:[%s17266_s3 + $0x11a0] sm:$0xff] }
 0x27f   :  { %12240 = vmatprep.subr.bf16.mxu1 %v12998_v11  ;;  %v12275_v33 = vpack.c.bf16 %v9348_v28, %v9347_v27  ;;  %v9401_v27 = vld [vmem:[%s17266_s3 + $0x1318] sm:$0xff] }
 0x280   :  { %v10067_v38 = vpop.f32.mrb[22].mxu1 }
 0x281   :  { %v10068_v39 = vpop.f32.mrb[23].mxu1 }
 0x282   :  { %12242 = vmatpush1.bf16.msra.mxu1 %v12241_v35  ;;  %v14731_v40 = vadd.f32 %v10068_v39, %v10067_v38  ;;  %v9331_v35 = vld [vmem:[%s17266_s3 + $0x1118] sm:$0xff]  ;;  %v9349_v38 = vld [vmem:[%s17266_s3 + $0x11a8] sm:$0xff]  ;;  %v9350_v39 = vld [vmem:[%s17266_s3 + $0x11b0] sm:$0xff] }
 0x283   :  { %12243 = vmatprep.subr.bf16.mxu1 %v12998_v11  ;;  %v12279_v42 = vpack.c.bf16 %v9350_v39, %v9349_v38 }
 0x286   :  { %12245 = vmatpush1.bf16.msra.mxu1 %v12244_v41  ;;  %v12277_v41 = vpack.c.bf16 %v9332_v36, %v9331_v35  ;;  %v9402_v35 = vld [vmem:[%s17266_s3 + $0x1320] sm:$0xff]  ;;  %v9403_v36 = vld [vmem:[%s17266_s3 + $0x1328] sm:$0xff] }
 0x287   :  { %12246 = vmatprep.subr.bf16.mxu1 %v12998_v11 }
 0x28a   :  { %12248 = vmatpush1.bf16.msra.mxu1 %v12247_v44  ;;  %v9334_v44 = vld [vmem:[%s17266_s3 + $0x1130] sm:$0xff] }
 0x28b   :  { %12249 = vmatprep.subr.bf16.mxu1 %v12998_v11 }
 0x28e   :  { %12251 = vmatpush1.bf16.msra.mxu1 %v12250_v47  ;;  %v12281_v47 = vpack.c.bf16 %v9334_v44, %v9333_v43  ;;  %v9386_v43 = vld [vmem:[%s17266_s3 + $0x12a0] sm:$0xff]  ;;  %v9387_v44 = vld [vmem:[%s17266_s3 + $0x12a8] sm:$0xff] }
 0x28f   :  { %12252 = vmatprep.subr.bf16.mxu1 %v12998_v11 }
 0x292   :  { %12254 = vmatpush1.bf16.msra.mxu1 %v12253_v52  ;;  %v9336_v52 = vld [vmem:[%s17266_s3 + $0x1140] sm:$0xff] }
 0x293   :  { %3378 = vmatprep.subr.mxu1 %v12999_v30  ;;  %v12285_v57 = vpack.c.bf16 %v9336_v52, %v9335_v51  ;;  %v12337_v51 = vpack.c.bf16 %v9387_v44, %v9386_v43  ;;  %v9457_v43 = vld [vmem:[%s17266_s3 + $0x14a8] sm:$0xff]  ;;  %v9458_v44 = vld [vmem:[%s17266_s3 + $0x14b0] sm:$0xff] }
 0x296   :  { %3379 = vmatpush1.msra.mxu1 %v9316_v61  ;;  %v9394_v61 = vld [vmem:[%s17266_s3 + $0x12e0] sm:$0xff] }
 0x297   :  { %3411 = vmatmul.mubr.f32.vlgmr.msra.gmra.mrb[48].mxu1 %v13702_v49  ;;  %12260 = vmatprep.subr.bf16.mxu1 %v12259_v63  ;;  %v9395_v63 = vld [vmem:[%s17266_s3 + $0x12e8] sm:$0xff] }
 0x298   :  { %9318 = vmatprep.mubr.msk.f32.mxu1 %vm408_vm0, %v13737_v9  ;;  %12262 = vmatpush3.bf16.msra.mxu1 %v12261_v0  ;;  %v12289_v0 = vpack.c.bf16 %v9338_v60, %v9337_v59 }
 0x299   :  { %12264 = vmatprep.subr.bf16.mxu1 %v12263_v1  ;;  %v12319_v1 = vpack.c.bf16 %v9395_v63, %v9394_v61  ;;  %v9390_v61 = vld [vmem:[%s17266_s3 + $0x12c0] sm:$0xff]  ;;  %v9391_v63 = vld [vmem:[%s17266_s3 + $0x12c8] sm:$0xff] }
 0x29b   :  { %3416 = vmatmul.mubr.f32.gmra.mrb[50].mxu1 %v13748_v15 }
 0x29c   :  { %12266 = vmatpush3.bf16.msra.mxu1 %v12265_v10  ;;  %3621 = vmatprep.mubr.f32.mxu1 %v13704_v50  ;;  %v10106_v19 = vpop.f32.mrb[24].mxu1  ;;  %v9397_v10 = vld [vmem:[%s17266_s3 + $0x12f8] sm:$0xff] }
 0x29d   :  { %v10107_v21 = vpop.f32.mrb[25].mxu1  ;;  %12268 = vmatprep.subr.bf16.mxu1 %v12267_v12  ;;  %v12321_v12 = vpack.c.bf16 %v9379_v3, %v9378_v2  ;;  %v12323_v13 = vpack.c.bf16 %v9397_v10, %v9396_v7  ;;  %v12345_v2 = vpack.c.bf16 %v9391_v63, %v9390_v61  ;;  %v9393_v7 = vld [vmem:[%s17266_s3 + $0x12d8] sm:$0xff]  ;;  %v9449_v10 = vld [vmem:[%s17266_s3 + $0x1468] sm:$0xff]  ;;  %v9444_v61 = vld [vmem:[%s17266_s3 + $0x1440] sm:$0xff] }
 0x29e   :  { %v14812_v26 = vadd.f32 %v10107_v21, %v10106_v19  ;;  %v9399_v19 = vld [vmem:[%s17266_s3 + $0x1308] sm:$0xff] }
 0x29f   :  { %v12327_v21 = vpack.c.bf16 %v9399_v19, %v9398_v18  ;;  %v9434_v18 = vld [vmem:[%s17266_s3 + $0x13f0] sm:$0xff]  ;;  %v9451_v19 = vld [vmem:[%s17266_s3 + $0x1478] sm:$0xff]  ;;  %v9461_v63 = vld [vmem:[%s17266_s3 + $0x14c8] sm:$0xff] }
 0x2a0   :  { %12270 = vmatpush3.bf16.msra.mxu1 %v12269_v20  ;;  %v10109_v29 = vpop.f32.mrb[26].mxu1  ;;  %v12325_v20 = vpack.c.bf16 %v9381_v17, %v9380_v14  ;;  %v9433_v17 = vld [vmem:[%s17266_s3 + $0x13e8] sm:$0xff] }
 0x2a1   :  { %v10110_v32 = vpop.f32.mrb[27].mxu1  ;;  %12272 = vmatprep.subr.bf16.mxu1 %v12271_v22  ;;  %v9382_v22 = vld [vmem:[%s17266_s3 + $0x1280] sm:$0xff] }
 0x2a2   :  { %v14826_v37 = vadd.f32 %v10110_v32, %v10109_v29  ;;  %v12329_v28 = vpack.c.bf16 %v9383_v23, %v9382_v22  ;;  %v12331_v29 = vpack.c.bf16 %v9401_v27, %v9400_v24  ;;  %v9385_v32 = vld [vmem:[%s17266_s3 + $0x1298] sm:$0xff]  ;;  %v9436_v24 = vld [vmem:[%s17266_s3 + $0x1400] sm:$0xff]  ;;  %v9453_v27 = vld [vmem:[%s17266_s3 + $0x1488] sm:$0xff] }
 0x2a3   :  { %v9435_v23 = vld [vmem:[%s17266_s3 + $0x13f8] sm:$0xff] }
 0x2a4   :  { %12274 = vmatpush3.bf16.msra.mxu1 %v12273_v31  ;;  %v9384_v31 = vld [vmem:[%s17266_s3 + $0x1290] sm:$0xff] }
 0x2a5   :  { %12276 = vmatprep.subr.bf16.mxu1 %v12275_v33 }
 0x2a8   :  { %12278 = vmatpush3.bf16.msra.mxu1 %v12277_v41  ;;  %v12333_v41 = vpack.c.bf16 %v9385_v32, %v9384_v31  ;;  %v9437_v32 = vld [vmem:[%s17266_s3 + $0x1408] sm:$0xff] }
 0x2a9   :  { %12280 = vmatprep.subr.bf16.mxu1 %v12279_v42  ;;  %v12335_v42 = vpack.c.bf16 %v9403_v36, %v9402_v35  ;;  %v9455_v35 = vld [vmem:[%s17266_s3 + $0x1498] sm:$0xff]  ;;  %v9456_v36 = vld [vmem:[%s17266_s3 + $0x14a0] sm:$0xff] }
 0x2ac   :  { %12282 = vmatpush3.bf16.msra.mxu1 %v12281_v47 }
 0x2ad   :  { %12284 = vmatprep.subr.bf16.mxu1 %v12283_v48 }
 0x2b0   :  { %12286 = vmatpush3.bf16.msra.mxu1 %v12285_v57  ;;  %v9389_v57 = vld [vmem:[%s17266_s3 + $0x12b8] sm:$0xff] }
 0x2b1   :  { %12288 = vmatprep.subr.bf16.mxu1 %v12287_v58  ;;  %v9406_v58 = vld [vmem:[%s17266_s3 + $0x1340] sm:$0xff]  ;;  %v12341_v59 = vpack.c.bf16 %v9389_v57, %v9388_v56 }
 0x2b2   :  { %v9460_v56 = vld [vmem:[%s17266_s3 + $0x14c0] sm:$0xff] }
 0x2b4   :  { %12290 = vmatpush3.bf16.msra.mxu1 %v12289_v0  ;;  %v9408_v0 = vld [vmem:[%s17266_s3 + $0x1350] sm:$0xff] }
 0x2b5   :  { %12320 = vmatprep.subr.bf16.mxu1 %v12319_v1  ;;  %v9409_v1 = vld [vmem:[%s17266_s3 + $0x1358] sm:$0xff] }
 0x2b6   :  { %v12347_v3 = vpack.c.bf16 %v9409_v1, %v9408_v0  ;;  %v9462_v0 = vld [vmem:[%s17266_s3 + $0x14d0] sm:$0xff] }
 0x2b7   :  { %3622 = vmatmul.mubr.f32.vlgmr.msra.gmra.mrb[52].mxu1 %v13706_v54 }
 0x2b8   :  { %3626 = vmatprep.mubr.f32.mxu1 %v13732_v6  ;;  %12322 = vmatpush3.bf16.msra.mxu1 %v12321_v12  ;;  %v9450_v12 = vld [vmem:[%s17266_s3 + $0x1470] sm:$0xff] }
 0x2b9   :  { %12324 = vmatprep.subr.bf16.mxu1 %v12323_v13  ;;  %v12349_v13 = vpack.c.bf16 %v9393_v7, %v9392_v5  ;;  %v12379_v14 = vpack.c.bf16 %v9450_v12, %v9449_v10  ;;  %v9446_v5 = vld [vmem:[%s17266_s3 + $0x1450] sm:$0xff]  ;;  %v9463_v7 = vld [vmem:[%s17266_s3 + $0x14d8] sm:$0xff]  ;;  %v9464_v10 = vld [vmem:[%s17266_s3 + $0x14e0] sm:$0xff] }
 0x2bb   :  { %3627 = vmatmul.mubr.f32.gmra.mrb[54].mxu1 %v13735_v8 }
 0x2bc   :  { %12326 = vmatpush3.bf16.msra.mxu1 %v12325_v20  ;;  %3907 = vmatprep.mubr.f32.mxu1 %v13704_v50  ;;  %v9452_v20 = vld [vmem:[%s17266_s3 + $0x1480] sm:$0xff] }
 0x2bd   :  { %12328 = vmatprep.subr.bf16.mxu1 %v12327_v21  ;;  %v12381_v21 = vpack.c.bf16 %v9434_v18, %v9433_v17  ;;  %v12383_v22 = vpack.c.bf16 %v9452_v20, %v9451_v19  ;;  %v9448_v17 = vld [vmem:[%s17266_s3 + $0x1460] sm:$0xff]  ;;  %v9504_v18 = vld [vmem:[%s17266_s3 + $0x15f0] sm:$0xff]  ;;  %v9505_v19 = vld [vmem:[%s17266_s3 + $0x15f8] sm:$0xff] }
 0x2be   :  { %v1982_v33 = vpop.f32.mrb[28].mxu1 }
 0x2bf   :  { %v1983_v38 = vadd.f32 %v14812_v26, %v1982_v33  ;;  %v1984_v39 = vpop.f32.mrb[29].mxu1  ;;  %v9405_v26 = vld [vmem:[%s17266_s3 + $0x1338] sm:$0xff]  ;;  %v9438_v33 = vld [vmem:[%s17266_s3 + $0x1410] sm:$0xff] }
 0x2c0   :  { %12330 = vmatpush3.bf16.msra.mxu1 %v12329_v28  ;;  %v12339_v53 = vpack.c.bf16 %v9405_v26, %v9404_v46  ;;  %v9454_v28 = vld [vmem:[%s17266_s3 + $0x1490] sm:$0xff]  ;;  %v12391_v39 = vpack.c.bf16 %v9456_v36, %v9455_v35  ;;  %v9509_v35 = vld [vmem:[%s17266_s3 + $0x1618] sm:$0xff] }
 0x2c1   :  { %12332 = vmatprep.subr.bf16.mxu1 %v12331_v29  ;;  %v12385_v29 = vpack.c.bf16 %v9436_v24, %v9435_v23  ;;  %v12387_v31 = vpack.c.bf16 %v9454_v28, %v9453_v27  ;;  %v9489_v23 = vld [vmem:[%s17266_s3 + $0x1578] sm:$0xff]  ;;  %v9506_v24 = vld [vmem:[%s17266_s3 + $0x1600] sm:$0xff]  ;;  %v9507_v27 = vld [vmem:[%s17266_s3 + $0x1608] sm:$0xff] }
 0x2c2   :  { %v1987_v45 = vpop.f32.mrb[30].mxu1 }
 0x2c3   :  { %v1988_v47 = vadd.f32 %v14826_v37, %v1987_v45  ;;  %v1989_v48 = vpop.f32.mrb[31].mxu1  ;;  %v9407_v37 = vld [vmem:[%s17266_s3 + $0x1348] sm:$0xff] }
 0x2c4   :  { %12334 = vmatpush3.bf16.msra.mxu1 %v12333_v41  ;;  %v12343_v60 = vpack.c.bf16 %v9407_v37, %v9406_v58  ;;  %v9439_v41 = vld [vmem:[%s17266_s3 + $0x1418] sm:$0xff]  ;;  %v9441_v48 = vld [vmem:[%s17266_s3 + $0x1428] sm:$0xff] }
 0x2c5   :  { %v14940_v52 = vpack.c.bf16 %v1988_v47, %v1983_v38  ;;  %12336 = vmatprep.subr.bf16.mxu1 %v12335_v42  ;;  %v12389_v38 = vpack.c.bf16 %v9438_v33, %v9437_v32  ;;  %v9440_v42 = vld [vmem:[%s17266_s3 + $0x1420] sm:$0xff]  ;;  %v12395_v47 = vpack.c.bf16 %v9458_v44, %v9457_v43  ;;  %v9491_v32 = vld [vmem:[%s17266_s3 + $0x1588] sm:$0xff]  ;;  %v9508_v33 = vld [vmem:[%s17266_s3 + $0x1610] sm:$0xff] }
 0x2c6   :  { %v12393_v46 = vpack.c.bf16 %v9440_v42, %v9439_v41  ;;  %v9493_v41 = vld [vmem:[%s17266_s3 + $0x1598] sm:$0xff]  ;;  %v9510_v42 = vld [vmem:[%s17266_s3 + $0x1620] sm:$0xff]  ;;  %v9511_v43 = vld [vmem:[%s17266_s3 + $0x1628] sm:$0xff] }
 0x2c8   :  { %12338 = vmatpush3.bf16.msra.mxu1 %v12337_v51  ;;  %v9442_v51 = vld [vmem:[%s17266_s3 + $0x1430] sm:$0xff] }
 0x2c9   :  { %12340 = vmatprep.subr.bf16.mxu1 %v12339_v53  ;;  %v9459_v53 = vld [vmem:[%s17266_s3 + $0x14b8] sm:$0xff]  ;;  %v12397_v58 = vpack.c.bf16 %v9442_v51, %v9441_v48  ;;  %v9512_v48 = vld [vmem:[%s17266_s3 + $0x1630] sm:$0xff] }
 0x2ca   :  { %v9513_v51 = vld [vmem:[%s17266_s3 + $0x1638] sm:$0xff] }
 0x2cc   :  { %12342 = vmatpush3.bf16.msra.mxu1 %v12341_v59  ;;  %v12399_v59 = vpack.c.bf16 %v9460_v56, %v9459_v53  ;;  %v12455_v56 = vpack.c.bf16 %v9513_v51, %v9512_v48  ;;  %v9530_v48 = vld [vmem:[%s17266_s3 + $0x16c0] sm:$0xff]  ;;  %v9531_v51 = vld [vmem:[%s17266_s3 + $0x16c8] sm:$0xff] }
 0x2cd   :  { %12344 = vmatprep.subr.bf16.mxu1 %v12343_v60  ;;  %v9443_v60 = vld [vmem:[%s17266_s3 + $0x1438] sm:$0xff] }
 0x2ce   :  { %v12401_v1 = vpack.c.bf16 %v9444_v61, %v9443_v60  ;;  %v9514_v60 = vld [vmem:[%s17266_s3 + $0x1640] sm:$0xff]  ;;  %v9515_v61 = vld [vmem:[%s17266_s3 + $0x1648] sm:$0xff] }
 0x2d0   :  { %12346 = vmatpush3.bf16.msra.mxu1 %v12345_v2  ;;  %v12403_v2 = vpack.c.bf16 %v9462_v0, %v9461_v63 }
 0x2d1   :  { %12348 = vmatprep.subr.bf16.mxu1 %v12347_v3  ;;  %v9445_v3 = vld [vmem:[%s17266_s3 + $0x1448] sm:$0xff] }
 0x2d2   :  { %v12405_v12 = vpack.c.bf16 %v9446_v5, %v9445_v3  ;;  %v9499_v3 = vld [vmem:[%s17266_s3 + $0x15c8] sm:$0xff]  ;;  %v9516_v5 = vld [vmem:[%s17266_s3 + $0x1650] sm:$0xff] }
 0x2d4   :  { %12350 = vmatpush3.bf16.msra.mxu1 %v12349_v13  ;;  %v12407_v13 = vpack.c.bf16 %v9464_v10, %v9463_v7  ;;  %v9517_v7 = vld [vmem:[%s17266_s3 + $0x1658] sm:$0xff] }
 0x2d5   :  { %12380 = vmatprep.subr.bf16.mxu1 %v12379_v14  ;;  %v9447_v14 = vld [vmem:[%s17266_s3 + $0x1458] sm:$0xff] }
 0x2d6   :  { %v12409_v20 = vpack.c.bf16 %v9448_v17, %v9447_v14  ;;  %v12463_v14 = vpack.c.bf16 %v9517_v7, %v9516_v5  ;;  %v9500_v17 = vld [vmem:[%s17266_s3 + $0x15d0] sm:$0xff]  ;;  %v9534_v7 = vld [vmem:[%s17266_s3 + $0x16e0] sm:$0xff] }
 0x2d7   :  { %3908 = vmatmul.mubr.f32.vlgmr.msra.gmra.mrb[56].mxu1 %v13706_v54 }
 0x2d8   :  { %3912 = vmatprep.mubr.f32.mxu1 %v13732_v6  ;;  %12382 = vmatpush3.bf16.msra.mxu1 %v12381_v21  ;;  %v12439_v21 = vpack.c.bf16 %v9505_v19, %v9504_v18  ;;  %v9501_v18 = vld [vmem:[%s17266_s3 + $0x15d8] sm:$0xff]  ;;  %v9518_v19 = vld [vmem:[%s17266_s3 + $0x1660] sm:$0xff] }
 0x2d9   :  { %12384 = vmatprep.subr.bf16.mxu1 %v12383_v22  ;;  %v9488_v22 = vld [vmem:[%s17266_s3 + $0x1570] sm:$0xff] }
 0x2da   :  { %v12441_v28 = vpack.c.bf16 %v9489_v23, %v9488_v22  ;;  %v9502_v23 = vld [vmem:[%s17266_s3 + $0x15e0] sm:$0xff] }
 0x2db   :  { %3913 = vmatmul.mubr.f32.gmra.mrb[58].mxu1 %v13735_v8 }
 0x2dc   :  { %12386 = vmatpush3.bf16.msra.mxu1 %v12385_v29  ;;  %4193 = vmatprep.mubr.f32.mxu1 %v13704_v50  ;;  %v12443_v29 = vpack.c.bf16 %v9507_v27, %v9506_v24  ;;  %v9503_v24 = vld [vmem:[%s17266_s3 + $0x15e8] sm:$0xff] }
 0x2dd   :  { %12388 = vmatprep.subr.bf16.mxu1 %v12387_v31  ;;  %v9490_v31 = vld [vmem:[%s17266_s3 + $0x1580] sm:$0xff]  ;;  %v12469_v27 = vpack.c.bf16 %v9503_v24, %v9502_v23  ;;  %v9536_v24 = vld [vmem:[%s17266_s3 + $0x16f0] sm:$0xff] }
 0x2de   :  { %v12445_v36 = vpack.c.bf16 %v9491_v32, %v9490_v31  ;;  %v9522_v32 = vld [vmem:[%s17266_s3 + $0x1680] sm:$0xff] }
 0x2df   :  { %v9576_v23 = vld [vmem:[%s17266_s3 + $0x1800] sm:$0xff] }
 0x2e0   :  { %12390 = vmatpush3.bf16.msra.mxu1 %v12389_v38  ;;  %v15030_v45 = vpop.f32.mrb[32].mxu1  ;;  %v12447_v38 = vpack.c.bf16 %v9509_v35, %v9508_v33  ;;  %v9523_v33 = vld [vmem:[%s17266_s3 + $0x1688] sm:$0xff] }
 0x2e1   :  { %v2270_v26 = vpop.f32.mrb[33].mxu1  ;;  %12392 = vmatprep.subr.bf16.mxu1 %v12391_v39  ;;  %v9492_v39 = vld [vmem:[%s17266_s3 + $0x1590] sm:$0xff]  ;;  %v12475_v35 = vpack.c.bf16 %v9523_v33, %v9522_v32  ;;  %v9577_v32 = vld [vmem:[%s17266_s3 + $0x1808] sm:$0xff] }
 0x2e2   :  { %v12449_v44 = vpack.c.bf16 %v9493_v41, %v9492_v39  ;;  %v9494_v26 = vld [vmem:[%s17266_s3 + $0x15a0] sm:$0xff]  ;;  %v9578_v33 = vld [vmem:[%s17266_s3 + $0x1810] sm:$0xff] }
 0x2e3   :  { %v9526_v41 = vld [vmem:[%s17266_s3 + $0x16a0] sm:$0xff] }
 0x2e4   :  { %12394 = vmatpush3.bf16.msra.mxu1 %v12393_v46  ;;  %v15044_v57 = vpop.f32.mrb[34].mxu1  ;;  %v12451_v46 = vpack.c.bf16 %v9511_v43, %v9510_v42  ;;  %v9527_v42 = vld [vmem:[%s17266_s3 + $0x16a8] sm:$0xff] }
 0x2e5   :  { %v2275_v37 = vpop.f32.mrb[35].mxu1  ;;  %12396 = vmatprep.subr.bf16.mxu1 %v12395_v47  ;;  %v9495_v47 = vld [vmem:[%s17266_s3 + $0x15a8] sm:$0xff]  ;;  %v12481_v43 = vpack.c.bf16 %v9527_v42, %v9526_v41  ;;  %v9579_v41 = vld [vmem:[%s17266_s3 + $0x1818] sm:$0xff]  ;;  %v9580_v42 = vld [vmem:[%s17266_s3 + $0x1820] sm:$0xff] }
 0x2e6   :  { %v12453_v53 = vpack.c.bf16 %v9495_v47, %v9494_v26  ;;  %v9497_v37 = vld [vmem:[%s17266_s3 + $0x15b8] sm:$0xff] }
 0x2e8   :  { %12398 = vmatpush3.bf16.msra.mxu1 %v12397_v58  ;;  %v9496_v58 = vld [vmem:[%s17266_s3 + $0x15b0] sm:$0xff] }
 0x2e9   :  { %12400 = vmatprep.subr.bf16.mxu1 %v12399_v59  ;;  %v12457_v0 = vpack.c.bf16 %v9497_v37, %v9496_v58 }
 0x2ec   :  { %12402 = vmatpush3.bf16.msra.mxu1 %v12401_v1  ;;  %v12459_v1 = vpack.c.bf16 %v9515_v61, %v9514_v60  ;;  %v12487_v60 = vpack.c.bf16 %v9531_v51, %v9530_v48  ;;  %v9581_v48 = vld [vmem:[%s17266_s3 + $0x1828] sm:$0xff]  ;;  %v9582_v51 = vld [vmem:[%s17266_s3 + $0x1830] sm:$0xff] }
 0x2ed   :  { %12404 = vmatprep.subr.bf16.mxu1 %v12403_v2  ;;  %v9498_v2 = vld [vmem:[%s17266_s3 + $0x15c0] sm:$0xff] }
 0x2f0   :  { %12406 = vmatpush3.bf16.msra.mxu1 %v12405_v12 }
 0x2f1   :  { %12408 = vmatprep.subr.bf16.mxu1 %v12407_v13  ;;  %v12461_v13 = vpack.c.bf16 %v9499_v3, %v9498_v2 }
 0x2f4   :  { %12410 = vmatpush3.bf16.msra.mxu1 %v12409_v20  ;;  %v9519_v20 = vld [vmem:[%s17266_s3 + $0x1668] sm:$0xff] }
 0x2f5   :  { %12440 = vmatprep.subr.bf16.mxu1 %v12439_v21  ;;  %v12465_v21 = vpack.c.bf16 %v9501_v18, %v9500_v17  ;;  %v12467_v22 = vpack.c.bf16 %v9519_v20, %v9518_v19  ;;  %v8880_v18 = vld [vmem:[%s17268_s4 + $0x28] sm:$0xff] }
 0x2f6   :  { %v8917_v20 = vld [vmem:[%s17266_s3 + $0x5a8] sm:$0xff] }
 0x2f7   :  { %4194 = vmatmul.mubr.f32.vlgmr.msra.gmra.mrb[60].mxu1 %v13706_v54 }
 0x2f8   :  { %4198 = vmatprep.mubr.f32.mxu1 %v13732_v6  ;;  %12442 = vmatpush3.bf16.msra.mxu1 %v12441_v28  ;;  %v9520_v28 = vld [vmem:[%s17266_s3 + $0x1670] sm:$0xff] }
 0x2f9   :  { %12444 = vmatprep.subr.bf16.mxu1 %v12443_v29  ;;  %v9521_v29 = vld [vmem:[%s17266_s3 + $0x1678] sm:$0xff] }
 0x2fa   :  { %v12472_v31 = vpack.c.bf16 %v9521_v29, %v9520_v28  ;;  %v8919_v29 = vld [vmem:[%s17266_s3 + $0x5b8] sm:$0xff] }
 0x2fb   :  { %4199 = vmatmul.mubr.f32.gmra.mrb[62].mxu1 %v13735_v8 }
 0x2fc   :  { %12446 = vmatpush3.bf16.msra.mxu1 %v12445_v36  ;;  %4479 = vmatprep.mubr.f32.mxu1 %v13704_v50  ;;  %v9524_v36 = vld [vmem:[%s17266_s3 + $0x1690] sm:$0xff] }
 0x2fd   :  { %12448 = vmatprep.subr.bf16.mxu1 %v12447_v38  ;;  %v9525_v38 = vld [vmem:[%s17266_s3 + $0x1698] sm:$0xff] }
 0x2fe   :  { %v12478_v39 = vpack.c.bf16 %v9525_v38, %v9524_v36  ;;  %v12535_v36 = vpack.c.bf16 %v9578_v33, %v9577_v32  ;;  %v8921_v38 = vld [vmem:[%s17266_s3 + $0x5c8] sm:$0xff] }
 0x300   :  { %12450 = vmatpush3.bf16.msra.mxu1 %v12449_v44  ;;  %v9528_v44 = vld [vmem:[%s17266_s3 + $0x16b0] sm:$0xff] }
 0x301   :  { %12452 = vmatprep.subr.bf16.mxu1 %v12451_v46  ;;  %v9529_v46 = vld [vmem:[%s17266_s3 + $0x16b8] sm:$0xff] }
 0x302   :  { %v15140_v59 = vpop.f32.mrb[36].mxu1  ;;  %v12484_v26 = vpack.c.bf16 %v9529_v46, %v9528_v44  ;;  %v12538_v44 = vpack.c.bf16 %v9580_v42, %v9579_v41  ;;  %v8923_v46 = vld [vmem:[%s17266_s3 + $0x5d8] sm:$0xff] }
 0x303   :  { %v2556_v63 = vpop.f32.mrb[37].mxu1 }
 0x304   :  { %12454 = vmatpush3.bf16.msra.mxu1 %v12453_v53  ;;  %v9532_v63 = vld [vmem:[%s17266_s3 + $0x16d0] sm:$0xff] }
 0x305   :  { %12456 = vmatprep.subr.bf16.mxu1 %v12455_v56 }
 0x307   :  { %v15160_v10 = vpop.f32.mrb[38].mxu1 }
 0x308   :  { %12458 = vmatpush3.bf16.msra.mxu1 %v12457_v0  ;;  %v2561_v12 = vpop.f32.mrb[39].mxu1  ;;  %v9533_v0 = vld [vmem:[%s17266_s3 + $0x16d8] sm:$0xff] }
 0x309   :  { %12460 = vmatprep.subr.bf16.mxu1 %v12459_v1  ;;  %v12490_v5 = vpack.c.bf16 %v9533_v0, %v9532_v63  ;;  %v9535_v12 = vld [vmem:[%s17266_s3 + $0x16e8] sm:$0xff]  ;;  %v9584_v63 = vld [vmem:[%s17266_s3 + $0x1840] sm:$0xff] }
 0x30a   :  { %v12493_v17 = vpack.c.bf16 %v9535_v12, %v9534_v7  ;;  %v9586_v7 = vld [vmem:[%s17266_s3 + $0x1850] sm:$0xff] }
 0x30c   :  { %12462 = vmatpush3.bf16.msra.mxu1 %v12461_v13 }
 0x30d   :  { %12464 = vmatprep.subr.bf16.mxu1 %v12463_v14  ;;  %v8915_v14 = vld [vmem:[%s17266_s3 + $0x598] sm:$0xff] }
 0x310   :  { %12466 = vmatpush3.bf16.msra.mxu1 %v12465_v21  ;;  %v8918_v21 = vld [vmem:[%s17266_s3 + $0x5b0] sm:$0xff] }
 0x311   :  { %12468 = vmatprep.subr.bf16.mxu1 %v12467_v22  ;;  %v9575_v22 = vld [vmem:[%s17266_s3 + $0x17f8] sm:$0xff] }
 0x312   :  { %v12532_v28 = vpack.c.bf16 %v9576_v23, %v9575_v22 }
 0x314   :  { %12470 = vmatpush3.bf16.msra.mxu1 %v12469_v27  ;;  %v11815_v27 = vpack.c.bf16 %v8918_v21, %v8917_v20  ;;  %v9588_v20 = vld [vmem:[%s17266_s3 + $0x1860] sm:$0xff] }
 0x315   :  { %12471 = vmatprep.subr.bf16.mxu1 %v12998_v11 }
 0x317   :  { %4480 = vmatmul.mubr.f32.vlgmr.msra.gmra.mrb[64].mxu1 %v13706_v54 }
 0x318   :  { %4484 = vmatprep.mubr.f32.mxu1 %v13732_v6  ;;  %12473 = vmatpush1.bf16.msra.mxu1 %v12472_v31  ;;  %v8920_v31 = vld [vmem:[%s17266_s3 + $0x5c0] sm:$0xff] }
 0x319   :  { %12474 = vmatprep.subr.bf16.mxu1 %v12998_v11 }
 0x31b   :  { %4485 = vmatmul.mubr.f32.gmra.mrb[66].mxu1 %v13735_v8 }
 0x31c   :  { %12476 = vmatpush1.bf16.msra.mxu1 %v12475_v35  ;;  %9537 = vmatprep.mubr.msk.f32.mxu1 %vm408_vm0, %v13708_v55  ;;  %v11818_v35 = vpack.c.bf16 %v8920_v31, %v8919_v29  ;;  %v9591_v31 = vld [vmem:[%s17266_s3 + $0x1878] sm:$0xff] }
 0x31d   :  { %12477 = vmatprep.subr.bf16.mxu1 %v12998_v11 }
 0x320   :  { %12479 = vmatpush1.bf16.msra.mxu1 %v12478_v39  ;;  %v8922_v39 = vld [vmem:[%s17266_s3 + $0x5d0] sm:$0xff] }
 0x321   :  { %12480 = vmatprep.subr.bf16.mxu1 %v12998_v11 }
 0x324   :  { %12482 = vmatpush1.bf16.msra.mxu1 %v12481_v43  ;;  %v11821_v43 = vpack.c.bf16 %v8922_v39, %v8921_v38 }
 0x325   :  { %v15219_v47 = vpop.f32.mrb[40].mxu1  ;;  %12483 = vmatprep.subr.bf16.mxu1 %v12998_v11 }
 0x326   :  { %v2842_v53 = vpop.f32.mrb[41].mxu1 }
 0x327   :  { %v1124_v56 = vpop.f32.mrb[14].mxu0 }
 0x328   :  { %v1125_v58 = vadd.f32 %v14559_v16, %v1124_v56  ;;  %12485 = vmatpush1.bf16.msra.mxu1 %v12484_v26  ;;  %v1126_v37 = vpop.f32.mrb[15].mxu0  ;;  %v8924_v26 = vld [vmem:[%s17266_s3 + $0x5e0] sm:$0xff]  ;;  %v12541_v56 = vpack.c.bf16 %v9582_v51, %v9581_v48 }
 0x329   :  { %v15229_v61 = vpop.f32.mrb[42].mxu1  ;;  %12486 = vmatprep.subr.bf16.mxu1 %v12998_v11  ;;  %v11824_v53 = vpack.c.bf16 %v8924_v26, %v8923_v46  ;;  %v8926_v37 = vld [vmem:[%s17266_s3 + $0x5f0] sm:$0xff] }
 0x32a   :  { %v2847_v1 = vpop.f32.mrb[43].mxu1 }
 0x32b   :  { %v1129_v2 = vpop.f32.mrb[16].mxu0 }
 0x32c   :  { %v1130_v3 = vadd.f32 %v14575_v25, %v1129_v2  ;;  %12488 = vmatpush1.bf16.msra.mxu1 %v12487_v60  ;;  %v1131_v16 = vpop.f32.mrb[17].mxu0  ;;  %v8916_v25 = vld [vmem:[%s17266_s3 + $0x5a0] sm:$0xff]  ;;  %v9583_v60 = vld [vmem:[%s17266_s3 + $0x1838] sm:$0xff] }
 0x32d   :  { %12489 = vmatprep.subr.bf16.mxu1 %v12998_v11  ;;  %v11812_v19 = vpack.c.bf16 %v8916_v25, %v8915_v14  ;;  %v12544_v1 = vpack.c.bf16 %v9584_v63, %v9583_v60  ;;  %v8927_v2 = vld [vmem:[%s17266_s3 + $0x5f8] sm:$0xff]  ;;  %v8929_v25 = vld [vmem:[%s17266_s3 + $0x608] sm:$0xff] }
 0x32e   :  { %v11775_v13 = vpack.c.bf16 %v1130_v3, %v1125_v58  ;;  %v8925_v58 = vld [vmem:[%s17266_s3 + $0x5e8] sm:$0xff]  ;;  %v8928_v3 = vld [vmem:[%s17266_s3 + $0x600] sm:$0xff] }
 0x32f   :  { %v11827_v0 = vpack.c.bf16 %v8926_v37, %v8925_v58  ;;  %v8934_v58 = vld [vmem:[%s17268_s4 + $0x30] sm:$0xff] }
 0x330   :  { %12491 = vmatpush1.bf16.msra.mxu1 %v12490_v5  ;;  %11776 = vmatprep.subr.bf16.mxu0 %v11775_v13  ;;  %v9585_v5 = vld [vmem:[%s17266_s3 + $0x1848] sm:$0xff] }
 0x331   :  { %11778 = vmatpush3.bf16.msra.mxu0 %v11775_v13  ;;  %12492 = vmatprep.subr.bf16.mxu1 %v12998_v11  ;;  %v11830_v13 = vpack.c.bf16 %v8928_v3, %v8927_v2  ;;  %v12547_v14 = vpack.c.bf16 %v9586_v7, %v9585_v5 }
 0x332   :  { %11811 = vmatprep.subr.bf16.mxu0 %v12998_v11 }
 0x334   :  { %12494 = vmatpush1.bf16.msra.mxu1 %v12493_v17  ;;  %10843 = vmatmul.mubr.msk.f32.vlgmr.msra.gmra.mrb[12].mxu0 %vm770_vm1, %v8880_v18  ;;  %v8930_v17 = vld [vmem:[%s17266_s3 + $0x610] sm:$0xff] }
 0x335   :  { %11813 = vmatpush1.bf16.msra.mxu0 %v11812_v19  ;;  %8932 = vmatprep.mubr.msk.f32.mxu0 %vm408_vm0, %v13708_v55  ;;  %v9587_v19 = vld [vmem:[%s17266_s3 + $0x1858] sm:$0xff]  ;;  %v11833_v22 = vpack.c.bf16 %v8930_v17, %v8929_v25 }
 0x336   :  { %4522 = vmatprep.subr.mxu1 %v12999_v30  ;;  %11814 = vmatprep.subr.bf16.mxu0 %v12998_v11  ;;  %v12550_v23 = vpack.c.bf16 %v9588_v20, %v9587_v19 }
 0x338   :  { %4523 = vmatpush1.msra.mxu1 %v9536_v24  ;;  %v9589_v24 = vld [vmem:[%s17266_s3 + $0x1868] sm:$0xff] }
 0x339   :  { %4555 = vmatmul.mubr.f32.vlgmr.msra.gmra.mrb[68].mxu1 %v13702_v49  ;;  %12531 = vmatprep.subr.bf16.mxu1 %v12998_v11 }
 0x33a   :  { %11816 = vmatpush1.bf16.msra.mxu0 %v11815_v27  ;;  %9538 = vmatprep.mubr.msk.f32.mxu1 %vm408_vm0, %v13737_v9  ;;  %v9590_v27 = vld [vmem:[%s17266_s3 + $0x1870] sm:$0xff] }
 0x33b   :  { %12533 = vmatpush1.bf16.msra.mxu1 %v12532_v28  ;;  %11817 = vmatprep.subr.bf16.mxu0 %v12998_v11  ;;  %v8931_v28 = vld [vmem:[%s17266_s3 + $0x618] sm:$0xff]  ;;  %v12553_v29 = vpack.c.bf16 %v9590_v27, %v9589_v24 }
 0x33c   :  { %12534 = vmatprep.subr.bf16.mxu1 %v12998_v11 }
 0x33d   :  { %4560 = vmatmul.mubr.f32.gmra.mrb[70].mxu1 %v13748_v15 }
 0x33e   :  { %11819 = vmatpush1.bf16.msra.mxu0 %v11818_v35  ;;  %9592 = vmatprep.mubr.msk.f32.mxu1 %vm408_vm0, %v13708_v55 }
 0x33f   :  { %12536 = vmatpush1.bf16.msra.mxu1 %v12535_v36  ;;  %11820 = vmatprep.subr.bf16.mxu0 %v12998_v11 }
 0x340   :  { %12537 = vmatprep.subr.bf16.mxu1 %v12998_v11 }
 0x342   :  { %11822 = vmatpush1.bf16.msra.mxu0 %v11821_v43 }
 0x343   :  { %12539 = vmatpush1.bf16.msra.mxu1 %v12538_v44  ;;  %11823 = vmatprep.subr.bf16.mxu0 %v12998_v11 }
 0x344   :  { %12540 = vmatprep.subr.bf16.mxu1 %v12998_v11 }
 0x346   :  { %11825 = vmatpush1.bf16.msra.mxu0 %v11824_v53 }
 0x347   :  { %12542 = vmatpush1.bf16.msra.mxu1 %v12541_v56  ;;  %11826 = vmatprep.subr.bf16.mxu0 %v12998_v11 }
 0x348   :  { %v15345_v16 = vpop.f32.mrb[44].mxu1  ;;  %12543 = vmatprep.subr.bf16.mxu1 %v12998_v11 }
 0x349   :  { %v3128_v12 = vpop.f32.mrb[45].mxu1 }
 0x34a   :  { %11828 = vmatpush1.bf16.msra.mxu0 %v11827_v0 }
 0x34b   :  { %12545 = vmatpush1.bf16.msra.mxu1 %v12544_v1  ;;  %11829 = vmatprep.subr.bf16.mxu0 %v12998_v11 }
 0x34c   :  { %v15361_v18 = vpop.f32.mrb[46].mxu1  ;;  %12546 = vmatprep.subr.bf16.mxu1 %v12998_v11 }
 0x34d   :  { %v3133_v21 = vpop.f32.mrb[47].mxu1 }
 0x34e   :  { %11831 = vmatpush1.bf16.msra.mxu0 %v11830_v13 }
 0x34f   :  { %12548 = vmatpush1.bf16.msra.mxu1 %v12547_v14  ;;  %11832 = vmatprep.subr.bf16.mxu0 %v12998_v11 }
 0x350   :  { %12549 = vmatprep.subr.bf16.mxu1 %v12998_v11 }
 0x352   :  { %11834 = vmatpush1.bf16.msra.mxu0 %v11833_v22 }
 0x353   :  { %12551 = vmatpush1.bf16.msra.mxu1 %v12550_v23  ;;  %1376 = vmatprep.subr.mxu0 %v12999_v30 }
 0x354   :  { %12552 = vmatprep.subr.bf16.mxu1 %v12998_v11 }
 0x356   :  { %1377 = vmatpush1.msra.mxu0 %v8931_v28 }
 0x357   :  { %12554 = vmatpush1.bf16.msra.mxu1 %v12553_v29  ;;  %1409 = vmatmul.mubr.f32.vlgmr.msra.gmra.mrb[18].mxu0 %v13702_v49 }
 0x358   :  { %8933 = vmatprep.mubr.msk.f32.mxu0 %vm408_vm0, %v13737_v9  ;;  %4808 = vmatprep.subr.mxu1 %v12999_v30 }
 0x35b   :  { %4809 = vmatpush1.msra.mxu1 %v9591_v31  ;;  %1414 = vmatmul.mubr.f32.gmra.mrb[20].mxu0 %v13748_v15 }
 0x35c   :  { %4841 = vmatmul.mubr.f32.vlgmr.msra.gmra.mrb[72].mxu1 %v13702_v49  ;;  %10849 = vmatprep.mubr.msk.f32.mxu0 %vm770_vm1, %v8934_v58 }
 0x35d   :  { %9593 = vmatprep.mubr.msk.f32.mxu1 %vm408_vm0, %v13737_v9 }
 0x360   :  { %4846 = vmatmul.mubr.f32.gmra.mrb[74].mxu1 %v13748_v15 }
 0x36a   :  { %v15395_v32 = vpop.f32.mrb[48].mxu1 }
 0x36b   :  { %v3414_v33 = vpop.f32.mrb[49].mxu1 }
 0x36e   :  { %v15397_v35 = vpop.f32.mrb[50].mxu1 }
 0x36f   :  { %v3419_v36 = vpop.f32.mrb[51].mxu1 }
 0x38a   :  { %v10358_v38 = vpop.f32.mrb[52].mxu1 }
 0x38b   :  { %v10359_v39 = vpop.f32.mrb[53].mxu1 }
 0x38c   :  { %v15399_v41 = vadd.f32 %v10359_v39, %v10358_v38 }
 0x38e   :  { %v10361_v42 = vpop.f32.mrb[54].mxu1 }
 0x38f   :  { %v10362_v43 = vpop.f32.mrb[55].mxu1 }
 0x390   :  { %v15401_v44 = vadd.f32 %v10362_v43, %v10361_v42  ;;  %v8970_v42 = vld [vmem:[%s17266_s3 + $0x720] sm:$0xff]  ;;  %v8971_v43 = vld [vmem:[%s17266_s3 + $0x728] sm:$0xff] }
 0x3aa   :  { %v10400_v46 = vpop.f32.mrb[56].mxu1 }
 0x3ab   :  { %v10401_v26 = vpop.f32.mrb[57].mxu1 }
 0x3ac   :  { %v15403_v48 = vadd.f32 %v10401_v26, %v10400_v46  ;;  %v11872_v26 = vpack.c.bf16 %v8971_v43, %v8970_v42 }
 0x3ae   :  { %v10403_v51 = vpop.f32.mrb[58].mxu1 }
 0x3af   :  { %v10404_v53 = vpop.f32.mrb[59].mxu1 }
 0x3b0   :  { %v15405_v56 = vadd.f32 %v10404_v53, %v10403_v51  ;;  %v8972_v51 = vld [vmem:[%s17266_s3 + $0x730] sm:$0xff]  ;;  %v8973_v53 = vld [vmem:[%s17266_s3 + $0x738] sm:$0xff] }
 0x3b1   :  { %v11875_v58 = vpack.c.bf16 %v8973_v53, %v8972_v51  ;;  %v9048_v53 = vld [vmem:[%s17266_s3 + $0x930] sm:$0xff] }
 0x3ca   :  { %v10442_v37 = vpop.f32.mrb[60].mxu1 }
 0x3cb   :  { %v10443_v60 = vpop.f32.mrb[61].mxu1 }
 0x3cc   :  { %v15411_v63 = vadd.f32 %v10443_v60, %v10442_v37  ;;  %v8974_v37 = vld [vmem:[%s17266_s3 + $0x740] sm:$0xff]  ;;  %v8975_v60 = vld [vmem:[%s17266_s3 + $0x748] sm:$0xff] }
 0x3ce   :  { %v10445_v0 = vpop.f32.mrb[62].mxu1 }
 0x3cf   :  { %v10446_v1 = vpop.f32.mrb[63].mxu1 }
 0x3d0   :  { %v15413_v2 = vadd.f32 %v10446_v1, %v10445_v0  ;;  %v11878_v0 = vpack.c.bf16 %v8975_v60, %v8974_v37  ;;  %v8976_v1 = vld [vmem:[%s17266_s3 + $0x750] sm:$0xff]  ;;  %v9066_v37 = vld [vmem:[%s17266_s3 + $0x9c0] sm:$0xff]  ;;  %v9067_v60 = vld [vmem:[%s17266_s3 + $0x9c8] sm:$0xff] }
 0x3ea   :  { %v10484_v3 = vpop.f32.mrb[64].mxu1 }
 0x3eb   :  { %v10485_v5 = vpop.f32.mrb[65].mxu1 }
 0x3ec   :  { %v10486_v7 = vadd.f32 %v10485_v5, %v10484_v3  ;;  %v8977_v3 = vld [vmem:[%s17266_s3 + $0x758] sm:$0xff] }
 0x3ed   :  { %v11881_v5 = vpack.c.bf16 %v8977_v3, %v8976_v1  ;;  %v11963_v1 = vpack.c.bf16 %v9067_v60, %v9066_v37  ;;  %v9050_v3 = vld [vmem:[%s17266_s3 + $0x940] sm:$0xff]  ;;  %v9060_v37 = vld [vmem:[%s17266_s3 + $0x990] sm:$0xff]  ;;  %v9061_v60 = vld [vmem:[%s17266_s3 + $0x998] sm:$0xff] }
 0x3ee   :  { %v10487_v12 = vpop.f32.mrb[66].mxu1 }
 0x3ef   :  { %v10488_v13 = vpop.f32.mrb[67].mxu1 }
 0x3f0   :  { %v10489_v14 = vadd.f32 %v10488_v13, %v10487_v12  ;;  %v8979_v12 = vld [vmem:[%s17266_s3 + $0x768] sm:$0xff] }
 0x40c   :  { %v4556_v25 = vpop.f32.mrb[68].mxu1 }
 0x40d   :  { %v4557_v17 = vadd.f32 %v10486_v7, %v4556_v25  ;;  %v4558_v19 = vpop.f32.mrb[69].mxu1  ;;  %v8978_v7 = vld [vmem:[%s17266_s3 + $0x760] sm:$0xff]  ;;  %v8981_v25 = vld [vmem:[%s17266_s3 + $0x778] sm:$0xff] }
 0x40e   :  { %v11884_v13 = vpack.c.bf16 %v8979_v12, %v8978_v7  ;;  %v8982_v19 = vld [vmem:[%s17266_s3 + $0x780] sm:$0xff]  ;;  %v9068_v7 = vld [vmem:[%s17266_s3 + $0x9d0] sm:$0xff]  ;;  %v9069_v12 = vld [vmem:[%s17266_s3 + $0x9d8] sm:$0xff] }
 0x410   :  { %v4561_v20 = vpop.f32.mrb[70].mxu1 }
 0x411   :  { %v4562_v21 = vadd.f32 %v10489_v14, %v4561_v20  ;;  %v4563_v22 = vpop.f32.mrb[71].mxu1  ;;  %v8980_v14 = vld [vmem:[%s17266_s3 + $0x770] sm:$0xff]  ;;  %v8983_v20 = vld [vmem:[%s17266_s3 + $0x788] sm:$0xff] }
 0x412   :  { %v8984_v22 = vld [vmem:[%s17266_s3 + $0x790] sm:$0xff] }
 0x413   :  { %v15415_v23 = vpack.c.bf16 %v4562_v21, %v4557_v17  ;;  %v11887_v17 = vpack.c.bf16 %v8981_v25, %v8980_v14  ;;  %v11890_v21 = vpack.c.bf16 %v8983_v20, %v8982_v19  ;;  %v11967_v14 = vpack.c.bf16 %v9069_v12, %v9068_v7  ;;  %v9052_v25 = vld [vmem:[%s17266_s3 + $0x950] sm:$0xff]  ;;  %v9070_v19 = vld [vmem:[%s17266_s3 + $0x9e0] sm:$0xff]  ;;  %v9071_v20 = vld [vmem:[%s17266_s3 + $0x9e8] sm:$0xff] }
 0x414   :  { %v9063_v7 = vld [vmem:[%s17266_s3 + $0x9a8] sm:$0xff] }
 0x42a   :  { %v1410_v24 = vpop.f32.mrb[18].mxu0 }
 0x42b   :  { %v1411_v27 = vadd.f32 %v14659_v62, %v1410_v24  ;;  %v1412_v28 = vpop.f32.mrb[19].mxu0  ;;  %v8985_v24 = vld [vmem:[%s17266_s3 + $0x798] sm:$0xff] }
 0x42c   :  { %v8986_v28 = vld [vmem:[%s17266_s3 + $0x7a0] sm:$0xff] }
 0x42e   :  { %v1415_v29 = vpop.f32.mrb[20].mxu0 }
 0x42f   :  { %v1416_v31 = vadd.f32 %v14668_v4, %v1415_v29  ;;  %v15419_v33 = vpop.f32.mrb[72].mxu1  ;;  %v1417_v36 = vpop.f32.mrb[21].mxu0  ;;  %v8935_v4 = vld [vmem:[%s17268_s4 + $0x38] sm:$0xff]  ;;  %v8989_v29 = vld [vmem:[%s17268_s4 + $0x40] sm:$0xff] }
 0x430   :  { %v4844_v38 = vpop.f32.mrb[73].mxu1 }
 0x431   :  { %v11835_v39 = vpack.c.bf16 %v1416_v31, %v1411_v27  ;;  %v11893_v27 = vpack.c.bf16 %v8985_v24, %v8984_v22  ;;  %v11971_v22 = vpack.c.bf16 %v9071_v20, %v9070_v19  ;;  %v9054_v24 = vld [vmem:[%s17266_s3 + $0x960] sm:$0xff] }
 0x433   :  { %v15427_v46 = vpop.f32.mrb[74].mxu1  ;;  %11836 = vmatprep.subr.bf16.mxu0 %v11835_v39 }
 0x434   :  { %v4849_v62 = vpop.f32.mrb[75].mxu1  ;;  %11838 = vmatpush3.bf16.msra.mxu0 %v11835_v39 }
 0x435   :  { %11871 = vmatprep.subr.bf16.mxu0 %v12998_v11 }
 0x437   :  { %10850 = vmatmul.mubr.msk.f32.vlgmr.msra.gmra.mrb[12].mxu0 %vm770_vm1, %v8935_v4  ;;  %v9064_v4 = vld [vmem:[%s17266_s3 + $0x9b0] sm:$0xff] }
 0x438   :  { %11873 = vmatpush1.bf16.msra.mxu0 %v11872_v26  ;;  %8987 = vmatprep.mubr.msk.f32.mxu0 %vm408_vm0, %v13708_v55  ;;  %v9065_v26 = vld [vmem:[%s17266_s3 + $0x9b8] sm:$0xff] }
 0x439   :  { %11874 = vmatprep.subr.bf16.mxu0 %v12998_v11  ;;  %v11959_v51 = vpack.c.bf16 %v9065_v26, %v9064_v4  ;;  %v9058_v26 = vld [vmem:[%s17266_s3 + $0x980] sm:$0xff] }
 0x43c   :  { %11876 = vmatpush1.bf16.msra.mxu0 %v11875_v58  ;;  %v9049_v58 = vld [vmem:[%s17266_s3 + $0x938] sm:$0xff] }
 0x43d   :  { %11877 = vmatprep.subr.bf16.mxu0 %v12998_v11 }
 0x440   :  { %11879 = vmatpush1.bf16.msra.mxu0 %v11878_v0  ;;  %v11961_v0 = vpack.c.bf16 %v9049_v58, %v9048_v53 }
 0x441   :  { %11880 = vmatprep.subr.bf16.mxu0 %v12998_v11 }
 0x444   :  { %11882 = vmatpush1.bf16.msra.mxu0 %v11881_v5  ;;  %v9051_v5 = vld [vmem:[%s17266_s3 + $0x948] sm:$0xff] }
 0x445   :  { %11883 = vmatprep.subr.bf16.mxu0 %v12998_v11 }
 0x448   :  { %11885 = vmatpush1.bf16.msra.mxu0 %v11884_v13  ;;  %v11965_v13 = vpack.c.bf16 %v9051_v5, %v9050_v3  ;;  %v9062_v5 = vld [vmem:[%s17266_s3 + $0x9a0] sm:$0xff] }
 0x449   :  { %11886 = vmatprep.subr.bf16.mxu0 %v12998_v11  ;;  %v11989_v12 = vpack.c.bf16 %v9063_v7, %v9062_v5  ;;  %v9127_v5 = vld [vmem:[%s17266_s3 + $0xb78] sm:$0xff]  ;;  %v9128_v7 = vld [vmem:[%s17266_s3 + $0xb80] sm:$0xff] }
 0x44c   :  { %11888 = vmatpush1.bf16.msra.mxu0 %v11887_v17  ;;  %v9053_v17 = vld [vmem:[%s17266_s3 + $0x958] sm:$0xff] }
 0x44d   :  { %11889 = vmatprep.subr.bf16.mxu0 %v12998_v11 }
 0x450   :  { %11891 = vmatpush1.bf16.msra.mxu0 %v11890_v21  ;;  %v11969_v21 = vpack.c.bf16 %v9053_v17, %v9052_v25 }
 0x451   :  { %11892 = vmatprep.subr.bf16.mxu0 %v12998_v11 }
 0x454   :  { %11894 = vmatpush1.bf16.msra.mxu0 %v11893_v27  ;;  %v9055_v27 = vld [vmem:[%s17266_s3 + $0x968] sm:$0xff] }
 0x455   :  { %1662 = vmatprep.subr.mxu0 %v12999_v30 }
 0x458   :  { %1663 = vmatpush1.msra.mxu0 %v8986_v28  ;;  %v9072_v28 = vld [vmem:[%s17266_s3 + $0x9f0] sm:$0xff] }
 0x459   :  { %1695 = vmatmul.mubr.f32.vlgmr.msra.gmra.mrb[22].mxu0 %v13702_v49 }
 0x45a   :  { %8988 = vmatprep.mubr.msk.f32.mxu0 %vm408_vm0, %v13737_v9 }
 0x45d   :  { %1700 = vmatmul.mubr.f32.gmra.mrb[24].mxu0 %v13748_v15 }
 0x45e   :  { %10856 = vmatprep.mubr.msk.f32.mxu0 %vm770_vm1, %v8989_v29  ;;  %v9073_v29 = vld [vmem:[%s17266_s3 + $0x9f8] sm:$0xff] }
 0x52c   :  { %v1696_v31 = vpop.f32.mrb[22].mxu0 }
 0x52d   :  { %v1697_v36 = vadd.f32 %v14722_v34, %v1696_v31  ;;  %v1698_v38 = vpop.f32.mrb[23].mxu0  ;;  %v8990_v34 = vld [vmem:[%s17268_s4 + $0x48] sm:$0xff]  ;;  %v11973_v31 = vpack.c.bf16 %v9055_v27, %v9054_v24  ;;  %v9119_v24 = vld [vmem:[%s17266_s3 + $0xb38] sm:$0xff]  ;;  %v9120_v27 = vld [vmem:[%s17266_s3 + $0xb40] sm:$0xff] }
 0x52e   :  { %v9056_v38 = vld [vmem:[%s17266_s3 + $0x970] sm:$0xff] }
 0x530   :  { %v1701_v39 = vpop.f32.mrb[24].mxu0 }
 0x531   :  { %v1702_v42 = vadd.f32 %v14731_v40, %v1701_v39  ;;  %v1703_v43 = vpop.f32.mrb[25].mxu0  ;;  %v9044_v40 = vld [vmem:[%s17268_s4 + $0x50] sm:$0xff]  ;;  %v9057_v39 = vld [vmem:[%s17266_s3 + $0x978] sm:$0xff] }
 0x532   :  { %v9075_v43 = vld [vmem:[%s17266_s3 + $0xa08] sm:$0xff] }
 0x533   :  { %v11895_v62 = vpack.c.bf16 %v1702_v42, %v1697_v36  ;;  %v11975_v36 = vpack.c.bf16 %v9073_v29, %v9072_v28  ;;  %v9074_v42 = vld [vmem:[%s17266_s3 + $0xa00] sm:$0xff] }
 0x534   :  { %v11979_v4 = vpack.c.bf16 %v9075_v43, %v9074_v42 }
 0x535   :  { %11896 = vmatprep.subr.bf16.mxu0 %v11895_v62 }
 0x536   :  { %11898 = vmatpush3.bf16.msra.mxu0 %v11895_v62  ;;  %v11977_v62 = vpack.c.bf16 %v9057_v39, %v9056_v38  ;;  %v9121_v38 = vld [vmem:[%s17266_s3 + $0xb48] sm:$0xff]  ;;  %v9122_v39 = vld [vmem:[%s17266_s3 + $0xb50] sm:$0xff] }
 0x537   :  { %11956 = vmatprep.subr.bf16.mxu0 %v14940_v52  ;;  %v12023_v43 = vpack.c.bf16 %v9122_v39, %v9121_v38  ;;  %v9133_v38 = vld [vmem:[%s17266_s3 + $0xba8] sm:$0xff]  ;;  %v9134_v39 = vld [vmem:[%s17266_s3 + $0xbb0] sm:$0xff] }
 0x539   :  { %10857 = vmatmul.mubr.msk.f32.vlgmr.msra.gmra.mrb[12].mxu0 %vm770_vm1, %v8990_v34  ;;  %v9059_v34 = vld [vmem:[%s17266_s3 + $0x988] sm:$0xff] }
 0x53a   :  { %11958 = vmatpush3.bf16.msra.mxu0 %v14940_v52  ;;  %10863 = vmatprep.mubr.msk.f32.mxu0 %vm770_vm1, %v9044_v40  ;;  %v9045_v52 = vld [vmem:[%s17268_s4 + $0x58] sm:$0xff]  ;;  %v9076_v40 = vld [vmem:[%s17266_s3 + $0xa10] sm:$0xff]  ;;  %v11981_v53 = vpack.c.bf16 %v9059_v34, %v9058_v26  ;;  %v9124_v34 = vld [vmem:[%s17266_s3 + $0xb60] sm:$0xff] }
 0x53b   :  { %11960 = vmatprep.subr.bf16.mxu0 %v11959_v51  ;;  %v9077_v51 = vld [vmem:[%s17266_s3 + $0xa18] sm:$0xff] }
 0x53c   :  { %v11983_v58 = vpack.c.bf16 %v9077_v51, %v9076_v40  ;;  %v9123_v26 = vld [vmem:[%s17266_s3 + $0xb58] sm:$0xff] }
 0x53d   :  { %v12027_v51 = vpack.c.bf16 %v9124_v34, %v9123_v26  ;;  %v9154_v26 = vld [vmem:[%s17268_s4 + $0x70] sm:$0xff] }
 0x541   :  { %10864 = vmatmul.mubr.msk.f32.vlgmr.msra.gmra.mrb[12].mxu0 %vm770_vm1, %v9045_v52  ;;  %v9078_v52 = vld [vmem:[%s17266_s3 + $0xa20] sm:$0xff] }
 0x542   :  { %11962 = vmatpush3.bf16.msra.mxu0 %v11961_v0  ;;  %2191 = vmatprep.mubr.f32.mxu0 %v13704_v50  ;;  %v9079_v0 = vld [vmem:[%s17266_s3 + $0xa28] sm:$0xff] }
 0x543   :  { %11964 = vmatprep.subr.bf16.mxu0 %v11963_v1  ;;  %v11985_v1 = vpack.c.bf16 %v9061_v60, %v9060_v37  ;;  %v11987_v3 = vpack.c.bf16 %v9079_v0, %v9078_v52  ;;  %v9125_v37 = vld [vmem:[%s17266_s3 + $0xb68] sm:$0xff]  ;;  %v9126_v60 = vld [vmem:[%s17266_s3 + $0xb70] sm:$0xff] }
 0x544   :  { %v12031_v0 = vpack.c.bf16 %v9126_v60, %v9125_v37 }
 0x546   :  { %11966 = vmatpush3.bf16.msra.mxu0 %v11965_v13  ;;  %v9099_v13 = vld [vmem:[%s17268_s4 + $0x60] sm:$0xff] }
 0x547   :  { %11968 = vmatprep.subr.bf16.mxu0 %v11967_v14 }
 0x54a   :  { %11970 = vmatpush3.bf16.msra.mxu0 %v11969_v21 }
 0x54b   :  { %11972 = vmatprep.subr.bf16.mxu0 %v11971_v22 }
 0x54e   :  { %11974 = vmatpush3.bf16.msra.mxu0 %v11973_v31  ;;  %v12019_v31 = vpack.c.bf16 %v9120_v27, %v9119_v24  ;;  %v9114_v24 = vld [vmem:[%s17266_s3 + $0xb10] sm:$0xff]  ;;  %v9131_v27 = vld [vmem:[%s17266_s3 + $0xb98] sm:$0xff] }
 0x54f   :  { %11976 = vmatprep.subr.bf16.mxu0 %v11975_v36  ;;  %v9103_v36 = vld [vmem:[%s17266_s3 + $0xab8] sm:$0xff] }
 0x552   :  { %11978 = vmatpush3.bf16.msra.mxu0 %v11977_v62  ;;  %v9105_v62 = vld [vmem:[%s17266_s3 + $0xac8] sm:$0xff] }
 0x553   :  { %11980 = vmatprep.subr.bf16.mxu0 %v11979_v4  ;;  %v9106_v4 = vld [vmem:[%s17266_s3 + $0xad0] sm:$0xff] }
 0x554   :  { %v12025_v40 = vpack.c.bf16 %v9106_v4, %v9105_v62  ;;  %v9118_v62 = vld [vmem:[%s17266_s3 + $0xb30] sm:$0xff] }
 0x556   :  { %11982 = vmatpush3.bf16.msra.mxu0 %v11981_v53  ;;  %v9107_v53 = vld [vmem:[%s17266_s3 + $0xad8] sm:$0xff] }
 0x557   :  { %11984 = vmatprep.subr.bf16.mxu0 %v11983_v58  ;;  %v9108_v58 = vld [vmem:[%s17266_s3 + $0xae0] sm:$0xff] }
 0x558   :  { %v12029_v52 = vpack.c.bf16 %v9108_v58, %v9107_v53 }
 0x55a   :  { %11986 = vmatpush3.bf16.msra.mxu0 %v11985_v1  ;;  %v9109_v1 = vld [vmem:[%s17266_s3 + $0xae8] sm:$0xff] }
 0x55b   :  { %11988 = vmatprep.subr.bf16.mxu0 %v11987_v3  ;;  %v9110_v3 = vld [vmem:[%s17266_s3 + $0xaf0] sm:$0xff] }
 0x55e   :  { %11990 = vmatpush3.bf16.msra.mxu0 %v11989_v12  ;;  %v12033_v12 = vpack.c.bf16 %v9110_v3, %v9109_v1 }
 0x561   :  { %2192 = vmatmul.mubr.f32.vlgmr.msra.gmra.mrb[26].mxu0 %v13706_v54 }
 0x562   :  { %2196 = vmatprep.mubr.f32.mxu0 %v13732_v6 }
 0x565   :  { %2197 = vmatmul.mubr.f32.gmra.mrb[28].mxu0 %v13735_v8 }
 0x566   :  { %10870 = vmatprep.mubr.msk.f32.mxu0 %vm770_vm1, %v9099_v13  ;;  %v12035_v13 = vpack.c.bf16 %v9128_v7, %v9127_v5  ;;  %v9158_v7 = vld [vmem:[%s17266_s3 + $0xc40] sm:$0xff] }
 0x634   :  { %v10148_v14 = vpop.f32.mrb[26].mxu0 }
 0x635   :  { %v10149_v25 = vpop.f32.mrb[27].mxu0 }
 0x636   :  { %v10150_v17 = vadd.f32 %v10149_v25, %v10148_v14  ;;  %v9111_v14 = vld [vmem:[%s17266_s3 + $0xaf8] sm:$0xff]  ;;  %v9112_v25 = vld [vmem:[%s17266_s3 + $0xb00] sm:$0xff] }
 0x638   :  { %v2269_v19 = vadd.f32 %v10150_v17, %v15030_v45  ;;  %v10151_v20 = vpop.f32.mrb[28].mxu0  ;;  %v9104_v45 = vld [vmem:[%s17266_s3 + $0xac0] sm:$0xff]  ;;  %v9129_v17 = vld [vmem:[%s17266_s3 + $0xb88] sm:$0xff] }
 0x639   :  { %v10152_v21 = vpop.f32.mrb[29].mxu0  ;;  %v12021_v42 = vpack.c.bf16 %v9104_v45, %v9103_v36  ;;  %v9115_v36 = vld [vmem:[%s17266_s3 + $0xb18] sm:$0xff]  ;;  %v9116_v45 = vld [vmem:[%s17266_s3 + $0xb20] sm:$0xff] }
 0x63a   :  { %v10153_v22 = vadd.f32 %v10152_v21, %v10151_v20  ;;  %v12037_v20 = vpack.c.bf16 %v9112_v25, %v9111_v14 }
 0x63c   :  { %v2274_v28 = vadd.f32 %v10153_v22, %v15044_v57  ;;  %v9100_v57 = vld [vmem:[%s17268_s4 + $0x68] sm:$0xff] }
 0x63d   :  { %v9113_v22 = vld [vmem:[%s17266_s3 + $0xb08] sm:$0xff] }
 0x63e   :  { %v12015_v29 = vpack.c.bf16 %v2274_v28, %v2269_v19  ;;  %v9130_v19 = vld [vmem:[%s17266_s3 + $0xb90] sm:$0xff]  ;;  %v9132_v28 = vld [vmem:[%s17266_s3 + $0xba0] sm:$0xff] }
 0x63f   :  { %v12039_v21 = vpack.c.bf16 %v9130_v19, %v9129_v17  ;;  %v9160_v17 = vld [vmem:[%s17266_s3 + $0xc50] sm:$0xff]  ;;  %v9161_v19 = vld [vmem:[%s17266_s3 + $0xc58] sm:$0xff] }
 0x640   :  { %12016 = vmatprep.subr.bf16.mxu0 %v12015_v29 }
 0x641   :  { %12018 = vmatpush3.bf16.msra.mxu0 %v12015_v29  ;;  %v12041_v29 = vpack.c.bf16 %v9114_v24, %v9113_v22  ;;  %v12085_v22 = vpack.c.bf16 %v9161_v19, %v9160_v17  ;;  %v9209_v17 = vld [vmem:[%s17268_s4 + $0x80] sm:$0xff] }
 0x642   :  { %12020 = vmatprep.subr.bf16.mxu0 %v12019_v31  ;;  %v12043_v31 = vpack.c.bf16 %v9132_v28, %v9131_v27  ;;  %v9162_v27 = vld [vmem:[%s17266_s3 + $0xc60] sm:$0xff]  ;;  %v9163_v28 = vld [vmem:[%s17266_s3 + $0xc68] sm:$0xff] }
 0x644   :  { %10871 = vmatmul.mubr.msk.f32.vlgmr.msra.gmra.mrb[12].mxu0 %vm770_vm1, %v9100_v57  ;;  %v12045_v57 = vpack.c.bf16 %v9116_v45, %v9115_v36  ;;  %v12089_v36 = vpack.c.bf16 %v9163_v28, %v9162_v27 }
 0x645   :  { %12022 = vmatpush3.bf16.msra.mxu0 %v12021_v42  ;;  %2477 = vmatprep.mubr.f32.mxu0 %v13704_v50  ;;  %v12047_v42 = vpack.c.bf16 %v9134_v39, %v9133_v38  ;;  %v9164_v38 = vld [vmem:[%s17266_s3 + $0xc70] sm:$0xff]  ;;  %v9165_v39 = vld [vmem:[%s17266_s3 + $0xc78] sm:$0xff] }
 0x646   :  { %12024 = vmatprep.subr.bf16.mxu0 %v12023_v43  ;;  %v9117_v43 = vld [vmem:[%s17266_s3 + $0xb28] sm:$0xff] }
 0x647   :  { %v12049_v4 = vpack.c.bf16 %v9118_v62, %v9117_v43  ;;  %v12093_v43 = vpack.c.bf16 %v9165_v39, %v9164_v38  ;;  %v9213_v39 = vld [vmem:[%s17266_s3 + $0xdc8] sm:$0xff] }
 0x649   :  { %12026 = vmatpush3.bf16.msra.mxu0 %v12025_v40 }
 0x64a   :  { %12028 = vmatprep.subr.bf16.mxu0 %v12027_v51 }
 0x64d   :  { %12030 = vmatpush3.bf16.msra.mxu0 %v12029_v52  ;;  %v9174_v52 = vld [vmem:[%s17266_s3 + $0xcc0] sm:$0xff] }
 0x64e   :  { %12032 = vmatprep.subr.bf16.mxu0 %v12031_v0  ;;  %v9175_v0 = vld [vmem:[%s17266_s3 + $0xcc8] sm:$0xff] }
 0x64f   :  { %v12079_v5 = vpack.c.bf16 %v9175_v0, %v9174_v52  ;;  %v9187_v52 = vld [vmem:[%s17266_s3 + $0xd28] sm:$0xff] }
 0x651   :  { %12034 = vmatpush3.bf16.msra.mxu0 %v12033_v12  ;;  %v9176_v12 = vld [vmem:[%s17266_s3 + $0xcd0] sm:$0xff] }
 0x652   :  { %12036 = vmatprep.subr.bf16.mxu0 %v12035_v13  ;;  %v9177_v13 = vld [vmem:[%s17266_s3 + $0xcd8] sm:$0xff] }
 0x653   :  { %v12083_v25 = vpack.c.bf16 %v9177_v13, %v9176_v12 }
 0x655   :  { %12038 = vmatpush3.bf16.msra.mxu0 %v12037_v20  ;;  %v9178_v20 = vld [vmem:[%s17266_s3 + $0xce0] sm:$0xff] }
 0x656   :  { %12040 = vmatprep.subr.bf16.mxu0 %v12039_v21  ;;  %v9179_v21 = vld [vmem:[%s17266_s3 + $0xce8] sm:$0xff] }
 0x657   :  { %v12087_v24 = vpack.c.bf16 %v9179_v21, %v9178_v20 }
 0x659   :  { %12042 = vmatpush3.bf16.msra.mxu0 %v12041_v29  ;;  %v9180_v29 = vld [vmem:[%s17266_s3 + $0xcf0] sm:$0xff] }
 0x65a   :  { %12044 = vmatprep.subr.bf16.mxu0 %v12043_v31  ;;  %v9181_v31 = vld [vmem:[%s17266_s3 + $0xcf8] sm:$0xff] }
 0x65b   :  { %v12091_v45 = vpack.c.bf16 %v9181_v31, %v9180_v29  ;;  %v9229_v29 = vld [vmem:[%s17266_s3 + $0xe48] sm:$0xff]  ;;  %v9230_v31 = vld [vmem:[%s17266_s3 + $0xe50] sm:$0xff] }
 0x65c   :  { %v12139_v38 = vpack.c.bf16 %v9230_v31, %v9229_v29  ;;  %v9225_v31 = vld [vmem:[%s17266_s3 + $0xe28] sm:$0xff] }
 0x65d   :  { %12046 = vmatpush3.bf16.msra.mxu0 %v12045_v57  ;;  %v9182_v57 = vld [vmem:[%s17266_s3 + $0xd00] sm:$0xff] }
 0x65e   :  { %12048 = vmatprep.subr.bf16.mxu0 %v12047_v42  ;;  %v9183_v42 = vld [vmem:[%s17266_s3 + $0xd08] sm:$0xff] }
 0x65f   :  { %v12095_v62 = vpack.c.bf16 %v9183_v42, %v9182_v57  ;;  %v9231_v57 = vld [vmem:[%s17266_s3 + $0xe58] sm:$0xff]  ;;  %v9232_v42 = vld [vmem:[%s17266_s3 + $0xe60] sm:$0xff] }
 0x661   :  { %12050 = vmatpush3.bf16.msra.mxu0 %v12049_v4  ;;  %v9166_v4 = vld [vmem:[%s17266_s3 + $0xc80] sm:$0xff] }
 0x664   :  { %2478 = vmatmul.mubr.f32.vlgmr.msra.gmra.mrb[30].mxu0 %v13706_v54 }
 0x665   :  { %2482 = vmatprep.mubr.f32.mxu0 %v13732_v6 }
 0x668   :  { %2483 = vmatmul.mubr.f32.gmra.mrb[32].mxu0 %v13735_v8 }
 0x669   :  { %10877 = vmatprep.mubr.msk.f32.mxu0 %vm770_vm1, %v9154_v26  ;;  %v9167_v26 = vld [vmem:[%s17266_s3 + $0xc88] sm:$0xff] }
 0x737   :  { %v10190_v34 = vpop.f32.mrb[30].mxu0 }
 0x738   :  { %v10191_v40 = vpop.f32.mrb[31].mxu0 }
 0x739   :  { %v10192_v51 = vadd.f32 %v10191_v40, %v10190_v34  ;;  %v9184_v34 = vld [vmem:[%s17266_s3 + $0xd10] sm:$0xff]  ;;  %v9185_v40 = vld [vmem:[%s17266_s3 + $0xd18] sm:$0xff] }
 0x73b   :  { %v2555_v53 = vadd.f32 %v10192_v51, %v15140_v59  ;;  %v10193_v58 = vpop.f32.mrb[32].mxu0  ;;  %v9159_v59 = vld [vmem:[%s17266_s3 + $0xc48] sm:$0xff]  ;;  %v12097_v51 = vpack.c.bf16 %v9167_v26, %v9166_v4  ;;  %v9215_v4 = vld [vmem:[%s17266_s3 + $0xdd8] sm:$0xff]  ;;  %v9216_v26 = vld [vmem:[%s17266_s3 + $0xde0] sm:$0xff] }
 0x73c   :  { %v10194_v37 = vpop.f32.mrb[33].mxu0  ;;  %v12081_v14 = vpack.c.bf16 %v9159_v59, %v9158_v7  ;;  %v9188_v7 = vld [vmem:[%s17266_s3 + $0xd30] sm:$0xff]  ;;  %v9189_v59 = vld [vmem:[%s17266_s3 + $0xd38] sm:$0xff] }
 0x73d   :  { %v10195_v60 = vadd.f32 %v10194_v37, %v10193_v58  ;;  %v9168_v58 = vld [vmem:[%s17266_s3 + $0xc90] sm:$0xff]  ;;  %v9169_v37 = vld [vmem:[%s17266_s3 + $0xc98] sm:$0xff]  ;;  %v12107_v13 = vpack.c.bf16 %v9189_v59, %v9188_v7  ;;  %v9237_v7 = vld [vmem:[%s17266_s3 + $0xe88] sm:$0xff] }
 0x73e   :  { %v12101_v0 = vpack.c.bf16 %v9169_v37, %v9168_v58  ;;  %v9217_v58 = vld [vmem:[%s17266_s3 + $0xde8] sm:$0xff]  ;;  %v9218_v37 = vld [vmem:[%s17266_s3 + $0xdf0] sm:$0xff] }
 0x73f   :  { %v2560_v1 = vadd.f32 %v10195_v60, %v15160_v10  ;;  %v9155_v10 = vld [vmem:[%s17268_s4 + $0x78] sm:$0xff]  ;;  %v9186_v60 = vld [vmem:[%s17266_s3 + $0xd20] sm:$0xff]  ;;  %v9238_v59 = vld [vmem:[%s17266_s3 + $0xe90] sm:$0xff] }
 0x741   :  { %v12075_v3 = vpack.c.bf16 %v2560_v1, %v2555_v53  ;;  %v12099_v53 = vpack.c.bf16 %v9185_v40, %v9184_v34  ;;  %v12103_v1 = vpack.c.bf16 %v9187_v52, %v9186_v60  ;;  %v9233_v34 = vld [vmem:[%s17266_s3 + $0xe68] sm:$0xff]  ;;  %v9234_v40 = vld [vmem:[%s17266_s3 + $0xe70] sm:$0xff]  ;;  %v9235_v60 = vld [vmem:[%s17266_s3 + $0xe78] sm:$0xff] }
 0x742   :  { %v9236_v52 = vld [vmem:[%s17266_s3 + $0xe80] sm:$0xff] }
 0x743   :  { %12076 = vmatprep.subr.bf16.mxu0 %v12075_v3 }
 0x744   :  { %12078 = vmatpush3.bf16.msra.mxu0 %v12075_v3  ;;  %v9170_v3 = vld [vmem:[%s17266_s3 + $0xca0] sm:$0xff] }
 0x745   :  { %12080 = vmatprep.subr.bf16.mxu0 %v12079_v5  ;;  %v9171_v5 = vld [vmem:[%s17266_s3 + $0xca8] sm:$0xff] }
 0x746   :  { %v12105_v12 = vpack.c.bf16 %v9171_v5, %v9170_v3  ;;  %v9219_v3 = vld [vmem:[%s17266_s3 + $0xdf8] sm:$0xff]  ;;  %v9220_v5 = vld [vmem:[%s17266_s3 + $0xe00] sm:$0xff] }
 0x747   :  { %10878 = vmatmul.mubr.msk.f32.vlgmr.msra.gmra.mrb[12].mxu0 %vm770_vm1, %v9155_v10  ;;  %v9172_v10 = vld [vmem:[%s17266_s3 + $0xcb0] sm:$0xff] }
 0x748   :  { %12082 = vmatpush3.bf16.msra.mxu0 %v12081_v14  ;;  %2763 = vmatprep.mubr.f32.mxu0 %v13704_v50  ;;  %v9173_v14 = vld [vmem:[%s17266_s3 + $0xcb8] sm:$0xff] }
 0x749   :  { %12084 = vmatprep.subr.bf16.mxu0 %v12083_v25  ;;  %v12109_v25 = vpack.c.bf16 %v9173_v14, %v9172_v10  ;;  %v9221_v10 = vld [vmem:[%s17266_s3 + $0xe08] sm:$0xff]  ;;  %v9222_v14 = vld [vmem:[%s17266_s3 + $0xe10] sm:$0xff] }
 0x74c   :  { %12086 = vmatpush3.bf16.msra.mxu0 %v12085_v22 }
 0x74d   :  { %12088 = vmatprep.subr.bf16.mxu0 %v12087_v24 }
 0x750   :  { %12090 = vmatpush3.bf16.msra.mxu0 %v12089_v36 }
 0x751   :  { %12092 = vmatprep.subr.bf16.mxu0 %v12091_v45 }
 0x754   :  { %12094 = vmatpush3.bf16.msra.mxu0 %v12093_v43 }
 0x755   :  { %12096 = vmatprep.subr.bf16.mxu0 %v12095_v62  ;;  %v12143_v62 = vpack.c.bf16 %v9232_v42, %v9231_v57  ;;  %v9227_v57 = vld [vmem:[%s17266_s3 + $0xe38] sm:$0xff]  ;;  %v9228_v42 = vld [vmem:[%s17266_s3 + $0xe40] sm:$0xff] }
 0x758   :  { %12098 = vmatpush3.bf16.msra.mxu0 %v12097_v51  ;;  %v12145_v51 = vpack.c.bf16 %v9216_v26, %v9215_v4 }
 0x759   :  { %12100 = vmatprep.subr.bf16.mxu0 %v12099_v53  ;;  %v12147_v53 = vpack.c.bf16 %v9234_v40, %v9233_v34 }
 0x75c   :  { %12102 = vmatpush3.bf16.msra.mxu0 %v12101_v0  ;;  %v12149_v0 = vpack.c.bf16 %v9218_v37, %v9217_v58  ;;  %v9284_v58 = vld [vmem:[%s17266_s3 + $0xfd0] sm:$0xff]  ;;  %v9285_v37 = vld [vmem:[%s17266_s3 + $0xfd8] sm:$0xff] }
 0x75d   :  { %12104 = vmatprep.subr.bf16.mxu0 %v12103_v1  ;;  %v12151_v1 = vpack.c.bf16 %v9236_v52, %v9235_v60 }
 0x760   :  { %12106 = vmatpush3.bf16.msra.mxu0 %v12105_v12  ;;  %v12153_v12 = vpack.c.bf16 %v9220_v5, %v9219_v3  ;;  %v9286_v3 = vld [vmem:[%s17266_s3 + $0xfe0] sm:$0xff]  ;;  %v9287_v5 = vld [vmem:[%s17266_s3 + $0xfe8] sm:$0xff] }
 0x761   :  { %12108 = vmatprep.subr.bf16.mxu0 %v12107_v13  ;;  %v12155_v13 = vpack.c.bf16 %v9238_v59, %v9237_v7  ;;  %v12203_v59 = vpack.c.bf16 %v9287_v5, %v9286_v3  ;;  %v9319_v5 = vld [vmem:[%s17268_s4 + $0xa0] sm:$0xff] }
 0x764   :  { %12110 = vmatpush3.bf16.msra.mxu0 %v12109_v25  ;;  %v9239_v25 = vld [vmem:[%s17266_s3 + $0xe98] sm:$0xff] }
 0x767   :  { %2764 = vmatmul.mubr.f32.vlgmr.msra.gmra.mrb[34].mxu0 %v13706_v54 }
 0x768   :  { %2768 = vmatprep.mubr.f32.mxu0 %v13732_v6 }
 0x76b   :  { %2769 = vmatmul.mubr.f32.gmra.mrb[36].mxu0 %v13735_v8 }
 0x76c   :  { %10884 = vmatprep.mubr.msk.f32.mxu0 %vm770_vm1, %v9209_v17  ;;  %v9240_v17 = vld [vmem:[%s17266_s3 + $0xea0] sm:$0xff] }
 0x83a   :  { %v10232_v19 = vpop.f32.mrb[34].mxu0 }
 0x83b   :  { %v10233_v20 = vpop.f32.mrb[35].mxu0 }
 0x83c   :  { %v10234_v21 = vadd.f32 %v10233_v20, %v10232_v19  ;;  %v12157_v19 = vpack.c.bf16 %v9222_v14, %v9221_v10  ;;  %v12159_v20 = vpack.c.bf16 %v9240_v17, %v9239_v25  ;;  %v9288_v10 = vld [vmem:[%s17266_s3 + $0xff0] sm:$0xff]  ;;  %v9289_v14 = vld [vmem:[%s17266_s3 + $0xff8] sm:$0xff] }
 0x83d   :  { %v12207_v17 = vpack.c.bf16 %v9289_v14, %v9288_v10 }
 0x83e   :  { %v2841_v22 = vadd.f32 %v10234_v21, %v15219_v47  ;;  %v10235_v24 = vpop.f32.mrb[36].mxu0  ;;  %v9214_v47 = vld [vmem:[%s17266_s3 + $0xdd0] sm:$0xff]  ;;  %v9223_v21 = vld [vmem:[%s17266_s3 + $0xe18] sm:$0xff] }
 0x83f   :  { %v10236_v27 = vpop.f32.mrb[37].mxu0  ;;  %v12141_v43 = vpack.c.bf16 %v9214_v47, %v9213_v39 }
 0x840   :  { %v10237_v28 = vadd.f32 %v10236_v27, %v10235_v24  ;;  %v9241_v24 = vld [vmem:[%s17266_s3 + $0xea8] sm:$0xff]  ;;  %v9242_v27 = vld [vmem:[%s17266_s3 + $0xeb0] sm:$0xff] }
 0x841   :  { %v12163_v29 = vpack.c.bf16 %v9242_v27, %v9241_v24 }
 0x842   :  { %v2846_v36 = vadd.f32 %v10237_v28, %v15229_v61  ;;  %v9210_v61 = vld [vmem:[%s17268_s4 + $0x88] sm:$0xff] }
 0x844   :  { %v12135_v45 = vpack.c.bf16 %v2846_v36, %v2841_v22  ;;  %v9224_v22 = vld [vmem:[%s17266_s3 + $0xe20] sm:$0xff]  ;;  %v9226_v36 = vld [vmem:[%s17266_s3 + $0xe30] sm:$0xff] }
 0x845   :  { %v12161_v28 = vpack.c.bf16 %v9224_v22, %v9223_v21  ;;  %v12165_v39 = vpack.c.bf16 %v9226_v36, %v9225_v31  ;;  %v9290_v21 = vld [vmem:[%s17266_s3 + $0x1000] sm:$0xff]  ;;  %v9291_v22 = vld [vmem:[%s17266_s3 + $0x1008] sm:$0xff]  ;;  %v9292_v31 = vld [vmem:[%s17266_s3 + $0x1010] sm:$0xff] }
 0x846   :  { %12136 = vmatprep.subr.bf16.mxu0 %v12135_v45  ;;  %v12211_v27 = vpack.c.bf16 %v9291_v22, %v9290_v21  ;;  %v9293_v36 = vld [vmem:[%s17266_s3 + $0x1018] sm:$0xff]  ;;  %v9358_v22 = vld [vmem:[%s17266_s3 + $0x11f0] sm:$0xff] }
 0x847   :  { %12138 = vmatpush3.bf16.msra.mxu0 %v12135_v45  ;;  %v9243_v45 = vld [vmem:[%s17266_s3 + $0xeb8] sm:$0xff] }
 0x848   :  { %12140 = vmatprep.subr.bf16.mxu0 %v12139_v38  ;;  %v9244_v38 = vld [vmem:[%s17266_s3 + $0xec0] sm:$0xff] }
 0x849   :  { %v12167_v47 = vpack.c.bf16 %v9244_v38, %v9243_v45  ;;  %v12215_v38 = vpack.c.bf16 %v9293_v36, %v9292_v31  ;;  %v9361_v31 = vld [vmem:[%s17266_s3 + $0x1208] sm:$0xff]  ;;  %v9362_v36 = vld [vmem:[%s17266_s3 + $0x1210] sm:$0xff] }
 0x84a   :  { %10885 = vmatmul.mubr.msk.f32.vlgmr.msra.gmra.mrb[12].mxu0 %vm770_vm1, %v9210_v61  ;;  %v12169_v61 = vpack.c.bf16 %v9228_v42, %v9227_v57  ;;  %v9294_v57 = vld [vmem:[%s17266_s3 + $0x1020] sm:$0xff]  ;;  %v9295_v42 = vld [vmem:[%s17266_s3 + $0x1028] sm:$0xff] }
 0x84b   :  { %12142 = vmatpush3.bf16.msra.mxu0 %v12141_v43  ;;  %3049 = vmatprep.mubr.f32.mxu0 %v13704_v50  ;;  %v9264_v43 = vld [vmem:[%s17268_s4 + $0x90] sm:$0xff] }
 0x84c   :  { %12144 = vmatprep.subr.bf16.mxu0 %v12143_v62 }
 0x84f   :  { %12146 = vmatpush3.bf16.msra.mxu0 %v12145_v51 }
 0x850   :  { %12148 = vmatprep.subr.bf16.mxu0 %v12147_v53 }
 0x853   :  { %12150 = vmatpush3.bf16.msra.mxu0 %v12149_v0  ;;  %v12199_v0 = vpack.c.bf16 %v9285_v37, %v9284_v58  ;;  %v9281_v58 = vld [vmem:[%s17266_s3 + $0xfb8] sm:$0xff]  ;;  %v9298_v37 = vld [vmem:[%s17266_s3 + $0x1040] sm:$0xff] }
 0x854   :  { %12152 = vmatprep.subr.bf16.mxu0 %v12151_v1  ;;  %v9268_v1 = vld [vmem:[%s17266_s3 + $0xf50] sm:$0xff] }
 0x857   :  { %12154 = vmatpush3.bf16.msra.mxu0 %v12153_v12  ;;  %v9270_v12 = vld [vmem:[%s17266_s3 + $0xf60] sm:$0xff] }
 0x858   :  { %12156 = vmatprep.subr.bf16.mxu0 %v12155_v13  ;;  %v9271_v13 = vld [vmem:[%s17266_s3 + $0xf68] sm:$0xff] }
 0x859   :  { %v12205_v25 = vpack.c.bf16 %v9271_v13, %v9270_v12 }
 0x85b   :  { %12158 = vmatpush3.bf16.msra.mxu0 %v12157_v19  ;;  %v9272_v19 = vld [vmem:[%s17266_s3 + $0xf70] sm:$0xff] }
 0x85c   :  { %12160 = vmatprep.subr.bf16.mxu0 %v12159_v20  ;;  %v9273_v20 = vld [vmem:[%s17266_s3 + $0xf78] sm:$0xff] }
 0x85d   :  { %v12209_v24 = vpack.c.bf16 %v9273_v20, %v9272_v19  ;;  %v9355_v19 = vld [vmem:[%s17266_s3 + $0x11d8] sm:$0xff]  ;;  %v9356_v20 = vld [vmem:[%s17266_s3 + $0x11e0] sm:$0xff] }
 0x85e   :  { %v12292_v21 = vpack.c.bf16 %v9356_v20, %v9355_v19  ;;  %v9418_v19 = vld [vmem:[%s17266_s3 + $0x13a0] sm:$0xff]  ;;  %v9419_v20 = vld [vmem:[%s17266_s3 + $0x13a8] sm:$0xff] }
 0x85f   :  { %12162 = vmatpush3.bf16.msra.mxu0 %v12161_v28  ;;  %v9274_v28 = vld [vmem:[%s17266_s3 + $0xf80] sm:$0xff] }
 0x860   :  { %12164 = vmatprep.subr.bf16.mxu0 %v12163_v29  ;;  %v9275_v29 = vld [vmem:[%s17266_s3 + $0xf88] sm:$0xff] }
 0x861   :  { %v12213_v45 = vpack.c.bf16 %v9275_v29, %v9274_v28  ;;  %v9360_v28 = vld [vmem:[%s17266_s3 + $0x1200] sm:$0xff] }
 0x863   :  { %12166 = vmatpush3.bf16.msra.mxu0 %v12165_v39  ;;  %v9276_v39 = vld [vmem:[%s17266_s3 + $0xf90] sm:$0xff] }
 0x864   :  { %12168 = vmatprep.subr.bf16.mxu0 %v12167_v47  ;;  %v9277_v47 = vld [vmem:[%s17266_s3 + $0xf98] sm:$0xff] }
 0x867   :  { %12170 = vmatpush3.bf16.msra.mxu0 %v12169_v61  ;;  %v12217_v61 = vpack.c.bf16 %v9277_v47, %v9276_v39  ;;  %v9364_v39 = vld [vmem:[%s17266_s3 + $0x1220] sm:$0xff] }
 0x86a   :  { %3050 = vmatmul.mubr.f32.vlgmr.msra.gmra.mrb[38].mxu0 %v13706_v54 }
 0x86b   :  { %3054 = vmatprep.mubr.f32.mxu0 %v13732_v6 }
 0x86e   :  { %3055 = vmatmul.mubr.f32.gmra.mrb[40].mxu0 %v13735_v8 }
 0x86f   :  { %10891 = vmatprep.mubr.msk.f32.mxu0 %vm770_vm1, %v9264_v43  ;;  %v12219_v43 = vpack.c.bf16 %v9295_v42, %v9294_v57  ;;  %v9365_v57 = vld [vmem:[%s17266_s3 + $0x1228] sm:$0xff]  ;;  %v9366_v42 = vld [vmem:[%s17266_s3 + $0x1230] sm:$0xff] }
 0x93d   :  { %v10274_v62 = vpop.f32.mrb[38].mxu0 }
 0x93e   :  { %v10275_v4 = vpop.f32.mrb[39].mxu0 }
 0x93f   :  { %v10276_v26 = vadd.f32 %v10275_v4, %v10274_v62  ;;  %v9278_v62 = vld [vmem:[%s17266_s3 + $0xfa0] sm:$0xff]  ;;  %v9279_v4 = vld [vmem:[%s17266_s3 + $0xfa8] sm:$0xff] }
 0x941   :  { %v3127_v34 = vadd.f32 %v10276_v26, %v15345_v16  ;;  %v10277_v40 = vpop.f32.mrb[40].mxu0  ;;  %v9269_v16 = vld [vmem:[%s17266_s3 + $0xf58] sm:$0xff]  ;;  %v9296_v26 = vld [vmem:[%s17266_s3 + $0x1030] sm:$0xff] }
 0x942   :  { %v10278_v51 = vpop.f32.mrb[41].mxu0  ;;  %v12201_v7 = vpack.c.bf16 %v9269_v16, %v9268_v1  ;;  %v9282_v1 = vld [vmem:[%s17266_s3 + $0xfc0] sm:$0xff]  ;;  %v9283_v16 = vld [vmem:[%s17266_s3 + $0xfc8] sm:$0xff] }
 0x943   :  { %v10279_v53 = vadd.f32 %v10278_v51, %v10277_v40  ;;  %v12221_v40 = vpack.c.bf16 %v9279_v4, %v9278_v62  ;;  %v12229_v3 = vpack.c.bf16 %v9283_v16, %v9282_v1  ;;  %v9368_v62 = vld [vmem:[%s17266_s3 + $0x1240] sm:$0xff] }
 0x945   :  { %v3132_v60 = vadd.f32 %v10279_v53, %v15361_v18  ;;  %v9265_v18 = vld [vmem:[%s17268_s4 + $0x98] sm:$0xff]  ;;  %v9280_v53 = vld [vmem:[%s17266_s3 + $0xfb0] sm:$0xff] }
 0x947   :  { %v12195_v52 = vpack.c.bf16 %v3132_v60, %v3127_v34  ;;  %v9297_v34 = vld [vmem:[%s17266_s3 + $0x1038] sm:$0xff]  ;;  %v9299_v60 = vld [vmem:[%s17266_s3 + $0x1048] sm:$0xff] }
 0x948   :  { %v12223_v51 = vpack.c.bf16 %v9297_v34, %v9296_v26  ;;  %v9369_v26 = vld [vmem:[%s17266_s3 + $0x1248] sm:$0xff]  ;;  %v9370_v34 = vld [vmem:[%s17266_s3 + $0x1250] sm:$0xff] }
 0x949   :  { %12196 = vmatprep.subr.bf16.mxu0 %v12195_v52 }
 0x94a   :  { %12198 = vmatpush3.bf16.msra.mxu0 %v12195_v52  ;;  %v12225_v52 = vpack.c.bf16 %v9281_v58, %v9280_v53  ;;  %v9374_v53 = vld [vmem:[%s17268_s4 + $0xb0] sm:$0xff] }
 0x94b   :  { %12200 = vmatprep.subr.bf16.mxu0 %v12199_v0  ;;  %v12227_v0 = vpack.c.bf16 %v9299_v60, %v9298_v37 }
 0x94d   :  { %10892 = vmatmul.mubr.msk.f32.vlgmr.msra.gmra.mrb[12].mxu0 %vm770_vm1, %v9265_v18 }
 0x94e   :  { %12202 = vmatpush3.bf16.msra.mxu0 %v12201_v7  ;;  %3335 = vmatprep.mubr.f32.mxu0 %v13704_v50 }
 0x94f   :  { %12204 = vmatprep.subr.bf16.mxu0 %v12203_v59 }
 0x952   :  { %12206 = vmatpush3.bf16.msra.mxu0 %v12205_v25 }
 0x953   :  { %12208 = vmatprep.subr.bf16.mxu0 %v12207_v17 }
 0x956   :  { %12210 = vmatpush3.bf16.msra.mxu0 %v12209_v24 }
 0x957   :  { %12212 = vmatprep.subr.bf16.mxu0 %v12211_v27  ;;  %v9359_v27 = vld [vmem:[%s17266_s3 + $0x11f8] sm:$0xff] }
 0x958   :  { %v12298_v29 = vpack.c.bf16 %v9360_v28, %v9359_v27  ;;  %v9423_v27 = vld [vmem:[%s17266_s3 + $0x13c8] sm:$0xff] }
 0x95a   :  { %12214 = vmatpush3.bf16.msra.mxu0 %v12213_v45  ;;  %v12301_v45 = vpack.c.bf16 %v9362_v36, %v9361_v31  ;;  %v9425_v31 = vld [vmem:[%s17266_s3 + $0x13d8] sm:$0xff] }
 0x95b   :  { %12216 = vmatprep.subr.bf16.mxu0 %v12215_v38  ;;  %v9363_v38 = vld [vmem:[%s17266_s3 + $0x1218] sm:$0xff] }
 0x95c   :  { %v12304_v47 = vpack.c.bf16 %v9364_v39, %v9363_v38  ;;  %v9429_v38 = vld [vmem:[%s17268_s4 + $0xc0] sm:$0xff] }
 0x95e   :  { %12218 = vmatpush3.bf16.msra.mxu0 %v12217_v61  ;;  %v12307_v61 = vpack.c.bf16 %v9366_v42, %v9365_v57 }
 0x95f   :  { %12220 = vmatprep.subr.bf16.mxu0 %v12219_v43  ;;  %v9367_v43 = vld [vmem:[%s17266_s3 + $0x1238] sm:$0xff] }
 0x960   :  { %v12310_v4 = vpack.c.bf16 %v9368_v62, %v9367_v43 }
 0x962   :  { %12222 = vmatpush3.bf16.msra.mxu0 %v12221_v40  ;;  %v12313_v40 = vpack.c.bf16 %v9370_v34, %v9369_v26  ;;  %v9466_v26 = vld [vmem:[%s17266_s3 + $0x14f0] sm:$0xff] }
 0x963   :  { %12224 = vmatprep.subr.bf16.mxu0 %v12223_v51  ;;  %v9371_v51 = vld [vmem:[%s17266_s3 + $0x1258] sm:$0xff] }
 0x966   :  { %12226 = vmatpush3.bf16.msra.mxu0 %v12225_v52 }
 0x967   :  { %12228 = vmatprep.subr.bf16.mxu0 %v12227_v0 }
 0x96a   :  { %12230 = vmatpush3.bf16.msra.mxu0 %v12229_v3  ;;  %v9410_v3 = vld [vmem:[%s17266_s3 + $0x1360] sm:$0xff] }
 0x96d   :  { %3336 = vmatmul.mubr.f32.vlgmr.msra.gmra.mrb[42].mxu0 %v13706_v54 }
 0x96e   :  { %3340 = vmatprep.mubr.f32.mxu0 %v13732_v6 }
 0x971   :  { %3341 = vmatmul.mubr.f32.gmra.mrb[44].mxu0 %v13735_v8 }
 0x972   :  { %10898 = vmatprep.mubr.msk.f32.mxu0 %vm770_vm1, %v9319_v5  ;;  %v9411_v5 = vld [vmem:[%s17266_s3 + $0x1368] sm:$0xff] }
 0xa40   :  { %v10316_v18 = vpop.f32.mrb[42].mxu0 }
 0xa41   :  { %v10317_v7 = vpop.f32.mrb[43].mxu0 }
 0xa42   :  { %v10318_v59 = vadd.f32 %v10317_v7, %v10316_v18  ;;  %v12352_v18 = vpack.c.bf16 %v9411_v5, %v9410_v3  ;;  %v9413_v7 = vld [vmem:[%s17266_s3 + $0x1378] sm:$0xff]  ;;  %v9476_v5 = vld [vmem:[%s17266_s3 + $0x1540] sm:$0xff] }
 0xa43   :  { %v9475_v3 = vld [vmem:[%s17266_s3 + $0x1538] sm:$0xff] }
 0xa44   :  { %v3413_v12 = vadd.f32 %v10318_v59, %v15395_v32  ;;  %v10319_v13 = vpop.f32.mrb[44].mxu0  ;;  %v9320_v32 = vld [vmem:[%s17268_s4 + $0xa8] sm:$0xff] }
 0xa45   :  { %v10320_v10 = vpop.f32.mrb[45].mxu0 }
 0xa46   :  { %v10321_v14 = vadd.f32 %v10320_v10, %v10319_v13  ;;  %v9415_v13 = vld [vmem:[%s17266_s3 + $0x1388] sm:$0xff] }
 0xa48   :  { %v3418_v25 = vadd.f32 %v10321_v14, %v15397_v35  ;;  %v9357_v35 = vld [vmem:[%s17266_s3 + $0x11e8] sm:$0xff]  ;;  %v9416_v14 = vld [vmem:[%s17266_s3 + $0x1390] sm:$0xff] }
 0xa49   :  { %v12295_v24 = vpack.c.bf16 %v9358_v22, %v9357_v35  ;;  %v9421_v35 = vld [vmem:[%s17266_s3 + $0x13b8] sm:$0xff] }
 0xa4a   :  { %v12255_v17 = vpack.c.bf16 %v3418_v25, %v3413_v12  ;;  %v9414_v12 = vld [vmem:[%s17266_s3 + $0x1380] sm:$0xff]  ;;  %v9417_v25 = vld [vmem:[%s17266_s3 + $0x1398] sm:$0xff] }
 0xa4b   :  { %v12358_v10 = vpack.c.bf16 %v9415_v13, %v9414_v12  ;;  %v9480_v12 = vld [vmem:[%s17266_s3 + $0x1560] sm:$0xff] }
 0xa4c   :  { %12256 = vmatprep.subr.bf16.mxu0 %v12255_v17 }
 0xa4d   :  { %12258 = vmatpush3.bf16.msra.mxu0 %v12255_v17  ;;  %v12361_v17 = vpack.c.bf16 %v9417_v25, %v9416_v14  ;;  %v9484_v14 = vld [vmem:[%s17268_s4 + $0xd0] sm:$0xff] }
 0xa4e   :  { %12291 = vmatprep.subr.bf16.mxu0 %v12998_v11 }
 0xa50   :  { %10899 = vmatmul.mubr.msk.f32.vlgmr.msra.gmra.mrb[12].mxu0 %vm770_vm1, %v9320_v32  ;;  %v12364_v32 = vpack.c.bf16 %v9419_v20, %v9418_v19 }
 0xa51   :  { %12293 = vmatpush1.bf16.msra.mxu0 %v12292_v21  ;;  %9372 = vmatprep.mubr.msk.f32.mxu0 %vm408_vm0, %v13708_v55  ;;  %v9420_v21 = vld [vmem:[%s17266_s3 + $0x13b0] sm:$0xff] }
 0xa52   :  { %12294 = vmatprep.subr.bf16.mxu0 %v12998_v11  ;;  %v12367_v22 = vpack.c.bf16 %v9421_v35, %v9420_v21 }
 0xa55   :  { %12296 = vmatpush1.bf16.msra.mxu0 %v12295_v24  ;;  %v9422_v24 = vld [vmem:[%s17266_s3 + $0x13c0] sm:$0xff] }
 0xa56   :  { %12297 = vmatprep.subr.bf16.mxu0 %v12998_v11  ;;  %v12370_v28 = vpack.c.bf16 %v9423_v27, %v9422_v24  ;;  %v9544_v24 = vld [vmem:[%s17266_s3 + $0x1700] sm:$0xff]  ;;  %v9561_v27 = vld [vmem:[%s17266_s3 + $0x1788] sm:$0xff] }
 0xa59   :  { %12299 = vmatpush1.bf16.msra.mxu0 %v12298_v29  ;;  %v9424_v29 = vld [vmem:[%s17266_s3 + $0x13d0] sm:$0xff] }
 0xa5a   :  { %12300 = vmatprep.subr.bf16.mxu0 %v12998_v11  ;;  %v12373_v36 = vpack.c.bf16 %v9425_v31, %v9424_v29 }
 0xa5d   :  { %12302 = vmatpush1.bf16.msra.mxu0 %v12301_v45  ;;  %v9426_v45 = vld [vmem:[%s17266_s3 + $0x13e0] sm:$0xff] }
 0xa5e   :  { %12303 = vmatprep.subr.bf16.mxu0 %v12998_v11 }
 0xa61   :  { %12305 = vmatpush1.bf16.msra.mxu0 %v12304_v47 }
 0xa62   :  { %12306 = vmatprep.subr.bf16.mxu0 %v12998_v11 }
 0xa65   :  { %12308 = vmatpush1.bf16.msra.mxu0 %v12307_v61 }
 0xa66   :  { %12309 = vmatprep.subr.bf16.mxu0 %v12998_v11 }
 0xa69   :  { %12311 = vmatpush1.bf16.msra.mxu0 %v12310_v4  ;;  %v9465_v4 = vld [vmem:[%s17266_s3 + $0x14e8] sm:$0xff] }
 0xa6a   :  { %12312 = vmatprep.subr.bf16.mxu0 %v12998_v11  ;;  %v12412_v34 = vpack.c.bf16 %v9466_v26, %v9465_v4  ;;  %v9549_v26 = vld [vmem:[%s17266_s3 + $0x1728] sm:$0xff] }
 0xa6d   :  { %12314 = vmatpush1.bf16.msra.mxu0 %v12313_v40  ;;  %v9468_v40 = vld [vmem:[%s17266_s3 + $0x1500] sm:$0xff] }
 0xa6e   :  { %3664 = vmatprep.subr.mxu0 %v12999_v30 }
 0xa71   :  { %3665 = vmatpush1.msra.mxu0 %v9371_v51 }
 0xa72   :  { %3697 = vmatmul.mubr.f32.vlgmr.msra.gmra.mrb[46].mxu0 %v13702_v49 }
 0xa73   :  { %9373 = vmatprep.mubr.msk.f32.mxu0 %vm408_vm0, %v13737_v9 }
 0xa76   :  { %3702 = vmatmul.mubr.f32.gmra.mrb[48].mxu0 %v13748_v15 }
 0xa77   :  { %10905 = vmatprep.mubr.msk.f32.mxu0 %vm770_vm1, %v9374_v53  ;;  %v9469_v53 = vld [vmem:[%s17266_s3 + $0x1508] sm:$0xff] }
 0xb45   :  { %v3698_v58 = vpop.f32.mrb[46].mxu0 }
 0xb46   :  { %v3699_v37 = vadd.f32 %v15399_v41, %v3698_v58  ;;  %v3700_v60 = vpop.f32.mrb[47].mxu0  ;;  %v9375_v41 = vld [vmem:[%s17268_s4 + $0xb8] sm:$0xff]  ;;  %v9470_v58 = vld [vmem:[%s17266_s3 + $0x1510] sm:$0xff] }
 0xb47   :  { %v9471_v60 = vld [vmem:[%s17266_s3 + $0x1518] sm:$0xff] }
 0xb49   :  { %v3703_v52 = vpop.f32.mrb[48].mxu0 }
 0xb4a   :  { %v3704_v0 = vadd.f32 %v15401_v44, %v3703_v52  ;;  %v3705_v1 = vpop.f32.mrb[49].mxu0  ;;  %v9412_v44 = vld [vmem:[%s17266_s3 + $0x1370] sm:$0xff] }
 0xb4b   :  { %v12355_v59 = vpack.c.bf16 %v9413_v7, %v9412_v44  ;;  %v9474_v1 = vld [vmem:[%s17266_s3 + $0x1530] sm:$0xff] }
 0xb4c   :  { %v12315_v16 = vpack.c.bf16 %v3704_v0, %v3699_v37  ;;  %v12418_v37 = vpack.c.bf16 %v9470_v58, %v9469_v53  ;;  %v9473_v0 = vld [vmem:[%s17266_s3 + $0x1528] sm:$0xff]  ;;  %v9478_v44 = vld [vmem:[%s17266_s3 + $0x1550] sm:$0xff]  ;;  %v9551_v53 = vld [vmem:[%s17266_s3 + $0x1738] sm:$0xff] }
 0xb4d   :  { %v9552_v58 = vld [vmem:[%s17266_s3 + $0x1740] sm:$0xff] }
 0xb4e   :  { %12316 = vmatprep.subr.bf16.mxu0 %v12315_v16 }
 0xb4f   :  { %12318 = vmatpush3.bf16.msra.mxu0 %v12315_v16  ;;  %v12424_v16 = vpack.c.bf16 %v9474_v1, %v9473_v0  ;;  %v9553_v0 = vld [vmem:[%s17266_s3 + $0x1748] sm:$0xff]  ;;  %v9554_v1 = vld [vmem:[%s17266_s3 + $0x1750] sm:$0xff] }
 0xb50   :  { %12351 = vmatprep.subr.bf16.mxu0 %v12998_v11 }
 0xb52   :  { %10906 = vmatmul.mubr.msk.f32.vlgmr.msra.gmra.mrb[12].mxu0 %vm770_vm1, %v9375_v41  ;;  %v12427_v41 = vpack.c.bf16 %v9476_v5, %v9475_v3  ;;  %v9572_v3 = vld [vmem:[%s17266_s3 + $0x17e0] sm:$0xff]  ;;  %v12521_v5 = vpack.c.bf16 %v9554_v1, %v9553_v0 }
 0xb53   :  { %12353 = vmatpush1.bf16.msra.mxu0 %v12352_v18  ;;  %9427 = vmatprep.mubr.msk.f32.mxu0 %vm408_vm0, %v13708_v55  ;;  %v9477_v18 = vld [vmem:[%s17266_s3 + $0x1548] sm:$0xff] }
 0xb54   :  { %12354 = vmatprep.subr.bf16.mxu0 %v12998_v11  ;;  %v12430_v7 = vpack.c.bf16 %v9478_v44, %v9477_v18  ;;  %v9555_v18 = vld [vmem:[%s17266_s3 + $0x1758] sm:$0xff]  ;;  %v9556_v44 = vld [vmem:[%s17266_s3 + $0x1760] sm:$0xff] }
 0xb57   :  { %12356 = vmatpush1.bf16.msra.mxu0 %v12355_v59  ;;  %v9479_v59 = vld [vmem:[%s17266_s3 + $0x1558] sm:$0xff] }
 0xb58   :  { %12357 = vmatprep.subr.bf16.mxu0 %v12998_v11  ;;  %v12433_v13 = vpack.c.bf16 %v9480_v12, %v9479_v59  ;;  %v9574_v59 = vld [vmem:[%s17266_s3 + $0x17f0] sm:$0xff]  ;;  %v12525_v12 = vpack.c.bf16 %v9556_v44, %v9555_v18  ;;  %v9604_v44 = vld [vmem:[%s17270_s6 + $0x68] sm:$0xff] }
 0xb5b   :  { %12359 = vmatpush1.bf16.msra.mxu0 %v12358_v10  ;;  %v9481_v10 = vld [vmem:[%s17266_s3 + $0x1568] sm:$0xff] }
 0xb5c   :  { %12360 = vmatprep.subr.bf16.mxu0 %v12998_v11 }
 0xb5f   :  { %12362 = vmatpush1.bf16.msra.mxu0 %v12361_v17 }
 0xb60   :  { %12363 = vmatprep.subr.bf16.mxu0 %v12998_v11 }
 0xb63   :  { %12365 = vmatpush1.bf16.msra.mxu0 %v12364_v32 }
 0xb64   :  { %12366 = vmatprep.subr.bf16.mxu0 %v12998_v11 }
 0xb67   :  { %12368 = vmatpush1.bf16.msra.mxu0 %v12367_v22  ;;  %v9543_v22 = vld [vmem:[%s17266_s3 + $0x16f8] sm:$0xff] }
 0xb68   :  { %12369 = vmatprep.subr.bf16.mxu0 %v12998_v11  ;;  %v12501_v29 = vpack.c.bf16 %v9544_v24, %v9543_v22  ;;  %v4956_v22 = vld [vmem:[%s17270_s6 + $0x18] sm:$0xff] }
 0xb6b   :  { %12371 = vmatpush1.bf16.msra.mxu0 %v12370_v28  ;;  %v9562_v28 = vld [vmem:[%s17266_s3 + $0x1790] sm:$0xff] }
 0xb6c   :  { %12372 = vmatprep.subr.bf16.mxu0 %v12998_v11  ;;  %v12503_v31 = vpack.c.bf16 %v9562_v28, %v9561_v27  ;;  %v8357_v27 = vld [vmem:[%s17265_s13 + $0x68] sm:$0xff]  ;;  %v4957_v28 = vld [vmem:[%s17270_s6 + $0x20] sm:$0xff] }
 0xb6f   :  { %12374 = vmatpush1.bf16.msra.mxu0 %v12373_v36  ;;  %v9545_v36 = vld [vmem:[%s17266_s3 + $0x1708] sm:$0xff] }
 0xb70   :  { %3950 = vmatprep.subr.mxu0 %v12999_v30 }
 0xb73   :  { %3951 = vmatpush1.msra.mxu0 %v9426_v45  ;;  %v9546_v45 = vld [vmem:[%s17266_s3 + $0x1710] sm:$0xff] }
 0xb74   :  { %3983 = vmatmul.mubr.f32.vlgmr.msra.gmra.mrb[50].mxu0 %v13702_v49 }
 0xb75   :  { %9428 = vmatprep.mubr.msk.f32.mxu0 %vm408_vm0, %v13737_v9 }
 0xb78   :  { %3988 = vmatmul.mubr.f32.gmra.mrb[52].mxu0 %v13748_v15 }
 0xb79   :  { %10912 = vmatprep.mubr.msk.f32.mxu0 %vm770_vm1, %v9429_v38  ;;  %v9563_v38 = vld [vmem:[%s17266_s3 + $0x1798] sm:$0xff] }
 0xc47   :  { %v3984_v39 = vpop.f32.mrb[50].mxu0 }
 0xc48   :  { %v3985_v47 = vadd.f32 %v15403_v48, %v3984_v39  ;;  %v3986_v57 = vpop.f32.mrb[51].mxu0  ;;  %v9430_v48 = vld [vmem:[%s17268_s4 + $0xc8] sm:$0xff]  ;;  %v9564_v39 = vld [vmem:[%s17266_s3 + $0x17a0] sm:$0xff] }
 0xc49   :  { %v12507_v57 = vpack.c.bf16 %v9564_v39, %v9563_v38 }
 0xc4b   :  { %v3989_v42 = vpop.f32.mrb[52].mxu0 }
 0xc4c   :  { %v3990_v61 = vadd.f32 %v15405_v56, %v3989_v42  ;;  %v3991_v43 = vpop.f32.mrb[53].mxu0  ;;  %v9467_v56 = vld [vmem:[%s17266_s3 + $0x14f8] sm:$0xff] }
 0xc4d   :  { %v12415_v51 = vpack.c.bf16 %v9468_v40, %v9467_v56  ;;  %v9547_v42 = vld [vmem:[%s17266_s3 + $0x1718] sm:$0xff]  ;;  %v9565_v43 = vld [vmem:[%s17266_s3 + $0x17a8] sm:$0xff]  ;;  %v9568_v56 = vld [vmem:[%s17266_s3 + $0x17c0] sm:$0xff] }
 0xc4e   :  { %v12375_v62 = vpack.c.bf16 %v3990_v61, %v3985_v47  ;;  %v12505_v47 = vpack.c.bf16 %v9546_v45, %v9545_v36  ;;  %v9548_v61 = vld [vmem:[%s17266_s3 + $0x1720] sm:$0xff]  ;;  %v8361_v36 = vld [vmem:[%s17265_s13 + $0x88] sm:$0xff] }
 0xc50   :  { %12376 = vmatprep.subr.bf16.mxu0 %v12375_v62 }
 0xc51   :  { %12378 = vmatpush3.bf16.msra.mxu0 %v12375_v62  ;;  %v9566_v62 = vld [vmem:[%s17266_s3 + $0x17b0] sm:$0xff] }
 0xc52   :  { %12411 = vmatprep.subr.bf16.mxu0 %v12998_v11  ;;  %v12511_v4 = vpack.c.bf16 %v9566_v62, %v9565_v43 }
 0xc54   :  { %10913 = vmatmul.mubr.msk.f32.vlgmr.msra.gmra.mrb[12].mxu0 %vm770_vm1, %v9430_v48  ;;  %v9550_v48 = vld [vmem:[%s17266_s3 + $0x1730] sm:$0xff] }
 0xc55   :  { %12413 = vmatpush1.bf16.msra.mxu0 %v12412_v34  ;;  %9482 = vmatprep.mubr.msk.f32.mxu0 %vm408_vm0, %v13708_v55  ;;  %v9472_v55 = vld [vmem:[%s17266_s3 + $0x1520] sm:$0xff]  ;;  %v9567_v34 = vld [vmem:[%s17266_s3 + $0x17b8] sm:$0xff]  ;;  %v12513_v40 = vpack.c.bf16 %v9550_v48, %v9549_v26  ;;  %v4959_v48 = vld [vmem:[%s17270_s6 + $0x30] sm:$0xff] }
 0xc56   :  { %12414 = vmatprep.subr.bf16.mxu0 %v12998_v11  ;;  %v12421_v52 = vpack.c.bf16 %v9472_v55, %v9471_v60  ;;  %v9570_v60 = vld [vmem:[%s17266_s3 + $0x17d0] sm:$0xff]  ;;  %v12517_v55 = vpack.c.bf16 %v9552_v58, %v9551_v53  ;;  %v9595_v26 = vld [vmem:[%s17268_s4 + $0xf8] sm:$0xff] }
 0xc59   :  { %12416 = vmatpush1.bf16.msra.mxu0 %v12415_v51  ;;  %v12515_v51 = vpack.c.bf16 %v9568_v56, %v9567_v34  ;;  %v9600_v56 = vld [vmem:[%s17270_s6 + $0x48] sm:$0xff] }
 0xc5a   :  { %12417 = vmatprep.subr.bf16.mxu0 %v12998_v11 }
 0xc5d   :  { %12419 = vmatpush1.bf16.msra.mxu0 %v12418_v37  ;;  %v9569_v37 = vld [vmem:[%s17266_s3 + $0x17c8] sm:$0xff] }
 0xc5e   :  { %12420 = vmatprep.subr.bf16.mxu0 %v12998_v11 }
 0xc61   :  { %12422 = vmatpush1.bf16.msra.mxu0 %v12421_v52  ;;  %v12519_v52 = vpack.c.bf16 %v9570_v60, %v9569_v37 }
 0xc62   :  { %12423 = vmatprep.subr.bf16.mxu0 %v12998_v11 }
 0xc65   :  { %12425 = vmatpush1.bf16.msra.mxu0 %v12424_v16  ;;  %v9571_v16 = vld [vmem:[%s17266_s3 + $0x17d8] sm:$0xff] }
 0xc66   :  { %12426 = vmatprep.subr.bf16.mxu0 %v12998_v11 }
 0xc69   :  { %12428 = vmatpush1.bf16.msra.mxu0 %v12427_v41  ;;  %v12523_v41 = vpack.c.bf16 %v9572_v3, %v9571_v16  ;;  %v9602_v16 = vld [vmem:[%s17270_s6 + $0x58] sm:$0xff]  ;;  %v9603_v3 = vld [vmem:[%s17270_s6 + $0x60] sm:$0xff] }
 0xc6a   :  { %12429 = vmatprep.subr.bf16.mxu0 %v12998_v11  ;;  %v12579_v18 = vpack.c.bf16 %v9603_v3, %v9602_v16  ;;  %v9715_v3 = vld [vmem:[%s17270_s6 + $0x280] sm:$0xff] }
 0xc6d   :  { %12431 = vmatpush1.bf16.msra.mxu0 %v12430_v7  ;;  %v9573_v7 = vld [vmem:[%s17266_s3 + $0x17e8] sm:$0xff] }
 0xc6e   :  { %12432 = vmatprep.subr.bf16.mxu0 %v12998_v11 }
 0xc71   :  { %12434 = vmatpush1.bf16.msra.mxu0 %v12433_v13  ;;  %v12527_v13 = vpack.c.bf16 %v9574_v59, %v9573_v7  ;;  %v9605_v7 = vld [vmem:[%s17270_s6 + $0x70] sm:$0xff] }
 0xc72   :  { %4236 = vmatprep.subr.mxu0 %v12999_v30  ;;  %v12583_v59 = vpack.c.bf16 %v9605_v7, %v9604_v44  ;;  %v9723_v44 = vld [vmem:[%s17270_s6 + $0x290] sm:$0xff]  ;;  %v9724_v7 = vld [vmem:[%s17270_s6 + $0x298] sm:$0xff] }
 0xc75   :  { %4237 = vmatpush1.msra.mxu0 %v9481_v10  ;;  %v9557_v10 = vld [vmem:[%s17266_s3 + $0x1768] sm:$0xff] }
 0xc76   :  { %4269 = vmatmul.mubr.f32.vlgmr.msra.gmra.mrb[54].mxu0 %v13702_v49 }
 0xc77   :  { %9483 = vmatprep.mubr.msk.f32.mxu0 %vm408_vm0, %v13737_v9  ;;  %v9559_v9 = vld [vmem:[%s17266_s3 + $0x1778] sm:$0xff] }
 0xc7a   :  { %4274 = vmatmul.mubr.f32.gmra.mrb[56].mxu0 %v13748_v15  ;;  %v9560_v15 = vld [vmem:[%s17266_s3 + $0x1780] sm:$0xff] }
 0xc7b   :  { %10919 = vmatprep.mubr.msk.f32.mxu0 %vm770_vm1, %v9484_v14  ;;  %v12499_v35 = vpack.c.bf16 %v9560_v15, %v9559_v9  ;;  %v9558_v14 = vld [vmem:[%s17266_s3 + $0x1770] sm:$0xff]  ;;  %v4953_v9 = vld [vmem:[%s17270_s6] sm:$0xff]  ;;  %v4954_v15 = vld [vmem:[%s17270_s6 + $0x8] sm:$0xff] }
 0xd49   :  { %v4270_v25 = vpop.f32.mrb[54].mxu0 }
 0xd4a   :  { %v4271_v17 = vadd.f32 %v15411_v63, %v4270_v25  ;;  %v4272_v19 = vpop.f32.mrb[55].mxu0  ;;  %v9485_v63 = vld [vmem:[%s17268_s4 + $0xd8] sm:$0xff]  ;;  %v12529_v25 = vpack.c.bf16 %v9558_v14, %v9557_v10  ;;  %v9608_v14 = vld [vmem:[%s17270_s6 + $0x88] sm:$0xff] }
 0xd4b   :  { %v4937_v19 = vld [vmem:[%s17269_s5] sm:$0xff] }
 0xd4c   :  { %4941 = vperm.xlu1 %12995, %v4937_v19   ;;  %v9634_v19 = vld [vmem:[%s17270_s6 + $0xe8] sm:$0xff] }
 0xd4d   :  { %v4275_v20 = vpop.f32.mrb[56].mxu0 }
 0xd4e   :  { %v4276_v32 = vadd.f32 %v15413_v2, %v4275_v20  ;;  %v4277_v21 = vpop.f32.mrb[57].mxu0  ;;  %v9539_v2 = vld [vmem:[%s17268_s4 + $0xe0] sm:$0xff]  ;;  %v4938_v20 = vld [vmem:[%s17269_s5 + $0x8] sm:$0xff] }
 0xd4f   :  { %v8351_v21 = vld [vmem:[%s17265_s13 + $0x38] sm:$0xff] }
 0xd50   :  { %v12435_v49 = vpack.c.bf16 %v4276_v32, %v4271_v17  ;;  %v9594_v17 = vld [vmem:[%s17268_s4 + $0xf0] sm:$0xff]  ;;  %4946 = vperm.xlu1 %12995, %v4938_v20   ;;  %v8349_v32 = vld [vmem:[%s17265_s13 + $0x28] sm:$0xff] }
 0xd51   :  { %10933 = vmatprep.mubr.msk.f32.mxu1 %vm770_vm1, %v9594_v17  ;;  %v9633_v17 = vld [vmem:[%s17270_s6 + $0xe0] sm:$0xff]  ;;  %v9635_v20 = vld [vmem:[%s17270_s6 + $0xf0] sm:$0xff] }
 0xd52   :  { %12436 = vmatprep.subr.bf16.mxu0 %v12435_v49 }
 0xd53   :  { %12438 = vmatpush3.bf16.msra.mxu0 %v12435_v49  ;;  %v8353_v49 = vld [vmem:[%s17265_s13 + $0x48] sm:$0xff] }
 0xd54   :  { %12496 = vmatprep.subr.bf16.mxu0 %v15415_v23 }
 0xd56   :  { %10920 = vmatmul.mubr.msk.f32.vlgmr.msra.gmra.mrb[12].mxu0 %vm770_vm1, %v9485_v63  ;;  %v8355_v63 = vld [vmem:[%s17265_s13 + $0x58] sm:$0xff] }
 0xd57   :  { %12498 = vmatpush3.bf16.msra.mxu0 %v15415_v23  ;;  %10926 = vmatprep.mubr.msk.f32.mxu0 %vm770_vm1, %v9539_v2  ;;  %v9540_v23 = vld [vmem:[%s17268_s4 + $0xe8] sm:$0xff]  ;;  %v12559_v2 = vpack.c.bf16 %v4954_v15, %v4953_v9  ;;  %v9639_v9 = vld [vmem:[%s17270_s6 + $0x110] sm:$0xff] }
 0xd58   :  { %12500 = vmatprep.subr.bf16.mxu0 %v12499_v35  ;;  %v4955_v35 = vld [vmem:[%s17270_s6 + $0x10] sm:$0xff] }
 0xd59   :  { %v12563_v24 = vpack.c.bf16 %v4956_v22, %v4955_v35  ;;  %v9648_v35 = vld [vmem:[%s17270_s6 + $0x128] sm:$0xff]  ;;  %v9649_v22 = vld [vmem:[%s17270_s6 + $0x130] sm:$0xff] }
 0xd5e   :  { %10927 = vmatmul.mubr.msk.f32.vlgmr.msra.gmra.mrb[12].mxu0 %vm770_vm1, %v9540_v23  ;;  %v4958_v23 = vld [vmem:[%s17270_s6 + $0x28] sm:$0xff] }
 0xd5f   :  { %12502 = vmatpush3.bf16.msra.mxu0 %v12501_v29  ;;  %4765 = vmatprep.mubr.f32.mxu0 %v13704_v50  ;;  %v12509_v50 = vpack.c.bf16 %v9548_v61, %v9547_v42  ;;  %v12567_v29 = vpack.c.bf16 %v4958_v23, %v4957_v28  ;;  %v9651_v23 = vld [vmem:[%s17270_s6 + $0x140] sm:$0xff] }
 0xd60   :  { %12504 = vmatprep.subr.bf16.mxu0 %v12503_v31  ;;  %v8359_v31 = vld [vmem:[%s17265_s13 + $0x78] sm:$0xff] }
 0xd63   :  { %12506 = vmatpush3.bf16.msra.mxu0 %v12505_v47 }
 0xd64   :  { %12508 = vmatprep.subr.bf16.mxu0 %v12507_v57 }
 0xd67   :  { %12510 = vmatpush3.bf16.msra.mxu0 %v12509_v50 }
 0xd68   :  { %12512 = vmatprep.subr.bf16.mxu0 %v12511_v4 }
 0xd6b   :  { %12514 = vmatpush3.bf16.msra.mxu0 %v12513_v40  ;;  %v9601_v40 = vld [vmem:[%s17270_s6 + $0x50] sm:$0xff] }
 0xd6c   :  { %12516 = vmatprep.subr.bf16.mxu0 %v12515_v51  ;;  %v12575_v51 = vpack.c.bf16 %v9601_v40, %v9600_v56  ;;  %v9707_v56 = vld [vmem:[%s17270_s6 + $0x240] sm:$0xff]  ;;  %v9708_v40 = vld [vmem:[%s17270_s6 + $0x248] sm:$0xff] }
 0xd6f   :  { %12518 = vmatpush3.bf16.msra.mxu0 %v12517_v55 }
 0xd70   :  { %12520 = vmatprep.subr.bf16.mxu0 %v12519_v52 }
 0xd73   :  { %12522 = vmatpush3.bf16.msra.mxu0 %v12521_v5 }
 0xd74   :  { %12524 = vmatprep.subr.bf16.mxu0 %v12523_v41 }
 0xd77   :  { %12526 = vmatpush3.bf16.msra.mxu0 %v12525_v12  ;;  %v9606_v12 = vld [vmem:[%s17270_s6 + $0x78] sm:$0xff] }
 0xd78   :  { %12528 = vmatprep.subr.bf16.mxu0 %v12527_v13  ;;  %v9607_v13 = vld [vmem:[%s17270_s6 + $0x80] sm:$0xff] }
 0xd79   :  { %v12587_v10 = vpack.c.bf16 %v9607_v13, %v9606_v12 }
 0xd7b   :  { %12530 = vmatpush3.bf16.msra.mxu0 %v12529_v25  ;;  %v9632_v25 = vld [vmem:[%s17270_s6 + $0xd8] sm:$0xff] }
 0xd7c   :  { %12560 = vmatprep.subr.bf16.mxu0 %v12559_v2 }
 0xd7e   :  { %4766 = vmatmul.mubr.f32.vlgmr.msra.gmra.mrb[58].mxu0 %v13706_v54  ;;  %v7691_v54 = vld [vmem:[%s17264_s8 + $0x8] sm:$0xff] }
 0xd7f   :  { %4770 = vmatprep.mubr.f32.mxu0 %v13732_v6  ;;  %7699 = vperm.xlu1 %12995, %v7691_v54   ;;  %v8345_v6 = vld [vmem:[%s17265_s13 + $0x8] sm:$0xff]  ;;  %v12619_v54 = vpack.c.bf16 %v9633_v17, %v9632_v25  ;;  %v9728_v17 = vld [vmem:[%s17270_s6 + $0x2b8] sm:$0xff] }
 0xd80   :  { %12562 = vmatpush3.bf16.msra.mxu0 %v12559_v2  ;;  %v9647_v2 = vld [vmem:[%s17270_s6 + $0x120] sm:$0xff] }
 0xd81   :  { %12564 = vmatprep.subr.bf16.mxu0 %v12563_v24 }
 0xd82   :  { %4771 = vmatmul.mubr.f32.gmra.mrb[60].mxu0 %v13735_v8  ;;  %v8347_v8 = vld [vmem:[%s17265_s13 + $0x18] sm:$0xff] }
 0xd83   :  { %8369 = vperm.xlu1 %12995, %v8345_v6   ;;  %v12623_v6 = vpack.c.bf16 %v9635_v20, %v9634_v19  ;;  %v9729_v19 = vld [vmem:[%s17270_s6 + $0x2c0] sm:$0xff] }
 0xd84   :  { %12566 = vmatpush3.bf16.msra.mxu0 %v12563_v24  ;;  %v9650_v24 = vld [vmem:[%s17270_s6 + $0x138] sm:$0xff]  ;;  %v12751_v20 = vpack.c.bf16 %v9729_v19, %v9728_v17 }
 0xd85   :  { %12568 = vmatprep.subr.bf16.mxu0 %v12567_v29  ;;  %v12643_v28 = vpack.c.bf16 %v9650_v24, %v9649_v22  ;;  %v9758_v22 = vld [vmem:[%s17270_s6 + $0x348] sm:$0xff]  ;;  %v9759_v24 = vld [vmem:[%s17270_s6 + $0x350] sm:$0xff]  ;;  %v9622_v17 = vld [vmem:[%s17270_s6 + $0xb8] sm:$0xff] }
 0xd87   :  { %8379 = vperm.xlu1 %12995, %v8347_v8   ;;  %v9636_v8 = vld [vmem:[%s17270_s6 + $0xf8] sm:$0xff] }
 0xd88   :  { %12570 = vmatpush3.bf16.msra.mxu0 %v12567_v29  ;;  %v9652_v29 = vld [vmem:[%s17270_s6 + $0x148] sm:$0xff] }
 0xd8b   :  { %8389 = vperm.xlu1 %12995, %v8349_v32   ;;  %v9637_v32 = vld [vmem:[%s17270_s6 + $0x100] sm:$0xff] }
 0xd8f   :  { %8399 = vperm.xlu1 %12995, %v8351_v21   ;;  %v12627_v21 = vpack.c.bf16 %v9637_v32, %v9636_v8  ;;  %v9753_v8 = vld [vmem:[%s17270_s6 + $0x320] sm:$0xff]  ;;  %v9754_v32 = vld [vmem:[%s17270_s6 + $0x328] sm:$0xff] }
 0xd93   :  { %8409 = vperm.xlu1 %12995, %v8353_v49   ;;  %v9638_v49 = vld [vmem:[%s17270_s6 + $0x108] sm:$0xff] }
 0xd94   :  { %v12631_v15 = vpack.c.bf16 %v9639_v9, %v9638_v49 }
 0xd97   :  { %8419 = vperm.xlu1 %12995, %v8355_v63   ;;  %v9640_v63 = vld [vmem:[%s17270_s6 + $0x118] sm:$0xff] }
 0xd9b   :  { %8429 = vperm.xlu1 %12995, %v8357_v27   ;;  %v12639_v27 = vpack.c.bf16 %v9648_v35, %v9647_v2  ;;  %v9611_v2 = vld [vmem:[%s17271_s7 + $0x10] sm:$0xff] }
 0xd9f   :  { %8439 = vperm.xlu1 %12995, %v8359_v31   ;;  %v12647_v31 = vpack.c.bf16 %v9652_v29, %v9651_v23  ;;  %v9767_v23 = vld [vmem:[%s17270_s6 + $0x360] sm:$0xff]  ;;  %v9768_v29 = vld [vmem:[%s17270_s6 + $0x368] sm:$0xff] }
 0xda3   :  { %8449 = vperm.xlu1 %12995, %v8361_v36   ;;  %v9653_v36 = vld [vmem:[%s17270_s6 + $0x150] sm:$0xff] }
 0xdcb   :  { %v4942_v53 = vpop.permute.xlu1 %4941 }
 0xdcf   :  { %v4947_v55 = vpop.permute.xlu1 %4946 }
 0xe31   :  { %v10928_v45 = vpop.f32.mrb[12].mxu0 }
 0xe32   :  { %v4640_v38 = vpop.f32.mrb[13].mxu0 }
 0xe51   :  { %v10526_v39 = vpop.f32.mrb[58].mxu0 }
 0xe52   :  { %v10527_v47 = vpop.f32.mrb[59].mxu0 }
 0xe53   :  { %v10528_v57 = vadd.f32 %v10527_v47, %v10526_v39  ;;  %v9655_v39 = vld [vmem:[%s17270_s6 + $0x160] sm:$0xff]  ;;  %v9677_v47 = vld [vmem:[%s17270_s6 + $0x1b0] sm:$0xff] }
 0xe55   :  { %v4843_v42 = vadd.f32 %v10528_v57, %v15419_v33  ;;  %v10529_v61 = vpop.f32.mrb[60].mxu0  ;;  %v4960_v33 = vld [vmem:[%s17270_s6 + $0x38] sm:$0xff] }
 0xe56   :  { %v10530_v43 = vpop.f32.mrb[61].mxu0  ;;  %v12571_v34 = vpack.c.bf16 %v4960_v33, %v4959_v48  ;;  %v9678_v57 = vld [vmem:[%s17270_s6 + $0x1b8] sm:$0xff]  ;;  %v9683_v48 = vld [vmem:[%s17270_s6 + $0x1e0] sm:$0xff]  ;;  %v9684_v33 = vld [vmem:[%s17270_s6 + $0x1e8] sm:$0xff] }
 0xe57   :  { %v10531_v62 = vadd.f32 %v10530_v43, %v10529_v61  ;;  %v9680_v61 = vld [vmem:[%s17270_s6 + $0x1c8] sm:$0xff]  ;;  %v12679_v43 = vpack.c.bf16 %v9678_v57, %v9677_v47 }
 0xe58   :  { %12572 = vmatprep.subr.bf16.mxu0 %v12571_v34  ;;  %v9772_v47 = vld [vmem:[%s17270_s6 + $0x388] sm:$0xff] }
 0xe59   :  { %v4848_v50 = vadd.f32 %v10531_v62, %v15427_v46  ;;  %12574 = vmatpush3.bf16.msra.mxu0 %v12571_v34  ;;  %v4961_v46 = vld [vmem:[%s17270_s6 + $0x40] sm:$0xff]  ;;  %v12691_v34 = vpack.c.bf16 %v9684_v33, %v9683_v48  ;;  %v9800_v48 = vld [vmem:[%s17270_s6 + $0x408] sm:$0xff] }
 0xe5a   :  { %10952 = vmatprep.subr.mxu0 %v4961_v46 }
 0xe5b   :  { %v12555_v4 = vpack.c.bf16 %v4848_v50, %v4843_v42  ;;  %v9679_v42 = vld [vmem:[%s17270_s6 + $0x1c0] sm:$0xff]  ;;  %v9681_v50 = vld [vmem:[%s17270_s6 + $0x1d0] sm:$0xff] }
 0xe5c   :  { %v12683_v62 = vpack.c.bf16 %v9680_v61, %v9679_v42  ;;  %v9773_v42 = vld [vmem:[%s17270_s6 + $0x390] sm:$0xff]  ;;  %v9774_v61 = vld [vmem:[%s17270_s6 + $0x398] sm:$0xff] }
 0xe5d   :  { %12556 = vmatprep.subr.bf16.mxu1 %v12555_v4  ;;  %10953 = vmatpush3.msra.mxu0 %v4961_v46  ;;  %v9685_v46 = vld [vmem:[%s17270_s6 + $0x1f0] sm:$0xff] }
 0xe5e   :  { %12558 = vmatpush3.bf16.msra.mxu1 %v12555_v4  ;;  %12576 = vmatprep.subr.bf16.mxu0 %v12575_v51  ;;  %v9682_v4 = vld [vmem:[%s17270_s6 + $0x1d8] sm:$0xff] }
 0xe61   :  { %10934 = vmatmul.mubr.msk.f32.vlgmr.msra.gmra.mrb[76].mxu1 %vm770_vm1, %v9595_v26  ;;  %v12687_v26 = vpack.c.bf16 %v9682_v4, %v9681_v50  ;;  %v9797_v50 = vld [vmem:[%s17270_s6 + $0x3f0] sm:$0xff]  ;;  %v9798_v4 = vld [vmem:[%s17270_s6 + $0x3f8] sm:$0xff] }
 0xe62   :  { %10982 = vmatprep.mubr.msk.f32.mxu1 %vm770_vm1, %v9611_v2  ;;  %v12839_v33 = vpack.c.bf16 %v9798_v4, %v9797_v50 }
 0xf34   :  { %v10935_v58 = vpop.f32.mrb[76].mxu1 }
 0xf35   :  { %v12930_v37 = vadd.f32 %v10935_v58, %v10928_v45  ;;  %v4926_v60 = vpop.f32.mrb[77].mxu1  ;;  %v9654_v45 = vld [vmem:[%s17270_s6 + $0x158] sm:$0xff]  ;;  %v12719_v58 = vpack.c.bf16 %v9708_v40, %v9707_v56 }
 0xf36   :  { %v12931_v52 = vadd.f32 %v4926_v60, %v4640_v38  ;;  %v12651_v38 = vpack.c.bf16 %v9654_v45, %v9653_v36  ;;  %v9711_v60 = vld [vmem:[%s17270_s6 + $0x260] sm:$0xff]  ;;  %v9770_v36 = vld [vmem:[%s17270_s6 + $0x378] sm:$0xff]  ;;  %v12799_v45 = vpack.c.bf16 %v9768_v29, %v9767_v23 }
 0xf37   :  { %v4950_v0 = vadd.f32 %v12930_v37, %v4947_v55  ;;  %v9712_v55 = vld [vmem:[%s17270_s6 + $0x268] sm:$0xff]  ;;  %v9802_v56 = vld [vmem:[%s17270_s6 + $0x418] sm:$0xff] }
 0xf38   :  { %v4949_v1 = vadd.f32 %v12931_v52, %v4942_v53  ;;  %v9710_v53 = vld [vmem:[%s17270_s6 + $0x258] sm:$0xff]  ;;  %v12727_v52 = vpack.c.bf16 %v9712_v55, %v9711_v60 }
 0xf39   :  { %v16488_v41 = vmax.f32 %v4950_v0, 0.0  ;;  %v9713_v0 = vld [vmem:[%s17270_s6 + $0x270] sm:$0xff] }
 0xf3a   :  { %v16486_v5 = vmax.f32 %v4949_v1, 0.0  ;;  %v9714_v1 = vld [vmem:[%s17270_s6 + $0x278] sm:$0xff] }
 0xf3b   :  { %v12731_v16 = vpack.c.bf16 %v9714_v1, %v9713_v0 }
 0xf3c   :  { %10954 = vmatprep.mubr.msk.f32.mxu0 %vm4962_vm2, %v16486_v5 }
 0xf3d   :  { %10955 = vmatmul.mubr.msk.f32.vlgmr.msra.gmra.mrb[62].mxu0 %vm4962_vm2, %v16488_v41 }
 0xf3e   :  { %12578 = vmatpush3.bf16.msra.mxu0 %v12575_v51  ;;  %10975 = vmatprep.mubr.msk.f32.mxu0 %vm4962_vm2, %v16486_v5  ;;  %v9709_v51 = vld [vmem:[%s17270_s6 + $0x250] sm:$0xff] }
 0xf3f   :  { %12580 = vmatprep.subr.bf16.mxu0 %v12579_v18  ;;  %v12723_v37 = vpack.c.bf16 %v9710_v53, %v9709_v51  ;;  %v9803_v51 = vld [vmem:[%s17270_s6 + $0x420] sm:$0xff]  ;;  %v9804_v53 = vld [vmem:[%s17270_s6 + $0x428] sm:$0xff] }
 0xf42   :  { %12582 = vmatpush3.bf16.msra.mxu0 %v12579_v18  ;;  %v9722_v18 = vld [vmem:[%s17270_s6 + $0x288] sm:$0xff] }
 0xf43   :  { %12584 = vmatprep.subr.bf16.mxu0 %v12583_v59  ;;  %v12739_v12 = vpack.c.bf16 %v9723_v44, %v9722_v18  ;;  %v9618_v18 = vld [vmem:[%s17270_s6 + $0x98] sm:$0xff] }
 0xf44   :  { %v9612_v44 = vld [vmem:[%s17271_s7 + $0x18] sm:$0xff] }
 0xf46   :  { %12586 = vmatpush3.bf16.msra.mxu0 %v12583_v59  ;;  %v9725_v59 = vld [vmem:[%s17270_s6 + $0x2a0] sm:$0xff] }
 0xf47   :  { %12588 = vmatprep.subr.bf16.mxu0 %v12587_v10  ;;  %v12743_v13 = vpack.c.bf16 %v9725_v59, %v9724_v7  ;;  %v5044_v7 = vld [vmem:[%s17271_s7] sm:$0xff] }
 0xf4a   :  { %12590 = vmatpush3.bf16.msra.mxu0 %v12587_v10  ;;  %v9726_v10 = vld [vmem:[%s17270_s6 + $0x2a8] sm:$0xff] }
 0xf4b   :  { %10973 = vmatprep.subr.mxu0 %v9608_v14 }
 0xf4e   :  { %10974 = vmatpush3.msra.mxu0 %v9608_v14  ;;  %v9727_v14 = vld [vmem:[%s17270_s6 + $0x2b0] sm:$0xff] }
 0xf4f   :  { %10976 = vmatmul.mubr.msk.f32.vlgmr.msra.gmra.mrb[64].mxu0 %vm4962_vm2, %v16488_v41  ;;  %12620 = vmatprep.subr.bf16.mxu0 %v12619_v54  ;;  %v12747_v25 = vpack.c.bf16 %v9727_v14, %v9726_v10  ;;  %v5045_v10 = vld [vmem:[%s17271_s7 + $0x8] sm:$0xff] }
 0xf50   :  { %12622 = vmatpush3.bf16.msra.mxu0 %v12619_v54  ;;  %11038 = vmatprep.mubr.msk.f32.mxu0 %vm4962_vm2, %v16486_v5  ;;  %v9730_v54 = vld [vmem:[%s17270_s6 + $0x2c8] sm:$0xff] }
 0xf51   :  { %12624 = vmatprep.subr.bf16.mxu0 %v12623_v6 }
 0xf54   :  { %12626 = vmatpush3.bf16.msra.mxu0 %v12623_v6  ;;  %v9752_v6 = vld [vmem:[%s17270_s6 + $0x318] sm:$0xff] }
 0xf55   :  { %12628 = vmatprep.subr.bf16.mxu0 %v12627_v21  ;;  %v12779_v49 = vpack.c.bf16 %v9753_v8, %v9752_v6  ;;  %v9623_v6 = vld [vmem:[%s17270_s6 + $0xc0] sm:$0xff]  ;;  %v9624_v8 = vld [vmem:[%s17270_s6 + $0xc8] sm:$0xff] }
 0xf58   :  { %12630 = vmatpush3.bf16.msra.mxu0 %v12627_v21  ;;  %v9755_v21 = vld [vmem:[%s17270_s6 + $0x330] sm:$0xff] }
 0xf59   :  { %12632 = vmatprep.subr.bf16.mxu0 %v12631_v15  ;;  %v12783_v9 = vpack.c.bf16 %v9755_v21, %v9754_v32  ;;  %v12611_v21 = vpack.c.bf16 %v9624_v8, %v9623_v6  ;;  %v9696_v8 = vld [vmem:[%s17270_s6 + $0x218] sm:$0xff] }
 0xf5c   :  { %12634 = vmatpush3.bf16.msra.mxu0 %v12631_v15  ;;  %v9756_v15 = vld [vmem:[%s17270_s6 + $0x338] sm:$0xff] }
 0xf5d   :  { %11036 = vmatprep.subr.mxu0 %v9640_v63 }
 0xf60   :  { %11037 = vmatpush3.msra.mxu0 %v9640_v63  ;;  %v9757_v63 = vld [vmem:[%s17270_s6 + $0x340] sm:$0xff] }
 0xf61   :  { %11039 = vmatmul.mubr.msk.f32.vlgmr.msra.gmra.mrb[66].mxu0 %vm4962_vm2, %v16488_v41  ;;  %12640 = vmatprep.subr.bf16.mxu0 %v12639_v27  ;;  %v12787_v35 = vpack.c.bf16 %v9757_v63, %v9756_v15 }
 0xf62   :  { %12642 = vmatpush3.bf16.msra.mxu0 %v12639_v27  ;;  %11066 = vmatprep.mubr.msk.f32.mxu0 %vm4962_vm2, %v16486_v5  ;;  %v12791_v27 = vpack.c.bf16 %v9759_v24, %v9758_v22 }
 0xf63   :  { %12644 = vmatprep.subr.bf16.mxu0 %v12643_v28 }
 0xf66   :  { %12646 = vmatpush3.bf16.msra.mxu0 %v12643_v28  ;;  %v9760_v28 = vld [vmem:[%s17270_s6 + $0x358] sm:$0xff] }
 0xf67   :  { %12648 = vmatprep.subr.bf16.mxu0 %v12647_v31 }
 0xf6a   :  { %12650 = vmatpush3.bf16.msra.mxu0 %v12647_v31  ;;  %v9769_v31 = vld [vmem:[%s17270_s6 + $0x370] sm:$0xff] }
 0xf6b   :  { %12652 = vmatprep.subr.bf16.mxu0 %v12651_v38 }
 0xf6e   :  { %12654 = vmatpush3.bf16.msra.mxu0 %v12651_v38  ;;  %v12803_v38 = vpack.c.bf16 %v9770_v36, %v9769_v31 }
 0xf6f   :  { %11064 = vmatprep.subr.mxu0 %v9655_v39 }
 0xf72   :  { %11065 = vmatpush3.msra.mxu0 %v9655_v39  ;;  %v9771_v39 = vld [vmem:[%s17270_s6 + $0x380] sm:$0xff] }
 0xf73   :  { %11067 = vmatmul.mubr.msk.f32.vlgmr.msra.gmra.mrb[68].mxu0 %vm4962_vm2, %v16488_v41  ;;  %12680 = vmatprep.subr.bf16.mxu0 %v12679_v43  ;;  %v12807_v57 = vpack.c.bf16 %v9772_v47, %v9771_v39  ;;  %v9628_v39 = vld [vmem:[%s17271_s7 + $0x20] sm:$0xff] }
 0xf74   :  { %12682 = vmatpush3.bf16.msra.mxu0 %v12679_v43  ;;  %11122 = vmatprep.mubr.msk.f32.mxu0 %vm4962_vm2, %v16486_v5  ;;  %v12811_v43 = vpack.c.bf16 %v9774_v61, %v9773_v42 }
 0xf75   :  { %12684 = vmatprep.subr.bf16.mxu0 %v12683_v62 }
 0xf78   :  { %12686 = vmatpush3.bf16.msra.mxu0 %v12683_v62  ;;  %v9775_v62 = vld [vmem:[%s17270_s6 + $0x3a0] sm:$0xff] }
 0xf79   :  { %12688 = vmatprep.subr.bf16.mxu0 %v12687_v26 }
 0xf7c   :  { %12690 = vmatpush3.bf16.msra.mxu0 %v12687_v26  ;;  %v9799_v26 = vld [vmem:[%s17270_s6 + $0x400] sm:$0xff] }
 0xf7d   :  { %12692 = vmatprep.subr.bf16.mxu0 %v12691_v34 }
 0xf80   :  { %12694 = vmatpush3.bf16.msra.mxu0 %v12691_v34  ;;  %v12843_v34 = vpack.c.bf16 %v9800_v48, %v9799_v26  ;;  %v9629_v48 = vld [vmem:[%s17271_s7 + $0x28] sm:$0xff] }
 0xf81   :  { %11120 = vmatprep.subr.mxu0 %v9685_v46 }
 0xf84   :  { %11121 = vmatpush3.msra.mxu0 %v9685_v46  ;;  %v9801_v46 = vld [vmem:[%s17270_s6 + $0x410] sm:$0xff] }
 0xf85   :  { %11123 = vmatmul.mubr.msk.f32.vlgmr.msra.gmra.mrb[70].mxu0 %vm4962_vm2, %v16488_v41  ;;  %12720 = vmatprep.subr.bf16.mxu0 %v12719_v58  ;;  %v12847_v40 = vpack.c.bf16 %v9802_v56, %v9801_v46  ;;  %v9663_v46 = vld [vmem:[%s17270_s6 + $0x170] sm:$0xff]  ;;  %v9644_v56 = vld [vmem:[%s17271_s7 + $0x38] sm:$0xff] }
 0xf86   :  { %12722 = vmatpush3.bf16.msra.mxu0 %v12719_v58  ;;  %11178 = vmatprep.mubr.msk.f32.mxu0 %vm4962_vm2, %v16486_v5  ;;  %v12851_v58 = vpack.c.bf16 %v9804_v53, %v9803_v51  ;;  %v9664_v53 = vld [vmem:[%s17270_s6 + $0x178] sm:$0xff] }
 0xf87   :  { %12724 = vmatprep.subr.bf16.mxu0 %v12723_v37 }
 0xf8a   :  { %12726 = vmatpush3.bf16.msra.mxu0 %v12723_v37  ;;  %v9805_v37 = vld [vmem:[%s17270_s6 + $0x430] sm:$0xff] }
 0xf8b   :  { %12728 = vmatprep.subr.bf16.mxu0 %v12727_v52 }
 0xf8e   :  { %12730 = vmatpush3.bf16.msra.mxu0 %v12727_v52 }
 0xf8f   :  { %12732 = vmatprep.subr.bf16.mxu0 %v12731_v16 }
 0xf92   :  { %12734 = vmatpush3.bf16.msra.mxu0 %v12731_v16 }
 0xf93   :  { %11176 = vmatprep.subr.mxu0 %v9715_v3 }
 0xf96   :  { %11177 = vmatpush3.msra.mxu0 %v9715_v3  ;;  %v9617_v3 = vld [vmem:[%s17270_s6 + $0x90] sm:$0xff] }
 0xf97   :  { %11179 = vmatmul.mubr.msk.f32.vlgmr.msra.gmra.mrb[72].mxu0 %vm4962_vm2, %v16488_v41  ;;  %12740 = vmatprep.subr.bf16.mxu0 %v12739_v12  ;;  %v12599_v59 = vpack.c.bf16 %v9618_v18, %v9617_v3  ;;  %v9670_v18 = vld [vmem:[%s17270_s6 + $0x1a8] sm:$0xff] }
 0xf98   :  { %12742 = vmatpush3.bf16.msra.mxu0 %v12739_v12  ;;  %11206 = vmatprep.mubr.msk.f32.mxu0 %vm4962_vm2, %v16486_v5  ;;  %v9619_v12 = vld [vmem:[%s17270_s6 + $0xa0] sm:$0xff] }
 0xf99   :  { %12744 = vmatprep.subr.bf16.mxu0 %v12743_v13 }
 0xf9c   :  { %12746 = vmatpush3.bf16.msra.mxu0 %v12743_v13  ;;  %v9620_v13 = vld [vmem:[%s17270_s6 + $0xa8] sm:$0xff] }
 0xf9d   :  { %12748 = vmatprep.subr.bf16.mxu0 %v12747_v25  ;;  %v12603_v14 = vpack.c.bf16 %v9620_v13, %v9619_v12  ;;  %v9692_v13 = vld [vmem:[%s17270_s6 + $0x1f8] sm:$0xff] }
 0xfa0   :  { %12750 = vmatpush3.bf16.msra.mxu0 %v12747_v25  ;;  %v9621_v25 = vld [vmem:[%s17270_s6 + $0xb0] sm:$0xff] }
 0xfa1   :  { %12752 = vmatprep.subr.bf16.mxu0 %v12751_v20 }
 0xfa4   :  { %12754 = vmatpush3.bf16.msra.mxu0 %v12751_v20  ;;  %v12607_v20 = vpack.c.bf16 %v9622_v17, %v9621_v25  ;;  %v9688_v25 = vld [vmem:[%s17271_s7 + $0x60] sm:$0xff] }
 0xfa5   :  { %11204 = vmatprep.subr.mxu0 %v9730_v54 }
 0xfa8   :  { %11205 = vmatpush3.msra.mxu0 %v9730_v54 }
 0xfa9   :  { %11207 = vmatmul.mubr.msk.f32.vlgmr.msra.gmra.mrb[74].mxu0 %vm4962_vm2, %v16488_v41  ;;  %12780 = vmatprep.subr.bf16.mxu0 %v12779_v49 }
 0xfaa   :  { %12782 = vmatpush3.bf16.msra.mxu0 %v12779_v49  ;;  %11262 = vmatprep.mubr.msk.f32.mxu0 %vm4962_vm2, %v16486_v5  ;;  %v9625_v49 = vld [vmem:[%s17270_s6 + $0xd0] sm:$0xff] }
 0xfab   :  { %12784 = vmatprep.subr.bf16.mxu0 %v12783_v9 }
 0xfae   :  { %12786 = vmatpush3.bf16.msra.mxu0 %v12783_v9 }
 0xfaf   :  { %12788 = vmatprep.subr.bf16.mxu0 %v12787_v35 }
 0xfb2   :  { %12790 = vmatpush3.bf16.msra.mxu0 %v12787_v35 }
 0xfb3   :  { %12792 = vmatprep.subr.bf16.mxu0 %v12791_v27 }
 0xfb6   :  { %12794 = vmatpush3.bf16.msra.mxu0 %v12791_v27 }
 0xfb7   :  { %11260 = vmatprep.subr.mxu0 %v9760_v28 }
 0xfba   :  { %11261 = vmatpush3.msra.mxu0 %v9760_v28 }
 0xfbb   :  { %11263 = vmatmul.mubr.msk.f32.vlgmr.msra.gmra.mrb[76].mxu0 %vm4962_vm2, %v16488_v41  ;;  %12800 = vmatprep.subr.bf16.mxu0 %v12799_v45 }
 0xfbc   :  { %12802 = vmatpush3.bf16.msra.mxu0 %v12799_v45  ;;  %11290 = vmatprep.mubr.msk.f32.mxu0 %vm4962_vm2, %v16486_v5 }
 0xfbd   :  { %12804 = vmatprep.subr.bf16.mxu0 %v12803_v38 }
 0xfc0   :  { %12806 = vmatpush3.bf16.msra.mxu0 %v12803_v38 }
 0xfc1   :  { %12808 = vmatprep.subr.bf16.mxu0 %v12807_v57 }
 0xfc4   :  { %12810 = vmatpush3.bf16.msra.mxu0 %v12807_v57 }
 0xfc5   :  { %12812 = vmatprep.subr.bf16.mxu0 %v12811_v43 }
 0xfc8   :  { %12814 = vmatpush3.bf16.msra.mxu0 %v12811_v43 }
 0xfc9   :  { %11288 = vmatprep.subr.mxu0 %v9775_v62 }
 0xfcc   :  { %11289 = vmatpush3.msra.mxu0 %v9775_v62 }
 0xfcd   :  { %11291 = vmatmul.mubr.msk.f32.vlgmr.msra.gmra.mrb[78].mxu0 %vm4962_vm2, %v16488_v41  ;;  %12840 = vmatprep.subr.bf16.mxu0 %v12839_v33 }
 0xfce   :  { %12842 = vmatpush3.bf16.msra.mxu0 %v12839_v33  ;;  %11346 = vmatprep.mubr.msk.f32.mxu0 %vm4962_vm2, %v16486_v5  ;;  %v9643_v33 = vld [vmem:[%s17271_s7 + $0x30] sm:$0xff] }
 0xfcf   :  { %12844 = vmatprep.subr.bf16.mxu0 %v12843_v34 }
 0xfd2   :  { %12846 = vmatpush3.bf16.msra.mxu0 %v12843_v34  ;;  %v9662_v34 = vld [vmem:[%s17270_s6 + $0x168] sm:$0xff] }
 0xfd3   :  { %12848 = vmatprep.subr.bf16.mxu0 %v12847_v40  ;;  %v12659_v51 = vpack.c.bf16 %v9663_v46, %v9662_v34  ;;  %v9745_v34 = vld [vmem:[%s17270_s6 + $0x310] sm:$0xff]  ;;  %v9748_v46 = vld [vmem:[%s17271_s7 + $0xa0] sm:$0xff] }
 0xfd6   :  { %12850 = vmatpush3.bf16.msra.mxu0 %v12847_v40  ;;  %v9658_v40 = vld [vmem:[%s17271_s7 + $0x40] sm:$0xff] }
 0xfd7   :  { %12852 = vmatprep.subr.bf16.mxu0 %v12851_v58 }
 0xfda   :  { %12854 = vmatpush3.bf16.msra.mxu0 %v12851_v58  ;;  %v9665_v58 = vld [vmem:[%s17270_s6 + $0x180] sm:$0xff] }
 0xfdb   :  { %11344 = vmatprep.subr.mxu0 %v9805_v37 }
 0xfde   :  { %11345 = vmatpush3.msra.mxu0 %v9805_v37  ;;  %v9659_v37 = vld [vmem:[%s17271_s7 + $0x48] sm:$0xff] }
 0xfdf   :  { %11347 = vmatmul.mubr.msk.f32.vlgmr.msra.gmra.mrb[80].mxu0 %vm4962_vm2, %v16488_v41 }
0x1010   :  { %v10956_v60 = vpop.f32.mrb[62].mxu0 }
0x1011   :  { %v5035_v55 = vpop.f32.mrb[63].mxu0 }
0x1012   :  { %v12595_v52 = vpack.c.bf16 %v10956_v60, %v5035_v55  ;;  %v12663_v60 = vpack.c.bf16 %v9665_v58, %v9664_v53  ;;  %v9666_v55 = vld [vmem:[%s17270_s6 + $0x188] sm:$0xff]  ;;  %v9763_v58 = vld [vmem:[%s17271_s7 + $0xb0] sm:$0xff] }
0x1013   :  { %v9749_v53 = vld [vmem:[%s17271_s7 + $0xa8] sm:$0xff] }
0x1022   :  { %v10977_v0 = vpop.f32.mrb[64].mxu0 }
0x1023   :  { %v5122_v1 = vpop.f32.mrb[65].mxu0 }
0x1024   :  { %v12591_v16 = vpack.c.bf16 %v10977_v0, %v5122_v1  ;;  %v9668_v1 = vld [vmem:[%s17270_s6 + $0x198] sm:$0xff] }
0x1026   :  { %12592 = vmatprep.subr.bf16.mxu1 %v12591_v16 }
0x1027   :  { %12594 = vmatpush3.bf16.msra.mxu1 %v12591_v16  ;;  %v9669_v16 = vld [vmem:[%s17270_s6 + $0x1a0] sm:$0xff] }
0x1028   :  { %12596 = vmatprep.subr.bf16.mxu1 %v12595_v52  ;;  %v12671_v3 = vpack.c.bf16 %v9669_v16, %v9668_v1  ;;  %v9785_v1 = vld [vmem:[%s17270_s6 + $0x3c0] sm:$0xff]  ;;  %v9779_v16 = vld [vmem:[%s17271_s7 + $0xc8] sm:$0xff] }
0x102a   :  { %10983 = vmatmul.mubr.msk.f32.vlgmr.msra.gmra.mrb[78].mxu1 %vm770_vm1, %v9612_v44  ;;  %v9673_v44 = vld [vmem:[%s17271_s7 + $0x50] sm:$0xff] }
0x102b   :  { %12598 = vmatpush3.bf16.msra.mxu1 %v12595_v52  ;;  %10989 = vmatprep.mubr.msk.f32.mxu1 %vm770_vm1, %v5044_v7  ;;  %v9667_v52 = vld [vmem:[%s17270_s6 + $0x190] sm:$0xff] }
0x102c   :  { %12600 = vmatprep.subr.bf16.mxu1 %v12599_v59  ;;  %v12667_v0 = vpack.c.bf16 %v9667_v52, %v9666_v55  ;;  %v9764_v55 = vld [vmem:[%s17271_s7 + $0xb8] sm:$0xff] }
0x1032   :  { %10990 = vmatmul.mubr.msk.f32.vlgmr.msra.gmra.mrb[78].mxu1 %vm770_vm1, %v5045_v10  ;;  %v9693_v10 = vld [vmem:[%s17270_s6 + $0x200] sm:$0xff] }
0x1033   :  { %12602 = vmatpush3.bf16.msra.mxu1 %v12599_v59  ;;  %11010 = vmatprep.mubr.msk.f32.mxu1 %vm4962_vm2, %v16486_v5  ;;  %v12699_v17 = vpack.c.bf16 %v9693_v10, %v9692_v13  ;;  %v9790_v13 = vld [vmem:[%s17270_s6 + $0x3e8] sm:$0xff]  ;;  %v9793_v10 = vld [vmem:[%s17271_s7 + $0xd0] sm:$0xff] }
0x1034   :  { %v11040_v19 = vpop.f32.mrb[66].mxu0  ;;  %12604 = vmatprep.subr.bf16.mxu1 %v12603_v14 }
0x1035   :  { %v5543_v54 = vpop.f32.mrb[67].mxu0 }
0x1036   :  { %v12635_v32 = vpack.c.bf16 %v11040_v19, %v5543_v54  ;;  %v9694_v19 = vld [vmem:[%s17270_s6 + $0x208] sm:$0xff] }
0x1037   :  { %12606 = vmatpush3.bf16.msra.mxu1 %v12603_v14  ;;  %v9674_v14 = vld [vmem:[%s17271_s7 + $0x58] sm:$0xff]  ;;  %v9689_v54 = vld [vmem:[%s17271_s7 + $0x68] sm:$0xff] }
0x1038   :  { %12608 = vmatprep.subr.bf16.mxu1 %v12607_v20 }
0x103b   :  { %12610 = vmatpush3.bf16.msra.mxu1 %v12607_v20  ;;  %v9695_v20 = vld [vmem:[%s17270_s6 + $0x210] sm:$0xff] }
0x103c   :  { %12612 = vmatprep.subr.bf16.mxu1 %v12611_v21  ;;  %v12703_v6 = vpack.c.bf16 %v9695_v20, %v9694_v19  ;;  %v9812_v19 = vld [vmem:[%s17270_s6 + $0x438] sm:$0xff]  ;;  %v9813_v20 = vld [vmem:[%s17270_s6 + $0x440] sm:$0xff] }
0x103f   :  { %12614 = vmatpush3.bf16.msra.mxu1 %v12611_v21 }
0x1040   :  { %11008 = vmatprep.subr.mxu1 %v9625_v49 }
0x1043   :  { %11009 = vmatpush3.msra.mxu1 %v9625_v49  ;;  %v9698_v49 = vld [vmem:[%s17270_s6 + $0x228] sm:$0xff] }
0x1044   :  { %11011 = vmatmul.mubr.msk.f32.vlgmr.msra.gmra.mrb[80].mxu1 %vm4962_vm2, %v16488_v41 }
0x1045   :  { %11017 = vmatprep.mubr.msk.f32.mxu1 %vm770_vm1, %v9628_v39 }
0x1046   :  { %v11068_v9 = vpop.f32.mrb[68].mxu0 }
0x1047   :  { %v5714_v15 = vpop.f32.mrb[69].mxu0 }
0x1048   :  { %v12655_v63 = vpack.c.bf16 %v11068_v9, %v5714_v15  ;;  %v9699_v9 = vld [vmem:[%s17270_s6 + $0x230] sm:$0xff] }
0x1049   :  { %v12711_v15 = vpack.c.bf16 %v9699_v9, %v9698_v49  ;;  %v9809_v49 = vld [vmem:[%s17271_s7 + $0xe8] sm:$0xff] }
0x1058   :  { %v11124_v2 = vpop.f32.mrb[70].mxu0 }
0x1059   :  { %v6056_v35 = vpop.f32.mrb[71].mxu0 }
0x105a   :  { %v16808_v22 = vpack.c.bf16 %v11124_v2, %v6056_v35  ;;  %v9703_v2 = vld [vmem:[%s17271_s7 + $0x70] sm:$0xff] }
0x106a   :  { %v11180_v24 = vpop.f32.mrb[72].mxu0 }
0x106b   :  { %v6398_v27 = vpop.f32.mrb[73].mxu0 }
0x106c   :  { %v16810_v28 = vpack.c.bf16 %v11180_v24, %v6398_v27  ;;  %v9704_v27 = vld [vmem:[%s17271_s7 + $0x78] sm:$0xff] }
0x107c   :  { %v11208_v23 = vpop.f32.mrb[74].mxu0 }
0x107d   :  { %v6569_v29 = vpop.f32.mrb[75].mxu0 }
0x107e   :  { %v16812_v31 = vpack.c.bf16 %v11208_v23, %v6569_v29  ;;  %v9718_v23 = vld [vmem:[%s17271_s7 + $0x80] sm:$0xff]  ;;  %v9737_v29 = vld [vmem:[%s17270_s6 + $0x2d0] sm:$0xff] }
0x108e   :  { %v11264_v36 = vpop.f32.mrb[76].mxu0 }
0x108f   :  { %v6911_v45 = vpop.f32.mrb[77].mxu0 }
0x1090   :  { %v16814_v38 = vpack.c.bf16 %v11264_v36, %v6911_v45  ;;  %v9738_v36 = vld [vmem:[%s17270_s6 + $0x2d8] sm:$0xff]  ;;  %v9719_v45 = vld [vmem:[%s17271_s7 + $0x88] sm:$0xff] }
0x1091   :  { %v12759_v39 = vpack.c.bf16 %v9738_v36, %v9737_v29  ;;  %v9824_v36 = vld [vmem:[%s17271_s7 + $0xf8] sm:$0xff] }
0x10a0   :  { %v11292_v47 = vpop.f32.mrb[78].mxu0 }
0x10a1   :  { %v7082_v57 = vpop.f32.mrb[79].mxu0 }
0x10a2   :  { %v16820_v42 = vpack.c.bf16 %v11292_v47, %v7082_v57  ;;  %v9739_v47 = vld [vmem:[%s17270_s6 + $0x2e0] sm:$0xff]  ;;  %v9740_v57 = vld [vmem:[%s17270_s6 + $0x2e8] sm:$0xff] }
0x10b2   :  { %v11348_v61 = vpop.f32.mrb[80].mxu0 }
0x10b3   :  { %v7424_v43 = vpop.f32.mrb[81].mxu0 }
0x10b4   :  { %v16822_v62 = vpack.c.bf16 %v11348_v61, %v7424_v43  ;;  %v9734_v61 = vld [vmem:[%s17271_s7 + $0x98] sm:$0xff]  ;;  %v12763_v43 = vpack.c.bf16 %v9740_v57, %v9739_v47  ;;  %v7695_v47 = vpop.permute.xlu0 %7694 }
0x1117   :  { %v11012_v50 = vpop.f32.mrb[80].mxu1 }
0x1118   :  { %v5372_v4 = vpop.f32.mrb[81].mxu1 }
0x1119   :  { %v12615_v26 = vpack.c.bf16 %v11012_v50, %v5372_v4  ;;  %v9742_v50 = vld [vmem:[%s17270_s6 + $0x2f8] sm:$0xff] }
0x111b   :  { %12616 = vmatprep.subr.bf16.mxu1 %v12615_v26 }
0x111c   :  { %12618 = vmatpush3.bf16.msra.mxu1 %v12615_v26  ;;  %v9743_v26 = vld [vmem:[%s17270_s6 + $0x300] sm:$0xff] }
0x111d   :  { %12636 = vmatprep.subr.bf16.mxu1 %v12635_v32 }
0x111f   :  { %11018 = vmatmul.mubr.msk.f32.vlgmr.msra.gmra.mrb[78].mxu1 %vm770_vm1, %v9629_v48  ;;  %v9744_v48 = vld [vmem:[%s17270_s6 + $0x308] sm:$0xff] }
0x1120   :  { %12638 = vmatpush3.bf16.msra.mxu1 %v12635_v32  ;;  %11045 = vmatprep.mubr.msk.f32.mxu1 %vm770_vm1, %v9643_v33  ;;  %v9697_v32 = vld [vmem:[%s17270_s6 + $0x220] sm:$0xff]  ;;  %v12771_v33 = vpack.c.bf16 %v9744_v48, %v9743_v26 }
0x1121   :  { %12656 = vmatprep.subr.bf16.mxu1 %v12655_v63  ;;  %v12707_v21 = vpack.c.bf16 %v9697_v32, %v9696_v8  ;;  %v12859_v8 = vpack.c.bf16 %v9813_v20, %v9812_v19  ;;  %v9814_v32 = vld [vmem:[%s17270_s6 + $0x448] sm:$0xff]  ;;  %v8332_v19 = vld [vmem:[%s17275_s12 + $0x60] sm:$0xff] }
0x1122   :  { %v8333_v20 = vld [vmem:[%s17275_s12 + $0x68] sm:$0xff] }
0x1127   :  { %11046 = vmatmul.mubr.msk.f32.vlgmr.msra.gmra.mrb[78].mxu1 %vm770_vm1, %v9644_v56 }
0x1128   :  { %12658 = vmatpush3.bf16.msra.mxu1 %v12655_v63  ;;  %11073 = vmatprep.mubr.msk.f32.mxu1 %vm770_vm1, %v9658_v40  ;;  %v9700_v63 = vld [vmem:[%s17270_s6 + $0x238] sm:$0xff] }
0x1129   :  { %12660 = vmatprep.subr.bf16.mxu1 %v12659_v51 }
0x112f   :  { %11074 = vmatmul.mubr.msk.f32.vlgmr.msra.gmra.mrb[78].mxu1 %vm770_vm1, %v9659_v37  ;;  %v9782_v37 = vld [vmem:[%s17270_s6 + $0x3a8] sm:$0xff] }
0x1130   :  { %12662 = vmatpush3.bf16.msra.mxu1 %v12659_v51  ;;  %11094 = vmatprep.mubr.msk.f32.mxu1 %vm4962_vm2, %v16486_v5 }
0x1131   :  { %12664 = vmatprep.subr.bf16.mxu1 %v12663_v60 }
0x1134   :  { %12666 = vmatpush3.bf16.msra.mxu1 %v12663_v60  ;;  %v9783_v60 = vld [vmem:[%s17270_s6 + $0x3b0] sm:$0xff] }
0x1135   :  { %12668 = vmatprep.subr.bf16.mxu1 %v12667_v0  ;;  %v12819_v52 = vpack.c.bf16 %v9783_v60, %v9782_v37  ;;  %v8339_v37 = vld [vmem:[%s17274_s11 + $0x8] sm:$0xff] }
0x1138   :  { %12670 = vmatpush3.bf16.msra.mxu1 %v12667_v0  ;;  %v9784_v0 = vld [vmem:[%s17270_s6 + $0x3b8] sm:$0xff] }
0x1139   :  { %12672 = vmatprep.subr.bf16.mxu1 %v12671_v3 }
0x113c   :  { %12674 = vmatpush3.bf16.msra.mxu1 %v12671_v3  ;;  %v12823_v3 = vpack.c.bf16 %v9785_v1, %v9784_v0  ;;  %v8320_v0 = vld [vmem:[%s17275_s12] sm:$0xff] }
0x113d   :  { %11092 = vmatprep.subr.mxu1 %v9670_v18  ;;  %v8342_v1 = vld [vmem:[%s17274_s11 + $0x20] sm:$0xff] }
0x1140   :  { %11093 = vmatpush3.msra.mxu1 %v9670_v18  ;;  %v9787_v18 = vld [vmem:[%s17270_s6 + $0x3d0] sm:$0xff] }
0x1141   :  { %11095 = vmatmul.mubr.msk.f32.vlgmr.msra.gmra.mrb[82].mxu1 %vm4962_vm2, %v16488_v41 }
0x1142   :  { %11101 = vmatprep.mubr.msk.f32.mxu1 %vm770_vm1, %v9673_v44 }
0x1214   :  { %v11096_v7 = vpop.f32.mrb[82].mxu1 }
0x1215   :  { %v5885_v59 = vpop.f32.mrb[83].mxu1 }
0x1216   :  { %v12675_v12 = vpack.c.bf16 %v11096_v7, %v5885_v59  ;;  %v9788_v7 = vld [vmem:[%s17270_s6 + $0x3d8] sm:$0xff]  ;;  %v9789_v59 = vld [vmem:[%s17270_s6 + $0x3e0] sm:$0xff] }
0x1218   :  { %12676 = vmatprep.subr.bf16.mxu1 %v12675_v12 }
0x1219   :  { %12678 = vmatpush3.bf16.msra.mxu1 %v12675_v12  ;;  %v12831_v12 = vpack.c.bf16 %v9789_v59, %v9788_v7  ;;  %v8324_v7 = vld [vmem:[%s17275_s12 + $0x20] sm:$0xff]  ;;  %v8325_v59 = vld [vmem:[%s17275_s12 + $0x28] sm:$0xff] }
0x121a   :  { %12696 = vmatprep.subr.bf16.mxu1 %v16808_v22 }
0x121c   :  { %11102 = vmatmul.mubr.msk.f32.vlgmr.msra.gmra.mrb[78].mxu1 %vm770_vm1, %v9674_v14 }
0x121d   :  { %12698 = vmatpush3.bf16.msra.mxu1 %v16808_v22  ;;  %11129 = vmatprep.mubr.msk.f32.mxu1 %vm770_vm1, %v9688_v25 }
0x121e   :  { %12700 = vmatprep.subr.bf16.mxu1 %v12699_v17 }
0x1224   :  { %11130 = vmatmul.mubr.msk.f32.vlgmr.msra.gmra.mrb[78].mxu1 %vm770_vm1, %v9689_v54  ;;  %v9794_v54 = vld [vmem:[%s17271_s7 + $0xd8] sm:$0xff] }
0x1225   :  { %12702 = vmatpush3.bf16.msra.mxu1 %v12699_v17  ;;  %11150 = vmatprep.mubr.msk.f32.mxu1 %vm4962_vm2, %v16486_v5 }
0x1226   :  { %12704 = vmatprep.subr.bf16.mxu1 %v12703_v6 }
0x1229   :  { %12706 = vmatpush3.bf16.msra.mxu1 %v12703_v6  ;;  %v9808_v6 = vld [vmem:[%s17271_s7 + $0xe0] sm:$0xff] }
0x122a   :  { %12708 = vmatprep.subr.bf16.mxu1 %v12707_v21 }
0x122d   :  { %12710 = vmatpush3.bf16.msra.mxu1 %v12707_v21  ;;  %v9815_v21 = vld [vmem:[%s17270_s6 + $0x450] sm:$0xff] }
0x122e   :  { %12712 = vmatprep.subr.bf16.mxu1 %v12711_v15  ;;  %v12863_v9 = vpack.c.bf16 %v9815_v21, %v9814_v32  ;;  %v8337_v32 = vld [vmem:[%s17275_s12 + $0x88] sm:$0xff] }
0x1231   :  { %12714 = vmatpush3.bf16.msra.mxu1 %v12711_v15  ;;  %v9817_v15 = vld [vmem:[%s17270_s6 + $0x460] sm:$0xff] }
0x1232   :  { %11148 = vmatprep.subr.mxu1 %v9700_v63 }
0x1235   :  { %11149 = vmatpush3.msra.mxu1 %v9700_v63 }
0x1236   :  { %11151 = vmatmul.mubr.msk.f32.vlgmr.msra.gmra.mrb[84].mxu1 %vm4962_vm2, %v16488_v41 }
0x1237   :  { %11157 = vmatprep.mubr.msk.f32.mxu1 %vm770_vm1, %v9703_v2  ;;  %v9818_v2 = vld [vmem:[%s17270_s6 + $0x468] sm:$0xff] }
0x1309   :  { %v11152_v35 = vpop.f32.mrb[84].mxu1 }
0x130a   :  { %v6227_v22 = vpop.f32.mrb[85].mxu1 }
0x130b   :  { %v12715_v24 = vpack.c.bf16 %v11152_v35, %v6227_v22  ;;  %v9819_v35 = vld [vmem:[%s17270_s6 + $0x470] sm:$0xff] }
0x130c   :  { %v12871_v22 = vpack.c.bf16 %v9819_v35, %v9818_v2  ;;  %v8365_v35 = vpop.permute.xlu0 %8364 }
0x130d   :  { %12716 = vmatprep.subr.bf16.mxu1 %v12715_v24 }
0x130e   :  { %12718 = vmatpush3.bf16.msra.mxu1 %v12715_v24  ;;  %v9820_v24 = vld [vmem:[%s17270_s6 + $0x478] sm:$0xff] }
0x130f   :  { %12736 = vmatprep.subr.bf16.mxu1 %v16810_v28 }
0x1311   :  { %11158 = vmatmul.mubr.msk.f32.vlgmr.msra.gmra.mrb[78].mxu1 %vm770_vm1, %v9704_v27 }
0x1312   :  { %12738 = vmatpush3.bf16.msra.mxu1 %v16810_v28  ;;  %11185 = vmatprep.mubr.msk.f32.mxu1 %vm770_vm1, %v9718_v23  ;;  %v9733_v28 = vld [vmem:[%s17271_s7 + $0x90] sm:$0xff] }
0x1313   :  { %12756 = vmatprep.subr.bf16.mxu1 %v16812_v31 }
0x1319   :  { %11186 = vmatmul.mubr.msk.f32.vlgmr.msra.gmra.mrb[78].mxu1 %vm770_vm1, %v9719_v45  ;;  %v9829_v45 = vld [vmem:[%s17272_s9 + $0x8] sm:$0xff] }
0x131a   :  { %12758 = vmatpush3.bf16.msra.mxu1 %v16812_v31  ;;  %11213 = vmatprep.mubr.msk.f32.mxu1 %vm770_vm1, %v9733_v28  ;;  %v9741_v31 = vld [vmem:[%s17270_s6 + $0x2f0] sm:$0xff]  ;;  %v7700_v28 = vpop.permute.xlu1 %7699 }
0x131b   :  { %12760 = vmatprep.subr.bf16.mxu1 %v12759_v39  ;;  %v12767_v4 = vpack.c.bf16 %v9742_v50, %v9741_v31 }
0x1321   :  { %11214 = vmatmul.mubr.msk.f32.vlgmr.msra.gmra.mrb[78].mxu1 %vm770_vm1, %v9734_v61 }
0x1322   :  { %12762 = vmatpush3.bf16.msra.mxu1 %v12759_v39  ;;  %11234 = vmatprep.mubr.msk.f32.mxu1 %vm4962_vm2, %v16486_v5 }
0x1323   :  { %12764 = vmatprep.subr.bf16.mxu1 %v12763_v43 }
0x1326   :  { %12766 = vmatpush3.bf16.msra.mxu1 %v12763_v43 }
0x1327   :  { %12768 = vmatprep.subr.bf16.mxu1 %v12767_v4 }
0x132a   :  { %12770 = vmatpush3.bf16.msra.mxu1 %v12767_v4 }
0x132b   :  { %12772 = vmatprep.subr.bf16.mxu1 %v12771_v33 }
0x132e   :  { %12774 = vmatpush3.bf16.msra.mxu1 %v12771_v33 }
0x132f   :  { %11232 = vmatprep.subr.mxu1 %v9745_v34 }
0x1332   :  { %11233 = vmatpush3.msra.mxu1 %v9745_v34 }
0x1333   :  { %11235 = vmatmul.mubr.msk.f32.vlgmr.msra.gmra.mrb[86].mxu1 %vm4962_vm2, %v16488_v41 }
0x1334   :  { %11241 = vmatprep.mubr.msk.f32.mxu1 %vm770_vm1, %v9748_v46 }
0x1406   :  { %v11236_v56 = vpop.f32.mrb[86].mxu1 }
0x1407   :  { %v6740_v40 = vpop.f32.mrb[87].mxu1 }
0x1408   :  { %v12775_v51 = vpack.c.bf16 %v11236_v56, %v6740_v40  ;;  %v9832_v56 = vld [vmem:[%s17273_s10 + $0x4] sm:$0xf]  ;;  %v9835_v40 = vld [vmem:[%s17272_s9 + $0x10] sm:$0xff] }
0x140a   :  { %12776 = vmatprep.subr.bf16.mxu1 %v12775_v51 }
0x140b   :  { %12778 = vmatpush3.bf16.msra.mxu1 %v12775_v51  ;;  %v7788_v51 = vld [vmem:[%s17273_s10] sm:$0xf] }
0x140c   :  { %12796 = vmatprep.subr.bf16.mxu1 %v16814_v38 }
0x140e   :  { %11242 = vmatmul.mubr.msk.f32.vlgmr.msra.gmra.mrb[78].mxu1 %vm770_vm1, %v9749_v53  ;;  %v9840_v53 = vld [vmem:[%s17272_s9 + $0x18] sm:$0xff] }
0x140f   :  { %12798 = vmatpush3.bf16.msra.mxu1 %v16814_v38  ;;  %11269 = vmatprep.mubr.msk.f32.mxu1 %vm770_vm1, %v9763_v58  ;;  %v9778_v38 = vld [vmem:[%s17271_s7 + $0xc0] sm:$0xff] }
0x1410   :  { %12816 = vmatprep.subr.bf16.mxu1 %v16820_v42  ;;  %v8338_v58 = vld [vmem:[%s17274_s11] sm:$0xff] }
0x1411   :  { %v12891_v60 = vpack.c.bf16 %v8339_v37, %v8338_v58 }
0x1416   :  { %11270 = vmatmul.mubr.msk.f32.vlgmr.msra.gmra.mrb[78].mxu1 %vm770_vm1, %v9764_v55  ;;  %v8340_v55 = vld [vmem:[%s17274_s11 + $0x10] sm:$0xff] }
0x1417   :  { %12818 = vmatpush3.bf16.msra.mxu1 %v16820_v42  ;;  %11297 = vmatprep.mubr.msk.f32.mxu1 %vm770_vm1, %v9778_v38  ;;  %v9786_v42 = vld [vmem:[%s17270_s6 + $0x3c8] sm:$0xff]  ;;  %v8341_v38 = vld [vmem:[%s17274_s11 + $0x18] sm:$0xff] }
0x1418   :  { %12820 = vmatprep.subr.bf16.mxu1 %v12819_v52  ;;  %v12827_v44 = vpack.c.bf16 %v9787_v18, %v9786_v42  ;;  %v8321_v42 = vld [vmem:[%s17275_s12 + $0x8] sm:$0xff]  ;;  %v8322_v18 = vld [vmem:[%s17275_s12 + $0x10] sm:$0xff] }
0x141e   :  { %11298 = vmatmul.mubr.msk.f32.vlgmr.msra.gmra.mrb[78].mxu1 %vm770_vm1, %v9779_v16  ;;  %v8343_v16 = vld [vmem:[%s17274_s11 + $0x28] sm:$0xff] }
0x141f   :  { %12822 = vmatpush3.bf16.msra.mxu1 %v12819_v52  ;;  %11318 = vmatprep.mubr.msk.f32.mxu1 %vm4962_vm2, %v16486_v5  ;;  %v12895_v52 = vpack.c.bf16 %v8341_v38, %v8340_v55 }
0x1420   :  { %12824 = vmatprep.subr.bf16.mxu1 %v12823_v3 }
0x1423   :  { %12826 = vmatpush3.bf16.msra.mxu1 %v12823_v3  ;;  %v12899_v3 = vpack.c.bf16 %v8343_v16, %v8342_v1 }
0x1424   :  { %12828 = vmatprep.subr.bf16.mxu1 %v12827_v44 }
0x1427   :  { %12830 = vmatpush3.bf16.msra.mxu1 %v12827_v44  ;;  %v8323_v44 = vld [vmem:[%s17275_s12 + $0x18] sm:$0xff] }
0x1428   :  { %12832 = vmatprep.subr.bf16.mxu1 %v12831_v12 }
0x142b   :  { %12834 = vmatpush3.bf16.msra.mxu1 %v12831_v12  ;;  %v8326_v12 = vld [vmem:[%s17275_s12 + $0x30] sm:$0xff] }
0x142c   :  { %11316 = vmatprep.subr.mxu1 %v9790_v13 }
0x142f   :  { %11317 = vmatpush3.msra.mxu1 %v9790_v13  ;;  %v8327_v13 = vld [vmem:[%s17275_s12 + $0x38] sm:$0xff] }
0x1430   :  { %11319 = vmatmul.mubr.msk.f32.vlgmr.msra.gmra.mrb[88].mxu1 %vm4962_vm2, %v16488_v41 }
0x1431   :  { %11325 = vmatprep.mubr.msk.f32.mxu1 %vm770_vm1, %v9793_v10  ;;  %v8328_v10 = vld [vmem:[%s17275_s12 + $0x40] sm:$0xff] }
0x1503   :  { %v11320_v14 = vpop.f32.mrb[88].mxu1 }
0x1504   :  { %v7253_v25 = vpop.f32.mrb[89].mxu1 }
0x1505   :  { %v12835_v17 = vpack.c.bf16 %v11320_v14, %v7253_v25  ;;  %v8329_v14 = vld [vmem:[%s17275_s12 + $0x48] sm:$0xff]  ;;  %v8330_v25 = vld [vmem:[%s17275_s12 + $0x50] sm:$0xff] }
0x1507   :  { %12836 = vmatprep.subr.bf16.mxu1 %v12835_v17 }
0x1508   :  { %12838 = vmatpush3.bf16.msra.mxu1 %v12835_v17  ;;  %v8331_v17 = vld [vmem:[%s17275_s12 + $0x58] sm:$0xff] }
0x1509   :  { %12856 = vmatprep.subr.bf16.mxu1 %v16822_v62 }
0x150b   :  { %11326 = vmatmul.mubr.msk.f32.vlgmr.msra.gmra.mrb[78].mxu1 %vm770_vm1, %v9794_v54  ;;  %v8334_v54 = vld [vmem:[%s17275_s12 + $0x70] sm:$0xff] }
0x150c   :  { %12858 = vmatpush3.bf16.msra.mxu1 %v16822_v62  ;;  %11353 = vmatprep.mubr.msk.f32.mxu1 %vm770_vm1, %v9808_v6  ;;  %v9816_v62 = vld [vmem:[%s17270_s6 + $0x458] sm:$0xff] }
0x150d   :  { %12860 = vmatprep.subr.bf16.mxu1 %v12859_v8  ;;  %v12867_v63 = vpack.c.bf16 %v9817_v15, %v9816_v62  ;;  %v8335_v6 = vld [vmem:[%s17275_s12 + $0x78] sm:$0xff] }
0x1513   :  { %11354 = vmatmul.mubr.msk.f32.vlgmr.msra.gmra.mrb[78].mxu1 %vm770_vm1, %v9809_v49 }
0x1514   :  { %12862 = vmatpush3.bf16.msra.mxu1 %v12859_v8  ;;  %11374 = vmatprep.mubr.msk.f32.mxu1 %vm4962_vm2, %v16486_v5  ;;  %v9823_v5 = vld [vmem:[%s17271_s7 + $0xf0] sm:$0xff]  ;;  %v8336_v8 = vld [vmem:[%s17275_s12 + $0x80] sm:$0xff] }
0x1515   :  { %12864 = vmatprep.subr.bf16.mxu1 %v12863_v9 }
0x1518   :  { %12866 = vmatpush3.bf16.msra.mxu1 %v12863_v9 }
0x1519   :  { %12868 = vmatprep.subr.bf16.mxu1 %v12867_v63 }
0x151c   :  { %12870 = vmatpush3.bf16.msra.mxu1 %v12867_v63  ;;  %v8370_v63 = vpop.permute.xlu1 %8369 }
0x151d   :  { %12872 = vmatprep.subr.bf16.mxu1 %v12871_v22 }
0x1520   :  { %12874 = vmatpush3.bf16.msra.mxu1 %v12871_v22 }
0x1521   :  { %11372 = vmatprep.subr.mxu1 %v9820_v24 }
0x1524   :  { %11373 = vmatpush3.msra.mxu1 %v9820_v24 }
0x1525   :  { %11375 = vmatmul.mubr.msk.f32.vlgmr.msra.gmra.mrb[90].mxu1 %vm4962_vm2, %v16488_v41  ;;  %v7706_v41 = vld [vmem:[%s17272_s9] sm:$0xff] }
0x1526   :  { %11381 = vmatprep.mubr.msk.f32.mxu1 %vm770_vm1, %v9823_v5  ;;  %11384 = vmatprep.subr.mxu0 %v7706_v41 }
0x1527   :  { %11385 = vmatpush3.msra.mxu0 %v7706_v41 }
0x1528   :  { %11389 = vmatprep.subr.mxu0 %v9829_v45 }
0x15f8   :  { %v11376_v27 = vpop.f32.mrb[90].mxu1 }
0x15f9   :  { %v7595_v23 = vpop.f32.mrb[91].mxu1 }
0x15fa   :  { %v12875_v29 = vpack.c.bf16 %v11376_v27, %v7595_v23  ;;  %v9838_v27 = vld [vmem:[%s17273_s10 + $0x8] sm:$0xf] }
0x15fc   :  { %12876 = vmatprep.subr.bf16.mxu1 %v12875_v29 }
0x15fd   :  { %12878 = vmatpush3.bf16.msra.mxu1 %v12875_v29  ;;  %v17235_v29 = vld [vmem:[%s17276_s14] sm:$0xff] }
0x15fe   :  { %12885 = vmatprep.subr.bf16.mxu1 %v12998_v11 }
0x1600   :  { %11382 = vmatmul.mubr.msk.f32.vlgmr.msra.gmra.mrb[78].mxu1 %vm770_vm1, %v9824_v36  ;;  %v8380_v36 = vpop.permute.xlu1 %8379 }
0x1601   :  { %11417 = vmatprep.mubr.msk.f32.mxu1 %vm13000_vm3, %v12999_v30 }
0x16d3   :  { %v11383_v39 = vpop.f32.mrb[78].mxu1 }
0x16d4   :  { %v7703_v57 = vadd.f32 %v11383_v39, %v7700_v28  ;;  %v7679_v61 = vpop.f32.mrb[79].mxu1  ;;  %v9843_v28 = vld [vmem:[%s17273_s10 + $0xc] sm:$0xf]  ;;  %v8682_v39 = vcombine.high %v17235_v29, %v17235_v29 }
0x16d5   :  { %v7702_v43 = vadd.f32 %v7695_v47, %v7679_v61  ;;  %v8390_v47 = vpop.permute.xlu1 %8389 }
0x16d6   :  { %v7705_v50 = vmax.f32 %v7703_v57, 0.0 }
0x16d7   :  { %v7704_v31 = vmax.f32 %v7702_v43, 0.0 }
0x16d9   :  { %11386 = vmatprep.mubr.msk.f32.mxu0 %vm408_vm0, %v7704_v31 }
0x16da   :  { %11387 = vmatmul.mubr.msk.f32.vlgmr.msra.gmra.mrb[82].mxu0 %vm408_vm0, %v7705_v50 }
0x16db   :  { %11391 = vmatprep.mubr.msk.f32.mxu0 %vm408_vm0, %v7704_v31  ;;  %11390 = vmatpush3.msra.mxu0 %v9829_v45  ;;  %v8375_v45 = vpop.permute.xlu0 %8374 }
0x16dc   :  { %12879 = vmatprep.subr.bf16.mxu0 %v12998_v11 }
0x16de   :  { %11392 = vmatmul.mubr.msk.f32.vlgmr.msra.gmra.mrb[84].mxu0 %vm408_vm0, %v7705_v50 }
0x16df   :  { %11398 = vmatprep.mubr.msk.f32.mxu0 %vm13000_vm3, %v12999_v30  ;;  %v8385_v57 = vpop.permute.xlu0 %8384 }
0x17ad   :  { %v11388_v4 = vpop.f32.mrb[82].mxu0 }
0x17ae   :  { %v7779_v26 = vpop.f32.mrb[83].mxu0 }
0x17af   :  { %v12883_v48 = vpack.c.bf16 %v11388_v4, %v7779_v26  ;;  %v8395_v4 = vpop.permute.xlu0 %8394 }
0x17b1   :  { %v11393_v33 = vpop.f32.mrb[84].mxu0 }
0x17b2   :  { %v7857_v34 = vpop.f32.mrb[85].mxu0 }
0x17b3   :  { %v12880_v46 = vpack.c.bf16 %v11393_v33, %v7857_v34 }
0x17b5   :  { %12881 = vmatpush3.bf16.msra.mxu0 %v12880_v46 }
0x17b6   :  { %12882 = vmatprep.subr.bf16.mxu0 %v12998_v11 }
0x17b8   :  { %11399 = vmatmul.mubr.msk.f32.vlgmr.msra.gmra.mrb[86].mxu0 %vm770_vm1, %v9832_v56 }
0x17b9   :  { %12884 = vmatpush3.bf16.msra.mxu0 %v12883_v48  ;;  %11405 = vmatprep.mubr.msk.f32.mxu0 %vm13000_vm3, %v12999_v30 }
0x17ba   :  { %11408 = vmatprep.subr.mxu0 %v9835_v40 }
0x17bc   :  { %11406 = vmatmul.mubr.msk.f32.vlgmr.msra.gmra.mrb[88].mxu0 %vm770_vm1, %v7788_v51 }
0x17bd   :  { %11410 = vmatprep.mubr.msk.f32.mxu0 %vm408_vm0, %v7704_v31  ;;  %11409 = vmatpush3.msra.mxu0 %v9835_v40 }
0x17be   :  { %11420 = vmatprep.subr.mxu0 %v9840_v53 }
0x17c0   :  { %11411 = vmatmul.mubr.msk.f32.vlgmr.msra.gmra.mrb[90].mxu0 %vm408_vm0, %v7705_v50 }
0x17c1   :  { %11422 = vmatprep.mubr.msk.f32.mxu0 %vm408_vm0, %v7704_v31  ;;  %11421 = vmatpush3.msra.mxu0 %v9840_v53 }
0x17c2   :  { %12892 = vmatprep.subr.bf16.mxu0 %v12891_v60 }
0x17c4   :  { %11423 = vmatmul.mubr.msk.f32.vlgmr.msra.gmra.mrb[92].mxu0 %vm408_vm0, %v7705_v50  ;;  %v8400_v50 = vpop.permute.xlu1 %8399 }
0x17c5   :  { %12894 = vmatpush3.bf16.msra.mxu0 %v12891_v60  ;;  %11444 = vmatprep.mubr.msk.f32.mxu0 %vm8452_vm4, %v8320_v0  ;;  %v8405_v60 = vpop.permute.xlu0 %8404 }
0x17c6   :  { %12896 = vmatprep.subr.bf16.mxu0 %v12895_v52 }
0x17c8   :  { %v8410_v53 = vpop.permute.xlu1 %8409 }
0x17c9   :  { %12898 = vmatpush3.bf16.msra.mxu0 %v12895_v52 }
0x17ca   :  { %12900 = vmatprep.subr.bf16.mxu0 %v12899_v3 }
0x17cd   :  { %12902 = vmatpush3.bf16.msra.mxu0 %v12899_v3 }
0x17d0   :  { %11445 = vmatmul.mubr.msk.f32.vlgmr.msra.gmra.mrb[94].mxu0 %vm8452_vm4, %v8321_v42 }
0x17d1   :  { %11447 = vmatprep.mubr.msk.f32.mxu0 %vm8452_vm4, %v8322_v18 }
0x17d4   :  { %11448 = vmatmul.mubr.msk.f32.gmra.mrb[96].mxu0 %vm8452_vm4, %v8323_v44  ;;  %v8420_v44 = vpop.permute.xlu1 %8419 }
0x17d5   :  { %11450 = vmatprep.mubr.msk.f32.mxu0 %vm8452_vm4, %v8324_v7 }
0x17d8   :  { %11451 = vmatmul.mubr.msk.f32.gmra.mrb[98].mxu0 %vm8452_vm4, %v8325_v59 }
0x17d9   :  { %11453 = vmatprep.mubr.msk.f32.mxu0 %vm8452_vm4, %v8326_v12  ;;  %v8415_v12 = vpop.permute.xlu0 %8414 }
0x17dc   :  { %11454 = vmatmul.mubr.msk.f32.gmra.mrb[100].mxu0 %vm8452_vm4, %v8327_v13 }
0x17dd   :  { %11456 = vmatprep.mubr.msk.f32.mxu0 %vm8452_vm4, %v8328_v10 }
0x17e0   :  { %11457 = vmatmul.mubr.msk.f32.gmra.mrb[102].mxu0 %vm8452_vm4, %v8329_v14 }
0x17e1   :  { %11459 = vmatprep.mubr.msk.f32.mxu0 %vm8452_vm4, %v8330_v25 }
0x17e4   :  { %11460 = vmatmul.mubr.msk.f32.gmra.mrb[104].mxu0 %vm8452_vm4, %v8331_v17 }
0x17e5   :  { %11462 = vmatprep.mubr.msk.f32.mxu0 %vm8452_vm4, %v8332_v19 }
0x17e8   :  { %11463 = vmatmul.mubr.msk.f32.gmra.mrb[106].mxu0 %vm8452_vm4, %v8333_v20 }
0x17e9   :  { %11465 = vmatprep.mubr.msk.f32.mxu0 %vm8452_vm4, %v8334_v54 }
0x17ec   :  { %11466 = vmatmul.mubr.msk.f32.gmra.mrb[108].mxu0 %vm8452_vm4, %v8335_v6  ;;  %v8430_v6 = vpop.permute.xlu1 %8429 }
0x17ed   :  { %11468 = vmatprep.mubr.msk.f32.mxu0 %vm8452_vm4, %v8336_v8 }
0x17f0   :  { %11469 = vmatmul.mubr.msk.f32.gmra.mrb[110].mxu0 %vm8452_vm4, %v8337_v32 }
0x188b   :  { %v7937_v21 = vpop.f32.mrb[86].mxu0 }
0x188c   :  { %v11400_v49 = vpop.f32.mrb[87].mxu0 }
0x188f   :  { %v8010_v9 = vpop.f32.mrb[88].mxu0 }
0x1890   :  { %v17226_v62 = vadd.f32 %v8010_v9, %v7937_v21  ;;  %v11407_v15 = vpop.f32.mrb[89].mxu0  ;;  %v8425_v21 = vpop.permute.xlu0 %8424 }
0x1893   :  { %v11412_v2 = vpop.f32.mrb[90].mxu0 }
0x1894   :  { %v8082_v22 = vpop.f32.mrb[91].mxu0 }
0x1895   :  { %v12886_v24 = vpack.c.bf16 %v11412_v2, %v8082_v22 }
0x1897   :  { %12887 = vmatpush3.bf16.msra.mxu1 %v12886_v24  ;;  %v11424_v5 = vpop.f32.mrb[92].mxu0 }
0x1898   :  { %v8235_v23 = vpop.f32.mrb[93].mxu0  ;;  %12888 = vmatprep.subr.bf16.mxu1 %v12998_v11 }
0x1899   :  { %v12889_v41 = vpack.c.bf16 %v11424_v5, %v8235_v23 }
0x189a   :  { %11418 = vmatmul.mubr.msk.f32.vlgmr.msra.gmra.mrb[92].mxu1 %vm770_vm1, %v9838_v27  ;;  %v8440_v27 = vpop.permute.xlu1 %8439 }
0x189b   :  { %12890 = vmatpush3.bf16.msra.mxu1 %v12889_v41  ;;  %11429 = vmatprep.mubr.msk.f32.mxu1 %vm13000_vm3, %v12999_v30  ;;  %v8435_v41 = vpop.permute.xlu0 %8434 }
0x189c   :  { %12903 = vmatprep.subr.bf16.mxu1 %v12998_v11 }
0x189e   :  { %11430 = vmatmul.mubr.msk.f32.vlgmr.msra.gmra.mrb[94].mxu1 %vm770_vm1, %v9843_v28 }
0x189f   :  { %9863 = vmatprep.mubr.msk.f32.mxu1 %vm770_vm1, %v8682_v39 }
0x18a3   :  { %v11446_v61 = vpop.f32.mrb[94].mxu0 }
0x18a4   :  { %v8579_v43 = vadd.f32 %v11446_v61, %v8370_v63  ;;  %v8573_v31 = vpop.f32.mrb[95].mxu0 }
0x18a5   :  { %v8574_v30 = vadd.f32 %v8573_v31, %v8365_v35 }
0x18a6   :  { %v8663_v26 = vmax.f32 %v8579_v43, 0.0 }
0x18a7   :  { %v8662_v48 = vmax.f32 %v8574_v30, 0.0  ;;  %v11449_v33 = vpop.f32.mrb[96].mxu0 }
0x18a8   :  { %v8589_v34 = vadd.f32 %v11449_v33, %v8380_v36  ;;  %v8583_v46 = vpop.f32.mrb[97].mxu0 }
0x18a9   :  { %v12904_v56 = vpack.c.bf16 %v8663_v26, %v8662_v48  ;;  %v8584_v40 = vadd.f32 %v8583_v46, %v8375_v45  ;;  %v8445_v26 = vpop.permute.xlu0 %8444 }
0x18aa   :  { %v8665_v51 = vmax.f32 %v8589_v34, 0.0 }
0x18ab   :  { %v8664_v58 = vmax.f32 %v8584_v40, 0.0  ;;  %v11452_v37 = vpop.f32.mrb[98].mxu0  ;;  %12905 = vmatpush1.bf16.msra.mxu1 %v12904_v56 }
0x18ac   :  { %v8599_v55 = vadd.f32 %v11452_v37, %v8390_v47  ;;  %v8593_v38 = vpop.f32.mrb[99].mxu0  ;;  %12906 = vmatprep.subr.bf16.mxu1 %v12998_v11 }
0x18ad   :  { %v12907_v52 = vpack.c.bf16 %v8665_v51, %v8664_v58  ;;  %v8594_v0 = vadd.f32 %v8593_v38, %v8385_v57 }
0x18ae   :  { %v8667_v1 = vmax.f32 %v8599_v55, 0.0 }
0x18af   :  { %v8666_v16 = vmax.f32 %v8594_v0, 0.0  ;;  %v11455_v3 = vpop.f32.mrb[100].mxu0  ;;  %12908 = vmatpush1.bf16.msra.mxu1 %v12907_v52 }
0x18b0   :  { %v8609_v42 = vadd.f32 %v11455_v3, %v8400_v50  ;;  %v8603_v18 = vpop.f32.mrb[101].mxu0  ;;  %12909 = vmatprep.subr.bf16.mxu1 %v12998_v11  ;;  %v8450_v50 = vpop.permute.xlu1 %8449 }
0x18b1   :  { %v12910_v7 = vpack.c.bf16 %v8667_v1, %v8666_v16  ;;  %v8604_v59 = vadd.f32 %v8603_v18, %v8395_v4  ;;  %v8760_v16 = vpop.permute.xlu0 %8759 }
0x18b2   :  { %v8669_v13 = vmax.f32 %v8609_v42, 0.0 }
0x18b3   :  { %v8668_v10 = vmax.f32 %v8604_v59, 0.0  ;;  %v11458_v14 = vpop.f32.mrb[102].mxu0  ;;  %12911 = vmatpush1.bf16.msra.mxu1 %v12910_v7 }
0x18b4   :  { %v8619_v25 = vadd.f32 %v11458_v14, %v8410_v53  ;;  %v8613_v17 = vpop.f32.mrb[103].mxu0  ;;  %12912 = vmatprep.subr.bf16.mxu1 %v12998_v11 }
0x18b5   :  { %v12913_v19 = vpack.c.bf16 %v8669_v13, %v8668_v10  ;;  %v8614_v20 = vadd.f32 %v8613_v17, %v8405_v60 }
0x18b6   :  { %v8671_v54 = vmax.f32 %v8619_v25, 0.0 }
0x18b7   :  { %v8670_v8 = vmax.f32 %v8614_v20, 0.0  ;;  %v11461_v32 = vpop.f32.mrb[104].mxu0  ;;  %12914 = vmatpush1.bf16.msra.mxu1 %v12913_v19 }
0x18b8   :  { %v8629_v49 = vadd.f32 %v11461_v32, %v8420_v44  ;;  %v8623_v9 = vpop.f32.mrb[105].mxu0  ;;  %12915 = vmatprep.subr.bf16.mxu1 %v12998_v11 }
0x18b9   :  { %v12916_v15 = vpack.c.bf16 %v8671_v54, %v8670_v8  ;;  %v8624_v63 = vadd.f32 %v8623_v9, %v8415_v12 }
0x18ba   :  { %v8673_v2 = vmax.f32 %v8629_v49, 0.0 }
0x18bb   :  { %v8672_v35 = vmax.f32 %v8624_v63, 0.0  ;;  %v11464_v22 = vpop.f32.mrb[106].mxu0  ;;  %12917 = vmatpush1.bf16.msra.mxu1 %v12916_v15 }
0x18bc   :  { %v8639_v24 = vadd.f32 %v11464_v22, %v8430_v6  ;;  %v8633_v5 = vpop.f32.mrb[107].mxu0  ;;  %12918 = vmatprep.subr.bf16.mxu1 %v12998_v11 }
0x18bd   :  { %v12919_v23 = vpack.c.bf16 %v8673_v2, %v8672_v35  ;;  %v8634_v36 = vadd.f32 %v8633_v5, %v8425_v21 }
0x18be   :  { %v8675_v45 = vmax.f32 %v8639_v24, 0.0 }
0x18bf   :  { %v8674_v28 = vmax.f32 %v8634_v36, 0.0  ;;  %v11467_v39 = vpop.f32.mrb[108].mxu0  ;;  %12920 = vmatpush1.bf16.msra.mxu1 %v12919_v23 }
0x18c0   :  { %v8649_v47 = vadd.f32 %v11467_v39, %v8440_v27  ;;  %v8643_v57 = vpop.f32.mrb[109].mxu0  ;;  %12921 = vmatprep.subr.bf16.mxu1 %v12998_v11 }
0x18c1   :  { %v12922_v61 = vpack.c.bf16 %v8675_v45, %v8674_v28  ;;  %v8644_v43 = vadd.f32 %v8643_v57, %v8435_v41 }
0x18c2   :  { %v8677_v31 = vmax.f32 %v8649_v47, 0.0 }
0x18c3   :  { %v8676_v30 = vmax.f32 %v8644_v43, 0.0  ;;  %v11470_v4 = vpop.f32.mrb[110].mxu0  ;;  %12923 = vmatpush1.bf16.msra.mxu1 %v12922_v61 }
0x18c4   :  { %v8659_v48 = vadd.f32 %v11470_v4, %v8450_v50  ;;  %v8653_v33 = vpop.f32.mrb[111].mxu0  ;;  %12924 = vmatprep.subr.bf16.mxu1 %v12998_v11 }
0x18c5   :  { %v12925_v34 = vpack.c.bf16 %v8677_v31, %v8676_v30  ;;  %v8654_v46 = vadd.f32 %v8653_v33, %v8445_v26 }
0x18c6   :  { %v8679_v56 = vmax.f32 %v8659_v48, 0.0 }
0x18c7   :  { %v8678_v40 = vmax.f32 %v8654_v46, 0.0  ;;  %12926 = vmatpush1.bf16.msra.mxu1 %v12925_v34 }
0x18c8   :  { %12927 = vmatprep.subr.bf16.mxu1 %v12998_v11 }
0x18c9   :  { %v12928_v51 = vpack.c.bf16 %v8679_v56, %v8678_v40 }
0x18cb   :  { %12929 = vmatpush1.bf16.msra.mxu1 %v12928_v51 }
0x18ce   :  { %8750 = vmatmul.mubr.f32.vlgmr.msra.gmra.mrb[96].mxu1 %v17235_v29 }
0x196d   :  { %v8162_v53 = vpop.f32.mrb[92].mxu1 }
0x196e   :  { %v8166_v58 = vadd.f32 %v8162_v53, %v17226_v62  ;;  %v11419_v37 = vpop.f32.mrb[93].mxu1 }
0x1971   :  { %v8315_v60 = vpop.f32.mrb[94].mxu1 }
0x1972   :  { %v8319_v55 = vadd.f32 %v8315_v60, %v8166_v58  ;;  %v11431_v38 = vpop.f32.mrb[95].mxu1 }
0x19a1   :  { %v8751_v52 = vpop.f32.mrb[96].mxu1 }
0x19a2   :  { %v8755_v0 = vadd.f32 %v8751_v52, %v8319_v55  ;;  %v8753_v1 = vpop.f32.mrb[97].mxu1 }
0x19a4   :  { %v8762_v3 = vadd.f32 %v8760_v16, %v8755_v0 }
0x19a6   :  { %8764 = vst.msk [vmem:[%s17277_s16] sm:$0xf] %vm8763_vm5, %v8762_v3 }

</bundles_post_ra>
